<compile_context>
chip_gen: v7x
topology: tpu7x:2x2x1
jax: 0.10.0
libtpu: 0.0.40
codegen_flags: <defaults>
</compile_context>

<pallas_src>
import jax
import jax.numpy as jnp
from jax.experimental import pallas as pl
from jax.experimental.pallas import tpu as pltpu


def _dot_attention_kernel(q_ref, kv_ref, o_ref):
    # q_ref, kv_ref: (TB, N, D) VMEM tiles; o_ref: (1, TB*N) lane-dense slab.
    q = q_ref[...].astype(jnp.float32)      # (TB, N, D)
    kv = kv_ref[...].astype(jnp.float32)    # (TB, N, D)

    d = kv.shape[-1]
    scale = jnp.float32((d // 2) ** (-0.5))

    # Tiny N, D: build scores on the VPU (broadcast-multiply + lane reduce)
    # instead of TB tiny MXU matmuls, each of which would need an XLU
    # transpose of kv and an MXU push/pop round trip.
    #   s[b, n, m] = sum_d q[b, n, d] * kv[b, m, d]
    prod = q[:, :, None, :] * kv[:, None, :, :]            # (TB, N, N, D)
    s = jnp.sum(prod, axis=-1) * scale                     # (TB, N, N)

    # Full score block is only needed for the row max and the softmax denom.
    m = jnp.max(s, axis=-1)                                 # (TB, N)
    e = jnp.exp(s - m[..., None])                           # (TB, N, N)
    denom = jnp.sum(e, axis=-1)                             # (TB, N)

    # Diagonal numerator directly on the VPU (no iota / where / masked reduce).
    diag_s = jnp.sum(q * kv, axis=-1) * scale               # (TB, N) == diag(s)
    diag = jnp.exp(diag_s - m) / denom                      # exact divide

    # Lane-dense store: flatten (TB, N) -> (1, TB*N).
    o_ref[...] = diag.reshape(1, -1).astype(o_ref.dtype)


def _num_tensorcores():
    """Best-effort TensorCore-per-chip count: 2 on v7x, 1 on v5e/v6e."""
    try:
        kind = jax.devices()[0].device_kind.lower()
        if "v7" in kind:
            return 2
    except Exception:
        pass
    return 1


def _vmem_budget_bytes():
    """Generation-aware VMEM budget (~3/4 of reported capacity)."""
    try:
        cap = int(pltpu.get_tpu_info().vmem_capacity_bytes)
        return (3 * cap) // 4
    except Exception:
        # Conservative fallback: under even v7x's 32 MiB scoped default.
        return 24 << 20


def _tile_vmem_bytes(t, N, D):
    """VMEM needed for one (t, N, D) tile, incl. double buffers + temps."""
    in_bytes = 2 * 2 * t * N * D * 4        # q, kv blocks, double-buffered
    out_bytes = 2 * t * N * 4               # output block, double-buffered
    tmp_bytes = t * N * N * D * 4           # broadcast q*kv product
    tmp_bytes += 3 * t * N * N * 4          # s, e + relayout slack
    return in_bytes + out_bytes + tmp_bytes


def _pick_tb(B, N, D, num_tc, vmem_budget):
    """Pick the batch tile TB.

    Single-TC chips (v5e/v6e): fewest grid steps that fit (TB=B / grid=1 when
    possible).  v7x (2 TCs): exactly one step per TensorCore when a lane-dense
    split exists, else fall back to grid=1.  A tile is only legal if its
    output slab (1, TB*N) is a full block (grid=1) or a multiple of 128 lanes.
    """
    def legal(t):
        return (B // t == 1) or ((t * N) % 128 == 0)

    def fits(t):
        return _tile_vmem_bytes(t, N, D) <= vmem_budget

    divisors = [t for t in range(1, B + 1) if B % t == 0]
    candidates = [t for t in divisors if legal(t) and fits(t)]

    if num_tc > 1:
        exact = [t for t in candidates if B // t == num_tc]
        if exact:
            return exact[0]
    if candidates:
        return max(candidates)          # fewest grid steps (TB=B if it fits)
    legal_divs = [t for t in divisors if legal(t)]
    return min(legal_divs) if legal_divs else B


def dot_attention(q, kv, *, tb=None):
    """q, kv: (B, N, D) with B = num_heads*bs collapsed, N = part_nums,
    D = dim_per_head.  Returns flat (B*N,) diagonal of
    softmax(q @ kv^T * (D//2)^-0.5), matching torch.masked_select order."""
    B, N, D = q.shape
    assert kv.shape == (B, N, D)

    num_tc = _num_tensorcores()
    vmem_budget = _vmem_budget_bytes()
    if tb is None:
        tb = _pick_tb(B, N, D, num_tc, vmem_budget)
    assert B % tb == 0
    grid_b = B // tb
    # Output block must be lane-dense unless it spans the whole array.
    assert grid_b == 1 or (tb * N) % 128 == 0

    compiler_kwargs = dict(dimension_semantics=("parallel",))
    need = _tile_vmem_bytes(tb, N, D)
    if need > (16 << 20):
        # Only raise the scoped VMEM limit when a big tile actually needs it.
        compiler_kwargs["vmem_limit_bytes"] = int(
            min(max(2 * need, 32 << 20), vmem_budget))

    out = pl.pallas_call(
        _dot_attention_kernel,
        out_shape=jax.ShapeDtypeStruct((1, B * N), jnp.float32),
        grid_spec=pltpu.PrefetchScalarGridSpec(
            num_scalar_prefetch=0,
            grid=(grid_b,),
            in_specs=[
                pl.BlockSpec((tb, N, D), lambda b: (b, 0, 0)),
                pl.BlockSpec((tb, N, D), lambda b: (b, 0, 0)),
            ],
            # Grid steps along the LANE axis of a single sublane row:
            # contiguous, unmasked appends.
            out_specs=pl.BlockSpec((1, tb * N), lambda b: (0, b)),
        ),
        compiler_params=pltpu.CompilerParams(**compiler_kwargs),
    )(q, kv)

    # Row-major (b, i) flatten == torch.masked_select gather order.
    return out.reshape(B * N)


def _reference(q, kv):
    # pure-JAX reference for the self-check
    scale = (kv.shape[-1] // 2) ** (-0.5)
    s = jnp.einsum("bnd,bmd->bnm", q, kv) * scale
    p = jax.nn.softmax(s, axis=-1)
    return jnp.diagonal(p, axis1=-2, axis2=-1).reshape(-1)


if __name__ == "__main__":
    key = jax.random.PRNGKey(0)
    kq, kk = jax.random.split(key)

    # (num_heads*bs collapsed, part_nums, dim_per_head)
    B, N, D = 32, 8, 32
    q = jax.random.normal(kq, (B, N, D), dtype=jnp.float32)
    kv = jax.random.normal(kk, (B, N, D), dtype=jnp.float32)

    out = dot_attention(q, kv)
    out = jax.block_until_ready(out)

    ref = _reference(q, kv)
    assert out.shape == (B * N,)
    assert jnp.allclose(out, ref, atol=1e-5, rtol=1e-5), \
        float(jnp.max(jnp.abs(out - ref)))

    print("KERNEL_OK")
</pallas_src>

<mosaic_0001>
module attributes {stable_mosaic.version = 11 : i64} {
  func.func @_dot_attention_kernel(%arg0: i32, %arg1: memref<32x8x32xf32, #tpu.memory_space<vmem>>, %arg2: memref<32x8x32xf32, #tpu.memory_space<vmem>>, %arg3: memref<1x256xf32, #tpu.memory_space<vmem>>) attributes {dimension_semantics = [#tpu.dimension_semantics<parallel>], iteration_bounds = array<i64: 1>, scalar_prefetch = 0 : i64, scratch_operands = 0 : i64, tpu.core_type = #tpu.core_type<tc>, window_params = [{transform_indices = @transform_0, window_bounds = array<i64: 32, 8, 32>}, {transform_indices = @transform_1, window_bounds = array<i64: 32, 8, 32>}, {transform_indices = @transform_2, window_bounds = array<i64: 1, 256>}]} {
    %c0 = arith.constant 0 : index
    %c0_0 = arith.constant 0 : index
    %c0_1 = arith.constant 0 : index
    %0 = vector.load %arg1[%c0, %c0_0, %c0_1] : memref<32x8x32xf32, #tpu.memory_space<vmem>>, vector<32x8x32xf32>
    %c0_2 = arith.constant 0 : index
    %c0_3 = arith.constant 0 : index
    %c0_4 = arith.constant 0 : index
    %1 = vector.load %arg2[%c0_2, %c0_3, %c0_4] : memref<32x8x32xf32, #tpu.memory_space<vmem>>, vector<32x8x32xf32>
    %2 = vector.shape_cast %0 : vector<32x8x32xf32> to vector<32x8x1x32xf32>
    %3 = vector.shape_cast %1 : vector<32x8x32xf32> to vector<32x1x8x32xf32>
    %4 = vector.broadcast %2 : vector<32x8x1x32xf32> to vector<32x8x8x32xf32>
    %5 = vector.broadcast %3 : vector<32x1x8x32xf32> to vector<32x8x8x32xf32>
    %6 = arith.mulf %4, %5 : vector<32x8x8x32xf32>
    %cst = arith.constant dense<0.000000e+00> : vector<32x8x8xf32>
    %7 = vector.multi_reduction <add>, %6, %cst [3] : vector<32x8x8x32xf32> to vector<32x8x8xf32>
    %cst_5 = arith.constant 2.500000e-01 : f32
    %8 = vector.broadcast %cst_5 : f32 to vector<32x8x8xf32>
    %9 = arith.mulf %7, %8 : vector<32x8x8xf32>
    %cst_6 = arith.constant dense<0xFF800000> : vector<32x8xf32>
    %10 = vector.multi_reduction <maximumf>, %9, %cst_6 [2] : vector<32x8x8xf32> to vector<32x8xf32>
    %11 = vector.shape_cast %10 : vector<32x8xf32> to vector<32x8x1xf32>
    %12 = vector.broadcast %11 : vector<32x8x1xf32> to vector<32x8x8xf32>
    %13 = arith.subf %9, %12 : vector<32x8x8xf32>
    %14 = math.exp %13 : vector<32x8x8xf32>
    %cst_7 = arith.constant dense<0.000000e+00> : vector<32x8xf32>
    %15 = vector.multi_reduction <add>, %14, %cst_7 [2] : vector<32x8x8xf32> to vector<32x8xf32>
    %16 = arith.mulf %0, %1 : vector<32x8x32xf32>
    %cst_8 = arith.constant dense<0.000000e+00> : vector<32x8xf32>
    %17 = vector.multi_reduction <add>, %16, %cst_8 [2] : vector<32x8x32xf32> to vector<32x8xf32>
    %cst_9 = arith.constant 2.500000e-01 : f32
    %18 = vector.broadcast %cst_9 : f32 to vector<32x8xf32>
    %19 = arith.mulf %17, %18 : vector<32x8xf32>
    %20 = arith.subf %19, %10 : vector<32x8xf32>
    %21 = math.exp %20 : vector<32x8xf32>
    %22 = arith.divf %21, %15 : vector<32x8xf32>
    %23 = vector.shape_cast %22 : vector<32x8xf32> to vector<1x256xf32>
    %c0_10 = arith.constant 0 : index
    %c0_11 = arith.constant 0 : index
    %24 = vector.load %arg3[%c0_10, %c0_11] : memref<1x256xf32, #tpu.memory_space<vmem>>, vector<1x256xf32>
    tpu.vector_store %arg3[%c0_10, %c0_11], %23 {strides = array<i32>} : memref<1x256xf32, #tpu.memory_space<vmem>>, vector<1x256xf32>,
    return
  }
  func.func @transform_0(%arg0: i32) -> (i32, i32, i32) {
    %c0_i32 = arith.constant 0 : i32
    %c0_i32_0 = arith.constant 0 : i32
    %c0_i32_1 = arith.constant 0 : i32
    return %arg0, %c0_i32, %c0_i32_0 : i32, i32, i32
  }
  func.func @transform_1(%arg0: i32) -> (i32, i32, i32) {
    %c0_i32 = arith.constant 0 : i32
    %c0_i32_0 = arith.constant 0 : i32
    %c0_i32_1 = arith.constant 0 : i32
    return %arg0, %c0_i32, %c0_i32_0 : i32, i32, i32
  }
  func.func @transform_2(%arg0: i32) -> (i32, i32) {
    %c0_i32 = arith.constant 0 : i32
    %c0_i32_0 = arith.constant 0 : i32
    return %c0_i32, %arg0 : i32, i32
  }
}

</mosaic_0001>

<bundles_post_ra>
// kernel: tpu_custom_call.1
= control target key start
LH: loop header
LB: loop body
LE: loop exit
PB: predicated region body
PF: predicated region fallthrough
CT: control target
= control target key end

     0   :  { %7 = vsyncpa [#allocation3], 0  ;;  %s20801_s0 = inlined_call_operand.hbm [shape: f32[32,8,32], index: 0, kind: input, shape index: {}]   ;;  %s20802_s1 = inlined_call_operand.hbm [shape: f32[32,8,32], index: 1, kind: input, shape index: {}]   ;;  %s20803_s2 = inlined_call_operand.hbm [shape: f32[1,256], index: 2, kind: output, shape index: {}]  }
   0x1   :  { %8 = vsyncpa [#allocation6], 0 }
   0x2   :  { %9 = vsyncpa [#allocation4], 0  ;;  %s14469_s9 = smov [#allocation2]   ;;  %s14397_s13 = scalar_lea.hbm %s20801_s0, 4096 }
   0x3   :  { %s15_s10 = sshll.u32 %s14469_s9, 4  ;;  %p14398_p0 = scmp.ne.s32.totalorder %s20801_s0, %s14397_s13  ;;  %s16_s10 = int_to_ptr.vmem [resolvable:$true] %s15_s10 }
   0x4   :  { %p14401_p1 = scmp.lt.u32.totalorder %s14397_s13, %s20801_s0 }
   0x6   :  { %p14403_p2 = pnand %p14401_p1, %p14398_p0 }
   0x8   :  { %14406 = shalt.err (!%p14403_p2)
}
   0x9   :  { %s14407_s18 = scalar_lea.vmem %s16_s10, 4096  ;;  %p14412_p4 = scmp.lt.s32.totalorder %s16_s10, %s16_s10 }
   0xa   :  { %p14408_p3 = scmp.ne.s32.totalorder %s16_s10, %s14407_s18  ;;  %p14413_p5 = scmp.lt.s32.totalorder %s14407_s18, %s14407_s18 }
   0xc   :  { %p14414_p6 = por %p14413_p5, %p14412_p4 }
   0xe   :  { %p14415_p7 = pnand %p14414_p6, %p14408_p3 }
  0x10   :  { %14418 = shalt.err (!%p14415_p7)
}
  0x11   :  { %s14470_s19 = smov 128   ;;  %s14471_s20 = smov 8  }
  0x12   :  { %21 = dma.hbm_to_vmem [thread:$0]  %s20801_s0, 4096, %s16_s10, [#allocation3], %s14470_s19, %s14470_s19, %s14471_s20  }
  0x13   :  { %s14472_s23 = smov [#allocation5]   ;;  %s14419_s27 = scalar_lea.hbm %s20802_s1, 4096 }
  0x14   :  { %s27_s24 = sshll.u32 %s14472_s23, 4  ;;  %p14420_p8 = scmp.ne.s32.totalorder %s20802_s1, %s14419_s27  ;;  %s28_s24 = int_to_ptr.vmem [resolvable:$true] %s27_s24 }
  0x15   :  { %p14423_p9 = scmp.lt.u32.totalorder %s14419_s27, %s20802_s1 }
  0x17   :  { %p14425_p10 = pnand %p14423_p9, %p14420_p8 }
  0x19   :  { %14428 = shalt.err (!%p14425_p10)
}
  0x1a   :  { %s14429_s4 = scalar_lea.vmem %s28_s24, 4096  ;;  %p14434_p12 = scmp.lt.s32.totalorder %s28_s24, %s28_s24 }
  0x1b   :  { %p14430_p11 = scmp.ne.s32.totalorder %s28_s24, %s14429_s4  ;;  %p14435_p13 = scmp.lt.s32.totalorder %s14429_s4, %s14429_s4 }
  0x1d   :  { %p14436_p0 = por %p14435_p13, %p14434_p12 }
  0x1f   :  { %p14437_p1 = pnand %p14436_p0, %p14430_p11 }
  0x21   :  { %14440 = shalt.err (!%p14437_p1)
}
  0x22   :  { %33 = dma.hbm_to_vmem [thread:$0]  %s20802_s1, 4096, %s28_s24, [#allocation6], %s14470_s19, %s14470_s19, %s14471_s20  }
  0x23   :  { %14463 = dma.done.wait [#allocation3], 4096  }
  0x24   :  { %14464 = vsyncadd [#allocation3], 4294963200 }
  0x25   :  { %14465 = dma.done.wait [#allocation6], 4096  }
  0x26   :  { %14466 = vsyncadd [#allocation6], 4294963200  ;;  %v20804_v0 = vlaneseq  ;;  %v14473_v1 = vmov 1966171168   ;;  %v40_v6 = vld [vmem:[#allocation2] sm:$0xff]  ;;  %v41_v7 = vld [vmem:[#allocation2 + $0x8] sm:$0xff] }
  0x27   :  { %v138_v2 = vunpack.c.l.s4 %v14473_v1  ;;  %v136_v11 = vcombine.high %v40_v6, %v40_v6  ;;  %v14528_v16 = vld [vmem:[#allocation5] sm:$0xff]  ;;  %v14530_v17 = vld [vmem:[#allocation5 + $0x8] sm:$0xff]  ;;  %vm3240_vm0 = vcmask 261120   ;;  %v185_v36 = vcombine.high %v41_v7, %v41_v7  ;;  %v42_v57 = vld [vmem:[#allocation2 + $0x10] sm:$0xff]  ;;  %s14475_s1 = smov [#allocation7]  }
  0x28   :  { %v14516_v3 = vshrl.u32 %v20804_v0, 7  ;;  %vm5547_vm1 = vcmask 1041409   ;;  %vm5549_vm2 = vcmask 1042434   ;;  %vm5551_vm3 = vcmask 1043459   ;;  %s13642_s6 = sshll.u32 %s14475_s1, 4  ;;  %s13643_s6 = int_to_ptr.vmem [resolvable:$true] %s13642_s6 }
  0x29   :  { %v139_v4 = vunpack.c.0.s8 %v138_v2  ;;  %vm5553_vm4 = vcmask 1044484   ;;  %vm5555_vm5 = vcmask 1045509   ;;  %vm5557_vm6 = vcmask 1046534   ;;  %s14441_s7 = scalar_lea.vmem %s13643_s6, 32  ;;  %p14446_p3 = scmp.lt.s32.totalorder %s13643_s6, %s13643_s6 }
  0x2a   :  { %21132 = vst [vmem:[#allocation11_spill] sm:$0xff] %v14516_v3  ;;  %v14523_v9 = vsub.s32 0, %v14516_v3  ;;  %vm5559_vm7 = vcmask 1047559   ;;  %vm5810_vm8 = vcmask 64512   ;;  %vm13436_vm9 = vcmask 130112   ;;  %p14442_p2 = scmp.ne.s32.totalorder %s13643_s6, %s14441_s7  ;;  %p14447_p4 = scmp.lt.s32.totalorder %s14441_s7, %s14441_s7 }
  0x2b   :  { %v14519_v5 = vsub.s32 %v139_v4, %v14516_v3  ;;  %vm13443_vm10 = vcmask 195712   ;;  %vm13450_vm11 = vcmask 261312   ;;  %vm13457_vm12 = vcmask 326912  }
  0x2c   :  { %21134 = vst [vmem:[#allocation13_spill] sm:$0xff] %v14523_v9  ;;  %vm13464_vm13 = vcmask 392512   ;;  %vm13471_vm14 = vcmask 458112   ;;  %vm13478_vm15 = vcmask 523712   ;;  %p14448_p5 = por %p14447_p4, %p14446_p3 }
  0x2d   :  { %21133 = vst [vmem:[#allocation12_spill] sm:$0xff] %v14519_v5  ;;  %v143_v8 = vrot.slane %v40_v6, %v14519_v5  ;;  %v192_v10 = vrot.slane %v41_v7, %v14519_v5  ;;  %v150_v18 = vrot.slane %v136_v11, %v14519_v5  ;;  %v199_v47 = vrot.slane %v185_v36, %v14519_v5 }
  0x2e   :  { %v241_v62 = vrot.slane %v42_v57, %v14519_v5  ;;  %p14449_p6 = pnand %p14448_p5, %p14442_p2 }
  0x2f   :  { %v159_v12 = vrot.slane %v143_v8, %v14519_v5  ;;  %v208_v13 = vrot.slane %v192_v10, %v14519_v5  ;;  %v200_v14 = vcombine.high %v192_v10, %v192_v10  ;;  %v151_v15 = vcombine.high %v143_v8, %v143_v8 }
  0x30   :  { %v166_v24 = vrot.slane %v150_v18, %v14519_v5  ;;  %v152_v25 = vcombine.high %v150_v18, %v150_v18  ;;  %v201_v56 = vcombine.high %v199_v47, %v199_v47  ;;  %v215_v61 = vrot.slane %v199_v47, %v14519_v5 }
  0x31   :  { %v1707_v19 = vrot.slane %v159_v12, %v14523_v9  ;;  %v181_v20 = vcombine.high %v159_v12, %v159_v12  ;;  %v1739_v21 = vrot.slane %v208_v13, %v14523_v9  ;;  %v222_v22 = vrot.slane %v200_v14, %v14519_v5 }
  0x32   :  { %v173_v23 = vrot.slane %v151_v15, %v14519_v5  ;;  %v180_v32 = vrot.slane %v152_v25, %v14519_v5  ;;  %v230_v38 = vcombine.high %v208_v13, %v208_v13  ;;  %v1723_v42 = vrot.slane %v166_v24, %v14523_v9 }
  0x33   :  { %v2984_v26 = vmul.f32 %v1707_v19, %v14528_v16  ;;  %v1715_v27 = vrot.slane %v181_v20, %v14523_v9  ;;  %v2992_v28 = vmul.f32 %v1739_v21, %v14530_v17  ;;  %v1743_v29 = vrot.slane %v222_v22, %v14523_v9 }
  0x34   :  { %v1711_v30 = vrot.slane %v173_v23, %v14523_v9  ;;  %v183_v31 = vcombine.high %v173_v23, %v173_v23  ;;  %v1727_v43 = vrot.slane %v180_v32, %v14523_v9  ;;  %v232_v46 = vcombine.high %v222_v22, %v222_v22 }
  0x35   :  { %v3241_v33 = vsel %vm3240_vm0, %v2984_v26, 0.0  ;;  %v2986_v34 = vmul.f32 %v1715_v27, %v14528_v16  ;;  %v2993_v35 = vmul.f32 %v1743_v29, %v14530_v17  ;;  %v3265_v40 = vsel %vm3240_vm0, %v2992_v28, 0.0 }
  0x36   :  { %3242 = vadd.xlane.f32.xlu0 %v3241_v33  ;;  %v1719_v37 = vrot.slane %v183_v31, %v14523_v9  ;;  %v2985_v41 = vmul.f32 %v1711_v30, %v14528_v16  ;;  %v2988_v49 = vmul.f32 %v1723_v42, %v14528_v16  ;;  %v1747_v50 = vrot.slane %v230_v38, %v14523_v9  ;;  %v74_v31 = vld [vmem:[#allocation5 + $0x10] sm:$0xff] }
  0x37   :  { %v3247_v39 = vsel %vm3240_vm0, %v2986_v34, 0.0  ;;  %v3268_v44 = vsel %vm3240_vm0, %v2993_v35, 0.0  ;;  %v182_v51 = vcombine.high %v166_v24, %v166_v24  ;;  %v2989_v52 = vmul.f32 %v1727_v43, %v14528_v16 }
  0x38   :  { %3248 = vadd.xlane.f32.xlu1 %v3247_v39  ;;  %v2987_v45 = vmul.f32 %v1719_v37, %v14528_v16  ;;  %v3244_v48 = vsel %vm3240_vm0, %v2985_v41, 0.0  ;;  %v1751_v54 = vrot.slane %v232_v46, %v14523_v9  ;;  %v184_v55 = vcombine.high %v180_v32, %v180_v32  ;;  %v43_v37 = vld [vmem:[#allocation2 + $0x18] sm:$0xff] }
  0x39   :  { %v3253_v58 = vsel %vm3240_vm0, %v2988_v49, 0.0  ;;  %v2994_v59 = vmul.f32 %v1747_v50, %v14530_v17  ;;  %v1731_v60 = vrot.slane %v182_v51, %v14523_v9  ;;  %v3256_v63 = vsel %vm3240_vm0, %v2989_v52, 0.0 }
  0x3a   :  { %3266 = vadd.xlane.f32.xlu0 %v3265_v40  ;;  %v3250_v53 = vsel %vm3240_vm0, %v2987_v45, 0.0  ;;  %v2995_v1 = vmul.f32 %v1751_v54, %v14530_v17  ;;  %v1735_v2 = vrot.slane %v184_v55, %v14523_v9  ;;  %v229_v4 = vrot.slane %v201_v56, %v14519_v5 }
  0x3b   :  { %v3271_v6 = vsel %vm3240_vm0, %v2994_v59, 0.0  ;;  %v2990_v7 = vmul.f32 %v1731_v60, %v14528_v16  ;;  %v1755_v8 = vrot.slane %v215_v61, %v14523_v9  ;;  %v231_v10 = vcombine.high %v215_v61, %v215_v61 }
  0x3c   :  { %3269 = vadd.xlane.f32.xlu1 %v3268_v44  ;;  %v249_v11 = vcombine.high %v241_v62, %v241_v62  ;;  %v234_v12 = vcombine.high %v42_v57, %v42_v57  ;;  %v3274_v13 = vsel %vm3240_vm0, %v2995_v1, 0.0  ;;  %v2991_v14 = vmul.f32 %v1735_v2, %v14528_v16 }
  0x3d   :  { %v1759_v15 = vrot.slane %v229_v4, %v14523_v9  ;;  %v233_v18 = vcombine.high %v229_v4, %v229_v4  ;;  %v3259_v19 = vsel %vm3240_vm0, %v2990_v7, 0.0  ;;  %v2996_v20 = vmul.f32 %v1755_v8, %v14530_v17  ;;  %v75_v8 = vld [vmem:[#allocation5 + $0x18] sm:$0xff] }
  0x3e   :  { %3245 = vadd.xlane.f32.xlu0 %v3244_v48  ;;  %v1763_v21 = vrot.slane %v231_v10, %v14523_v9  ;;  %v257_v22 = vrot.slane %v241_v62, %v14519_v5  ;;  %v271_v23 = vrot.slane %v249_v11, %v14519_v5  ;;  %v3262_v24 = vsel %vm3240_vm0, %v2991_v14, 0.0 }
  0x3f   :  { %v2997_v25 = vmul.f32 %v1759_v15, %v14530_v17  ;;  %v1767_v16 = vrot.slane %v233_v18, %v14523_v9  ;;  %v248_v26 = vrot.slane %v234_v12, %v14519_v5  ;;  %v3277_v27 = vsel %vm3240_vm0, %v2996_v20, 0.0  ;;  %v44_v15 = vld [vmem:[#allocation2 + $0x20] sm:$0xff] }
  0x40   :  { %3251 = vadd.xlane.f32.xlu1 %v3250_v53  ;;  %v2998_v28 = vmul.f32 %v1763_v21, %v14530_v17  ;;  %v1771_v29 = vrot.slane %v257_v22, %v14523_v9  ;;  %v279_v30 = vcombine.high %v257_v22, %v257_v22  ;;  %v1775_v32 = vrot.slane %v271_v23, %v14523_v9 }
  0x41   :  { %v3280_v33 = vsel %vm3240_vm0, %v2997_v25, 0.0  ;;  %v2999_v34 = vmul.f32 %v1767_v16, %v14530_v17  ;;  %v281_v35 = vcombine.high %v271_v23, %v271_v23  ;;  %v250_v36 = vcombine.high %v248_v26, %v248_v26 }
  0x42   :  { %3254 = vadd.xlane.f32.xlu0 %v3253_v58  ;;  %v3283_v38 = vsel %vm3240_vm0, %v2998_v28, 0.0  ;;  %v3000_v39 = vmul.f32 %v1771_v29, %v74_v31  ;;  %v1779_v40 = vrot.slane %v279_v30, %v14523_v9  ;;  %v264_v41 = vrot.slane %v248_v26, %v14519_v5 }
  0x43   :  { %v3001_v42 = vmul.f32 %v1775_v32, %v74_v31  ;;  %v290_v43 = vrot.slane %v43_v37, %v14519_v5  ;;  %v3286_v44 = vsel %vm3240_vm0, %v2999_v34, 0.0  ;;  %v1783_v45 = vrot.slane %v281_v35, %v14523_v9 }
  0x44   :  { %3257 = vadd.xlane.f32.xlu1 %v3256_v63  ;;  %v278_v17 = vrot.slane %v250_v36, %v14519_v5  ;;  %v3289_v46 = vsel %vm3240_vm0, %v3000_v39, 0.0  ;;  %v3002_v47 = vmul.f32 %v1779_v40, %v74_v31  ;;  %v1787_v48 = vrot.slane %v264_v41, %v14523_v9 }
  0x45   :  { %v280_v49 = vcombine.high %v264_v41, %v264_v41  ;;  %v3292_v50 = vsel %vm3240_vm0, %v3001_v42, 0.0  ;;  %v298_v51 = vcombine.high %v290_v43, %v290_v43  ;;  %v3003_v52 = vmul.f32 %v1783_v45, %v74_v31 }
  0x46   :  { %3272 = vadd.xlane.f32.xlu0 %v3271_v6  ;;  %v1791_v53 = vrot.slane %v278_v17, %v14523_v9  ;;  %v282_v54 = vcombine.high %v278_v17, %v278_v17  ;;  %v283_v55 = vcombine.high %v43_v37, %v43_v37  ;;  %v3295_v56 = vsel %vm3240_vm0, %v3002_v47, 0.0 }
  0x47   :  { %v3004_v57 = vmul.f32 %v1787_v48, %v74_v31  ;;  %v1795_v58 = vrot.slane %v280_v49, %v14523_v9  ;;  %v306_v59 = vrot.slane %v290_v43, %v14519_v5  ;;  %v320_v60 = vrot.slane %v298_v51, %v14519_v5  ;;  %v76_v48 = vld [vmem:[#allocation5 + $0x20] sm:$0xff] }
  0x48   :  { %3275 = vadd.xlane.f32.xlu1 %v3274_v13  ;;  %v3298_v61 = vsel %vm3240_vm0, %v3003_v52, 0.0  ;;  %v3005_v62 = vmul.f32 %v1791_v53, %v74_v31  ;;  %v1799_v63 = vrot.slane %v282_v54, %v14523_v9  ;;  %v297_v1 = vrot.slane %v283_v55, %v14519_v5  ;;  %v45_v54 = vld [vmem:[#allocation2 + $0x28] sm:$0xff] }
  0x49   :  { %v3301_v2 = vsel %vm3240_vm0, %v3004_v57, 0.0  ;;  %v3006_v4 = vmul.f32 %v1795_v58, %v74_v31  ;;  %v1803_v6 = vrot.slane %v306_v59, %v14523_v9  ;;  %v328_v7 = vcombine.high %v306_v59, %v306_v59 }
  0x4a   :  { %3260 = vadd.xlane.f32.xlu0 %v3259_v19  ;;  %v1807_v10 = vrot.slane %v320_v60, %v14523_v9  ;;  %v3304_v11 = vsel %vm3240_vm0, %v3005_v62, 0.0  ;;  %v3007_v12 = vmul.f32 %v1799_v63, %v74_v31  ;;  %v330_v13 = vcombine.high %v320_v60, %v320_v60 }
  0x4b   :  { %v299_v14 = vcombine.high %v297_v1, %v297_v1  ;;  %v3307_v18 = vsel %vm3240_vm0, %v3006_v4, 0.0  ;;  %v3008_v19 = vmul.f32 %v1803_v6, %v75_v8  ;;  %v1811_v20 = vrot.slane %v328_v7, %v14523_v9 }
  0x4c   :  { %3263 = vadd.xlane.f32.xlu1 %v3262_v24  ;;  %v313_v21 = vrot.slane %v297_v1, %v14519_v5  ;;  %v3009_v22 = vmul.f32 %v1807_v10, %v75_v8  ;;  %v339_v23 = vrot.slane %v44_v15, %v14519_v5  ;;  %v3310_v24 = vsel %vm3240_vm0, %v3007_v12, 0.0 }
  0x4d   :  { %v1815_v25 = vrot.slane %v330_v13, %v14523_v9  ;;  %v327_v16 = vrot.slane %v299_v14, %v14519_v5  ;;  %v3313_v26 = vsel %vm3240_vm0, %v3008_v19, 0.0  ;;  %v332_v35 = vcombine.high %v44_v15, %v44_v15 }
  0x4e   :  { %3278 = vadd.xlane.f32.xlu0 %v3277_v27  ;;  %v3010_v27 = vmul.f32 %v1811_v20, %v75_v8  ;;  %v1819_v28 = vrot.slane %v313_v21, %v14523_v9  ;;  %v329_v29 = vcombine.high %v313_v21, %v313_v21  ;;  %v3316_v30 = vsel %vm3240_vm0, %v3009_v22, 0.0 }
  0x4f   :  { %v347_v31 = vcombine.high %v339_v23, %v339_v23  ;;  %v3011_v32 = vmul.f32 %v1815_v25, %v75_v8  ;;  %v331_v34 = vcombine.high %v327_v16, %v327_v16  ;;  %v355_v39 = vrot.slane %v339_v23, %v14519_v5 }
  0x50   :  { %3281 = vadd.xlane.f32.xlu1 %v3280_v33  ;;  %v1823_v33 = vrot.slane %v327_v16, %v14523_v9  ;;  %v3319_v36 = vsel %vm3240_vm0, %v3010_v27, 0.0  ;;  %v3012_v37 = vmul.f32 %v1819_v28, %v75_v8  ;;  %v388_v60 = vrot.slane %v45_v54, %v14519_v5  ;;  %v77_v28 = vld [vmem:[#allocation5 + $0x28] sm:$0xff] }
  0x51   :  { %v369_v40 = vrot.slane %v347_v31, %v14519_v5  ;;  %v3322_v41 = vsel %vm3240_vm0, %v3011_v32, 0.0  ;;  %v1831_v43 = vrot.slane %v331_v34, %v14523_v9  ;;  %v377_v47 = vcombine.high %v355_v39, %v355_v39  ;;  %v46_v34 = vld [vmem:[#allocation2 + $0x30] sm:$0xff] }
  0x52   :  { %3284 = vadd.xlane.f32.xlu0 %v3283_v38  ;;  %v1827_v38 = vrot.slane %v329_v29, %v14523_v9  ;;  %v3013_v42 = vmul.f32 %v1823_v33, %v75_v8  ;;  %v3325_v45 = vsel %vm3240_vm0, %v3012_v37, 0.0  ;;  %v381_v13 = vcombine.high %v45_v54, %v45_v54 }
  0x53   :  { %v1839_v49 = vrot.slane %v369_v40, %v14523_v9  ;;  %v3015_v51 = vmul.f32 %v1831_v43, %v75_v8  ;;  %v379_v52 = vcombine.high %v369_v40, %v369_v40  ;;  %v1843_v57 = vrot.slane %v377_v47, %v14523_v9 }
  0x54   :  { %3287 = vadd.xlane.f32.xlu1 %v3286_v44  ;;  %v346_v44 = vrot.slane %v332_v35, %v14519_v5  ;;  %v3014_v17 = vmul.f32 %v1827_v38, %v75_v8  ;;  %v396_v8 = vcombine.high %v388_v60, %v388_v60  ;;  %v404_v19 = vrot.slane %v388_v60, %v14519_v5 }
  0x55   :  { %v3017_v59 = vmul.f32 %v1839_v49, %v76_v48  ;;  %v1847_v62 = vrot.slane %v379_v52, %v14523_v9  ;;  %v437_v40 = vrot.slane %v46_v34, %v14519_v5  ;;  %v430_v52 = vcombine.high %v46_v34, %v46_v34 }
  0x56   :  { %3290 = vadd.xlane.f32.xlu0 %v3289_v46  ;;  %v1835_v46 = vrot.slane %v355_v39, %v14523_v9  ;;  %v348_v53 = vcombine.high %v346_v44, %v346_v44  ;;  %v3331_v55 = vsel %vm3240_vm0, %v3014_v17, 0.0  ;;  %v362_v58 = vrot.slane %v346_v44, %v14519_v5 }
  0x57   :  { %v3340_v7 = vsel %vm3240_vm0, %v3017_v59, 0.0  ;;  %v3019_v10 = vmul.f32 %v1847_v62, %v76_v48  ;;  %v418_v20 = vrot.slane %v396_v8, %v14519_v5  ;;  %v426_v27 = vcombine.high %v404_v19, %v404_v19 }
  0x58   :  { %3293 = vadd.xlane.f32.xlu1 %v3292_v50  ;;  %v3328_v50 = vsel %vm3240_vm0, %v3013_v42, 0.0  ;;  %v376_v63 = vrot.slane %v348_v53, %v14519_v5  ;;  %v1851_v4 = vrot.slane %v362_v58, %v14523_v9  ;;  %v378_v6 = vcombine.high %v362_v58, %v362_v58 }
  0x59   :  { %v3346_v21 = vsel %vm3240_vm0, %v3019_v10, 0.0  ;;  %v1871_v29 = vrot.slane %v418_v20, %v14523_v9  ;;  %v428_v32 = vcombine.high %v418_v20, %v418_v20  ;;  %v1875_v37 = vrot.slane %v426_v27, %v14523_v9 }
  0x5a   :  { %3296 = vadd.xlane.f32.xlu0 %v3295_v56  ;;  %v3016_v56 = vmul.f32 %v1835_v46, %v76_v48  ;;  %v380_v12 = vcombine.high %v376_v63, %v376_v63  ;;  %v3020_v15 = vmul.f32 %v1851_v4, %v76_v48  ;;  %v78_v4 = vld [vmem:[#allocation5 + $0x30] sm:$0xff] }
  0x5b   :  { %v3025_v39 = vmul.f32 %v1871_v29, %v77_v28  ;;  %v1879_v42 = vrot.slane %v428_v32, %v14523_v9 }
  0x5c   :  { %3299 = vadd.xlane.f32.xlu1 %v3298_v61  ;;  %v3334_v61 = vsel %vm3240_vm0, %v3015_v51, 0.0  ;;  %v3337_v1 = vsel %vm3240_vm0, %v3016_v56, 0.0  ;;  %v1863_v23 = vrot.slane %v380_v12, %v14523_v9  ;;  %v3349_v25 = vsel %vm3240_vm0, %v3020_v15, 0.0  ;;  %v47_v12 = vld [vmem:[#allocation2 + $0x38] sm:$0xff] }
  0x5d   :  { %v3364_v47 = vsel %vm3240_vm0, %v3025_v39, 0.0  ;;  %v3027_v49 = vmul.f32 %v1879_v42, %v77_v28  ;;  %v453_v56 = vrot.slane %v437_v40, %v14519_v5  ;;  %v486_v20 = vrot.slane %v47_v12, %v14519_v5 }
  0x5e   :  { %3302 = vadd.xlane.f32.xlu0 %v3301_v2  ;;  %v3018_v2 = vmul.f32 %v1843_v57, %v76_v48  ;;  %v3023_v31 = vmul.f32 %v1863_v23, %v76_v48  ;;  %v479_v32 = vcombine.high %v47_v12, %v47_v12 }
  0x5f   :  { %v3370_v58 = vsel %vm3240_vm0, %v3027_v49, 0.0 }
  0x60   :  { %3305 = vadd.xlane.f32.xlu1 %v3304_v11  ;;  %v1855_v11 = vrot.slane %v376_v63, %v14523_v9  ;;  %v3343_v14 = vsel %vm3240_vm0, %v3018_v2, 0.0  ;;  %v475_v2 = vcombine.high %v453_v56, %v453_v56 }
  0x62   :  { %3308 = vadd.xlane.f32.xlu0 %v3307_v18  ;;  %v1859_v18 = vrot.slane %v378_v6, %v14523_v9  ;;  %v3021_v22 = vmul.f32 %v1855_v11, %v76_v48  ;;  %v1907_v15 = vrot.slane %v475_v2, %v14523_v9 }
  0x64   :  { %3311 = vadd.xlane.f32.xlu1 %v3310_v24  ;;  %v395_v24 = vrot.slane %v381_v13, %v14519_v5  ;;  %v3022_v16 = vmul.f32 %v1859_v18, %v76_v48  ;;  %v445_v48 = vcombine.high %v437_v40, %v437_v40 }
  0x66   :  { %3314 = vadd.xlane.f32.xlu0 %v3313_v26  ;;  %v1867_v26 = vrot.slane %v404_v19, %v14523_v9  ;;  %v397_v33 = vcombine.high %v395_v24, %v395_v24  ;;  %v3355_v35 = vsel %vm3240_vm0, %v3022_v16, 0.0  ;;  %v411_v38 = vrot.slane %v395_v24, %v14519_v5 }
  0x67   :  { %v467_v57 = vrot.slane %v445_v48, %v14519_v5 }
  0x68   :  { %3317 = vadd.xlane.f32.xlu1 %v3316_v30  ;;  %v3352_v30 = vsel %vm3240_vm0, %v3021_v22, 0.0  ;;  %v425_v43 = vrot.slane %v397_v33, %v14519_v5  ;;  %v1883_v17 = vrot.slane %v411_v38, %v14523_v9  ;;  %v427_v46 = vcombine.high %v411_v38, %v411_v38 }
  0x69   :  { %v1903_v6 = vrot.slane %v467_v57, %v14523_v9  ;;  %v477_v10 = vcombine.high %v467_v57, %v467_v57 }
  0x6a   :  { %3320 = vadd.xlane.f32.xlu0 %v3319_v36  ;;  %v3024_v36 = vmul.f32 %v1867_v26, %v77_v28  ;;  %v429_v51 = vcombine.high %v425_v43, %v425_v43  ;;  %v3028_v54 = vmul.f32 %v1883_v17, %v77_v28  ;;  %v79_v17 = vld [vmem:[#allocation5 + $0x38] sm:$0xff] }
  0x6b   :  { %v3033_v19 = vmul.f32 %v1903_v6, %v78_v4  ;;  %v1911_v22 = vrot.slane %v477_v10, %v14523_v9 }
  0x6c   :  { %3323 = vadd.xlane.f32.xlu1 %v3322_v41  ;;  %v3358_v41 = vsel %vm3240_vm0, %v3023_v31, 0.0  ;;  %v3361_v44 = vsel %vm3240_vm0, %v3024_v36, 0.0  ;;  %v1895_v60 = vrot.slane %v429_v51, %v14523_v9  ;;  %v3373_v62 = vsel %vm3240_vm0, %v3028_v54, 0.0  ;;  %v48_v51 = vld [vmem:[#allocation2 + $0x40] sm:$0xff] }
  0x6d   :  { %v3388_v27 = vsel %vm3240_vm0, %v3033_v19, 0.0  ;;  %v3035_v29 = vmul.f32 %v1911_v22, %v78_v4  ;;  %v502_v36 = vrot.slane %v486_v20, %v14519_v5  ;;  %v535_v57 = vrot.slane %v48_v51, %v14519_v5 }
  0x6e   :  { %3326 = vadd.xlane.f32.xlu0 %v3325_v45  ;;  %v3026_v45 = vmul.f32 %v1875_v37, %v77_v28  ;;  %v3031_v8 = vmul.f32 %v1895_v60, %v77_v28  ;;  %v528_v10 = vcombine.high %v48_v51, %v48_v51 }
  0x6f   :  { %v3394_v38 = vsel %vm3240_vm0, %v3035_v29, 0.0 }
  0x70   :  { %3329 = vadd.xlane.f32.xlu1 %v3328_v50  ;;  %v1887_v50 = vrot.slane %v425_v43, %v14523_v9  ;;  %v3367_v53 = vsel %vm3240_vm0, %v3026_v45, 0.0  ;;  %v524_v45 = vcombine.high %v502_v36, %v502_v36 }
  0x72   :  { %3332 = vadd.xlane.f32.xlu0 %v3331_v55  ;;  %v1891_v55 = vrot.slane %v427_v46, %v14523_v9  ;;  %v3029_v59 = vmul.f32 %v1887_v50, %v77_v28  ;;  %v1939_v54 = vrot.slane %v524_v45, %v14523_v9 }
  0x74   :  { %3335 = vadd.xlane.f32.xlu1 %v3334_v61  ;;  %v444_v61 = vrot.slane %v430_v52, %v14519_v5  ;;  %v3030_v63 = vmul.f32 %v1891_v55, %v77_v28  ;;  %v494_v28 = vcombine.high %v486_v20, %v486_v20 }
  0x76   :  { %3338 = vadd.xlane.f32.xlu0 %v3337_v1  ;;  %v1899_v1 = vrot.slane %v453_v56, %v14523_v9  ;;  %v446_v11 = vcombine.high %v444_v61, %v444_v61  ;;  %v3379_v13 = vsel %vm3240_vm0, %v3030_v63, 0.0  ;;  %v460_v18 = vrot.slane %v444_v61, %v14519_v5 }
  0x77   :  { %v516_v37 = vrot.slane %v494_v28, %v14519_v5 }
  0x78   :  { %3341 = vadd.xlane.f32.xlu1 %v3340_v7  ;;  %v3376_v7 = vsel %vm3240_vm0, %v3029_v59, 0.0  ;;  %v474_v23 = vrot.slane %v446_v11, %v14519_v5  ;;  %v1915_v16 = vrot.slane %v460_v18, %v14523_v9  ;;  %v476_v26 = vcombine.high %v460_v18, %v460_v18 }
  0x79   :  { %v1935_v46 = vrot.slane %v516_v37, %v14523_v9  ;;  %v526_v49 = vcombine.high %v516_v37, %v516_v37 }
  0x7a   :  { %3344 = vadd.xlane.f32.xlu0 %v3343_v14  ;;  %v3032_v14 = vmul.f32 %v1899_v1, %v78_v4  ;;  %v478_v31 = vcombine.high %v474_v23, %v474_v23  ;;  %v3036_v34 = vmul.f32 %v1915_v16, %v78_v4  ;;  %v80_v16 = vld [vmem:[#allocation5 + $0x40] sm:$0xff] }
  0x7b   :  { %v3041_v56 = vmul.f32 %v1935_v46, %v79_v17  ;;  %v1943_v59 = vrot.slane %v526_v49, %v14523_v9 }
  0x7c   :  { %3347 = vadd.xlane.f32.xlu1 %v3346_v21  ;;  %v3382_v21 = vsel %vm3240_vm0, %v3031_v8, 0.0  ;;  %v3385_v24 = vsel %vm3240_vm0, %v3032_v14, 0.0  ;;  %v1927_v40 = vrot.slane %v478_v31, %v14523_v9  ;;  %v3397_v42 = vsel %vm3240_vm0, %v3036_v34, 0.0  ;;  %v49_v31 = vld [vmem:[#allocation2 + $0x48] sm:$0xff] }
  0x7d   :  { %v3412_v2 = vsel %vm3240_vm0, %v3041_v56, 0.0  ;;  %v3043_v6 = vmul.f32 %v1943_v59, %v79_v17  ;;  %v551_v14 = vrot.slane %v535_v57, %v14519_v5  ;;  %v584_v37 = vrot.slane %v49_v31, %v14519_v5 }
  0x7e   :  { %3350 = vadd.xlane.f32.xlu0 %v3349_v25  ;;  %v3034_v25 = vmul.f32 %v1907_v15, %v78_v4  ;;  %v3039_v48 = vmul.f32 %v1927_v40, %v78_v4  ;;  %v577_v49 = vcombine.high %v49_v31, %v49_v31 }
  0x7f   :  { %v3418_v18 = vsel %vm3240_vm0, %v3043_v6, 0.0 }
  0x80   :  { %3353 = vadd.xlane.f32.xlu1 %v3352_v30  ;;  %v1919_v30 = vrot.slane %v474_v23, %v14523_v9  ;;  %v3391_v33 = vsel %vm3240_vm0, %v3034_v25, 0.0  ;;  %v573_v25 = vcombine.high %v551_v14, %v551_v14 }
  0x82   :  { %3356 = vadd.xlane.f32.xlu0 %v3355_v35  ;;  %v1923_v35 = vrot.slane %v476_v26, %v14523_v9  ;;  %v3037_v39 = vmul.f32 %v1919_v30, %v78_v4  ;;  %v1971_v34 = vrot.slane %v573_v25, %v14523_v9 }
  0x84   :  { %3359 = vadd.xlane.f32.xlu1 %v3358_v41  ;;  %v493_v41 = vrot.slane %v479_v32, %v14519_v5  ;;  %v3038_v43 = vmul.f32 %v1923_v35, %v78_v4  ;;  %v543_v4 = vcombine.high %v535_v57, %v535_v57 }
  0x86   :  { %3362 = vadd.xlane.f32.xlu0 %v3361_v44  ;;  %v1931_v44 = vrot.slane %v502_v36, %v14523_v9  ;;  %v495_v50 = vcombine.high %v493_v41, %v493_v41  ;;  %v3403_v52 = vsel %vm3240_vm0, %v3038_v43, 0.0  ;;  %v509_v55 = vrot.slane %v493_v41, %v14519_v5 }
  0x87   :  { %v565_v15 = vrot.slane %v543_v4, %v14519_v5 }
  0x88   :  { %3365 = vadd.xlane.f32.xlu1 %v3364_v47  ;;  %v3400_v47 = vsel %vm3240_vm0, %v3037_v39, 0.0  ;;  %v523_v60 = vrot.slane %v495_v50, %v14519_v5  ;;  %v1947_v63 = vrot.slane %v509_v55, %v14523_v9  ;;  %v525_v1 = vcombine.high %v509_v55, %v509_v55 }
  0x89   :  { %v1967_v26 = vrot.slane %v565_v15, %v14523_v9  ;;  %v575_v29 = vcombine.high %v565_v15, %v565_v15 }
  0x8a   :  { %3368 = vadd.xlane.f32.xlu0 %v3367_v53  ;;  %v3040_v53 = vmul.f32 %v1931_v44, %v79_v17  ;;  %v527_v8 = vcombine.high %v523_v60, %v523_v60  ;;  %v3044_v12 = vmul.f32 %v1947_v63, %v79_v17  ;;  %v81_v63 = vld [vmem:[#allocation5 + $0x48] sm:$0xff] }
  0x8b   :  { %v3049_v36 = vmul.f32 %v1967_v26, %v80_v16  ;;  %v1975_v39 = vrot.slane %v575_v29, %v14523_v9 }
  0x8c   :  { %3371 = vadd.xlane.f32.xlu1 %v3370_v58  ;;  %v3406_v58 = vsel %vm3240_vm0, %v3039_v48, 0.0  ;;  %v3409_v61 = vsel %vm3240_vm0, %v3040_v53, 0.0  ;;  %v1959_v20 = vrot.slane %v527_v8, %v14523_v9  ;;  %v3421_v22 = vsel %vm3240_vm0, %v3044_v12, 0.0  ;;  %v50_v8 = vld [vmem:[#allocation2 + $0x50] sm:$0xff] }
  0x8d   :  { %v3436_v45 = vsel %vm3240_vm0, %v3049_v36, 0.0  ;;  %v3051_v46 = vmul.f32 %v1975_v39, %v80_v16  ;;  %v600_v53 = vrot.slane %v584_v37, %v14519_v5  ;;  %v633_v15 = vrot.slane %v50_v8, %v14519_v5 }
  0x8e   :  { %3374 = vadd.xlane.f32.xlu0 %v3373_v62  ;;  %v3042_v62 = vmul.f32 %v1939_v54, %v79_v17  ;;  %v3047_v28 = vmul.f32 %v1959_v20, %v79_v17  ;;  %v626_v31 = vcombine.high %v50_v8, %v50_v8 }
  0x8f   :  { %v3442_v55 = vsel %vm3240_vm0, %v3051_v46, 0.0  ;;  %v641_v26 = vcombine.high %v633_v15, %v633_v15  ;;  %v649_v36 = vrot.slane %v633_v15, %v14519_v5 }
  0x90   :  { %3377 = vadd.xlane.f32.xlu1 %v3376_v7  ;;  %v1951_v7 = vrot.slane %v523_v60, %v14523_v9  ;;  %v3415_v11 = vsel %vm3240_vm0, %v3042_v62, 0.0  ;;  %v622_v62 = vcombine.high %v600_v53, %v600_v53 }
  0x91   :  { %v671_v46 = vcombine.high %v649_v36, %v649_v36 }
  0x92   :  { %3380 = vadd.xlane.f32.xlu0 %v3379_v13  ;;  %v1955_v13 = vrot.slane %v525_v1, %v14523_v9  ;;  %v3045_v19 = vmul.f32 %v1951_v7, %v79_v17  ;;  %v2003_v12 = vrot.slane %v622_v62, %v14523_v9 }
  0x94   :  { %3383 = vadd.xlane.f32.xlu1 %v3382_v21  ;;  %v542_v21 = vrot.slane %v528_v10, %v14519_v5  ;;  %v3046_v23 = vmul.f32 %v1955_v13, %v79_v17  ;;  %v592_v17 = vcombine.high %v584_v37, %v584_v37  ;;  %v663_v37 = vrot.slane %v641_v26, %v14519_v5 }
  0x96   :  { %3386 = vadd.xlane.f32.xlu0 %v3385_v24  ;;  %v1963_v24 = vrot.slane %v551_v14, %v14523_v9  ;;  %v544_v30 = vcombine.high %v542_v21, %v542_v21  ;;  %v3427_v32 = vsel %vm3240_vm0, %v3046_v23, 0.0  ;;  %v558_v35 = vrot.slane %v542_v21, %v14519_v5 }
  0x97   :  { %v614_v54 = vrot.slane %v592_v17, %v14519_v5  ;;  %v3058_v23 = vmul.f32 %v2003_v12, %v81_v63  ;;  %v2027_v17 = vrot.slane %v649_v36, %v14523_v9 }
  0x98   :  { %3389 = vadd.xlane.f32.xlu1 %v3388_v27  ;;  %v3424_v27 = vsel %vm3240_vm0, %v3045_v19, 0.0  ;;  %v572_v40 = vrot.slane %v544_v30, %v14519_v5  ;;  %v1979_v43 = vrot.slane %v558_v35, %v14523_v9  ;;  %v574_v44 = vcombine.high %v558_v35, %v558_v35 }
  0x99   :  { %v1999_v1 = vrot.slane %v614_v54, %v14523_v9  ;;  %v624_v6 = vcombine.high %v614_v54, %v614_v54  ;;  %v51_v54 = vld [vmem:[#allocation2 + $0x58] sm:$0xff] }
  0x9a   :  { %3392 = vadd.xlane.f32.xlu0 %v3391_v33  ;;  %v3048_v33 = vmul.f32 %v1963_v24, %v80_v16  ;;  %v576_v48 = vcombine.high %v572_v40, %v572_v40  ;;  %v3052_v51 = vmul.f32 %v1979_v43, %v80_v16  ;;  %v675_v12 = vcombine.high %v51_v54, %v51_v54 }
  0x9b   :  { %v3057_v14 = vmul.f32 %v1999_v1, %v81_v63  ;;  %v2007_v19 = vrot.slane %v624_v6, %v14523_v9 }
  0x9c   :  { %3395 = vadd.xlane.f32.xlu1 %v3394_v38  ;;  %v3430_v38 = vsel %vm3240_vm0, %v3047_v28, 0.0  ;;  %v3433_v41 = vsel %vm3240_vm0, %v3048_v33, 0.0  ;;  %v1991_v57 = vrot.slane %v576_v48, %v14523_v9  ;;  %v3445_v59 = vsel %vm3240_vm0, %v3052_v51, 0.0 }
  0x9d   :  { %v3059_v28 = vmul.f32 %v2007_v19, %v81_v63  ;;  %v3463_v33 = vsel %vm3240_vm0, %v3058_v23, 0.0  ;;  %v2031_v48 = vrot.slane %v663_v37, %v14523_v9 }
  0x9e   :  { %3398 = vadd.xlane.f32.xlu0 %v3397_v42  ;;  %v3050_v42 = vmul.f32 %v1971_v34, %v80_v16  ;;  %v3055_v4 = vmul.f32 %v1991_v57, %v80_v16 }
  0x9f   :  { %v3466_v39 = vsel %vm3240_vm0, %v3059_v28, 0.0 }
  0xa0   :  { %3401 = vadd.xlane.f32.xlu1 %v3400_v47  ;;  %v1983_v47 = vrot.slane %v572_v40, %v14523_v9  ;;  %v3439_v50 = vsel %vm3240_vm0, %v3050_v42, 0.0  ;;  %v640_v42 = vrot.slane %v626_v31, %v14519_v5  ;;  %v689_v31 = vrot.slane %v675_v12, %v14519_v5 }
  0xa2   :  { %3404 = vadd.xlane.f32.xlu0 %v3403_v52  ;;  %v1987_v52 = vrot.slane %v574_v44, %v14523_v9  ;;  %v3053_v56 = vmul.f32 %v1983_v47, %v80_v16  ;;  %v82_v47 = vld [vmem:[#allocation5 + $0x50] sm:$0xff] }
  0xa3   :  { %v3064_v57 = vmul.f32 %v2027_v17, %v82_v47  ;;  %v691_v17 = vcombine.high %v689_v31, %v689_v31 }
  0xa4   :  { %3407 = vadd.xlane.f32.xlu1 %v3406_v58  ;;  %v591_v58 = vrot.slane %v577_v49, %v14519_v5  ;;  %v3054_v60 = vmul.f32 %v1987_v52, %v80_v16  ;;  %v3460_v16 = vsel %vm3240_vm0, %v3057_v14, 0.0  ;;  %v673_v52 = vcombine.high %v663_v37, %v663_v37 }
  0xa5   :  { %v3481_v6 = vsel %vm3240_vm0, %v3064_v57, 0.0 }
  0xa6   :  { %3410 = vadd.xlane.f32.xlu0 %v3409_v61  ;;  %v1995_v61 = vrot.slane %v600_v53, %v14523_v9  ;;  %v593_v7 = vcombine.high %v591_v58, %v591_v58  ;;  %v3451_v10 = vsel %vm3240_vm0, %v3054_v60, 0.0  ;;  %v607_v13 = vrot.slane %v591_v58, %v14519_v5 }
  0xa7   :  { %v642_v53 = vcombine.high %v640_v42, %v640_v42  ;;  %v2035_v58 = vrot.slane %v671_v46, %v14523_v9  ;;  %v682_v60 = vrot.slane %v51_v54, %v14519_v5  ;;  %v2039_v1 = vrot.slane %v673_v52, %v14523_v9  ;;  %v52_v46 = vld [vmem:[#allocation2 + $0x60] sm:$0xff] }
  0xa8   :  { %3413 = vadd.xlane.f32.xlu1 %v3412_v2  ;;  %v3448_v2 = vsel %vm3240_vm0, %v3053_v56, 0.0  ;;  %v621_v20 = vrot.slane %v593_v7, %v14519_v5  ;;  %v2011_v24 = vrot.slane %v607_v13, %v14523_v9  ;;  %v623_v25 = vcombine.high %v607_v13, %v607_v13 }
  0xa9   :  { %v3066_v7 = vmul.f32 %v2035_v58, %v82_v47  ;;  %v3067_v15 = vmul.f32 %v2039_v1, %v82_v47 }
  0xaa   :  { %3416 = vadd.xlane.f32.xlu0 %v3415_v11  ;;  %v3056_v11 = vmul.f32 %v1995_v61, %v81_v63  ;;  %v2015_v29 = vrot.slane %v621_v20, %v14523_v9  ;;  %v625_v30 = vcombine.high %v621_v20, %v621_v20  ;;  %v3060_v34 = vmul.f32 %v2011_v24, %v81_v63 }
  0xab   :  { %v2019_v35 = vrot.slane %v623_v25, %v14523_v9  ;;  %v698_v25 = vrot.slane %v682_v60, %v14519_v5  ;;  %v3490_v28 = vsel %vm3240_vm0, %v3067_v15, 0.0 }
  0xac   :  { %3419 = vadd.xlane.f32.xlu1 %v3418_v18  ;;  %v3454_v18 = vsel %vm3240_vm0, %v3055_v4, 0.0  ;;  %v3061_v40 = vmul.f32 %v2015_v29, %v81_v63  ;;  %v3469_v44 = vsel %vm3240_vm0, %v3060_v34, 0.0 }
  0xad   :  { %v2059_v36 = vrot.slane %v698_v25, %v14523_v9  ;;  %v720_v37 = vcombine.high %v698_v25, %v698_v25 }
  0xae   :  { %3422 = vadd.xlane.f32.xlu0 %v3421_v22  ;;  %v3457_v22 = vsel %vm3240_vm0, %v3056_v11, 0.0  ;;  %v690_v11 = vcombine.high %v682_v60, %v682_v60 }
  0xaf   :  { %v2067_v52 = vrot.slane %v720_v37, %v14523_v9 }
  0xb0   :  { %3425 = vadd.xlane.f32.xlu1 %v3424_v27 }
  0xb2   :  { %3428 = vadd.xlane.f32.xlu0 %v3427_v32 }
  0xb4   :  { %3431 = vadd.xlane.f32.xlu1 %v3430_v38 }
  0xb6   :  { %3434 = vadd.xlane.f32.xlu0 %v3433_v41  ;;  %v2023_v41 = vrot.slane %v625_v30, %v14523_v9 }
  0xb8   :  { %3437 = vadd.xlane.f32.xlu1 %v3436_v45  ;;  %v3062_v45 = vmul.f32 %v2019_v35, %v81_v63  ;;  %v3063_v51 = vmul.f32 %v2023_v41, %v81_v63  ;;  %v3065_v63 = vmul.f32 %v2031_v48, %v82_v47 }
  0xba   :  { %3440 = vadd.xlane.f32.xlu0 %v3439_v50  ;;  %v3472_v50 = vsel %vm3240_vm0, %v3061_v40, 0.0  ;;  %v3475_v56 = vsel %vm3240_vm0, %v3062_v45, 0.0  ;;  %v3478_v62 = vsel %vm3240_vm0, %v3063_v51, 0.0  ;;  %v3484_v14 = vsel %vm3240_vm0, %v3065_v63, 0.0 }
  0xbc   :  { %3443 = vadd.xlane.f32.xlu1 %v3442_v55 }
  0xbe   :  { %3446 = vadd.xlane.f32.xlu0 %v3445_v59  ;;  %v656_v59 = vrot.slane %v640_v42, %v14519_v5 }
  0xc0   :  { %3449 = vadd.xlane.f32.xlu1 %v3448_v2  ;;  %v670_v2 = vrot.slane %v642_v53, %v14519_v5  ;;  %v2043_v8 = vrot.slane %v656_v59, %v14523_v9  ;;  %v705_v53 = vrot.slane %v689_v31, %v14519_v5 }
  0xc2   :  { %3452 = vadd.xlane.f32.xlu0 %v3451_v10  ;;  %v672_v10 = vcombine.high %v656_v59, %v656_v59  ;;  %v674_v19 = vcombine.high %v670_v2, %v670_v2  ;;  %v3068_v23 = vmul.f32 %v2043_v8, %v82_v47  ;;  %v719_v59 = vrot.slane %v691_v17, %v14519_v5 }
  0xc3   :  { %v14753_v21 = vpop.xlane.xlu0 %3242  ;;  %v2075_v1 = vrot.slane %v705_v53, %v14523_v9 }
  0xc4   :  { %3455 = vadd.xlane.f32.xlu1 %v3454_v18  ;;  %v2047_v18 = vrot.slane %v670_v2, %v14523_v9  ;;  %v2051_v24 = vrot.slane %v672_v10, %v14523_v9  ;;  %v2055_v30 = vrot.slane %v674_v19, %v14523_v9  ;;  %v3493_v34 = vsel %vm3240_vm0, %v3068_v23, 0.0 }
  0xc5   :  { %v14758_v27 = vpop.xlane.xlu1 %3248  ;;  %v721_v2 = vcombine.high %v705_v53, %v705_v53  ;;  %v723_v12 = vcombine.high %v719_v59, %v719_v59 }
  0xc6   :  { %3458 = vadd.xlane.f32.xlu0 %v3457_v22  ;;  %v3487_v22 = vsel %vm3240_vm0, %v3066_v7, 0.0  ;;  %v3069_v29 = vmul.f32 %v2047_v18, %v82_v47  ;;  %v3070_v35 = vmul.f32 %v2051_v24, %v82_v47 }
  0xc7   :  { %v14761_v32 = vpop.xlane.xlu0 %3266 }
  0xc8   :  { %3461 = vadd.xlane.f32.xlu1 %v3460_v16  ;;  %v712_v16 = vrot.slane %v690_v11, %v14519_v5  ;;  %v3496_v42 = vsel %vm3240_vm0, %v3069_v29, 0.0  ;;  %v2079_v11 = vrot.slane %v719_v59, %v14523_v9  ;;  %v2087_v29 = vrot.slane %v723_v12, %v14523_v9 }
  0xc9   :  { %v14767_v38 = vpop.xlane.xlu1 %3269 }
  0xca   :  { %3464 = vadd.xlane.f32.xlu0 %v3463_v33  ;;  %v2063_v40 = vrot.slane %v712_v16, %v14523_v9  ;;  %v722_v45 = vcombine.high %v712_v16, %v712_v16 }
  0xcb   :  { %v14772_v43 = vpop.xlane.xlu0 %3245 }
  0xcc   :  { %3467 = vadd.xlane.f32.xlu1 %v3466_v39  ;;  %v83_v39 = vld [vmem:[#allocation5 + $0x58] sm:$0xff]  ;;  %v2071_v58 = vrot.slane %v722_v45, %v14523_v9 }
  0xcd   :  { %v14777_v49 = vpop.xlane.xlu1 %3251  ;;  %v3072_v51 = vmul.f32 %v2059_v36, %v83_v39  ;;  %v3073_v54 = vmul.f32 %v2063_v40, %v83_v39  ;;  %v3074_v63 = vmul.f32 %v2067_v52, %v83_v39  ;;  %v3076_v19 = vmul.f32 %v2075_v1, %v83_v39  ;;  %v84_v40 = vld [vmem:[#allocation5 + $0x60] sm:$0xff] }
  0xce   :  { %3470 = vadd.xlane.f32.xlu0 %v3469_v44  ;;  %v3071_v44 = vmul.f32 %v2055_v30, %v82_v47  ;;  %v3075_v10 = vmul.f32 %v2071_v58, %v83_v39  ;;  %v3079_v17 = vmul.f32 %v2087_v29, %v83_v39 }
  0xcf   :  { %v14780_v55 = vpop.xlane.xlu0 %3254  ;;  %v3511_v18 = vsel %vm3240_vm0, %v3074_v63, 0.0 }
  0xd0   :  { %3473 = vadd.xlane.f32.xlu1 %v3472_v50  ;;  %v3499_v50 = vsel %vm3240_vm0, %v3070_v35, 0.0  ;;  %v3502_v47 = vsel %vm3240_vm0, %v3071_v44, 0.0  ;;  %v3514_v16 = vsel %vm3240_vm0, %v3075_v10, 0.0 }
  0xd1   :  { %v14786_v61 = vpop.xlane.xlu1 %3257 }
  0xd2   :  { %3476 = vadd.xlane.f32.xlu0 %v3475_v56  ;;  %v731_v56 = vrot.slane %v52_v46, %v14519_v5 }
  0xd3   :  { %v14791_v4 = vpop.xlane.xlu0 %3272 }
  0xd4   :  { %3479 = vadd.xlane.f32.xlu1 %v3478_v62  ;;  %v3505_v62 = vsel %vm3240_vm0, %v3072_v51, 0.0  ;;  %v739_v7 = vcombine.high %v731_v56, %v731_v56  ;;  %v747_v23 = vrot.slane %v731_v56, %v14519_v5  ;;  %v53_v51 = vld [vmem:[#allocation2 + $0x68] sm:$0xff] }
  0xd5   :  { %v14795_v13 = vpop.xlane.xlu1 %3275  ;;  %v780_v59 = vrot.slane %v53_v51, %v14519_v5 }
  0xd6   :  { %3482 = vadd.xlane.f32.xlu0 %v3481_v6  ;;  %v3508_v6 = vsel %vm3240_vm0, %v3073_v54, 0.0  ;;  %v761_v24 = vrot.slane %v739_v7, %v14519_v5  ;;  %v2091_v36 = vrot.slane %v747_v23, %v14523_v9  ;;  %v769_v37 = vcombine.high %v747_v23, %v747_v23 }
  0xd7   :  { %v14799_v20 = vpop.xlane.xlu0 %3260 }
  0xd8   :  { %3485 = vadd.xlane.f32.xlu1 %v3484_v14  ;;  %v724_v14 = vcombine.high %v52_v46, %v52_v46  ;;  %v771_v46 = vcombine.high %v761_v24, %v761_v24  ;;  %v3080_v54 = vmul.f32 %v2091_v36, %v84_v40  ;;  %v2099_v56 = vrot.slane %v769_v37, %v14523_v9 }
  0xd9   :  { %v14805_v26 = vpop.xlane.xlu1 %3263 }
  0xda   :  { %3488 = vadd.xlane.f32.xlu0 %v3487_v22  ;;  %v2083_v22 = vrot.slane %v721_v2, %v14523_v9  ;;  %v738_v30 = vrot.slane %v724_v14, %v14519_v5  ;;  %v2103_v63 = vrot.slane %v771_v46, %v14523_v9  ;;  %v3082_v7 = vmul.f32 %v2099_v56, %v84_v40  ;;  %v85_v56 = vld [vmem:[#allocation5 + $0x68] sm:$0xff] }
  0xdb   :  { %v14810_v33 = vpop.xlane.xlu0 %3278  ;;  %v788_v14 = vcombine.high %v780_v59, %v780_v59 }
  0xdc   :  { %3491 = vadd.xlane.f32.xlu1 %v3490_v28  ;;  %v3077_v28 = vmul.f32 %v2079_v11, %v83_v39  ;;  %v3078_v35 = vmul.f32 %v2083_v22, %v83_v39  ;;  %v3526_v39 = vsel %vm3240_vm0, %v3079_v17, 0.0 }
  0xdd   :  { %v14815_v41 = vpop.xlane.xlu1 %3281 }
  0xde   :  { %3494 = vadd.xlane.f32.xlu0 %v3493_v34  ;;  %v3517_v34 = vsel %vm3240_vm0, %v3076_v19, 0.0  ;;  %v3520_v45 = vsel %vm3240_vm0, %v3077_v28, 0.0  ;;  %v3523_v53 = vsel %vm3240_vm0, %v3078_v35, 0.0  ;;  %v3083_v19 = vmul.f32 %v2103_v63, %v84_v40 }
  0xdf   :  { %v14818_v48 = vpop.xlane.xlu0 %3284  ;;  %v3535_v28 = vsel %vm3240_vm0, %v3082_v7, 0.0  ;;  %v810_v35 = vrot.slane %v788_v14, %v14519_v5 }
  0xe0   :  { %3497 = vadd.xlane.f32.xlu1 %v3496_v42  ;;  %v2095_v42 = vrot.slane %v761_v24, %v14523_v9  ;;  %v773_v24 = vcombine.high %v53_v51, %v53_v51  ;;  %v3538_v37 = vsel %vm3240_vm0, %v3083_v19, 0.0 }
  0xe1   :  { %v14824_v57 = vpop.xlane.xlu1 %3287  ;;  %v820_v63 = vcombine.high %v810_v35, %v810_v35 }
  0xe2   :  { %3500 = vadd.xlane.f32.xlu0 %v3499_v50  ;;  %v740_v50 = vcombine.high %v738_v30, %v738_v30  ;;  %v3081_v58 = vmul.f32 %v2095_v42, %v84_v40  ;;  %v787_v17 = vrot.slane %v773_v24, %v14519_v5 }
  0xe3   :  { %v14829_v60 = vpop.xlane.xlu0 %3290  ;;  %v2135_v24 = vrot.slane %v820_v63, %v14523_v9 }
  0xe4   :  { %3503 = vadd.xlane.f32.xlu1 %v3502_v47  ;;  %v754_v47 = vrot.slane %v738_v30, %v14519_v5  ;;  %v768_v1 = vrot.slane %v740_v50, %v14519_v5  ;;  %v3532_v12 = vsel %vm3240_vm0, %v3081_v58, 0.0  ;;  %v803_v14 = vrot.slane %v787_v17, %v14519_v5 }
  0xe5   :  { %v14834_v8 = vpop.xlane.xlu1 %3293 }
  0xe6   :  { %3506 = vadd.xlane.f32.xlu0 %v3505_v62  ;;  %v2107_v10 = vrot.slane %v754_v47, %v14523_v9  ;;  %v770_v11 = vcombine.high %v754_v47, %v754_v47  ;;  %v2111_v22 = vrot.slane %v768_v1, %v14523_v9  ;;  %v772_v23 = vcombine.high %v768_v1, %v768_v1 }
  0xe7   :  { %v14837_v15 = vpop.xlane.xlu0 %3296  ;;  %v2127_v47 = vrot.slane %v810_v35, %v14523_v9  ;;  %v789_v1 = vcombine.high %v787_v17, %v787_v17  ;;  %v2139_v35 = vrot.slane %v803_v14, %v14523_v9 }
  0xe8   :  { %3509 = vadd.xlane.f32.xlu1 %v3508_v6  ;;  %v3529_v6 = vsel %vm3240_vm0, %v3080_v54, 0.0  ;;  %v3084_v29 = vmul.f32 %v2107_v10, %v84_v40  ;;  %v2115_v30 = vrot.slane %v770_v11, %v14523_v9  ;;  %v3085_v42 = vmul.f32 %v2111_v22, %v84_v40 }
  0xe9   :  { %v14843_v25 = vpop.xlane.xlu1 %3299  ;;  %v3089_v19 = vmul.f32 %v2127_v47, %v85_v56 }
  0xea   :  { %3512 = vadd.xlane.f32.xlu0 %v3511_v18  ;;  %v3541_v50 = vsel %vm3240_vm0, %v3084_v29, 0.0  ;;  %v3086_v51 = vmul.f32 %v2115_v30, %v84_v40 }
  0xeb   :  { %v14848_v31 = vpop.xlane.xlu0 %3302 }
  0xec   :  { %3515 = vadd.xlane.f32.xlu1 %v3514_v16  ;;  %v3547_v10 = vsel %vm3240_vm0, %v3086_v51, 0.0 }
  0xed   :  { %v14853_v44 = vpop.xlane.xlu1 %3305 }
  0xee   :  { %3518 = vadd.xlane.f32.xlu0 %v3517_v34  ;;  %v796_v34 = vrot.slane %v780_v59, %v14519_v5  ;;  %v3544_v59 = vsel %vm3240_vm0, %v3085_v42, 0.0  ;;  %v3556_v42 = vsel %vm3240_vm0, %v3089_v19, 0.0 }
  0xef   :  { %v14856_v52 = vpop.xlane.xlu0 %3308 }
  0xf0   :  { %3521 = vadd.xlane.f32.xlu1 %v3520_v45  ;;  %v2119_v45 = vrot.slane %v772_v23, %v14523_v9  ;;  %v818_v54 = vcombine.high %v796_v34, %v796_v34 }
  0xf1   :  { %v14862_v62 = vpop.xlane.xlu1 %3311 }
  0xf2   :  { %3524 = vadd.xlane.f32.xlu0 %v3523_v53  ;;  %v2123_v53 = vrot.slane %v796_v34, %v14523_v9 }
  0xf3   :  { %v14867_v2 = vpop.xlane.xlu0 %3314 }
  0xf4   :  { %3527 = vadd.xlane.f32.xlu1 %v3526_v39  ;;  %v3087_v39 = vmul.f32 %v2119_v45, %v84_v40  ;;  %v3088_v11 = vmul.f32 %v2123_v53, %v85_v56 }
  0xf5   :  { %v14872_v18 = vpop.xlane.xlu1 %3317 }
  0xf6   :  { %3530 = vadd.xlane.f32.xlu0 %v3529_v6  ;;  %v54_v6 = vld [vmem:[#allocation2 + $0x70] sm:$0xff]  ;;  %v3550_v40 = vsel %vm3240_vm0, %v3087_v39, 0.0  ;;  %v3553_v30 = vsel %vm3240_vm0, %v3088_v11, 0.0  ;;  %v3092_v39 = vmul.f32 %v2139_v35, %v85_v56 }
  0xf7   :  { %v14875_v16 = vpop.xlane.xlu0 %3320  ;;  %v829_v22 = vrot.slane %v54_v6, %v14519_v5 }
  0xf8   :  { %3533 = vadd.xlane.f32.xlu1 %v3532_v12  ;;  %v2131_v12 = vrot.slane %v818_v54, %v14523_v9  ;;  %v822_v54 = vcombine.high %v54_v6, %v54_v6 }
  0xf9   :  { %v14881_v36 = vpop.xlane.xlu1 %3323  ;;  %v837_v45 = vcombine.high %v829_v22, %v829_v22 }
  0xfa   :  { %3536 = vadd.xlane.f32.xlu0 %v3535_v28  ;;  %v817_v28 = vrot.slane %v789_v1, %v14519_v5  ;;  %v3090_v34 = vmul.f32 %v2131_v12, %v85_v56  ;;  %v845_v1 = vrot.slane %v829_v22, %v14519_v5  ;;  %v836_v19 = vrot.slane %v822_v54, %v14519_v5 }
  0xfb   :  { %v14886_v46 = vpop.xlane.xlu0 %3326 }
  0xfc   :  { %3539 = vadd.xlane.f32.xlu1 %v3538_v37  ;;  %v819_v37 = vcombine.high %v803_v14, %v803_v14  ;;  %v2143_v51 = vrot.slane %v817_v28, %v14523_v9  ;;  %v821_v53 = vcombine.high %v817_v28, %v817_v28  ;;  %v2155_v22 = vrot.slane %v845_v1, %v14523_v9 }
  0xfd   :  { %v14891_v58 = vpop.xlane.xlu1 %3329 }
  0xfe   :  { %3542 = vadd.xlane.f32.xlu0 %v3541_v50  ;;  %v3091_v50 = vmul.f32 %v2135_v24, %v85_v56  ;;  %v2147_v63 = vrot.slane %v819_v37, %v14523_v9  ;;  %v3093_v14 = vmul.f32 %v2143_v51, %v85_v56  ;;  %v2151_v6 = vrot.slane %v821_v53, %v14523_v9  ;;  %v55_v53 = vld [vmem:[#allocation2 + $0x78] sm:$0xff] }
  0xff   :  { %v14894_v7 = vpop.xlane.xlu0 %3332  ;;  %v3565_v24 = vsel %vm3240_vm0, %v3092_v39, 0.0  ;;  %v838_v51 = vcombine.high %v836_v19, %v836_v19  ;;  %v878_v0 = vrot.slane %v55_v53, %v14519_v5 }
 0x100   :  { %3545 = vadd.xlane.f32.xlu1 %v3544_v59  ;;  %v3559_v59 = vsel %vm3240_vm0, %v3090_v34, 0.0  ;;  %v3562_v12 = vsel %vm3240_vm0, %v3091_v50, 0.0  ;;  %v3094_v28 = vmul.f32 %v2147_v63, %v85_v56  ;;  %v86_v34 = vld [vmem:[#allocation5 + $0x70] sm:$0xff] }
 0x101   :  { %v14900_v23 = vpop.xlane.xlu1 %3335  ;;  %v3096_v39 = vmul.f32 %v2155_v22, %v86_v34 }
 0x102   :  { %3548 = vadd.xlane.f32.xlu0 %v3547_v10  ;;  %v859_v10 = vrot.slane %v837_v45, %v14519_v5  ;;  %v3095_v45 = vmul.f32 %v2151_v6, %v85_v56 }
 0x103   :  { %v14905_v29 = vpop.xlane.xlu0 %3338 }
 0x104   :  { %3551 = vadd.xlane.f32.xlu1 %v3550_v40  ;;  %v2159_v35 = vrot.slane %v859_v10, %v14523_v9  ;;  %v869_v50 = vcombine.high %v859_v10, %v859_v10  ;;  %v3574_v56 = vsel %vm3240_vm0, %v3095_v45, 0.0 }
 0x105   :  { %v14910_v17 = vpop.xlane.xlu1 %3341 }
 0x106   :  { %3554 = vadd.xlane.f32.xlu0 %v3553_v30  ;;  %v867_v30 = vcombine.high %v845_v1, %v845_v1  ;;  %v852_v1 = vrot.slane %v836_v19, %v14519_v5  ;;  %v2167_v10 = vrot.slane %v869_v50, %v14523_v9 }
 0x107   :  { %v14913_v47 = vpop.xlane.xlu0 %3344 }
 0x108   :  { %3557 = vadd.xlane.f32.xlu1 %v3556_v42  ;;  %v3568_v42 = vsel %vm3240_vm0, %v3093_v14, 0.0  ;;  %v2163_v63 = vrot.slane %v867_v30, %v14523_v9  ;;  %v866_v14 = vrot.slane %v838_v51, %v14519_v5  ;;  %v2171_v19 = vrot.slane %v852_v1, %v14523_v9 }
 0x109   :  { %v14919_v11 = vpop.xlane.xlu1 %3347  ;;  %v868_v22 = vcombine.high %v852_v1, %v852_v1  ;;  %v3099_v45 = vmul.f32 %v2167_v10, %v86_v34  ;;  %v871_v51 = vcombine.high %v55_v53, %v55_v53  ;;  %v894_v1 = vrot.slane %v878_v0, %v14519_v5 }
 0x10a   :  { %3560 = vadd.xlane.f32.xlu0 %v3559_v59  ;;  %v3571_v59 = vsel %vm3240_vm0, %v3094_v28, 0.0  ;;  %v3098_v28 = vmul.f32 %v2163_v63, %v86_v34  ;;  %v2175_v50 = vrot.slane %v866_v14, %v14523_v9  ;;  %v3100_v63 = vmul.f32 %v2171_v19, %v86_v34 }
 0x10b   :  { %v14924_v40 = vpop.xlane.xlu0 %3350  ;;  %v3586_v10 = vsel %vm3240_vm0, %v3099_v45, 0.0 }
 0x10c   :  { %3563 = vadd.xlane.f32.xlu1 %v3562_v12  ;;  %v3097_v12 = vmul.f32 %v2159_v35, %v86_v34  ;;  %v886_v35 = vcombine.high %v878_v0, %v878_v0  ;;  %v2187_v0 = vrot.slane %v894_v1, %v14523_v9 }
 0x10d   :  { %v14929_v37 = vpop.xlane.xlu1 %3353 }
 0x10e   :  { %21135 = vst [vmem:[#allocation14_spill] sm:$0xff] %v14929_v37  ;;  %3566 = vadd.xlane.f32.xlu0 %v3565_v24  ;;  %v3577_v24 = vsel %vm3240_vm0, %v3096_v39, 0.0  ;;  %v3580_v30 = vsel %vm3240_vm0, %v3097_v12, 0.0  ;;  %v3583_v39 = vsel %vm3240_vm0, %v3098_v28, 0.0  ;;  %v908_v12 = vrot.slane %v886_v35, %v14519_v5 }
 0x10f   :  { %v14932_v54 = vpop.xlane.xlu0 %3356  ;;  %v3589_v28 = vsel %vm3240_vm0, %v3100_v63, 0.0 }
 0x110   :  { %21136 = vst [vmem:[#allocation15_spill] sm:$0xff] %v14932_v54  ;;  %3569 = vadd.xlane.f32.xlu1 %v3568_v42  ;;  %v2179_v54 = vrot.slane %v868_v22, %v14523_v9  ;;  %v916_v22 = vcombine.high %v894_v1, %v894_v1  ;;  %v2191_v35 = vrot.slane %v908_v12, %v14523_v9 }
 0x111   :  { %v14938_v37 = vpop.xlane.xlu1 %3359 }
 0x112   :  { %21137 = vst [vmem:[#allocation16_spill] sm:$0xff] %v14938_v37  ;;  %3572 = vadd.xlane.f32.xlu0 %v3571_v59  ;;  %v870_v37 = vcombine.high %v866_v14, %v866_v14  ;;  %v885_v14 = vrot.slane %v871_v51, %v14519_v5  ;;  %v3102_v19 = vmul.f32 %v2179_v54, %v86_v34 }
 0x113   :  { %v14943_v6 = vpop.xlane.xlu0 %3362  ;;  %v2195_v1 = vrot.slane %v916_v22, %v14523_v9 }
 0x114   :  { %21138 = vst [vmem:[#allocation17_spill] sm:$0xff] %v14943_v6  ;;  %3575 = vadd.xlane.f32.xlu1 %v3574_v56  ;;  %v2183_v53 = vrot.slane %v870_v37, %v14523_v9  ;;  %v887_v51 = vcombine.high %v885_v14, %v885_v14  ;;  %v3595_v54 = vsel %vm3240_vm0, %v3102_v19, 0.0 }
 0x115   :  { %v14948_v42 = vpop.xlane.xlu1 %3365 }
 0x116   :  { %21139 = vst [vmem:[#allocation18_spill] sm:$0xff] %v14948_v42  ;;  %3578 = vadd.xlane.f32.xlu0 %v3577_v24  ;;  %v3101_v42 = vmul.f32 %v2175_v50, %v86_v34  ;;  %v3103_v37 = vmul.f32 %v2183_v53, %v86_v34  ;;  %v918_v50 = vcombine.high %v908_v12, %v908_v12 }
 0x117   :  { %v14951_v59 = vpop.xlane.xlu0 %3368  ;;  %v915_v12 = vrot.slane %v887_v51, %v14519_v5 }
 0x118   :  { %21140 = vst [vmem:[#allocation19_spill] sm:$0xff] %v14951_v59  ;;  %3581 = vadd.xlane.f32.xlu1 %v3580_v30  ;;  %v87_v30 = vld [vmem:[#allocation5 + $0x78] sm:$0xff]  ;;  %v3592_v45 = vsel %vm3240_vm0, %v3101_v42, 0.0  ;;  %v3598_v34 = vsel %vm3240_vm0, %v3103_v37, 0.0  ;;  %v2199_v42 = vrot.slane %v918_v50, %v14523_v9 }
 0x119   :  { %v14957_v56 = vpop.xlane.xlu1 %3371  ;;  %v3104_v63 = vmul.f32 %v2187_v0, %v87_v30  ;;  %v3105_v59 = vmul.f32 %v2191_v35, %v87_v30  ;;  %v3106_v19 = vmul.f32 %v2195_v1, %v87_v30  ;;  %v2207_v50 = vrot.slane %v915_v12, %v14523_v9 }
 0x11a   :  { %21141 = vst [vmem:[#allocation20_spill] sm:$0xff] %v14957_v56  ;;  %3584 = vadd.xlane.f32.xlu0 %v3583_v39  ;;  %v56_v39 = vld [vmem:[#allocation2 + $0x80] sm:$0xff]  ;;  %v3107_v37 = vmul.f32 %v2199_v42, %v87_v30 }
 0x11b   :  { %v14962_v24 = vpop.xlane.xlu0 %3374  ;;  %v3604_v22 = vsel %vm3240_vm0, %v3105_v59, 0.0  ;;  %v920_v51 = vcombine.high %v56_v39, %v56_v39 }
 0x11c   :  { %21142 = vst [vmem:[#allocation21_spill] sm:$0xff] %v14962_v24  ;;  %3587 = vadd.xlane.f32.xlu1 %v3586_v10  ;;  %v901_v10 = vrot.slane %v885_v14, %v14519_v5  ;;  %v3610_v42 = vsel %vm3240_vm0, %v3107_v37, 0.0 }
 0x11d   :  { %v14967_v56 = vpop.xlane.xlu1 %3377 }
 0x11e   :  { %21143 = vst [vmem:[#allocation22_spill] sm:$0xff] %v14967_v56  ;;  %3590 = vadd.xlane.f32.xlu0 %v3589_v28  ;;  %v927_v56 = vrot.slane %v56_v39, %v14519_v5  ;;  %v3601_v28 = vsel %vm3240_vm0, %v3104_v63, 0.0  ;;  %v2203_v14 = vrot.slane %v901_v10, %v14523_v9  ;;  %v917_v0 = vcombine.high %v901_v10, %v901_v10 }
 0x11f   :  { %v14970_v24 = vpop.xlane.xlu0 %3380  ;;  %v3607_v63 = vsel %vm3240_vm0, %v3106_v19, 0.0 }
 0x120   :  { %21144 = vst [vmem:[#allocation23_spill] sm:$0xff] %v14970_v24  ;;  %3593 = vadd.xlane.f32.xlu1 %v3592_v45  ;;  %v935_v35 = vcombine.high %v927_v56, %v927_v56  ;;  %v3108_v1 = vmul.f32 %v2203_v14, %v87_v30  ;;  %v2211_v24 = vrot.slane %v917_v0, %v14523_v9 }
 0x121   :  { %v14976_v6 = vpop.xlane.xlu1 %3383  ;;  %v943_v10 = vrot.slane %v927_v56, %v14519_v5 }
 0x122   :  { %21145 = vst [vmem:[#allocation24_spill] sm:$0xff] %v14976_v6  ;;  %3596 = vadd.xlane.f32.xlu0 %v3595_v54  ;;  %v919_v6 = vcombine.high %v915_v12, %v915_v12  ;;  %v957_v59 = vrot.slane %v935_v35, %v14519_v5  ;;  %v934_v12 = vrot.slane %v920_v51, %v14519_v5  ;;  %v3613_v19 = vsel %vm3240_vm0, %v3108_v1, 0.0 }
 0x123   :  { %v14981_v53 = vpop.xlane.xlu0 %3386  ;;  %v3110_v14 = vmul.f32 %v2211_v24, %v87_v30  ;;  %v2219_v56 = vrot.slane %v943_v10, %v14523_v9  ;;  %v965_v0 = vcombine.high %v943_v10, %v943_v10 }
 0x124   :  { %3599 = vadd.xlane.f32.xlu1 %v3598_v34  ;;  %v2215_v39 = vrot.slane %v919_v6, %v14523_v9  ;;  %v2223_v35 = vrot.slane %v957_v59, %v14523_v9  ;;  %v967_v51 = vcombine.high %v957_v59, %v957_v59 }
 0x125   :  { %v14986_v45 = vpop.xlane.xlu1 %3389  ;;  %v3619_v24 = vsel %vm3240_vm0, %v3110_v14, 0.0  ;;  %v2227_v10 = vrot.slane %v965_v0, %v14523_v9 }
 0x126   :  { %21146 = vst [vmem:[#allocation25_spill] sm:$0xff] %v14986_v45  ;;  %3602 = vadd.xlane.f32.xlu0 %v3601_v28  ;;  %v3109_v45 = vmul.f32 %v2207_v50, %v87_v30  ;;  %v3111_v50 = vmul.f32 %v2215_v39, %v87_v30  ;;  %v2231_v39 = vrot.slane %v967_v51, %v14523_v9 }
 0x127   :  { %v14989_v54 = vpop.xlane.xlu0 %3392 }
 0x128   :  { %3605 = vadd.xlane.f32.xlu1 %v3604_v22  ;;  %v15004_v22 = vld [vmem:[#allocation5 + $0x80] sm:$0xff]  ;;  %v3616_v6 = vsel %vm3240_vm0, %v3109_v45, 0.0  ;;  %v3622_v59 = vsel %vm3240_vm0, %v3111_v50, 0.0 }
 0x129   :  { %v14995_v34 = vpop.xlane.xlu1 %3395  ;;  %v3112_v1 = vmul.f32 %v2219_v56, %v15004_v22 }
 0x12a   :  { %21147 = vst [vmem:[#allocation26_spill] sm:$0xff] %v14995_v34  ;;  %3608 = vadd.xlane.f32.xlu0 %v3607_v63  ;;  %v936_v63 = vcombine.high %v934_v12, %v934_v12  ;;  %v57_v34 = vld [vmem:[#allocation2 + $0x88] sm:$0xff] }
 0x12b   :  { %v15000_v28 = vpop.xlane.xlu0 %3398  ;;  %v976_v45 = vrot.slane %v57_v34, %v14519_v5  ;;  %v3625_v56 = vsel %vm3240_vm0, %v3112_v1, 0.0  ;;  %v969_v1 = vcombine.high %v57_v34, %v57_v34  ;;  %v15050_v34 = vmul.f32 0.25, %v14753_v21 }
 0x12c   :  { %21148 = vst [vmem:[#allocation27_spill] sm:$0xff] %v15000_v28  ;;  %3611 = vadd.xlane.f32.xlu1 %v3610_v42  ;;  %v950_v42 = vrot.slane %v934_v12, %v14519_v5  ;;  %v3114_v12 = vmul.f32 %v2227_v10, %v15004_v22 }
 0x12d   :  { %v15007_v37 = vpop.xlane.xlu1 %3401  ;;  %v992_v10 = vrot.slane %v976_v45, %v14519_v5  ;;  %21159 = vst [vmem:[#allocation37_spill] sm:$0xff] %v15050_v34 }
 0x12e   :  { %21149 = vst [vmem:[#allocation28_spill] sm:$0xff] %v15007_v37  ;;  %3614 = vadd.xlane.f32.xlu0 %v3613_v19  ;;  %v3113_v37 = vmul.f32 %v2223_v35, %v15004_v22  ;;  %v964_v19 = vrot.slane %v936_v63, %v14519_v5  ;;  %v2235_v0 = vrot.slane %v950_v42, %v14523_v9 }
 0x12f   :  { %v15010_v28 = vpop.xlane.xlu0 %3404  ;;  %v966_v35 = vcombine.high %v950_v42, %v950_v42  ;;  %v3115_v63 = vmul.f32 %v2231_v39, %v15004_v22  ;;  %v15038_v42 = vmul.f32 0.25, %v14772_v43 }
 0x130   :  { %21150 = vst [vmem:[#allocation29_spill] sm:$0xff] %v15010_v28  ;;  %3617 = vadd.xlane.f32.xlu1 %v3616_v6  ;;  %v21153_v6 = vlaneseq  ;;  %v3628_v50 = vsel %vm3240_vm0, %v3113_v37, 0.0  ;;  %v3116_v37 = vmul.f32 %v2235_v0, %v15004_v22  ;;  %v983_v0 = vrot.slane %v969_v1, %v14519_v5 }
 0x131   :  { %v15018_v30 = vpop.xlane.xlu1 %3407  ;;  %21156 = vst [vmem:[#allocation34_spill] sm:$0xff] %v15038_v42 }
 0x132   :  { %21151 = vst [vmem:[#allocation30_spill] sm:$0xff] %v15018_v30  ;;  %3620 = vadd.xlane.f32.xlu0 %v3619_v24  ;;  %v15029_v28 = vand.u32 127, %v21153_v6  ;;  %v984_v30 = vcombine.high %v976_v45, %v976_v45  ;;  %v2239_v24 = vrot.slane %v964_v19, %v14523_v9 }
 0x133   :  { %v15023_v14 = vpop.xlane.xlu0 %3410 }
 0x134   :  { %21152 = vst [vmem:[#allocation31_spill] sm:$0xff] %v15023_v14  ;;  %21154 = vst [vmem:[#allocation32_spill] sm:$0xff] %v15029_v28  ;;  %3623 = vadd.xlane.f32.xlu1 %v3622_v59  ;;  %v968_v14 = vcombine.high %v964_v19, %v964_v19  ;;  %v3631_v59 = vsel %vm3240_vm0, %v3114_v12, 0.0  ;;  %v15047_v39 = vsub.s32 %v15029_v28, %v14516_v3  ;;  %v3634_v19 = vsel %vm3240_vm0, %v3115_v63, 0.0  ;;  %v15066_v3 = vld [vmem:[#allocation5 + $0x88] sm:$0xff] }
 0x135   :  { %v15032_v51 = vpop.xlane.xlu1 %3413  ;;  %v1006_v45 = vrot.slane %v984_v30, %v14519_v5  ;;  %v1014_v28 = vcombine.high %v992_v10, %v992_v10  ;;  %v3637_v30 = vsel %vm3240_vm0, %v3116_v37, 0.0 }
 0x136   :  { %21155 = vst [vmem:[#allocation33_spill] sm:$0xff] %v15032_v51  ;;  %3626 = vadd.xlane.f32.xlu0 %v3625_v56  ;;  %v2243_v51 = vrot.slane %v966_v35, %v14523_v9  ;;  %21158 = vst [vmem:[#allocation36_spill] sm:$0xff] %v15047_v39  ;;  %v3117_v56 = vmul.f32 %v2239_v24, %v15004_v22  ;;  %v2247_v12 = vrot.slane %v968_v14, %v14523_v9 }
 0x137   :  { %v15040_v6 = vpop.xlane.xlu0 %3416  ;;  %v2251_v35 = vrot.slane %v992_v10, %v14523_v9  ;;  %v4530_v21 = vrot.slane %v15038_v42, %v15047_v39  ;;  %v4526_v14 = vrot.slane %v15050_v34, %v15047_v39  ;;  %v15071_v24 = vmul.f32 0.25, %v14758_v27  ;;  %v15074_v10 = vld [vmem:[#allocation2 + $0x90] sm:$0xff] }
 0x138   :  { %21157 = vst [vmem:[#allocation35_spill] sm:$0xff] %v15040_v6  ;;  %3629 = vadd.xlane.f32.xlu1 %v3628_v50  ;;  %v3118_v63 = vmul.f32 %v2243_v51, %v15004_v22  ;;  %v2255_v1 = vrot.slane %v1006_v45, %v14523_v9  ;;  %v3640_v37 = vsel %vm3240_vm0, %v3117_v56, 0.0  ;;  %v3119_v51 = vmul.f32 %v2247_v12, %v15004_v22 }
 0x139   :  { %v15053_v43 = vpop.xlane.xlu1 %3419  ;;  %21162 = vst [vmem:[#allocation40_spill] sm:$0xff] %v15071_v24  ;;  %v1016_v42 = vcombine.high %v1006_v45, %v1006_v45  ;;  %v15081_v34 = vmul.f32 0.25, %v14777_v49  ;;  %v3120_v27 = vmul.f32 %v2251_v35, %v15066_v3  ;;  %v999_v56 = vrot.slane %v983_v0, %v14519_v5 }
 0x13a   :  { %21160 = vst [vmem:[#allocation38_spill] sm:$0xff] %v15053_v43  ;;  %3632 = vadd.xlane.f32.xlu0 %v3631_v59  ;;  %v5548_v43 = vsel %vm5547_vm1, %v4530_v21, %v4526_v14  ;;  %v1025_v22 = vrot.slane %v15074_v10, %v14519_v5  ;;  %v4534_v49 = vrot.slane %v15071_v24, %v15047_v39  ;;  %v15095_v45 = vmul.f32 0.25, %v14761_v32 }
 0x13b   :  { %v15062_v50 = vpop.xlane.xlu0 %3422  ;;  %21164 = vst [vmem:[#allocation42_spill] sm:$0xff] %v15081_v34  ;;  %v15098_v12 = vmul.f32 0.25, %v14767_v38  ;;  %v2263_v21 = vrot.slane %v1016_v42, %v14523_v9  ;;  %v4538_v32 = vrot.slane %v15081_v34, %v15047_v39  ;;  %v15110_v38 = vmul.f32 0.25, %v14780_v55 }
 0x13c   :  { %21161 = vst [vmem:[#allocation39_spill] sm:$0xff] %v15062_v50  ;;  %3635 = vadd.xlane.f32.xlu1 %v3634_v19  ;;  %v985_v50 = vcombine.high %v983_v0, %v983_v0  ;;  %v2259_v19 = vrot.slane %v1014_v28, %v14523_v9  ;;  %21165 = vst [vmem:[#allocation43_spill] sm:$0xff] %v15095_v45  ;;  %v3121_v28 = vmul.f32 %v2255_v1, %v15066_v3 }
 0x13d   :  { %v15076_v59 = vpop.xlane.xlu1 %3425  ;;  %21166 = vst [vmem:[#allocation44_spill] sm:$0xff] %v15098_v12  ;;  %v3646_v0 = vsel %vm3240_vm0, %v3119_v51, 0.0  ;;  %21168 = vst [vmem:[#allocation46_spill] sm:$0xff] %v15110_v38  ;;  %v3649_v14 = vsel %vm3240_vm0, %v3120_v27, 0.0  ;;  %v2267_v51 = vrot.slane %v999_v56, %v14523_v9  ;;  %v1015_v42 = vcombine.high %v999_v56, %v999_v56 }
 0x13e   :  { %21163 = vst [vmem:[#allocation41_spill] sm:$0xff] %v15076_v59  ;;  %3638 = vadd.xlane.f32.xlu0 %v3637_v30  ;;  %v3643_v59 = vsel %vm3240_vm0, %v3118_v63, 0.0  ;;  %v1013_v30 = vrot.slane %v985_v50, %v14519_v5  ;;  %v5550_v63 = vsel %vm5549_vm2, %v4534_v49, %v5548_v43  ;;  %v1033_v24 = vcombine.high %v1025_v22, %v1025_v22 }
 0x13f   :  { %v15086_v6 = vpop.xlane.xlu0 %3428  ;;  %v4558_v43 = vrot.slane %v15095_v45, %v15047_v39  ;;  %v4562_v50 = vrot.slane %v15098_v12, %v15047_v39  ;;  %v15122_v55 = vmul.f32 0.25, %v14791_v4  ;;  %v1018_v34 = vcombine.high %v15074_v10, %v15074_v10 }
 0x140   :  { %3641 = vadd.xlane.f32.xlu1 %v3640_v37  ;;  %v3122_v37 = vmul.f32 %v2259_v19, %v15066_v3  ;;  %v3123_v19 = vmul.f32 %v2263_v21, %v15066_v3  ;;  %v2271_v49 = vrot.slane %v1013_v30, %v14523_v9  ;;  %v1017_v56 = vcombine.high %v1013_v30, %v1013_v30 }
 0x141   :  { %v15101_v35 = vpop.xlane.xlu1 %3431  ;;  %21169 = vst [vmem:[#allocation47_spill] sm:$0xff] %v15122_v55  ;;  %v5552_v45 = vsel %vm5551_vm3, %v4538_v32, %v5550_v63  ;;  %v4542_v12 = vrot.slane %v15110_v38, %v15047_v39  ;;  %v15135_v4 = vmul.f32 0.25, %v14786_v61  ;;  %v3124_v30 = vmul.f32 %v2267_v51, %v15066_v3 }
 0x142   :  { %21167 = vst [vmem:[#allocation45_spill] sm:$0xff] %v15101_v35  ;;  %3644 = vadd.xlane.f32.xlu0 %v3643_v59  ;;  %v3652_v59 = vsel %vm3240_vm0, %v3121_v28, 0.0  ;;  %v1041_v28 = vrot.slane %v1025_v22, %v14519_v5  ;;  %v3655_v21 = vsel %vm3240_vm0, %v3122_v37, 0.0  ;;  %v2275_v35 = vrot.slane %v1015_v42, %v14523_v9 }
 0x143   :  { %v15113_v1 = vpop.xlane.xlu0 %3434  ;;  %21170 = vst [vmem:[#allocation48_spill] sm:$0xff] %v15135_v4  ;;  %v1055_v10 = vrot.slane %v1033_v24, %v14519_v5  ;;  %v4566_v63 = vrot.slane %v15122_v55, %v15047_v39  ;;  %v15147_v32 = vmul.f32 0.25, %v14795_v13  ;;  %v3658_v22 = vsel %vm3240_vm0, %v3123_v19, 0.0  ;;  %v15160_v55 = vld [vmem:[#allocation2 + $0x98] sm:$0xff] }
 0x144   :  { %3647 = vadd.xlane.f32.xlu1 %v3646_v0  ;;  %v2279_v37 = vrot.slane %v1017_v56, %v14523_v9  ;;  %v1032_v51 = vrot.slane %v1018_v34, %v14519_v5  ;;  %v5561_v24 = vsel %vm5547_vm1, %v4562_v50, %v4558_v43  ;;  %v5554_v42 = vsel %vm5553_vm4, %v4542_v12, %v5552_v45  ;;  %v15166_v56 = vld [vmem:[#allocation5 + $0x90] sm:$0xff] }
 0x145   :  { %v15125_v27 = vpop.xlane.xlu1 %3437  ;;  %21171 = vst [vmem:[#allocation49_spill] sm:$0xff] %v15147_v32  ;;  %v4546_v13 = vrot.slane %v15135_v4, %v15047_v39  ;;  %v3661_v19 = vsel %vm3240_vm0, %v3124_v30, 0.0  ;;  %v2287_v34 = vrot.slane %v1055_v10, %v14523_v9  ;;  %v1063_v43 = vcombine.high %v1041_v28, %v1041_v28 }
 0x146   :  { %3650 = vadd.xlane.f32.xlu0 %v3649_v14  ;;  %v3125_v14 = vmul.f32 %v2271_v49, %v15066_v3  ;;  %v3126_v49 = vmul.f32 %v2275_v35, %v15066_v3  ;;  %v5562_v45 = vsel %vm5549_vm2, %v4566_v63, %v5561_v24  ;;  %v4570_v12 = vrot.slane %v15147_v32, %v15047_v39 }
 0x147   :  { %v15138_v0 = vpop.xlane.xlu0 %3440  ;;  %v15173_v50 = vmul.f32 0.25, %v14799_v20  ;;  %v3127_v35 = vmul.f32 %v2279_v37, %v15066_v3  ;;  %v15182_v63 = vmul.f32 0.25, %v14805_v26  ;;  %v15185_v24 = vmul.f32 0.25, %v14810_v33 }
 0x148   :  { %3653 = vadd.xlane.f32.xlu1 %v3652_v59  ;;  %v2283_v59 = vrot.slane %v1041_v28, %v14523_v9  ;;  %v3664_v30 = vsel %vm3240_vm0, %v3125_v14, 0.0  ;;  %v1074_v28 = vrot.slane %v15160_v55, %v14519_v5  ;;  %v3667_v3 = vsel %vm3240_vm0, %v3126_v49, 0.0 }
 0x149   :  { %v15149_v61 = vpop.xlane.xlu1 %3443  ;;  %21173 = vst [vmem:[#allocation51_spill] sm:$0xff] %v15173_v50  ;;  %21174 = vst [vmem:[#allocation52_spill] sm:$0xff] %v15182_v63  ;;  %v3129_v14 = vmul.f32 %v2287_v34, %v15166_v56  ;;  %v2291_v37 = vrot.slane %v1063_v43, %v14523_v9  ;;  %v1048_v26 = vrot.slane %v1032_v51, %v14519_v5  ;;  %v15199_v33 = vmul.f32 0.25, %v14829_v60 }
 0x14a   :  { %3656 = vadd.xlane.f32.xlu0 %v3655_v21  ;;  %v1065_v21 = vcombine.high %v1055_v10, %v1055_v10  ;;  %21175 = vst [vmem:[#allocation53_spill] sm:$0xff] %v15185_v24  ;;  %v3128_v20 = vmul.f32 %v2283_v59, %v15166_v56  ;;  %v15189_v10 = vsel %vm5555_vm5, %v4546_v13, %v5554_v42  ;;  %v15202_v59 = vmul.f32 0.25, %v14834_v8 }
 0x14b   :  { %v15162_v38 = vpop.xlane.xlu0 %3446  ;;  %v5563_v32 = vsel %vm5551_vm3, %v4570_v12, %v5562_v45  ;;  %21177 = vst [vmem:[#allocation55_spill] sm:$0xff] %v15199_v33  ;;  %v3670_v49 = vsel %vm3240_vm0, %v3127_v35, 0.0  ;;  %v1082_v34 = vcombine.high %v1074_v28, %v1074_v28  ;;  %v4574_v8 = vrot.slane %v15185_v24, %v15047_v39 }
 0x14c   :  { %21172 = vst [vmem:[#allocation50_spill] sm:$0xff] %v15162_v38  ;;  %3659 = vadd.xlane.f32.xlu1 %v3658_v22  ;;  %v1034_v38 = vcombine.high %v1032_v51, %v1032_v51  ;;  %21178 = vst [vmem:[#allocation56_spill] sm:$0xff] %v15202_v59  ;;  %v2295_v42 = vrot.slane %v1065_v21, %v14523_v9  ;;  %v3673_v43 = vsel %vm3240_vm0, %v3128_v20, 0.0  ;;  %v3676_v21 = vsel %vm3240_vm0, %v3129_v14, 0.0 }
 0x14d   :  { %v15175_v4 = vpop.xlane.xlu1 %3449  ;;  %v1090_v45 = vrot.slane %v1074_v28, %v14519_v5  ;;  %v1064_v35 = vcombine.high %v1048_v26, %v1048_v26  ;;  %v4590_v60 = vrot.slane %v15199_v33, %v15047_v39  ;;  %v4594_v13 = vrot.slane %v15202_v59, %v15047_v39 }
 0x14e   :  { %3662 = vadd.xlane.f32.xlu0 %v3661_v19  ;;  %v1062_v51 = vrot.slane %v1034_v38, %v14519_v5  ;;  %v2299_v38 = vrot.slane %v1048_v26, %v14523_v9  ;;  %v3131_v28 = vmul.f32 %v2295_v42, %v15166_v56  ;;  %v1104_v24 = vrot.slane %v1082_v34, %v14519_v5 }
 0x14f   :  { %v15191_v22 = vpop.xlane.xlu0 %3452  ;;  %v1067_v26 = vcombine.high %v15160_v55, %v15160_v55  ;;  %v15237_v33 = vsel %vm5553_vm4, %v4574_v8, %v5563_v32  ;;  %v15240_v59 = vmul.f32 0.25, %v14815_v41  ;;  %v2315_v42 = vrot.slane %v1090_v45, %v14523_v9  ;;  %v15254_v8 = vld [vmem:[#allocation5 + $0x98] sm:$0xff] }
 0x150   :  { %21176 = vst [vmem:[#allocation54_spill] sm:$0xff] %v15191_v22  ;;  %3665 = vadd.xlane.f32.xlu1 %v3664_v30  ;;  %v3130_v30 = vmul.f32 %v2291_v37, %v15166_v56  ;;  %v2303_v14 = vrot.slane %v1062_v51, %v14523_v9  ;;  %v1066_v37 = vcombine.high %v1062_v51, %v1062_v51  ;;  %v15257_v41 = vmul.f32 0.25, %v14824_v57 }
 0x151   :  { %v15207_v19 = vpop.xlane.xlu1 %3455  ;;  %21181 = vst [vmem:[#allocation59_spill] sm:$0xff] %v15240_v59  ;;  %v3132_v55 = vmul.f32 %v2299_v38, %v15166_v56  ;;  %v2307_v32 = vrot.slane %v1064_v35, %v14523_v9  ;;  %v1081_v57 = vrot.slane %v1067_v26, %v14519_v5  ;;  %v15296_v22 = vmul.f32 0.25, %v14867_v2 }
 0x152   :  { %21179 = vst [vmem:[#allocation57_spill] sm:$0xff] %v15207_v19  ;;  %3668 = vadd.xlane.f32.xlu0 %v3667_v3  ;;  %v15227_v3 = vmul.f32 0.25, %v14837_v15  ;;  %v15243_v15 = vmul.f32 0.25, %v14818_v48  ;;  %v3679_v34 = vsel %vm3240_vm0, %v3130_v30, 0.0  ;;  %21185 = vst [vmem:[#allocation63_spill] sm:$0xff] %v15257_v41  ;;  %v5568_v48 = vsel %vm5547_vm1, %v4594_v13, %v4590_v60  ;;  %v15263_v19 = vld [vmem:[#allocation2 + $0xa0] sm:$0xff] }
 0x153   :  { %v15217_v12 = vpop.xlane.xlu0 %3458  ;;  %v3133_v38 = vmul.f32 %v2303_v14, %v15166_v56  ;;  %v2311_v35 = vrot.slane %v1066_v37, %v14523_v9  ;;  %v3685_v37 = vsel %vm3240_vm0, %v3132_v55, 0.0  ;;  %v1123_v26 = vrot.slane %v15263_v19, %v14519_v5  ;;  %21189 = vst [vmem:[#allocation67_spill] sm:$0xff] %v15296_v22 }
 0x154   :  { %21180 = vst [vmem:[#allocation58_spill] sm:$0xff] %v15227_v3  ;;  %3671 = vadd.xlane.f32.xlu1 %v3670_v49  ;;  %21182 = vst [vmem:[#allocation60_spill] sm:$0xff] %v15243_v15  ;;  %v15247_v49 = vmul.f32 0.25, %v14843_v25  ;;  %v3682_v25 = vsel %vm3240_vm0, %v3131_v28, 0.0  ;;  %v1112_v28 = vcombine.high %v1090_v45, %v1090_v45  ;;  %v1114_v45 = vcombine.high %v1104_v24, %v1104_v24 }
 0x155   :  { %v15230_v20 = vpop.xlane.xlu1 %3461  ;;  %v3135_v55 = vmul.f32 %v2311_v35, %v15166_v56  ;;  %v15311_v35 = vmul.f32 0.25, %v14853_v44  ;;  %v15323_v44 = vmul.f32 0.25, %v14875_v16  ;;  %v1116_v13 = vcombine.high %v15263_v19, %v15263_v19 }
 0x156   :  { %3674 = vadd.xlane.f32.xlu0 %v3673_v43  ;;  %21183 = vst [vmem:[#allocation61_spill] sm:$0xff] %v15247_v49  ;;  %v4598_v43 = vrot.slane %v15227_v3, %v15047_v39  ;;  %v4602_v3 = vrot.slane %v15247_v49, %v15047_v39  ;;  %v3688_v49 = vsel %vm3240_vm0, %v3133_v38, 0.0 }
 0x157   :  { %v15249_v51 = vpop.xlane.xlu0 %3464  ;;  %21192 = vst [vmem:[#allocation70_spill] sm:$0xff] %v15311_v35  ;;  %21194 = vst [vmem:[#allocation72_spill] sm:$0xff] %v15323_v44 }
 0x158   :  { %21184 = vst [vmem:[#allocation62_spill] sm:$0xff] %v15249_v51  ;;  %3677 = vadd.xlane.f32.xlu1 %v3676_v21  ;;  %v2319_v51 = vrot.slane %v1104_v24, %v14523_v9  ;;  %v3136_v21 = vmul.f32 %v2315_v42, %v15254_v8  ;;  %v15288_v42 = vmul.f32 0.25, %v14848_v31  ;;  %v2323_v31 = vrot.slane %v1112_v28, %v14523_v9 }
 0x159   :  { %v15265_v30 = vpop.xlane.xlu1 %3467 }
 0x15a   :  { %21186 = vst [vmem:[#allocation64_spill] sm:$0xff] %v15265_v30  ;;  %3680 = vadd.xlane.f32.xlu0 %v3679_v34  ;;  %v3134_v30 = vmul.f32 %v2307_v32, %v15166_v56  ;;  %v5569_v34 = vsel %vm5549_vm2, %v4598_v43, %v5568_v48  ;;  %21188 = vst [vmem:[#allocation66_spill] sm:$0xff] %v15288_v42  ;;  %v3137_v32 = vmul.f32 %v2319_v51, %v15254_v8 }
 0x15b   :  { %v15278_v14 = vpop.xlane.xlu0 %3470  ;;  %v3697_v48 = vsel %vm3240_vm0, %v3136_v21, 0.0  ;;  %v1097_v43 = vrot.slane %v1081_v57, %v14519_v5  ;;  %v5570_v24 = vsel %vm5551_vm3, %v4602_v3, %v5569_v34  ;;  %v1131_v51 = vcombine.high %v1123_v26, %v1123_v26 }
 0x15c   :  { %21187 = vst [vmem:[#allocation65_spill] sm:$0xff] %v15278_v14  ;;  %3683 = vadd.xlane.f32.xlu1 %v3682_v25  ;;  %v1083_v14 = vcombine.high %v1081_v57, %v1081_v57  ;;  %v15303_v25 = vmul.f32 0.25, %v14872_v18  ;;  %v3691_v56 = vsel %vm3240_vm0, %v3134_v30, 0.0  ;;  %v4606_v2 = vrot.slane %v15288_v42, %v15047_v39 }
 0x15d   :  { %v15290_v60 = vpop.xlane.xlu1 %3473  ;;  %v2327_v21 = vrot.slane %v1114_v45, %v14523_v9  ;;  %v1139_v57 = vrot.slane %v1123_v26, %v14519_v5  ;;  %v3694_v18 = vsel %vm3240_vm0, %v3135_v55, 0.0  ;;  %v3700_v28 = vsel %vm3240_vm0, %v3137_v32, 0.0 }
 0x15e   :  { %3686 = vadd.xlane.f32.xlu0 %v3685_v37  ;;  %21190 = vst [vmem:[#allocation68_spill] sm:$0xff] %v15303_v25  ;;  %v1111_v30 = vrot.slane %v1083_v14, %v14519_v5  ;;  %v1113_v37 = vcombine.high %v1097_v43, %v1097_v43  ;;  %v4622_v34 = vrot.slane %v15296_v22, %v15047_v39  ;;  %v15344_v22 = vmul.f32 0.25, %v14856_v52 }
 0x15f   :  { %v15305_v38 = vpop.xlane.xlu0 %3476  ;;  %v2331_v26 = vrot.slane %v1097_v43, %v14523_v9  ;;  %v4626_v45 = vrot.slane %v15303_v25, %v15047_v39  ;;  %v15332_v14 = vrot.slane %v1131_v51, %v14519_v5  ;;  %v15337_v16 = vsel %vm5553_vm4, %v4606_v2, %v5570_v24  ;;  %v15353_v2 = vld [vmem:[#allocation5 + $0xa0] sm:$0xff] }
 0x160   :  { %21191 = vst [vmem:[#allocation69_spill] sm:$0xff] %v15305_v38  ;;  %3689 = vadd.xlane.f32.xlu1 %v3688_v49  ;;  %v3138_v49 = vmul.f32 %v2323_v31, %v15254_v8  ;;  %v1115_v32 = vcombine.high %v1111_v30, %v1111_v30  ;;  %v3139_v43 = vmul.f32 %v2327_v21, %v15254_v8  ;;  %21195 = vst [vmem:[#allocation73_spill] sm:$0xff] %v15344_v22  ;;  %v15366_v38 = vld [vmem:[#allocation2 + $0xa8] sm:$0xff] }
 0x161   :  { %v15315_v3 = vpop.xlane.xlu1 %3479  ;;  %v15347_v51 = vmul.f32 0.25, %v14881_v36  ;;  %v2335_v19 = vrot.slane %v1111_v30, %v14523_v9  ;;  %v2339_v24 = vrot.slane %v1113_v37, %v14523_v9  ;;  %v3140_v52 = vmul.f32 %v2331_v26, %v15254_v8 }
 0x162   :  { %21193 = vst [vmem:[#allocation71_spill] sm:$0xff] %v15315_v3  ;;  %3692 = vadd.xlane.f32.xlu0 %v3691_v56  ;;  %v2347_v56 = vrot.slane %v1139_v57, %v14523_v9  ;;  %v3703_v21 = vsel %vm3240_vm0, %v3138_v49, 0.0  ;;  %v1161_v31 = vcombine.high %v1139_v57, %v1139_v57  ;;  %v5575_v36 = vsel %vm5547_vm1, %v4626_v45, %v4622_v34 }
 0x163   :  { %v15329_v55 = vpop.xlane.xlu0 %3482  ;;  %21196 = vst [vmem:[#allocation74_spill] sm:$0xff] %v15347_v51  ;;  %v2343_v3 = vrot.slane %v1115_v32, %v14523_v9  ;;  %v2351_v30 = vrot.slane %v15332_v14, %v14523_v9  ;;  %v1130_v37 = vrot.slane %v1116_v13, %v14519_v5  ;;  %v3706_v49 = vsel %vm3240_vm0, %v3139_v43, 0.0 }
 0x164   :  { %3695 = vadd.xlane.f32.xlu1 %v3694_v18  ;;  %v4630_v18 = vrot.slane %v15323_v44, %v15047_v39  ;;  %v3144_v57 = vmul.f32 %v2347_v56, %v15353_v2  ;;  %v4634_v34 = vrot.slane %v15347_v51, %v15047_v39  ;;  %v15376_v26 = vmul.f32 0.25, %v14886_v46 }
 0x165   :  { %v15349_v42 = vpop.xlane.xlu1 %3485  ;;  %v3141_v13 = vmul.f32 %v2335_v19, %v15254_v8  ;;  %v3142_v32 = vmul.f32 %v2339_v24, %v15254_v8  ;;  %v2355_v43 = vrot.slane %v1161_v31, %v14523_v9  ;;  %v1172_v56 = vrot.slane %v15366_v38, %v14519_v5 }
 0x166   :  { %3698 = vadd.xlane.f32.xlu0 %v3697_v48  ;;  %v15369_v48 = vmul.f32 0.25, %v14862_v62  ;;  %21198 = vst [vmem:[#allocation76_spill] sm:$0xff] %v15376_v26  ;;  %v3709_v46 = vsel %vm3240_vm0, %v3140_v52, 0.0  ;;  %v3143_v51 = vmul.f32 %v2343_v3, %v15254_v8  ;;  %v3145_v19 = vmul.f32 %v2351_v30, %v15353_v2 }
 0x167   :  { %v15360_v25 = vpop.xlane.xlu0 %3488  ;;  %v1132_v24 = vcombine.high %v1130_v37, %v1130_v37  ;;  %v1163_v31 = vcombine.high %v15332_v14, %v15332_v14  ;;  %v4638_v3 = vrot.slane %v15376_v26, %v15047_v39  ;;  %v3712_v30 = vsel %vm3240_vm0, %v3141_v13, 0.0 }
 0x168   :  { %21197 = vst [vmem:[#allocation75_spill] sm:$0xff] %v15369_v48  ;;  %3701 = vadd.xlane.f32.xlu1 %v3700_v28  ;;  %v5576_v28 = vsel %vm5549_vm2, %v4630_v18, %v5575_v36  ;;  %v3721_v18 = vsel %vm3240_vm0, %v3144_v57, 0.0  ;;  %v15411_v57 = vmul.f32 0.25, %v14891_v58  ;;  %v3146_v14 = vmul.f32 %v2355_v43, %v15353_v2 }
 0x169   :  { %v15378_v45 = vpop.xlane.xlu1 %3491  ;;  %v5577_v8 = vsel %vm5551_vm3, %v4634_v34, %v5576_v28  ;;  %v1146_v62 = vrot.slane %v1130_v37, %v14519_v5  ;;  %v3718_v34 = vsel %vm3240_vm0, %v3143_v51, 0.0  ;;  %v3724_v28 = vsel %vm3240_vm0, %v3145_v19, 0.0 }
 0x16a   :  { %3704 = vadd.xlane.f32.xlu0 %v3703_v21  ;;  %v21200_v21 = vrot.slane %v15173_v50, %v15047_v39  ;;  %21202 = vst [vmem:[#allocation79_spill] sm:$0xff] %v15411_v57  ;;  %v1160_v26 = vrot.slane %v1132_v24, %v14519_v5  ;;  %v1188_v13 = vrot.slane %v1172_v56, %v14519_v5  ;;  %v15425_v58 = vmul.f32 0.25, %v14910_v17 }
 0x16b   :  { %v15388_v44 = vpop.xlane.xlu0 %3494  ;;  %v2359_v37 = vrot.slane %v1163_v31, %v14523_v9  ;;  %v1162_v43 = vcombine.high %v1146_v62, %v1146_v62  ;;  %v15432_v51 = vmul.f32 0.25, %v14894_v7  ;;  %v3727_v17 = vsel %vm3240_vm0, %v3146_v14, 0.0 }
 0x16c   :  { %21199 = vst [vmem:[#allocation77_spill] sm:$0xff] %v15388_v44  ;;  %3707 = vadd.xlane.f32.xlu1 %v3706_v49  ;;  %v5558_v52 = vsel %vm5557_vm6, %v21200_v21, %v15189_v10  ;;  %v3715_v49 = vsel %vm3240_vm0, %v3142_v32, 0.0  ;;  %v1180_v10 = vcombine.high %v1172_v56, %v1172_v56  ;;  %v15422_v32 = vmul.f32 0.25, %v14905_v29  ;;  %21205 = vst [vmem:[#allocation82_spill] sm:$0xff] %v15425_v58 }
 0x16d   :  { %v15406_v36 = vpop.xlane.xlu1 %3497  ;;  %21206 = vst [vmem:[#allocation83_spill] sm:$0xff] %v15432_v51  ;;  %v1165_v56 = vcombine.high %v15366_v38, %v15366_v38  ;;  %v1164_v24 = vcombine.high %v1160_v26, %v1160_v26  ;;  %v2379_v38 = vrot.slane %v1188_v13, %v14523_v9  ;;  %v2371_v14 = vrot.slane %v1162_v43, %v14523_v9  ;;  %v15471_v43 = vld [vmem:[#allocation2 + $0xb0] sm:$0xff] }
 0x16e   :  { %21201 = vst [vmem:[#allocation78_spill] sm:$0xff] %v15406_v36  ;;  %3710 = vadd.xlane.f32.xlu0 %v3709_v46  ;;  %21204 = vst [vmem:[#allocation81_spill] sm:$0xff] %v15422_v32  ;;  %v15429_v46 = vsel %vm5553_vm4, %v4638_v3, %v5577_v8  ;;  %v1202_v31 = vrot.slane %v1180_v10, %v14519_v5  ;;  %v15443_v8 = vmul.f32 0.25, %v14913_v47  ;;  %v15455_v10 = vld [vmem:[#allocation5 + $0xa8] sm:$0xff]  ;;  %v21239_v36 = vld [vmem:[#allocation21_spill] sm:$0xff] }
 0x16f   :  { %v15415_v21 = vpop.xlane.xlu0 %3500  ;;  %v2363_v3 = vrot.slane %v1146_v62, %v14523_v9  ;;  %v4654_v29 = vrot.slane %v15422_v32, %v15047_v39  ;;  %v1210_v47 = vcombine.high %v1188_v13, %v1188_v13  ;;  %v15460_v62 = vmul.f32 0.25, %v14900_v23 }
 0x170   :  { %21203 = vst [vmem:[#allocation80_spill] sm:$0xff] %v15415_v21  ;;  %3713 = vadd.xlane.f32.xlu1 %v3712_v30  ;;  %21208 = vst [vmem:[#allocation85_spill] sm:$0xff] %v15443_v8  ;;  %v2367_v30 = vrot.slane %v1160_v26, %v14523_v9  ;;  %v1179_v32 = vrot.slane %v1165_v56, %v14519_v5  ;;  %v2383_v13 = vrot.slane %v1202_v31, %v14523_v9 }
 0x171   :  { %v15434_v19 = vpop.xlane.xlu1 %3503  ;;  %21210 = vst [vmem:[#allocation87_spill] sm:$0xff] %v15460_v62  ;;  %v21213_v23 = vrot.slane %v15182_v63, %v15047_v39  ;;  %v3152_v56 = vmul.f32 %v2379_v38, %v15455_v10  ;;  %v2387_v63 = vrot.slane %v1210_v47, %v14523_v9  ;;  %v15593_v44 = vmul.f32 0.25, %v21239_v36 }
 0x172   :  { %21207 = vst [vmem:[#allocation84_spill] sm:$0xff] %v15434_v19  ;;  %3716 = vadd.xlane.f32.xlu0 %v3715_v49  ;;  %v4658_v49 = vrot.slane %v15425_v58, %v15047_v39  ;;  %v3147_v19 = vmul.f32 %v2359_v37, %v15353_v2  ;;  %v15467_v58 = vmul.f32 0.25, %v14919_v11  ;;  %v4662_v37 = vrot.slane %v15443_v8, %v15047_v39 }
 0x173   :  { %v15445_v7 = vpop.xlane.xlu0 %3506  ;;  %v5560_v50 = vsel %vm5559_vm7, %v21213_v23, %v5558_v52  ;;  %v3148_v11 = vmul.f32 %v2363_v3, %v15353_v2  ;;  %v15488_v52 = vmul.f32 0.25, %v14924_v40  ;;  %v1181_v3 = vcombine.high %v1179_v32, %v1179_v32  ;;  %21240 = vst [vmem:[#allocation21_spill] sm:$0xff] %v15593_v44 }
 0x174   :  { %21209 = vst [vmem:[#allocation86_spill] sm:$0xff] %v15445_v7  ;;  %3719 = vadd.xlane.f32.xlu1 %v3718_v34  ;;  %21212 = vst [vmem:[#allocation89_spill] sm:$0xff] %v15467_v58  ;;  %v2375_v34 = vrot.slane %v1164_v24, %v14523_v9  ;;  %v5582_v24 = vsel %vm5547_vm1, %v4658_v49, %v4654_v29  ;;  %v1212_v7 = vcombine.high %v1202_v31, %v1202_v31 }
 0x175   :  { %v15462_v26 = vpop.xlane.xlu1 %3509  ;;  %21215 = vst [vmem:[#allocation91_spill] sm:$0xff] %v15488_v52  ;;  %v3730_v8 = vsel %vm3240_vm0, %v3147_v19, 0.0  ;;  %v3153_v40 = vmul.f32 %v2383_v13, %v15455_v10  ;;  %v5583_v38 = vsel %vm5549_vm2, %v4662_v37, %v5582_v24  ;;  %v3733_v19 = vsel %vm3240_vm0, %v3148_v11, 0.0  ;;  %v21221_v24 = vld [vmem:[#allocation17_spill] sm:$0xff] }
 0x176   :  { %21211 = vst [vmem:[#allocation88_spill] sm:$0xff] %v15462_v26  ;;  %3722 = vadd.xlane.f32.xlu0 %v3721_v18  ;;  %v3149_v18 = vmul.f32 %v2367_v30, %v15353_v2  ;;  %v3150_v26 = vmul.f32 %v2371_v14, %v15353_v2  ;;  %v1221_v30 = vrot.slane %v15471_v43, %v14519_v5  ;;  %v3745_v47 = vsel %vm3240_vm0, %v3152_v56, 0.0 }
 0x177   :  { %v15479_v21 = vpop.xlane.xlu0 %3512  ;;  %v3151_v31 = vmul.f32 %v2375_v34, %v15353_v2  ;;  %v4670_v2 = vrot.slane %v15488_v52, %v15047_v39  ;;  %v1195_v13 = vrot.slane %v1179_v32, %v14519_v5  ;;  %v1209_v37 = vrot.slane %v1181_v3, %v14519_v5 }
 0x178   :  { %21214 = vst [vmem:[#allocation90_spill] sm:$0xff] %v15479_v21  ;;  %3725 = vadd.xlane.f32.xlu1 %v3724_v28  ;;  %v4666_v28 = vrot.slane %v15467_v58, %v15047_v39  ;;  %v3736_v14 = vsel %vm3240_vm0, %v3149_v18, 0.0  ;;  %v3739_v29 = vsel %vm3240_vm0, %v3150_v26, 0.0  ;;  %v3154_v58 = vmul.f32 %v2387_v63, %v15455_v10  ;;  %v21219_v26 = vld [vmem:[#allocation14_spill] sm:$0xff] }
 0x179   :  { %v15490_v23 = vpop.xlane.xlu1 %3515  ;;  %v1229_v11 = vcombine.high %v1221_v30, %v1221_v30  ;;  %v3748_v63 = vsel %vm3240_vm0, %v3153_v40, 0.0  ;;  %v15521_v56 = vmul.f32 0.25, %v21219_v26  ;;  %v15524_v52 = vmul.f32 0.25, %v21221_v24  ;;  %v21230_v24 = vld [vmem:[#allocation16_spill] sm:$0xff]  ;;  %v63_v21 = vld [vmem:[#allocation2 + $0xb8] sm:$0xff] }
 0x17a   :  { %21216 = vst [vmem:[#allocation92_spill] sm:$0xff] %v15490_v23  ;;  %3728 = vadd.xlane.f32.xlu0 %v3727_v17  ;;  %v2391_v17 = vrot.slane %v1212_v7, %v14523_v9  ;;  %v5584_v18 = vsel %vm5551_vm3, %v4666_v28, %v5583_v38  ;;  %v1237_v7 = vrot.slane %v1221_v30, %v14519_v5  ;;  %v3751_v28 = vsel %vm3240_vm0, %v3154_v58, 0.0  ;;  %v21227_v38 = vld [vmem:[#allocation15_spill] sm:$0xff] }
 0x17b   :  { %v15502_v49 = vpop.xlane.xlu0 %3518  ;;  %21220 = vst [vmem:[#allocation14_spill] sm:$0xff] %v15521_v56  ;;  %21222 = vst [vmem:[#allocation17_spill] sm:$0xff] %v15524_v52  ;;  %v1211_v32 = vcombine.high %v1195_v13, %v1195_v13  ;;  %v1213_v3 = vcombine.high %v1209_v37, %v1209_v37  ;;  %v15535_v30 = vsel %vm5810_vm8, %v5560_v50, -inf  ;;  %v15538_v40 = vsel %vm5553_vm4, %v4670_v2, %v5584_v18 }
 0x17c   :  { %21217 = vst [vmem:[#allocation93_spill] sm:$0xff] %v15502_v49  ;;  %3731 = vadd.xlane.f32.xlu1 %v3730_v8  ;;  %v3742_v8 = vsel %vm3240_vm0, %v3151_v31, 0.0  ;;  %v21224_v49 = vld [vmem:[#allocation18_spill] sm:$0xff]  ;;  %v1214_v31 = vcombine.high %v15471_v43, %v15471_v43  ;;  %21226 = vst [vmem:[#allocation96_spill] sm:$0xff] %v15535_v30  ;;  %v15548_v58 = vmul.f32 0.25, %v21230_v24  ;;  %v2395_v43 = vrot.slane %v1195_v13, %v14523_v9  ;;  %v15562_v24 = vld [vmem:[#allocation5 + $0xb0] sm:$0xff] }
 0x17d   :  { %v15512_v34 = vpop.xlane.xlu1 %3521  ;;  %v15529_v23 = vmul.f32 0.25, %v21224_v49  ;;  %v3155_v49 = vmul.f32 %v2391_v17, %v15455_v10  ;;  %v2399_v50 = vrot.slane %v1209_v37, %v14523_v9  ;;  %v2411_v2 = vrot.slane %v1237_v7, %v14523_v9 }
 0x17e   :  { %21218 = vst [vmem:[#allocation94_spill] sm:$0xff] %v15512_v34  ;;  %3734 = vadd.xlane.f32.xlu0 %v3733_v19  ;;  %v15541_v19 = vmul.f32 0.25, %v21227_v38  ;;  %21231 = vst [vmem:[#allocation16_spill] sm:$0xff] %v15548_v58  ;;  %v4686_v18 = vrot.slane %v15524_v52, %v15047_v39  ;;  %v21232_v38 = vld [vmem:[#allocation19_spill] sm:$0xff]  ;;  %v2403_v17 = vrot.slane %v1211_v32, %v14523_v9 }
 0x17f   :  { %v15526_v34 = vpop.xlane.xlu0 %3524  ;;  %21225 = vst [vmem:[#allocation18_spill] sm:$0xff] %v15529_v23  ;;  %v15556_v30 = vmul.f32 0.25, %v21232_v38  ;;  %v1259_v13 = vcombine.high %v1237_v7, %v1237_v7  ;;  %v3754_v32 = vsel %vm3240_vm0, %v3155_v49, 0.0  ;;  %v3160_v38 = vmul.f32 %v2411_v2, %v15562_v24 }
 0x180   :  { %21223 = vst [vmem:[#allocation95_spill] sm:$0xff] %v15526_v34  ;;  %3737 = vadd.xlane.f32.xlu1 %v3736_v14  ;;  %21228 = vst [vmem:[#allocation15_spill] sm:$0xff] %v15541_v19  ;;  %v1251_v14 = vrot.slane %v1229_v11, %v14519_v5  ;;  %v2407_v11 = vrot.slane %v1213_v3, %v14523_v9  ;;  %v1228_v34 = vrot.slane %v1214_v31, %v14519_v5 }
 0x181   :  { %v15543_v26 = vpop.xlane.xlu1 %3527  ;;  %21233 = vst [vmem:[#allocation19_spill] sm:$0xff] %v15556_v30  ;;  %v3156_v31 = vmul.f32 %v2395_v43, %v15455_v10  ;;  %v4694_v52 = vrot.slane %v15556_v30, %v15047_v39  ;;  %v3157_v49 = vmul.f32 %v2399_v50, %v15455_v10  ;;  %v1270_v50 = vrot.slane %v63_v21, %v14519_v5 }
 0x182   :  { %21229 = vst [vmem:[#allocation97_spill] sm:$0xff] %v15543_v26  ;;  %3740 = vadd.xlane.f32.xlu0 %v3739_v29  ;;  %v4690_v29 = vrot.slane %v15529_v23, %v15047_v39  ;;  %v1261_v37 = vcombine.high %v1251_v14, %v1251_v14  ;;  %v2415_v3 = vrot.slane %v1251_v14, %v14523_v9  ;;  %v3769_v36 = vsel %vm3240_vm0, %v3160_v38, 0.0 }
 0x183   :  { %v15558_v26 = vpop.xlane.xlu0 %3530  ;;  %v3158_v14 = vmul.f32 %v2403_v17, %v15455_v10  ;;  %v3159_v23 = vmul.f32 %v2407_v11, %v15455_v10  ;;  %v1230_v2 = vcombine.high %v1228_v34, %v1228_v34  ;;  %v21242_v10 = vrot.slane %v15240_v59, %v15047_v39 }
 0x184   :  { %21234 = vst [vmem:[#allocation98_spill] sm:$0xff] %v15558_v26  ;;  %3743 = vadd.xlane.f32.xlu1 %v3742_v8  ;;  %v21236_v8 = vld [vmem:[#allocation20_spill] sm:$0xff]  ;;  %v2423_v43 = vrot.slane %v1261_v37, %v14523_v9  ;;  %v3757_v17 = vsel %vm3240_vm0, %v3156_v31, 0.0  ;;  %v1244_v11 = vrot.slane %v1228_v34, %v14519_v5  ;;  %v3760_v37 = vsel %vm3240_vm0, %v3157_v49, 0.0 }
 0x185   :  { %v15571_v26 = vpop.xlane.xlu1 %3533  ;;  %v15578_v7 = vmul.f32 0.25, %v21236_v8  ;;  %v5589_v8 = vsel %vm5547_vm1, %v4690_v29, %v4686_v18  ;;  %v1258_v31 = vrot.slane %v1230_v2, %v14519_v5  ;;  %v21244_v34 = vrot.slane %v15243_v15, %v15047_v39 }
 0x186   :  { %21235 = vst [vmem:[#allocation99_spill] sm:$0xff] %v15571_v26  ;;  %3746 = vadd.xlane.f32.xlu0 %v3745_v47  ;;  %v2419_v47 = vrot.slane %v1259_v13, %v14523_v9  ;;  %v5590_v29 = vsel %vm5549_vm2, %v4694_v52, %v5589_v8  ;;  %v4702_v38 = vrot.slane %v15593_v44, %v15047_v39 }
 0x187   :  { %21237 = vst [vmem:[#allocation20_spill] sm:$0xff] %v15578_v7  ;;  %v15584_v26 = vpop.xlane.xlu0 %3536  ;;  %v4698_v18 = vrot.slane %v15578_v7, %v15047_v39  ;;  %v1286_v2 = vrot.slane %v1270_v50, %v14519_v5  ;;  %v15631_v7 = vmul.f32 0.25, %v14981_v53  ;;  %v1262_v15 = vcombine.high %v1258_v31, %v1258_v31 }
 0x188   :  { %21238 = vst [vmem:[#allocation100_spill] sm:$0xff] %v15584_v26  ;;  %3749 = vadd.xlane.f32.xlu1 %v3748_v63  ;;  %v3161_v26 = vmul.f32 %v2415_v3, %v15562_v24  ;;  %v5565_v63 = vsel %vm5555_vm5, %v21242_v10, %v15237_v33  ;;  %v3763_v3 = vsel %vm3240_vm0, %v3158_v14, 0.0  ;;  %v3766_v33 = vsel %vm3240_vm0, %v3159_v23, 0.0 }
 0x189   :  { %v15595_v30 = vpop.xlane.xlu1 %3539  ;;  %v3162_v10 = vmul.f32 %v2419_v47, %v15562_v24  ;;  %v5566_v52 = vsel %vm5557_vm6, %v21244_v34, %v5565_v63  ;;  %v1278_v23 = vcombine.high %v1270_v50, %v1270_v50  ;;  %v5591_v8 = vsel %vm5551_vm3, %v4698_v18, %v5590_v29  ;;  %21246 = vst [vmem:[#allocation104_spill] sm:$0xff] %v15631_v7  ;;  %v21247_v63 = vld [vmem:[#allocation25_spill] sm:$0xff]  ;;  %v21251_v18 = vld [vmem:[#allocation22_spill] sm:$0xff] }
 0x18a   :  { %21241 = vst [vmem:[#allocation101_spill] sm:$0xff] %v15595_v30  ;;  %3752 = vadd.xlane.f32.xlu0 %v3751_v28  ;;  %v3163_v28 = vmul.f32 %v2423_v43, %v15562_v24  ;;  %v3772_v14 = vsel %vm3240_vm0, %v3161_v26, 0.0  ;;  %v2427_v47 = vrot.slane %v1244_v11, %v14523_v9  ;;  %v1260_v43 = vcombine.high %v1244_v11, %v1244_v11 }
 0x18b   :  { %v15610_v13 = vpop.xlane.xlu0 %3542  ;;  %v15634_v34 = vmul.f32 0.25, %v21247_v63  ;;  %v3775_v50 = vsel %vm3240_vm0, %v3162_v10, 0.0  ;;  %v2431_v11 = vrot.slane %v1258_v31, %v14523_v9  ;;  %v15651_v29 = vsel %vm5553_vm4, %v4702_v38, %v5591_v8  ;;  %v21253_v63 = vld [vmem:[#allocation23_spill] sm:$0xff] }
 0x18c   :  { %21243 = vst [vmem:[#allocation102_spill] sm:$0xff] %v15610_v13  ;;  %3755 = vadd.xlane.f32.xlu1 %v3754_v32  ;;  %v1263_v32 = vcombine.high %v63_v21, %v63_v21  ;;  %v21250_v21 = vrot.slane %v15257_v41, %v15047_v39  ;;  %v3778_v53 = vsel %vm3240_vm0, %v3163_v28, 0.0  ;;  %v15654_v59 = vmul.f32 0.25, %v21253_v63 }
 0x18d   :  { %v15624_v49 = vpop.xlane.xlu1 %3545  ;;  %21248 = vst [vmem:[#allocation25_spill] sm:$0xff] %v15634_v34  ;;  %v3164_v10 = vmul.f32 %v2427_v47, %v15562_v24  ;;  %v2435_v28 = vrot.slane %v1260_v43, %v14523_v9  ;;  %v2443_v31 = vrot.slane %v1286_v2, %v14523_v9  ;;  %v4718_v38 = vrot.slane %v15631_v7, %v15047_v39  ;;  %v21258_v47 = vld [vmem:[#allocation24_spill] sm:$0xff] }
 0x18e   :  { %21245 = vst [vmem:[#allocation103_spill] sm:$0xff] %v15624_v49  ;;  %3758 = vadd.xlane.f32.xlu0 %v3757_v17  ;;  %v15642_v26 = vsel %vm5559_vm7, %v21250_v21, %v5566_v52  ;;  %v15645_v17 = vmul.f32 0.25, %v21251_v18  ;;  %21254 = vst [vmem:[#allocation23_spill] sm:$0xff] %v15654_v59  ;;  %v1300_v52 = vrot.slane %v1278_v23, %v14519_v5  ;;  %v15678_v43 = vmul.f32 0.25, %v21258_v47  ;;  %v64_v49 = vld [vmem:[#allocation2 + $0xc0] sm:$0xff] }
 0x18f   :  { %v15636_v44 = vpop.xlane.xlu0 %3548  ;;  %v1277_v21 = vrot.slane %v1263_v32, %v14519_v5  ;;  %v4722_v8 = vrot.slane %v15634_v34, %v15047_v39  ;;  %v2439_v23 = vrot.slane %v1262_v15, %v14523_v9  ;;  %v15673_v32 = vld [vmem:[#allocation5 + $0xb8] sm:$0xff]  ;;  %v3165_v63 = vmul.f32 %v2431_v11, %v15562_v24 }
 0x190   :  { %21249 = vst [vmem:[#allocation105_spill] sm:$0xff] %v15636_v44  ;;  %21252 = vst [vmem:[#allocation22_spill] sm:$0xff] %v15645_v17  ;;  %3761 = vadd.xlane.f32.xlu1 %v3760_v37  ;;  %v15661_v37 = vmul.f32 0.25, %v14989_v54  ;;  %v1308_v54 = vcombine.high %v1286_v2, %v1286_v2  ;;  %v1310_v7 = vcombine.high %v1300_v52, %v1300_v52 }
 0x191   :  { %v15656_v41 = vpop.xlane.xlu1 %3551  ;;  %21259 = vst [vmem:[#allocation24_spill] sm:$0xff] %v15678_v43  ;;  %v2447_v2 = vrot.slane %v1300_v52, %v14523_v9  ;;  %v1279_v44 = vcombine.high %v1277_v21, %v1277_v21  ;;  %v3166_v11 = vmul.f32 %v2435_v28, %v15562_v24  ;;  %v3168_v47 = vmul.f32 %v2443_v31, %v15673_v32 }
 0x192   :  { %21255 = vst [vmem:[#allocation106_spill] sm:$0xff] %v15656_v41  ;;  %21256 = vst [vmem:[#allocation107_spill] sm:$0xff] %v15661_v37  ;;  %3764 = vadd.xlane.f32.xlu0 %v3763_v3  ;;  %v21260_v41 = vld [vmem:[#allocation26_spill] sm:$0xff]  ;;  %v4726_v3 = vrot.slane %v15661_v37, %v15047_v39  ;;  %v5596_v34 = vsel %vm5547_vm1, %v4722_v8, %v4718_v38  ;;  %v2451_v52 = vrot.slane %v1308_v54, %v14523_v9  ;;  %v21264_v37 = vld [vmem:[#allocation27_spill] sm:$0xff] }
 0x193   :  { %v15670_v18 = vpop.xlane.xlu0 %3554  ;;  %v1293_v13 = vrot.slane %v1277_v21, %v14519_v5  ;;  %v3784_v28 = vsel %vm3240_vm0, %v3165_v63, 0.0  ;;  %v2455_v31 = vrot.slane %v1310_v7, %v14523_v9  ;;  %v1307_v21 = vrot.slane %v1279_v44, %v14519_v5 }
 0x194   :  { %21257 = vst [vmem:[#allocation108_spill] sm:$0xff] %v15670_v18  ;;  %3767 = vadd.xlane.f32.xlu1 %v3766_v33  ;;  %v15684_v18 = vmul.f32 0.25, %v21260_v41  ;;  %v3781_v33 = vsel %vm3240_vm0, %v3164_v10, 0.0  ;;  %v15703_v10 = vmul.f32 0.25, %v21264_v37  ;;  %v5597_v54 = vsel %vm5549_vm2, %v4726_v3, %v5596_v34 }
 0x195   :  { %v15686_v15 = vpop.xlane.xlu1 %3557  ;;  %v1309_v37 = vcombine.high %v1293_v13, %v1293_v13  ;;  %v1312_v63 = vcombine.high %v64_v49, %v64_v49  ;;  %v3171_v34 = vmul.f32 %v2455_v31, %v15673_v32 }
 0x196   :  { %21261 = vst [vmem:[#allocation26_spill] sm:$0xff] %v15684_v18  ;;  %21262 = vst [vmem:[#allocation109_spill] sm:$0xff] %v15686_v15  ;;  %3770 = vadd.xlane.f32.xlu0 %v3769_v36  ;;  %v3167_v15 = vmul.f32 %v2439_v23, %v15562_v24  ;;  %v4730_v38 = vrot.slane %v15684_v18, %v15047_v39  ;;  %v3169_v24 = vmul.f32 %v2447_v2, %v15673_v32 }
 0x197   :  { %v15695_v41 = vpop.xlane.xlu0 %3560  ;;  %21265 = vst [vmem:[#allocation27_spill] sm:$0xff] %v15703_v10  ;;  %v1319_v23 = vrot.slane %v64_v49, %v14519_v5  ;;  %v3793_v18 = vsel %vm3240_vm0, %v3168_v47, 0.0  ;;  %v2459_v2 = vrot.slane %v1293_v13, %v14523_v9  ;;  %v4734_v44 = vrot.slane %v15703_v10, %v15047_v39 }
 0x198   :  { %21263 = vst [vmem:[#allocation110_spill] sm:$0xff] %v15695_v41  ;;  %3773 = vadd.xlane.f32.xlu1 %v3772_v14  ;;  %v3787_v14 = vsel %vm3240_vm0, %v3166_v11, 0.0  ;;  %v3790_v7 = vsel %vm3240_vm0, %v3167_v15, 0.0  ;;  %v21269_v49 = vrot.slane %v15311_v35, %v15047_v39  ;;  %v5598_v15 = vsel %vm5551_vm3, %v4730_v38, %v5597_v54  ;;  %v21288_v41 = vld [vmem:[#allocation38_spill] sm:$0xff] }
 0x199   :  { %v15709_v8 = vpop.xlane.xlu1 %3563  ;;  %v3796_v13 = vsel %vm3240_vm0, %v3169_v24, 0.0  ;;  %v1327_v47 = vcombine.high %v1319_v23, %v1319_v23  ;;  %v1311_v10 = vcombine.high %v1307_v21, %v1307_v21  ;;  %v1326_v35 = vrot.slane %v1312_v63, %v14519_v5  ;;  %v21277_v63 = vld [vmem:[#allocation33_spill] sm:$0xff] }
 0x19a   :  { %21266 = vst [vmem:[#allocation111_spill] sm:$0xff] %v15709_v8  ;;  %3776 = vadd.xlane.f32.xlu0 %v3775_v50  ;;  %v3170_v8 = vmul.f32 %v2451_v52, %v15673_v32  ;;  %v15727_v50 = vsel %vm5810_vm8, %v15642_v26, -inf  ;;  %v5572_v3 = vsel %vm5555_vm5, %v21269_v49, %v15337_v16  ;;  %v21271_v52 = vld [vmem:[#allocation28_spill] sm:$0xff]  ;;  %v2467_v26 = vrot.slane %v1309_v37, %v14523_v9  ;;  %v21275_v37 = vld [vmem:[#allocation31_spill] sm:$0xff] }
 0x19b   :  { %v15716_v36 = vpop.xlane.xlu0 %3566  ;;  %21268 = vst [vmem:[#allocation113_spill] sm:$0xff] %v15727_v50  ;;  %v15740_v31 = vmul.f32 0.25, %v21271_v52  ;;  %v3172_v38 = vmul.f32 %v2459_v2, %v15673_v32  ;;  %v1335_v24 = vrot.slane %v1319_v23, %v14519_v5  ;;  %v21274_v54 = vrot.slane %v15344_v22, %v15047_v39  ;;  %v21279_v2 = vld [vmem:[#allocation29_spill] sm:$0xff] }
 0x19c   :  { %21267 = vst [vmem:[#allocation112_spill] sm:$0xff] %v15716_v36  ;;  %3779 = vadd.xlane.f32.xlu1 %v3778_v53  ;;  %v2463_v53 = vrot.slane %v1307_v21, %v14523_v9  ;;  %v3799_v16 = vsel %vm3240_vm0, %v3170_v8, 0.0  ;;  %v15757_v21 = vmul.f32 0.25, %v21275_v37  ;;  %v15760_v52 = vmul.f32 0.25, %v21277_v63 }
 0x19d   :  { %v15735_v11 = vpop.xlane.xlu1 %3569  ;;  %21272 = vst [vmem:[#allocation28_spill] sm:$0xff] %v15740_v31  ;;  %v5573_v49 = vsel %vm5557_vm6, %v21274_v54, %v5572_v3  ;;  %v3802_v8 = vsel %vm3240_vm0, %v3171_v34, 0.0  ;;  %v1349_v3 = vrot.slane %v1327_v47, %v14519_v5  ;;  %v3174_v54 = vmul.f32 %v2467_v26, %v15673_v32  ;;  %v21282_v34 = vld [vmem:[#allocation35_spill] sm:$0xff] }
 0x19e   :  { %21270 = vst [vmem:[#allocation114_spill] sm:$0xff] %v15735_v11  ;;  %3782 = vadd.xlane.f32.xlu0 %v3781_v33  ;;  %v15754_v33 = vsel %vm5553_vm4, %v4734_v44, %v5598_v15  ;;  %21276 = vst [vmem:[#allocation31_spill] sm:$0xff] %v15757_v21  ;;  %v3173_v22 = vmul.f32 %v2463_v53, %v15673_v32  ;;  %v1357_v44 = vcombine.high %v1335_v24, %v1335_v24  ;;  %v21285_v11 = vld [vmem:[#allocation30_spill] sm:$0xff]  ;;  %v65_v15 = vld [vmem:[#allocation2 + $0xc8] sm:$0xff] }
 0x19f   :  { %v15744_v50 = vpop.xlane.xlu0 %3572  ;;  %21278 = vst [vmem:[#allocation33_spill] sm:$0xff] %v15760_v52  ;;  %v1328_v37 = vcombine.high %v1326_v35, %v1326_v35  ;;  %v15775_v63 = vmul.f32 0.25, %v21282_v34  ;;  %v2475_v53 = vrot.slane %v1335_v24, %v14523_v9  ;;  %v1359_v47 = vcombine.high %v1349_v3, %v1349_v3  ;;  %v15788_v26 = vld [vmem:[#allocation5 + $0xc0] sm:$0xff] }
 0x1a0   :  { %21273 = vst [vmem:[#allocation115_spill] sm:$0xff] %v15744_v50  ;;  %3785 = vadd.xlane.f32.xlu1 %v3784_v28  ;;  %v15764_v50 = vmul.f32 0.25, %v21279_v2  ;;  %v2471_v28 = vrot.slane %v1311_v10, %v14523_v9  ;;  %v15782_v36 = vmul.f32 0.25, %v21285_v11  ;;  %v4754_v10 = vrot.slane %v15760_v52, %v15047_v39 }
 0x1a1   :  { %v15766_v23 = vpop.xlane.xlu1 %3575  ;;  %21283 = vst [vmem:[#allocation35_spill] sm:$0xff] %v15775_v63  ;;  %v1342_v34 = vrot.slane %v1326_v35, %v14519_v5  ;;  %v3808_v11 = vsel %vm3240_vm0, %v3173_v22, 0.0  ;;  %v15799_v30 = vmul.f32 0.25, %v21288_v41  ;;  %v1356_v52 = vrot.slane %v1328_v37, %v14519_v5 }
 0x1a2   :  { %21280 = vst [vmem:[#allocation29_spill] sm:$0xff] %v15764_v50  ;;  %21281 = vst [vmem:[#allocation116_spill] sm:$0xff] %v15766_v23  ;;  %3788 = vadd.xlane.f32.xlu0 %v3787_v14  ;;  %v3805_v23 = vsel %vm3240_vm0, %v3172_v38, 0.0  ;;  %v4750_v14 = vrot.slane %v15757_v21, %v15047_v39  ;;  %v2483_v21 = vrot.slane %v1357_v44, %v14523_v9 }
 0x1a3   :  { %v15777_v2 = vpop.xlane.xlu0 %3578  ;;  %21286 = vst [vmem:[#allocation30_spill] sm:$0xff] %v15782_v36  ;;  %21289 = vst [vmem:[#allocation38_spill] sm:$0xff] %v15799_v30  ;;  %v3175_v35 = vmul.f32 %v2471_v28, %v15673_v32  ;;  %v4758_v38 = vrot.slane %v15775_v63, %v15047_v39  ;;  %v3176_v22 = vmul.f32 %v2475_v53, %v15788_v26  ;;  %v21291_v28 = vld [vmem:[#allocation39_spill] sm:$0xff] }
 0x1a4   :  { %21284 = vst [vmem:[#allocation117_spill] sm:$0xff] %v15777_v2  ;;  %3791 = vadd.xlane.f32.xlu1 %v3790_v7  ;;  %v2479_v2 = vrot.slane %v1349_v3, %v14523_v9  ;;  %v3811_v7 = vsel %vm3240_vm0, %v3174_v54, 0.0  ;;  %v2487_v3 = vrot.slane %v1359_v47, %v14523_v9  ;;  %v1368_v44 = vrot.slane %v65_v15, %v14519_v5 }
 0x1a5   :  { %v15793_v24 = vpop.xlane.xlu1 %3581  ;;  %v5603_v41 = vsel %vm5547_vm1, %v4754_v10, %v4750_v14  ;;  %v2491_v32 = vrot.slane %v1342_v34, %v14523_v9  ;;  %v1358_v54 = vcombine.high %v1342_v34, %v1342_v34  ;;  %v15816_v37 = vmul.f32 0.25, %v21291_v28 }
 0x1a6   :  { %21287 = vst [vmem:[#allocation118_spill] sm:$0xff] %v15793_v24  ;;  %3794 = vadd.xlane.f32.xlu0 %v3793_v18  ;;  %v3177_v53 = vmul.f32 %v2479_v2, %v15788_v26  ;;  %v3178_v47 = vmul.f32 %v2483_v21, %v15788_v26  ;;  %v3814_v14 = vsel %vm3240_vm0, %v3175_v35, 0.0  ;;  %v2495_v10 = vrot.slane %v1356_v52, %v14523_v9 }
 0x1a7   :  { %v15806_v24 = vpop.xlane.xlu0 %3584  ;;  %21292 = vst [vmem:[#allocation39_spill] sm:$0xff] %v15816_v37  ;;  %v1361_v34 = vcombine.high %v65_v15, %v65_v15  ;;  %v5604_v28 = vsel %vm5549_vm2, %v4758_v38, %v5603_v41  ;;  %v3817_v21 = vsel %vm3240_vm0, %v3176_v22, 0.0  ;;  %v3179_v2 = vmul.f32 %v2487_v3, %v15788_v26 }
 0x1a8   :  { %21290 = vst [vmem:[#allocation119_spill] sm:$0xff] %v15806_v24  ;;  %3797 = vadd.xlane.f32.xlu1 %v3796_v13  ;;  %v21294_v24 = vrot.slane %v15369_v48, %v15047_v39  ;;  %v4762_v13 = vrot.slane %v15799_v30, %v15047_v39  ;;  %v1376_v48 = vcombine.high %v1368_v44, %v1368_v44  ;;  %v15851_v3 = vsel %vm3240_vm0, %v3178_v47, 0.0 }
 0x1a9   :  { %v15818_v63 = vpop.xlane.xlu1 %3587  ;;  %v21296_v15 = vrot.slane %v15411_v57, %v15047_v39  ;;  %v4766_v35 = vrot.slane %v15816_v37, %v15047_v39  ;;  %v1360_v41 = vcombine.high %v1356_v52, %v1356_v52  ;;  %v3181_v30 = vmul.f32 %v2495_v10, %v15788_v26  ;;  %v66_v57 = vld [vmem:[#allocation2 + $0xd0] sm:$0xff] }
 0x1aa   :  { %21293 = vst [vmem:[#allocation120_spill] sm:$0xff] %v15818_v63  ;;  %v5574_v18 = vsel %vm5559_vm7, %v21294_v24, %v5573_v49  ;;  %3800 = vadd.xlane.f32.xlu0 %v3799_v16  ;;  %v3180_v49 = vmul.f32 %v2491_v32, %v15788_v26  ;;  %v2499_v24 = vrot.slane %v1358_v54, %v14523_v9  ;;  %v21297_v32 = vld [vmem:[#allocation41_spill] sm:$0xff]  ;;  %v15862_v37 = vsel %vm3240_vm0, %v3179_v2, 0.0 }
 0x1ab   :  { %v15831_v63 = vpop.xlane.xlu0 %3590  ;;  %v15838_v16 = vsel %vm5810_vm8, %v5574_v18, -inf  ;;  %v5579_v38 = vsel %vm5555_vm5, %v21296_v15, %v15429_v46  ;;  %v5605_v18 = vsel %vm5551_vm3, %v4762_v13, %v5604_v28  ;;  %v15855_v54 = vmul.f32 0.25, %v21297_v32 }
 0x1ac   :  { %3803 = vadd.xlane.f32.xlu1 %v3802_v8  ;;  %21295 = vst [vmem:[#allocation121_spill] sm:$0xff] %v15838_v16  ;;  %v3820_v8 = vsel %vm3240_vm0, %v3177_v53, 0.0  ;;  %v1375_v46 = vrot.slane %v1361_v34, %v14519_v5  ;;  %v1384_v53 = vrot.slane %v1368_v44, %v14519_v5  ;;  %v1398_v47 = vrot.slane %v1376_v48, %v14519_v5 }
 0x1ad   :  { %v15847_v22 = vpop.xlane.xlu1 %3593  ;;  %21298 = vst [vmem:[#allocation41_spill] sm:$0xff] %v15855_v54  ;;  %v21300_v52 = vrot.slane %v15432_v51, %v15047_v39  ;;  %v15874_v10 = vmul.f32 0.25, %v15125_v27  ;;  %v15877_v34 = vsel %vm3240_vm0, %v3180_v49, 0.0  ;;  %v3182_v28 = vmul.f32 %v2499_v24, %v15788_v26 }
 0x1ae   :  { %3806 = vadd.xlane.f32.xlu0 %v3805_v23  ;;  %v15871_v23 = vmul.f32 0.25, %v15113_v1  ;;  %v15881_v44 = vsel %vm5553_vm4, %v4766_v35, %v5605_v18  ;;  %v15884_v48 = vmul.f32 0.25, %v15086_v6  ;;  %v2503_v1 = vrot.slane %v1360_v41, %v14523_v9 }
 0x1af   :  { %v15859_v15 = vpop.xlane.xlu0 %3596  ;;  %v5580_v13 = vsel %vm5557_vm6, %v21300_v52, %v5579_v38  ;;  %21302 = vst [vmem:[#allocation124_spill] sm:$0xff] %v15874_v10  ;;  %v1406_v38 = vcombine.high %v1384_v53, %v1384_v53  ;;  %v15895_v49 = vsel %vm3240_vm0, %v3181_v30, 0.0  ;;  %v1377_v24 = vcombine.high %v1375_v46, %v1375_v46 }
 0x1b0   :  { %21299 = vst [vmem:[#allocation122_spill] sm:$0xff] %v15859_v15  ;;  %21301 = vst [vmem:[#allocation123_spill] sm:$0xff] %v15871_v23  ;;  %3809 = vadd.xlane.f32.xlu1 %v3808_v11  ;;  %v21305_v11 = vld [vmem:[#allocation45_spill] sm:$0xff]  ;;  %v15898_v35 = vmul.f32 0.25, %v15138_v0  ;;  %v2507_v18 = vrot.slane %v1384_v53, %v14523_v9  ;;  %v2511_v41 = vrot.slane %v1398_v47, %v14523_v9  ;;  %v15909_v30 = vsel %vm3240_vm0, %v3182_v28, 0.0 }
 0x1b1   :  { %21303 = vst [vmem:[#allocation125_spill] sm:$0xff] %v15884_v48  ;;  %v15886_v2 = vpop.xlane.xlu1 %3599  ;;  %v15892_v32 = vmul.f32 0.25, %v21305_v11  ;;  %v1408_v52 = vcombine.high %v1398_v47, %v1398_v47  ;;  %v4782_v27 = vrot.slane %v15871_v23, %v15047_v39  ;;  %v15911_v11 = vld [vmem:[#allocation5 + $0xc8] sm:$0xff]  ;;  %v1391_v0 = vrot.slane %v1375_v46, %v14519_v5 }
 0x1b2   :  { %21304 = vst [vmem:[#allocation126_spill] sm:$0xff] %v15886_v2  ;;  %3812 = vadd.xlane.f32.xlu0 %v3811_v7  ;;  %21307 = vst [vmem:[#allocation127_spill] sm:$0xff] %v15898_v35  ;;  %v4786_v7 = vrot.slane %v15874_v10, %v15047_v39  ;;  %v3183_v47 = vmul.f32 %v2503_v1, %v15788_v26  ;;  %v2515_v23 = vrot.slane %v1406_v38, %v14523_v9  ;;  %v21310_v10 = vld [vmem:[#allocation50_spill] sm:$0xff] }
 0x1b3   :  { %21306 = vst [vmem:[#allocation45_spill] sm:$0xff] %v15892_v32  ;;  %v15900_v6 = vpop.xlane.xlu0 %3602  ;;  %v15927_v46 = vmul.f32 0.25, %v15149_v61  ;;  %v1405_v53 = vrot.slane %v1377_v24, %v14519_v5  ;;  %v1407_v16 = vcombine.high %v1391_v0, %v1391_v0  ;;  %v4790_v26 = vrot.slane %v15898_v35, %v15047_v39 }
 0x1b4   :  { %3815 = vadd.xlane.f32.xlu1 %v3814_v14  ;;  %v21308_v14 = vrot.slane %v15460_v62, %v15047_v39  ;;  %v3184_v38 = vmul.f32 %v2507_v18, %v15911_v11  ;;  %v3185_v62 = vmul.f32 %v2511_v41, %v15911_v11  ;;  %v2523_v61 = vrot.slane %v1391_v0, %v14523_v9 }
 0x1b5   :  { %v15916_v51 = vpop.xlane.xlu1 %3605  ;;  %21309 = vst [vmem:[#allocation128_spill] sm:$0xff] %v15927_v46  ;;  %v1410_v24 = vcombine.high %v66_v57, %v66_v57  ;;  %v15941_v2 = vmul.f32 0.25, %v21310_v10  ;;  %v3838_v15 = vsel %vm3240_vm0, %v3183_v47, 0.0  ;;  %v3186_v18 = vmul.f32 %v2515_v23, %v15911_v11 }
 0x1b6   :  { %v5581_v28 = vsel %vm5559_vm7, %v21308_v14, %v5580_v13  ;;  %3818 = vadd.xlane.f32.xlu0 %v3817_v21  ;;  %v2519_v13 = vrot.slane %v1408_v52, %v14523_v9  ;;  %v5610_v14 = vsel %vm5547_vm1, %v4786_v7, %v4782_v27  ;;  %v1417_v21 = vrot.slane %v66_v57, %v14519_v5 }
 0x1b7   :  { %v15932_v1 = vpop.xlane.xlu0 %3608  ;;  %21311 = vst [vmem:[#allocation50_spill] sm:$0xff] %v15941_v2  ;;  %v21312_v41 = vrot.slane %v15521_v56, %v15047_v39  ;;  %v4794_v27 = vrot.slane %v15927_v46, %v15047_v39  ;;  %v2527_v57 = vrot.slane %v1405_v53, %v14523_v9  ;;  %v2531_v10 = vrot.slane %v1407_v16, %v14523_v9  ;;  %v21328_v56 = vld [vmem:[#allocation64_spill] sm:$0xff] }
 0x1b8   :  { %3821 = vadd.xlane.f32.xlu1 %v3820_v8  ;;  %v15958_v52 = vsel %vm5810_vm8, %v5581_v28, -inf  ;;  %v5611_v23 = vsel %vm5549_vm2, %v4790_v26, %v5610_v14  ;;  %v3841_v0 = vsel %vm3240_vm0, %v3184_v38, 0.0  ;;  %v3187_v47 = vmul.f32 %v2519_v13, %v15911_v11 }
 0x1b9   :  { %v15943_v35 = vpop.xlane.xlu1 %3611  ;;  %v5586_v8 = vsel %vm5555_vm5, %v21312_v41, %v15538_v40  ;;  %21313 = vst [vmem:[#allocation129_spill] sm:$0xff] %v15958_v52  ;;  %v15965_v40 = vsel %vm3240_vm0, %v3185_v62, 0.0  ;;  %v1425_v41 = vcombine.high %v1417_v21, %v1417_v21  ;;  %v1424_v16 = vrot.slane %v1410_v24, %v14519_v5 }
 0x1ba   :  { %3824 = vadd.xlane.f32.xlu0 %v15851_v3  ;;  %v3188_v3 = vmul.f32 %v2523_v61, %v15911_v11  ;;  %v21314_v28 = vrot.slane %v15541_v19, %v15047_v39  ;;  %v4798_v38 = vrot.slane %v15941_v2, %v15047_v39  ;;  %v15978_v62 = vmul.f32 0.25, %v15175_v4 }
 0x1bb   :  { %v15961_v7 = vpop.xlane.xlu0 %3614  ;;  %v1409_v13 = vcombine.high %v1405_v53, %v1405_v53  ;;  %v5612_v61 = vsel %vm5551_vm3, %v4794_v27, %v5611_v23  ;;  %v3189_v24 = vmul.f32 %v2527_v57, %v15911_v11  ;;  %v15991_v2 = vmul.f32 0.25, %v15217_v12  ;;  %v21320_v23 = vld [vmem:[#allocation54_spill] sm:$0xff] }
 0x1bc   :  { %3827 = vadd.xlane.f32.xlu1 %v15862_v37  ;;  %v5587_v26 = vsel %vm5557_vm6, %v21314_v28, %v5586_v8  ;;  %21315 = vst [vmem:[#allocation130_spill] sm:$0xff] %v15978_v62  ;;  %v15983_v37 = vsel %vm3240_vm0, %v3186_v18, 0.0  ;;  %v3190_v8 = vmul.f32 %v2531_v10, %v15911_v11  ;;  %v1433_v28 = vrot.slane %v1417_v21, %v14519_v5 }
 0x1bd   :  { %v15980_v14 = vpop.xlane.xlu1 %3617  ;;  %21316 = vst [vmem:[#allocation131_spill] sm:$0xff] %v15991_v2  ;;  %v15994_v4 = vmul.f32 0.25, %v15230_v20  ;;  %v15999_v53 = vsel %vm3240_vm0, %v3187_v47, 0.0  ;;  %v16007_v21 = vsel %vm3240_vm0, %v3188_v3, 0.0  ;;  %v1447_v12 = vrot.slane %v1425_v41, %v14519_v5 }
 0x1be   :  { %3830 = vadd.xlane.f32.xlu0 %v15877_v34  ;;  %v21319_v34 = vrot.slane %v15548_v58, %v15047_v39  ;;  %v1455_v27 = vcombine.high %v1433_v28, %v1433_v28  ;;  %v1426_v20 = vcombine.high %v1424_v16, %v1424_v16  ;;  %v16011_v57 = vsel %vm5553_vm4, %v4798_v38, %v5612_v61  ;;  %v21326_v58 = vld [vmem:[#allocation57_spill] sm:$0xff] }
 0x1bf   :  { %21317 = vst [vmem:[#allocation132_spill] sm:$0xff] %v15994_v4  ;;  %v15996_v46 = vpop.xlane.xlu0 %3620  ;;  %v16016_v47 = vmul.f32 0.25, %v21320_v23  ;;  %v16026_v41 = vsel %vm3240_vm0, %v3189_v24, 0.0  ;;  %v16029_v38 = vsel %vm3240_vm0, %v3190_v8, 0.0  ;;  %v21325_v61 = vrot.slane %v15645_v17, %v15047_v39 }
 0x1c0   :  { %21318 = vst [vmem:[#allocation133_spill] sm:$0xff] %v15996_v46  ;;  %v5588_v18 = vsel %vm5559_vm7, %v21319_v34, %v5587_v26  ;;  %3833 = vadd.xlane.f32.xlu1 %v15895_v49  ;;  %v2535_v49 = vrot.slane %v1409_v13, %v14523_v9  ;;  %v21323_v26 = vld [vmem:[#allocation62_spill] sm:$0xff]  ;;  %v4814_v13 = vrot.slane %v15991_v2, %v15047_v39  ;;  %v16053_v52 = vmul.f32 0.25, %v21328_v56 }
 0x1c1   :  { %21321 = vst [vmem:[#allocation54_spill] sm:$0xff] %v16016_v47  ;;  %v16018_v19 = vpop.xlane.xlu1 %3623  ;;  %v16022_v3 = vmul.f32 0.25, %v21323_v26  ;;  %v5593_v34 = vsel %vm5555_vm5, %v21325_v61, %v15651_v29  ;;  %v4818_v23 = vrot.slane %v15994_v4, %v15047_v39  ;;  %v1440_v24 = vrot.slane %v1424_v16, %v14519_v5  ;;  %v67_v61 = vld [vmem:[#allocation2 + $0xd8] sm:$0xff] }
 0x1c2   :  { %21322 = vst [vmem:[#allocation134_spill] sm:$0xff] %v16018_v19  ;;  %3836 = vadd.xlane.f32.xlu0 %v15909_v30  ;;  %v1457_v30 = vcombine.high %v1447_v12, %v1447_v12  ;;  %v2539_v8 = vrot.slane %v1433_v28, %v14523_v9  ;;  %v2543_v10 = vrot.slane %v1447_v12, %v14523_v9  ;;  %v16050_v4 = vmul.f32 0.25, %v21326_v58  ;;  %v16058_v28 = vld [vmem:[#allocation5 + $0xd0] sm:$0xff] }
 0x1c3   :  { %21324 = vst [vmem:[#allocation62_spill] sm:$0xff] %v16022_v3  ;;  %v16040_v26 = vpop.xlane.xlu0 %3626  ;;  %v2547_v17 = vrot.slane %v1455_v27, %v14523_v9  ;;  %v1454_v29 = vrot.slane %v1426_v20, %v14519_v5  ;;  %21329 = vst [vmem:[#allocation64_spill] sm:$0xff] %v16053_v52  ;;  %v4822_v12 = vrot.slane %v16022_v3, %v15047_v39  ;;  %v16063_v20 = vsel %vm5810_vm8, %v5588_v18, -inf }
 0x1c4   :  { %3839 = vadd.xlane.f32.xlu1 %v3838_v15  ;;  %21327 = vst [vmem:[#allocation57_spill] sm:$0xff] %v16050_v4  ;;  %v3191_v15 = vmul.f32 %v2535_v49, %v15911_v11  ;;  %v1456_v27 = vcombine.high %v1440_v24, %v1440_v24  ;;  %21330 = vst [vmem:[#allocation135_spill] sm:$0xff] %v16063_v20  ;;  %v21331_v58 = vrot.slane %v15654_v59, %v15047_v39 }
 0x1c5   :  { %v16055_v16 = vpop.xlane.xlu1 %3629  ;;  %v5617_v2 = vsel %vm5547_vm1, %v4818_v23, %v4814_v13  ;;  %v2551_v11 = vrot.slane %v1457_v30, %v14523_v9  ;;  %v2555_v49 = vrot.slane %v1440_v24, %v14523_v9  ;;  %v1466_v3 = vrot.slane %v67_v61, %v14519_v5  ;;  %v21332_v30 = vld [vmem:[#allocation65_spill] sm:$0xff] }
 0x1c6   :  { %3842 = vadd.xlane.f32.xlu0 %v3841_v0  ;;  %v5594_v56 = vsel %vm5557_vm6, %v21331_v58, %v5593_v34  ;;  %v3192_v0 = vmul.f32 %v2539_v8, %v16058_v28  ;;  %v3193_v18 = vmul.f32 %v2543_v10, %v16058_v28  ;;  %v3194_v59 = vmul.f32 %v2547_v17, %v16058_v28 }
 0x1c7   :  { %v16070_v19 = vpop.xlane.xlu0 %3632  ;;  %v2559_v34 = vrot.slane %v1454_v29, %v14523_v9  ;;  %v4826_v23 = vrot.slane %v16053_v52, %v15047_v39  ;;  %v16085_v24 = vmul.f32 0.25, %v21332_v30  ;;  %v5618_v8 = vsel %vm5549_vm2, %v4822_v12, %v5617_v2 }
 0x1c8   :  { %3845 = vadd.xlane.f32.xlu1 %v15965_v40  ;;  %v3862_v40 = vsel %vm3240_vm0, %v3191_v15, 0.0  ;;  %v2563_v17 = vrot.slane %v1456_v27, %v14523_v9  ;;  %v1458_v10 = vcombine.high %v1454_v29, %v1454_v29  ;;  %v21335_v13 = vrot.slane %v15678_v43, %v15047_v39  ;;  %v21353_v43 = vld [vmem:[#allocation77_spill] sm:$0xff] }
 0x1c9   :  { %21333 = vst [vmem:[#allocation65_spill] sm:$0xff] %v16085_v24  ;;  %v16087_v58 = vpop.xlane.xlu1 %3635  ;;  %v3195_v30 = vmul.f32 %v2551_v11, %v16058_v28  ;;  %v1474_v46 = vcombine.high %v1466_v3, %v1466_v3  ;;  %v1459_v15 = vcombine.high %v67_v61, %v67_v61  ;;  %v3865_v2 = vsel %vm3240_vm0, %v3192_v0, 0.0 }
 0x1ca   :  { %21334 = vst [vmem:[#allocation136_spill] sm:$0xff] %v16087_v58  ;;  %3848 = vadd.xlane.f32.xlu0 %v15983_v37  ;;  %v5595_v20 = vsel %vm5559_vm7, %v21335_v13, %v5594_v56  ;;  %v3196_v58 = vmul.f32 %v2555_v49, %v16058_v28  ;;  %v3868_v37 = vsel %vm3240_vm0, %v3193_v18, 0.0  ;;  %v16105_v29 = vsel %vm3240_vm0, %v3194_v59, 0.0 }
 0x1cb   :  { %v16097_v52 = vpop.xlane.xlu0 %3638  ;;  %v3197_v12 = vmul.f32 %v2559_v34, %v16058_v28  ;;  %v5619_v27 = vsel %vm5551_vm3, %v4826_v23, %v5618_v8  ;;  %v4830_v56 = vrot.slane %v16085_v24, %v15047_v39  ;;  %v16114_v61 = vsel %vm5810_vm8, %v5595_v20, -inf  ;;  %v68_v24 = vld [vmem:[#allocation2 + $0xe0] sm:$0xff] }
 0x1cc   :  { %3851 = vadd.xlane.f32.xlu1 %v15999_v53  ;;  %21336 = vst [vmem:[#allocation137_spill] sm:$0xff] %v16114_v61  ;;  %v21337_v53 = vrot.slane %v15740_v31, %v15047_v39  ;;  %v16122_v59 = vmul.f32 0.25, %v15290_v60  ;;  %v3198_v0 = vmul.f32 %v2563_v17, %v16058_v28  ;;  %v2567_v18 = vrot.slane %v1458_v10, %v14523_v9  ;;  %v21342_v10 = vld [vmem:[#allocation69_spill] sm:$0xff]  ;;  %v16317_v61 = vld [vmem:[#allocation2 + $0xe8] sm:$0xff] }
 0x1cd   :  { %v16111_v11 = vpop.xlane.xlu1 %3641  ;;  %v1482_v34 = vrot.slane %v1466_v3, %v14519_v5  ;;  %v16131_v20 = vsel %vm3240_vm0, %v3195_v30, 0.0  ;;  %v16134_v23 = vsel %vm3240_vm0, %v3196_v58, 0.0  ;;  %v1473_v60 = vrot.slane %v1459_v15, %v14519_v5 }
 0x1ce   :  { %v5600_v49 = vsel %vm5555_vm5, %v21337_v53, %v15754_v33  ;;  %21338 = vst [vmem:[#allocation138_spill] sm:$0xff] %v16122_v59  ;;  %3854 = vadd.xlane.f32.xlu0 %v16007_v21  ;;  %v1496_v33 = vrot.slane %v1474_v46, %v14519_v5  ;;  %v16139_v21 = vmul.f32 0.25, %v15329_v55  ;;  %v16142_v8 = vmul.f32 0.25, %v15349_v42 }
 0x1cf   :  { %v16128_v13 = vpop.xlane.xlu0 %3644  ;;  %v16146_v3 = vsel %vm3240_vm0, %v3197_v12, 0.0  ;;  %v21341_v17 = vrot.slane %v15764_v50, %v15047_v39  ;;  %v16153_v46 = vsel %vm5553_vm4, %v4830_v56, %v5619_v27  ;;  %v16156_v30 = vmul.f32 0.25, %v21342_v10 }
 0x1d0   :  { %21339 = vst [vmem:[#allocation139_spill] sm:$0xff] %v16139_v21  ;;  %21340 = vst [vmem:[#allocation140_spill] sm:$0xff] %v16142_v8  ;;  %3857 = vadd.xlane.f32.xlu1 %v16026_v41  ;;  %v1504_v42 = vcombine.high %v1482_v34, %v1482_v34  ;;  %v1506_v15 = vcombine.high %v1496_v33, %v1496_v33  ;;  %v16164_v12 = vsel %vm3240_vm0, %v3198_v0, 0.0  ;;  %v16169_v56 = vmul.f32 0.25, %v15360_v25 }
 0x1d1   :  { %v5601_v58 = vsel %vm5557_vm6, %v21341_v17, %v5600_v49  ;;  %21343 = vst [vmem:[#allocation69_spill] sm:$0xff] %v16156_v30  ;;  %v16158_v55 = vpop.xlane.xlu1 %3647  ;;  %v3199_v53 = vmul.f32 %v2567_v18, %v16058_v28  ;;  %v2571_v27 = vrot.slane %v1482_v34, %v14523_v9  ;;  %v16173_v17 = vld [vmem:[#allocation5 + $0xd8] sm:$0xff]  ;;  %v2575_v10 = vrot.slane %v1496_v33, %v14523_v9 }
 0x1d2   :  { %21344 = vst [vmem:[#allocation141_spill] sm:$0xff] %v16158_v55  ;;  %3860 = vadd.xlane.f32.xlu0 %v16029_v38  ;;  %21345 = vst [vmem:[#allocation142_spill] sm:$0xff] %v16169_v56  ;;  %v1489_v41 = vrot.slane %v1473_v60, %v14519_v5  ;;  %v21346_v38 = vrot.slane %v15782_v36, %v15047_v39  ;;  %v4846_v28 = vrot.slane %v16139_v21, %v15047_v39  ;;  %v21348_v36 = vld [vmem:[#allocation71_spill] sm:$0xff] }
 0x1d3   :  { %v16171_v49 = vpop.xlane.xlu0 %3650  ;;  %v4850_v25 = vrot.slane %v16142_v8, %v15047_v39  ;;  %v1475_v18 = vcombine.high %v1473_v60, %v1473_v60  ;;  %v21347_v34 = vrot.slane %v15855_v54, %v15047_v39  ;;  %v16193_v31 = vmul.f32 0.25, %v21348_v36 }
 0x1d4   :  { %v5602_v0 = vsel %vm5559_vm7, %v21346_v38, %v5601_v58  ;;  %3863 = vadd.xlane.f32.xlu1 %v3862_v40  ;;  %v2579_v38 = vrot.slane %v1504_v42, %v14523_v9  ;;  %v2583_v21 = vrot.slane %v1506_v15, %v14523_v9  ;;  %v16200_v40 = vmul.f32 0.25, %v15378_v45 }
 0x1d5   :  { %v5607_v33 = vsel %vm5555_vm5, %v21347_v34, %v15881_v44  ;;  %21349 = vst [vmem:[#allocation71_spill] sm:$0xff] %v16193_v31  ;;  %v16195_v58 = vpop.xlane.xlu1 %3653  ;;  %v3200_v60 = vmul.f32 %v2571_v27, %v16173_v17  ;;  %v1515_v44 = vrot.slane %v68_v24, %v14519_v5  ;;  %v16205_v34 = vsel %vm5810_vm8, %v5602_v0, -inf }
 0x1d6   :  { %21350 = vst [vmem:[#allocation143_spill] sm:$0xff] %v16200_v40  ;;  %3866 = vadd.xlane.f32.xlu0 %v3865_v2  ;;  %21351 = vst [vmem:[#allocation144_spill] sm:$0xff] %v16205_v34  ;;  %v4854_v36 = vrot.slane %v16169_v56, %v15047_v39  ;;  %v3201_v42 = vmul.f32 %v2575_v10, %v16173_v17  ;;  %v2587_v15 = vrot.slane %v1489_v41, %v14523_v9 }
 0x1d7   :  { %v16209_v50 = vpop.xlane.xlu0 %3656  ;;  %v21352_v45 = vrot.slane %v15884_v48, %v15047_v39  ;;  %v5624_v27 = vsel %vm5547_vm1, %v4850_v25, %v4846_v28  ;;  %v3886_v0 = vsel %vm3240_vm0, %v3199_v53, 0.0  ;;  %v1503_v8 = vrot.slane %v1475_v18, %v14519_v5 }
 0x1d8   :  { %3869 = vadd.xlane.f32.xlu1 %v3868_v37  ;;  %v1505_v54 = vcombine.high %v1489_v41, %v1489_v41  ;;  %v16223_v10 = vmul.f32 0.25, %v21353_v43  ;;  %v3202_v48 = vmul.f32 %v2579_v38, %v16173_v17  ;;  %v4858_v37 = vrot.slane %v16200_v40, %v15047_v39 }
 0x1d9   :  { %v5608_v2 = vsel %vm5557_vm6, %v21352_v45, %v5607_v33  ;;  %v16225_v34 = vpop.xlane.xlu1 %3659  ;;  %v3203_v33 = vmul.f32 %v2583_v21, %v16173_v17  ;;  %v3889_v53 = vsel %vm3240_vm0, %v3200_v60, 0.0  ;;  %v1523_v41 = vcombine.high %v1515_v44, %v1515_v44 }
 0x1da   :  { %21354 = vst [vmem:[#allocation77_spill] sm:$0xff] %v16223_v10  ;;  %3872 = vadd.xlane.f32.xlu0 %v16105_v29  ;;  %v21355_v28 = vrot.slane %v15892_v32, %v15047_v39  ;;  %v5625_v25 = vsel %vm5549_vm2, %v4854_v36, %v5624_v27  ;;  %v16241_v38 = vsel %vm3240_vm0, %v3201_v42, 0.0  ;;  %v3204_v21 = vmul.f32 %v2587_v15, %v16173_v17 }
 0x1db   :  { %v16238_v18 = vpop.xlane.xlu0 %3662  ;;  %v1508_v45 = vcombine.high %v68_v24, %v68_v24  ;;  %v2591_v29 = vrot.slane %v1503_v8, %v14523_v9  ;;  %v2595_v60 = vrot.slane %v1505_v54, %v14523_v9  ;;  %v1507_v56 = vcombine.high %v1503_v8, %v1503_v8 }
 0x1dc   :  { %v5609_v43 = vsel %vm5559_vm7, %v21355_v28, %v5608_v2  ;;  %3875 = vadd.xlane.f32.xlu1 %v16131_v20  ;;  %v1531_v40 = vrot.slane %v1515_v44, %v14519_v5  ;;  %v4862_v36 = vrot.slane %v16223_v10, %v15047_v39  ;;  %v21356_v2 = vld [vmem:[#allocation78_spill] sm:$0xff]  ;;  %v16256_v15 = vsel %vm3240_vm0, %v3202_v48, 0.0  ;;  %v21362_v10 = vld [vmem:[#allocation88_spill] sm:$0xff] }
 0x1dd   :  { %v16251_v27 = vmul.f32 0.25, %v21356_v2  ;;  %v16253_v42 = vpop.xlane.xlu1 %3665  ;;  %v16259_v24 = vsel %vm3240_vm0, %v3203_v33, 0.0  ;;  %v5626_v20 = vsel %vm5551_vm3, %v4858_v37, %v5625_v25  ;;  %v1545_v54 = vrot.slane %v1523_v41, %v14519_v5  ;;  %v21360_v28 = vld [vmem:[#allocation86_spill] sm:$0xff] }
 0x1de   :  { %21358 = vst [vmem:[#allocation145_spill] sm:$0xff] %v16253_v42  ;;  %3878 = vadd.xlane.f32.xlu0 %v16134_v23  ;;  %v1553_v8 = vcombine.high %v1531_v40, %v1531_v40  ;;  %v16265_v44 = vsel %vm5810_vm8, %v5609_v43, -inf  ;;  %v16268_v2 = vmul.f32 0.25, %v21360_v28  ;;  %v16271_v32 = vmul.f32 0.25, %v21362_v10 }
 0x1df   :  { %21357 = vst [vmem:[#allocation78_spill] sm:$0xff] %v16251_v27  ;;  %21359 = vst [vmem:[#allocation146_spill] sm:$0xff] %v16265_v44  ;;  %v16273_v48 = vpop.xlane.xlu0 %3668  ;;  %v1522_v33 = vrot.slane %v1508_v45, %v14519_v5  ;;  %v21365_v23 = vrot.slane %v15978_v62, %v15047_v39  ;;  %v16283_v41 = vsel %vm3240_vm0, %v3204_v21, 0.0  ;;  %v3205_v43 = vmul.f32 %v2591_v29, %v16173_v17  ;;  %v21366_v62 = vld [vmem:[#allocation80_spill] sm:$0xff]  ;;  %v21369_v21 = vld [vmem:[#allocation90_spill] sm:$0xff] }
 0x1e0   :  { %21361 = vst [vmem:[#allocation86_spill] sm:$0xff] %v16268_v2  ;;  %21363 = vst [vmem:[#allocation88_spill] sm:$0xff] %v16271_v32  ;;  %3881 = vadd.xlane.f32.xlu1 %v16146_v3  ;;  %v3206_v10 = vmul.f32 %v2595_v60, %v16173_v17  ;;  %v2599_v25 = vrot.slane %v1507_v56, %v14523_v9  ;;  %v16289_v28 = vsel %vm5553_vm4, %v4862_v36, %v5626_v20  ;;  %v16303_v29 = vld [vmem:[#allocation5 + $0xe0] sm:$0xff] }
 0x1e1   :  { %21364 = vst [vmem:[#allocation147_spill] sm:$0xff] %v16273_v48  ;;  %v5614_v37 = vsel %vm5555_vm5, %v21365_v23, %v16011_v57  ;;  %v16294_v44 = vmul.f32 0.25, %v21366_v62  ;;  %v16296_v57 = vpop.xlane.xlu1 %3671  ;;  %v2603_v3 = vrot.slane %v1531_v40, %v14523_v9  ;;  %v16300_v23 = vmul.f32 0.25, %v21369_v21 }
 0x1e2   :  { %21368 = vst [vmem:[#allocation148_spill] sm:$0xff] %v16296_v57  ;;  %3884 = vadd.xlane.f32.xlu0 %v16164_v12  ;;  %v2607_v56 = vrot.slane %v1545_v54, %v14523_v9  ;;  %v2611_v60 = vrot.slane %v1553_v8, %v14523_v9  ;;  %v21371_v36 = vrot.slane %v16016_v47, %v15047_v39  ;;  %v3904_v8 = vsel %vm3240_vm0, %v3205_v43, 0.0  ;;  %v21372_v47 = vld [vmem:[#allocation84_spill] sm:$0xff] }
 0x1e3   :  { %21367 = vst [vmem:[#allocation80_spill] sm:$0xff] %v16294_v44  ;;  %21370 = vst [vmem:[#allocation90_spill] sm:$0xff] %v16300_v23  ;;  %v4878_v20 = vrot.slane %v16268_v2, %v15047_v39  ;;  %v4882_v40 = vrot.slane %v16271_v32, %v15047_v39  ;;  %v16315_v21 = vpop.xlane.xlu0 %3674  ;;  %v1555_v12 = vcombine.high %v1545_v54, %v1545_v54  ;;  %v16321_v57 = vsel %vm3240_vm0, %v3206_v10, 0.0  ;;  %v21374_v54 = vld [vmem:[#allocation92_spill] sm:$0xff] }
 0x1e4   :  { %v5615_v62 = vsel %vm5557_vm6, %v21371_v36, %v5614_v37  ;;  %v1524_v45 = vcombine.high %v1522_v33, %v1522_v33  ;;  %3887 = vadd.xlane.f32.xlu1 %v3886_v0  ;;  %v3207_v37 = vmul.f32 %v2599_v25, %v16173_v17  ;;  %v1538_v36 = vrot.slane %v1522_v33, %v14519_v5 }
 0x1e5   :  { %v16328_v32 = vmul.f32 0.25, %v21372_v47  ;;  %v16331_v55 = vmul.f32 0.25, %v21374_v54  ;;  %v16333_v48 = vpop.xlane.xlu1 %3677  ;;  %v3208_v0 = vmul.f32 %v2603_v3, %v16303_v29  ;;  %v4886_v43 = vrot.slane %v16300_v23, %v15047_v39 }
 0x1e6   :  { %3890 = vadd.xlane.f32.xlu0 %v3889_v53  ;;  %v3209_v17 = vmul.f32 %v2607_v56, %v16303_v29  ;;  %v1564_v33 = vrot.slane %v16317_v61, %v14519_v5  ;;  %v21376_v47 = vrot.slane %v16050_v4, %v15047_v39  ;;  %v5631_v25 = vsel %vm5547_vm1, %v4882_v40, %v4878_v20 }
 0x1e7   :  { %21373 = vst [vmem:[#allocation84_spill] sm:$0xff] %v16328_v32  ;;  %21375 = vst [vmem:[#allocation92_spill] sm:$0xff] %v16331_v55  ;;  %v16346_v54 = vpop.xlane.xlu0 %3680  ;;  %v3210_v3 = vmul.f32 %v2611_v60, %v16303_v29  ;;  %v2615_v2 = vrot.slane %v1555_v12, %v14523_v9  ;;  %v1552_v53 = vrot.slane %v1524_v45, %v14519_v5  ;;  %v3910_v56 = vsel %vm3240_vm0, %v3207_v37, 0.0  ;;  %v21378_v45 = vld [vmem:[#allocation93_spill] sm:$0xff] }
 0x1e8   :  { %v5616_v10 = vsel %vm5559_vm7, %v21376_v47, %v5615_v62  ;;  %3893 = vadd.xlane.f32.xlu1 %v16241_v38  ;;  %v2619_v23 = vrot.slane %v1538_v36, %v14523_v9  ;;  %v1554_v42 = vcombine.high %v1538_v36, %v1538_v36  ;;  %v21377_v62 = vrot.slane %v16122_v59, %v15047_v39 }
 0x1e9   :  { %v4890_v40 = vrot.slane %v16331_v55, %v15047_v39  ;;  %v16364_v12 = vmul.f32 0.25, %v21378_v45  ;;  %v16366_v38 = vpop.xlane.xlu1 %3683  ;;  %v16369_v37 = vsel %vm3240_vm0, %v3208_v0, 0.0  ;;  %v5632_v36 = vsel %vm5549_vm2, %v4886_v43, %v5631_v25 }
 0x1ea   :  { %v5621_v20 = vsel %vm5555_vm5, %v21377_v62, %v16153_v46  ;;  %3896 = vadd.xlane.f32.xlu0 %v16256_v15  ;;  %v16374_v46 = vsel %vm3240_vm0, %v3209_v17, 0.0  ;;  %v1572_v47 = vcombine.high %v1564_v33, %v1564_v33  ;;  %v16377_v62 = vsel %vm5810_vm8, %v5616_v10, -inf }
 0x1eb   :  { %21379 = vst [vmem:[#allocation93_spill] sm:$0xff] %v16364_v12  ;;  %21380 = vst [vmem:[#allocation149_spill] sm:$0xff] %v16377_v62  ;;  %v16379_v60 = vpop.xlane.xlu0 %3686  ;;  %v16382_v45 = vsel %vm3240_vm0, %v3210_v3, 0.0  ;;  %v3211_v55 = vmul.f32 %v2615_v2, %v16303_v29  ;;  %v2623_v0 = vrot.slane %v1552_v53, %v14523_v9  ;;  %v1556_v59 = vcombine.high %v1552_v53, %v1552_v53  ;;  %v21393_v62 = vld [vmem:[#allocation95_spill] sm:$0xff] }
 0x1ec   :  { %21381 = vst [vmem:[#allocation150_spill] sm:$0xff] %v16379_v60  ;;  %3899 = vadd.xlane.f32.xlu1 %v16259_v24  ;;  %v3212_v15 = vmul.f32 %v2619_v23, %v16303_v29  ;;  %v2627_v43 = vrot.slane %v1554_v42, %v14523_v9  ;;  %v1557_v17 = vcombine.high %v16317_v61, %v16317_v61  ;;  %v21385_v23 = vld [vmem:[#allocation94_spill] sm:$0xff] }
 0x1ed   :  { %v21382_v10 = vrot.slane %v16156_v30, %v15047_v39  ;;  %v5633_v3 = vsel %vm5551_vm3, %v4890_v40, %v5632_v36  ;;  %v4894_v2 = vrot.slane %v16364_v12, %v15047_v39  ;;  %v16398_v53 = vpop.xlane.xlu1 %3689  ;;  %v1580_v24 = vrot.slane %v1564_v33, %v14519_v5  ;;  %v21387_v30 = vld [vmem:[#allocation98_spill] sm:$0xff]  ;;  %v21389_v40 = vld [vmem:[#allocation99_spill] sm:$0xff] }
 0x1ee   :  { %21383 = vst [vmem:[#allocation151_spill] sm:$0xff] %v16398_v53  ;;  %v21384_v42 = vrot.slane %v16251_v27, %v15047_v39  ;;  %v16407_v4 = vmul.f32 0.25, %v21385_v23  ;;  %v16413_v36 = vmul.f32 0.25, %v21389_v40  ;;  %3902 = vadd.xlane.f32.xlu0 %v16283_v41  ;;  %v16420_v12 = vsel %vm3240_vm0, %v3211_v55, 0.0 }
 0x1ef   :  { %v5622_v25 = vsel %vm5557_vm6, %v21382_v10, %v5621_v20  ;;  %v16410_v20 = vmul.f32 0.25, %v21387_v30  ;;  %v1594_v10 = vrot.slane %v1572_v47, %v14519_v5  ;;  %v16417_v33 = vpop.xlane.xlu0 %3692  ;;  %v1602_v23 = vcombine.high %v1580_v24, %v1580_v24 }
 0x1f0   :  { %v5628_v61 = vsel %vm5555_vm5, %v21384_v42, %v16289_v28  ;;  %21386 = vst [vmem:[#allocation94_spill] sm:$0xff] %v16407_v4  ;;  %21390 = vst [vmem:[#allocation99_spill] sm:$0xff] %v16413_v36  ;;  %v3213_v28 = vmul.f32 %v2623_v0, %v16303_v29  ;;  %v2631_v42 = vrot.slane %v1556_v59, %v14523_v9  ;;  %3905 = vadd.xlane.f32.xlu1 %v3904_v8  ;;  %v21395_v59 = vld [vmem:[#allocation100_spill] sm:$0xff] }
 0x1f1   :  { %21388 = vst [vmem:[#allocation98_spill] sm:$0xff] %v16410_v20  ;;  %21391 = vst [vmem:[#allocation152_spill] sm:$0xff] %v16417_v33  ;;  %v16425_v30 = vsel %vm3240_vm0, %v3212_v15, 0.0  ;;  %v3214_v40 = vmul.f32 %v2627_v43, %v16303_v29  ;;  %v1571_v41 = vrot.slane %v1557_v17, %v14519_v5  ;;  %v21392_v47 = vrot.slane %v16193_v31, %v15047_v39  ;;  %v16440_v8 = vpop.xlane.xlu1 %3695 }
 0x1f2   :  { %v5634_v55 = vsel %vm5553_vm4, %v4894_v2, %v5633_v3  ;;  %v16435_v0 = vmul.f32 0.25, %v21393_v62  ;;  %v16438_v33 = vmul.f32 0.25, %v21395_v59  ;;  %21397 = vst [vmem:[#allocation153_spill] sm:$0xff] %v16440_v8  ;;  %v2635_v15 = vrot.slane %v1580_v24, %v14523_v9  ;;  %3908 = vadd.xlane.f32.xlu0 %v16321_v57  ;;  %v16450_v62 = vld [vmem:[#allocation5 + $0xe8] sm:$0xff] }
 0x1f3   :  { %v5623_v27 = vsel %vm5559_vm7, %v21392_v47, %v5622_v25  ;;  %v4898_v43 = vrot.slane %v16407_v4, %v15047_v39  ;;  %v4910_v17 = vrot.slane %v16410_v20, %v15047_v39  ;;  %v4914_v25 = vrot.slane %v16413_v36, %v15047_v39  ;;  %v16453_v2 = vpop.xlane.xlu0 %3698  ;;  %v21398_v20 = vld [vmem:[#allocation97_spill] sm:$0xff] }
 0x1f4   :  { %21394 = vst [vmem:[#allocation95_spill] sm:$0xff] %v16435_v0  ;;  %21396 = vst [vmem:[#allocation100_spill] sm:$0xff] %v16438_v33  ;;  %v2639_v3 = vrot.slane %v1594_v10, %v14523_v9  ;;  %v16456_v47 = vsel %vm3240_vm0, %v3213_v28, 0.0  ;;  %v3215_v24 = vmul.f32 %v2631_v42, %v16303_v29  ;;  %v2643_v59 = vrot.slane %v1602_v23, %v14523_v9  ;;  %v21400_v36 = vld [vmem:[#allocation101_spill] sm:$0xff] }
 0x1f5   :  { %v1604_v4 = vcombine.high %v1594_v10, %v1594_v10  ;;  %v16461_v31 = vmul.f32 0.25, %v21398_v20  ;;  %v16464_v8 = vmul.f32 0.25, %v21400_v36  ;;  %3911 = vadd.xlane.f32.xlu1 %v3910_v56  ;;  %v1573_v57 = vcombine.high %v1571_v41, %v1571_v41  ;;  %v16474_v10 = vpop.xlane.xlu1 %3701 }
 0x1f6   :  { %v21402_v53 = vrot.slane %v16294_v44, %v15047_v39  ;;  %v4902_v28 = vrot.slane %v16435_v0, %v15047_v39  ;;  %v4918_v29 = vrot.slane %v16438_v33, %v15047_v39  ;;  %v16477_v20 = vsel %vm3240_vm0, %v3214_v40, 0.0  ;;  %3914 = vadd.xlane.f32.xlu0 %v16369_v37  ;;  %v21404_v33 = vld [vmem:[#allocation102_spill] sm:$0xff] }
 0x1f7   :  { %21399 = vst [vmem:[#allocation97_spill] sm:$0xff] %v16461_v31  ;;  %21401 = vst [vmem:[#allocation101_spill] sm:$0xff] %v16464_v8  ;;  %v3216_v36 = vmul.f32 %v2635_v15, %v16450_v62  ;;  %v5638_v56 = vsel %vm5547_vm1, %v4914_v25, %v4910_v17  ;;  %v3217_v42 = vmul.f32 %v2639_v3, %v16450_v62  ;;  %v16485_v23 = vsel %vm5810_vm8, %v5623_v27, -inf  ;;  %v16490_v44 = vpop.xlane.xlu0 %3704 }
 0x1f8   :  { %v5629_v60 = vsel %vm5557_vm6, %v21402_v53, %v5628_v61  ;;  %v1587_v53 = vrot.slane %v1571_v41, %v14519_v5  ;;  %v70_v61 = vld [vmem:[#allocation2 + $0xf0] sm:$0xff]  ;;  %21403 = vst [vmem:[#allocation154_spill] sm:$0xff] %v16485_v23  ;;  %v16488_v0 = vmul.f32 0.25, %v21404_v33  ;;  %21406 = vst [vmem:[#allocation155_spill] sm:$0xff] %v16490_v44  ;;  %v3218_v40 = vmul.f32 %v2643_v59, %v16450_v62  ;;  %v21409_v41 = vld [vmem:[#allocation103_spill] sm:$0xff] }
 0x1f9   :  { %v2647_v15 = vrot.slane %v1604_v4, %v14523_v9  ;;  %v21407_v37 = vrot.slane %v16328_v32, %v15047_v39  ;;  %v4922_v27 = vrot.slane %v16464_v8, %v15047_v39  ;;  %3917 = vadd.xlane.f32.xlu1 %v16374_v46  ;;  %v3934_v33 = vsel %vm3240_vm0, %v3215_v24, 0.0  ;;  %v16506_v4 = vpop.xlane.xlu1 %3707 }
 0x1fa   :  { %21405 = vst [vmem:[#allocation102_spill] sm:$0xff] %v16488_v0  ;;  %v1601_v25 = vrot.slane %v1573_v57, %v14519_v5  ;;  %v5639_v3 = vsel %vm5549_vm2, %v4918_v29, %v5638_v56  ;;  %21408 = vst [vmem:[#allocation156_spill] sm:$0xff] %v16506_v4  ;;  %v16509_v59 = vsel %vm3240_vm0, %v3216_v36, 0.0  ;;  %v16513_v32 = vmul.f32 0.25, %v21409_v41  ;;  %3920 = vadd.xlane.f32.xlu0 %v16382_v45 }
 0x1fb   :  { %v5630_v17 = vsel %vm5559_vm7, %v21407_v37, %v5629_v60  ;;  %v1613_v60 = vrot.slane %v70_v61, %v14519_v5  ;;  %v1606_v37 = vcombine.high %v70_v61, %v70_v61  ;;  %v16517_v46 = vsel %vm3240_vm0, %v3217_v42, 0.0  ;;  %v16525_v36 = vpop.xlane.xlu0 %3710  ;;  %v21413_v42 = vld [vmem:[#allocation105_spill] sm:$0xff] }
 0x1fc   :  { %21410 = vst [vmem:[#allocation103_spill] sm:$0xff] %v16513_v32  ;;  %v2651_v24 = vrot.slane %v1587_v53, %v14523_v9  ;;  %v16521_v57 = vsel %vm5810_vm8, %v5630_v17, -inf  ;;  %v4926_v29 = vrot.slane %v16488_v0, %v15047_v39  ;;  %21412 = vst [vmem:[#allocation158_spill] sm:$0xff] %v16525_v36  ;;  %v16528_v56 = vsel %vm3240_vm0, %v3218_v40, 0.0  ;;  %v21415_v0 = vld [vmem:[#allocation108_spill] sm:$0xff]  ;;  %v21417_v36 = vld [vmem:[#allocation109_spill] sm:$0xff] }
 0x1fd   :  { %21411 = vst [vmem:[#allocation157_spill] sm:$0xff] %v16521_v57  ;;  %v3219_v61 = vmul.f32 %v2647_v15, %v16450_v62  ;;  %v1603_v41 = vcombine.high %v1587_v53, %v1587_v53  ;;  %v5640_v45 = vsel %vm5551_vm3, %v4922_v27, %v5639_v3  ;;  %v16533_v8 = vmul.f32 0.25, %v21413_v42  ;;  %3923 = vadd.xlane.f32.xlu1 %v16420_v12  ;;  %v16544_v4 = vpop.xlane.xlu1 %3713 }
 0x1fe   :  { %v2655_v17 = vrot.slane %v1601_v25, %v14523_v9  ;;  %v5635_v57 = vsel %vm5555_vm5, %v4898_v43, %v5634_v55  ;;  %v16539_v23 = vmul.f32 0.25, %v21415_v0  ;;  %v16542_v40 = vmul.f32 0.25, %v21417_v36  ;;  %21419 = vst [vmem:[#allocation159_spill] sm:$0xff] %v16544_v4  ;;  %3926 = vadd.xlane.f32.xlu0 %v16425_v30  ;;  %v21421_v30 = vld [vmem:[#allocation106_spill] sm:$0xff] }
 0x1ff   :  { %21414 = vst [vmem:[#allocation105_spill] sm:$0xff] %v16533_v8  ;;  %v1621_v53 = vcombine.high %v1613_v60, %v1613_v60  ;;  %v1620_v15 = vrot.slane %v1606_v37, %v14519_v5  ;;  %v4930_v27 = vrot.slane %v16513_v32, %v15047_v39  ;;  %v3220_v12 = vmul.f32 %v2651_v24, %v16450_v62  ;;  %v16553_v43 = vpop.xlane.xlu0 %3716 }
 0x200   :  { %21416 = vst [vmem:[#allocation108_spill] sm:$0xff] %v16539_v23  ;;  %21418 = vst [vmem:[#allocation109_spill] sm:$0xff] %v16542_v40  ;;  %v1605_v3 = vcombine.high %v1601_v25, %v1601_v25  ;;  %v1629_v55 = vrot.slane %v1613_v60, %v14519_v5  ;;  %v5641_v0 = vsel %vm5553_vm4, %v4926_v29, %v5640_v45  ;;  %v16556_v36 = vsel %vm3240_vm0, %v3219_v61, 0.0  ;;  %v21423_v25 = vld [vmem:[#allocation110_spill] sm:$0xff] }
 0x201   :  { %21420 = vst [vmem:[#allocation160_spill] sm:$0xff] %v16553_v43  ;;  %v2659_v42 = vrot.slane %v1603_v41, %v14523_v9  ;;  %v5636_v37 = vsel %vm5557_vm6, %v4902_v28, %v5635_v57  ;;  %v4934_v32 = vrot.slane %v16533_v8, %v15047_v39  ;;  %v16563_v4 = vmul.f32 0.25, %v21421_v30  ;;  %3929 = vadd.xlane.f32.xlu1 %v16456_v47  ;;  %v16574_v28 = vpop.xlane.xlu1 %3719  ;;  %v16585_v8 = vld [vmem:[#allocation5 + $0xf0] sm:$0xff]  ;;  %v71_v43 = vld [vmem:[#allocation2 + $0xf8] sm:$0xff] }
 0x202   :  { %v16566_v24 = vmul.f32 0.25, %v21423_v25  ;;  %v3221_v60 = vmul.f32 %v2655_v17, %v16450_v62  ;;  %v4942_v29 = vrot.slane %v16539_v23, %v15047_v39  ;;  %v4946_v61 = vrot.slane %v16542_v40, %v15047_v39  ;;  %21425 = vst [vmem:[#allocation161_spill] sm:$0xff] %v16574_v28  ;;  %3932 = vadd.xlane.f32.xlu0 %v16477_v20 }
 0x203   :  { %21422 = vst [vmem:[#allocation106_spill] sm:$0xff] %v16563_v4  ;;  %v1643_v57 = vrot.slane %v1621_v53, %v14519_v5  ;;  %v1622_v41 = vcombine.high %v1620_v15, %v1620_v15  ;;  %v3949_v45 = vsel %vm3240_vm0, %v3220_v12, 0.0  ;;  %v2663_v30 = vrot.slane %v1605_v3, %v14523_v9  ;;  %v16582_v25 = vpop.xlane.xlu0 %3722  ;;  %v21427_v3 = vld [vmem:[#allocation111_spill] sm:$0xff] }
 0x204   :  { %21424 = vst [vmem:[#allocation110_spill] sm:$0xff] %v16566_v24  ;;  %v2667_v47 = vrot.slane %v1629_v55, %v14523_v9  ;;  %v5642_v17 = vsel %vm5555_vm5, %v4930_v27, %v5641_v0  ;;  %21426 = vst [vmem:[#allocation162_spill] sm:$0xff] %v16582_v25  ;;  %v3222_v23 = vmul.f32 %v2659_v42, %v16450_v62  ;;  %v16593_v44 = vmul.f32 0.25, %v21427_v3 }
 0x205   :  { %v1651_v40 = vcombine.high %v1629_v55, %v1629_v55  ;;  %v1653_v28 = vcombine.high %v1643_v57, %v1643_v57  ;;  %v1636_v53 = vrot.slane %v1620_v15, %v14519_v5  ;;  %v4938_v20 = vrot.slane %v16563_v4, %v15047_v39  ;;  %3935 = vadd.xlane.f32.xlu1 %v3934_v33  ;;  %v16597_v42 = vpop.xlane.xlu1 %3725 }
 0x206   :  { %v4950_v12 = vrot.slane %v16566_v24, %v15047_v39  ;;  %21428 = vst [vmem:[#allocation111_spill] sm:$0xff] %v16593_v44  ;;  %v3952_v27 = vsel %vm3240_vm0, %v3221_v60, 0.0  ;;  %v5645_v0 = vsel %vm5547_vm1, %v4946_v61, %v4942_v29  ;;  %v1650_v55 = vrot.slane %v1622_v41, %v14519_v5  ;;  %3938 = vadd.xlane.f32.xlu0 %v16509_v59 }
 0x207   :  { %v1652_v15 = vcombine.high %v1636_v53, %v1636_v53  ;;  %v5643_v25 = vsel %vm5557_vm6, %v4934_v32, %v5642_v17  ;;  %v3223_v4 = vmul.f32 %v2663_v30, %v16450_v62  ;;  %v3224_v24 = vmul.f32 %v2667_v47, %v16585_v8  ;;  %v16609_v29 = vpop.xlane.xlu0 %3728  ;;  %v21430_v17 = vld [vmem:[#allocation112_spill] sm:$0xff] }
 0x208   :  { %v1662_v3 = vrot.slane %v71_v43, %v14519_v5  ;;  %v21429_v33 = vrot.slane %v16461_v31, %v15047_v39  ;;  %v3955_v61 = vsel %vm3240_vm0, %v3222_v23, 0.0  ;;  %v2671_v41 = vrot.slane %v1643_v57, %v14523_v9 }
 0x209   :  { %v2675_v32 = vrot.slane %v1651_v40, %v14523_v9  ;;  %v2679_v59 = vrot.slane %v1653_v28, %v14523_v9  ;;  %v5646_v62 = vsel %vm5549_vm2, %v4950_v12, %v5645_v0  ;;  %v4954_v30 = vrot.slane %v16593_v44, %v15047_v39  ;;  %3941 = vadd.xlane.f32.xlu1 %v16517_v46  ;;  %v16624_v23 = vpop.xlane.xlu1 %3731 }
 0x20a   :  { %v5637_v60 = vsel %vm5559_vm7, %v21429_v33, %v5636_v37  ;;  %v2683_v47 = vrot.slane %v1636_v53, %v14523_v9  ;;  %v5644_v37 = vsel %vm5559_vm7, %v4938_v20, %v5643_v25  ;;  %v16622_v33 = vmul.f32 0.25, %v21430_v17  ;;  %3944 = vadd.xlane.f32.xlu0 %v16528_v56 }
 0x20b   :  { %v2687_v40 = vrot.slane %v1650_v55, %v14523_v9  ;;  %v2691_v28 = vrot.slane %v1652_v15, %v14523_v9  ;;  %v1655_v57 = vcombine.high %v71_v43, %v71_v43  ;;  %v3958_v12 = vsel %vm3240_vm0, %v3223_v4, 0.0  ;;  %v16634_v25 = vpop.xlane.xlu0 %3734  ;;  %v21435_v4 = vld [vmem:[#allocation114_spill] sm:$0xff] }
 0x20c   :  { %21431 = vst [vmem:[#allocation112_spill] sm:$0xff] %v16622_v33  ;;  %v3961_v46 = vsel %vm3240_vm0, %v3224_v24, 0.0  ;;  %v1670_v0 = vcombine.high %v1662_v3, %v1662_v3  ;;  %v16632_v53 = vsel %vm5810_vm8, %v5637_v60, -inf  ;;  %21433 = vst [vmem:[#allocation164_spill] sm:$0xff] %v16634_v25  ;;  %v3225_v20 = vmul.f32 %v2671_v41, %v16585_v8  ;;  %v21450_v25 = vld [vmem:[#allocation120_spill] sm:$0xff] }
 0x20d   :  { %21432 = vst [vmem:[#allocation163_spill] sm:$0xff] %v16632_v53  ;;  %v3226_v17 = vmul.f32 %v2675_v32, %v16585_v8  ;;  %v3227_v44 = vmul.f32 %v2679_v59, %v16585_v8  ;;  %v16640_v43 = vsel %vm5810_vm8, %v5644_v37, -inf  ;;  %v5647_v56 = vsel %vm5551_vm3, %v4954_v30, %v5646_v62  ;;  %3947 = vadd.xlane.f32.xlu1 %v16556_v36  ;;  %v16650_v31 = vpop.xlane.xlu1 %3737  ;;  %v21438_v62 = vld [vmem:[#allocation117_spill] sm:$0xff] }
 0x20e   :  { %21434 = vst [vmem:[#allocation165_spill] sm:$0xff] %v16640_v43  ;;  %v16644_v15 = vmul.f32 0.25, %v21435_v4  ;;  %v3228_v24 = vmul.f32 %v2683_v47, %v16585_v8  ;;  %v1654_v60 = vcombine.high %v1650_v55, %v1650_v55  ;;  %v4958_v41 = vrot.slane %v16622_v33, %v15047_v39  ;;  %21437 = vst [vmem:[#allocation166_spill] sm:$0xff] %v16650_v31  ;;  %v21440_v4 = vld [vmem:[#allocation118_spill] sm:$0xff]  ;;  %v21442_v47 = vld [vmem:[#allocation115_spill] sm:$0xff] }
 0x20f   :  { %v3229_v32 = vmul.f32 %v2687_v40, %v16585_v8  ;;  %v3230_v59 = vmul.f32 %v2691_v28, %v16585_v8  ;;  %v1669_v37 = vrot.slane %v1655_v57, %v14519_v5  ;;  %v16656_v30 = vmul.f32 0.25, %v21438_v62  ;;  %3950 = vadd.xlane.f32.xlu0 %v3949_v45  ;;  %v16666_v53 = vpop.xlane.xlu0 %3740 }
 0x210   :  { %21436 = vst [vmem:[#allocation114_spill] sm:$0xff] %v16644_v15  ;;  %v16659_v43 = vmul.f32 0.25, %v21440_v4  ;;  %v1678_v36 = vrot.slane %v1662_v3, %v14519_v5  ;;  %v1692_v55 = vrot.slane %v1670_v0, %v14519_v5  ;;  %v16664_v33 = vmul.f32 0.25, %v21442_v47  ;;  %21444 = vst [vmem:[#allocation167_spill] sm:$0xff] %v16666_v53  ;;  %v21445_v47 = vld [vmem:[#allocation119_spill] sm:$0xff] }
 0x211   :  { %21439 = vst [vmem:[#allocation117_spill] sm:$0xff] %v16656_v30  ;;  %v3964_v40 = vsel %vm3240_vm0, %v3225_v20, 0.0  ;;  %v3967_v28 = vsel %vm3240_vm0, %v3226_v17, 0.0  ;;  %v16671_v57 = vsel %vm3240_vm0, %v3227_v44, 0.0  ;;  %v4962_v62 = vrot.slane %v16644_v15, %v15047_v39  ;;  %3953 = vadd.xlane.f32.xlu1 %v3952_v27  ;;  %v16682_v20 = vpop.xlane.xlu1 %3743 }
 0x212   :  { %21441 = vst [vmem:[#allocation118_spill] sm:$0xff] %v16659_v43  ;;  %21443 = vst [vmem:[#allocation115_spill] sm:$0xff] %v16664_v33  ;;  %v16676_v45 = vsel %vm3240_vm0, %v3228_v24, 0.0  ;;  %v1700_v3 = vcombine.high %v1678_v36, %v1678_v36  ;;  %v1702_v0 = vcombine.high %v1692_v55, %v1692_v55  ;;  %v5648_v4 = vsel %vm5553_vm4, %v4958_v41, %v5647_v56 }
 0x213   :  { %v16680_v53 = vmul.f32 0.25, %v21445_v47  ;;  %21447 = vst [vmem:[#allocation168_spill] sm:$0xff] %v16682_v20  ;;  %v2695_v17 = vrot.slane %v1654_v60, %v14523_v9  ;;  %v1671_v44 = vcombine.high %v1669_v37, %v1669_v37  ;;  %v4974_v31 = vrot.slane %v16656_v30, %v15047_v39  ;;  %3956 = vadd.xlane.f32.xlu0 %v3955_v61  ;;  %v21448_v47 = vld [vmem:[#allocation116_spill] sm:$0xff]  ;;  %v16700_v60 = vpop.xlane.xlu0 %3746  ;;  %v16704_v61 = vld [vmem:[#allocation5 + $0xf8] sm:$0xff] }
 0x214   :  { %v4978_v27 = vrot.slane %v16659_v43, %v15047_v39  ;;  %v16690_v24 = vsel %vm3240_vm0, %v3229_v32, 0.0  ;;  %v16693_v56 = vsel %vm3240_vm0, %v3230_v59, 0.0  ;;  %v4966_v41 = vrot.slane %v16664_v33, %v15047_v39  ;;  %21449 = vst [vmem:[#allocation116_spill] sm:$0xff] %v16700_v60 }
 0x215   :  { %21446 = vst [vmem:[#allocation119_spill] sm:$0xff] %v16680_v53  ;;  %v16698_v15 = vmul.f32 0.25, %v21448_v47  ;;  %v2699_v30 = vrot.slane %v1678_v36, %v14523_v9  ;;  %v2703_v20 = vrot.slane %v1692_v55, %v14523_v9  ;;  %3959 = vadd.xlane.f32.xlu1 %v3958_v12  ;;  %v2707_v32 = vrot.slane %v1700_v3, %v14523_v9  ;;  %v16715_v36 = vpop.xlane.xlu1 %3749 }
 0x216   :  { %v2711_v59 = vrot.slane %v1702_v0, %v14523_v9  ;;  %v1685_v43 = vrot.slane %v1669_v37, %v14519_v5  ;;  %v5649_v33 = vsel %vm5555_vm5, %v4962_v62, %v5648_v4  ;;  %v4982_v47 = vrot.slane %v16680_v53, %v15047_v39 }
 0x217   :  { %v16713_v60 = vmul.f32 0.25, %v21450_v25  ;;  %v3231_v12 = vmul.f32 %v2695_v17, %v16585_v8  ;;  %v1699_v55 = vrot.slane %v1671_v44, %v14519_v5  ;;  %v5652_v3 = vsel %vm5547_vm1, %v4978_v27, %v4974_v31  ;;  %3962 = vadd.xlane.f32.xlu0 %v3961_v46  ;;  %v16728_v4 = vpop.xlane.xlu0 %3752 }
 0x218   :  { %v16721_v0 = vmul.f32 0.25, %v15900_v6  ;;  %v16724_v37 = vmul.f32 0.25, %v15916_v51  ;;  %v1701_v62 = vcombine.high %v1685_v43, %v1685_v43  ;;  %v4970_v25 = vrot.slane %v16698_v15, %v15047_v39 }
 0x219   :  { %v3232_v53 = vmul.f32 %v2699_v30, %v16704_v61  ;;  %v3233_v8 = vmul.f32 %v2703_v20, %v16704_v61  ;;  %v5650_v17 = vsel %vm5557_vm6, %v4966_v41, %v5649_v33  ;;  %v16734_v31 = vmul.f32 0.25, %v15831_v63  ;;  %3965 = vadd.xlane.f32.xlu1 %v3964_v40  ;;  %v16745_v20 = vpop.xlane.xlu1 %3755 }
 0x21a   :  { %21451 = vst [vmem:[#allocation120_spill] sm:$0xff] %v16721_v0  ;;  %v3234_v51 = vmul.f32 %v2707_v32, %v16704_v61  ;;  %v3235_v6 = vmul.f32 %v2711_v59, %v16704_v61  ;;  %v2715_v46 = vrot.slane %v1685_v43, %v14523_v9  ;;  %v5653_v44 = vsel %vm5549_vm2, %v4982_v47, %v5652_v3 }
 0x21b   :  { %v4986_v27 = vrot.slane %v16713_v60, %v15047_v39  ;;  %v16743_v30 = vmul.f32 0.25, %v15932_v1  ;;  %v2719_v63 = vrot.slane %v1699_v55, %v14523_v9  ;;  %v5006_v33 = vrot.slane %v16721_v0, %v15047_v39  ;;  %3968 = vadd.xlane.f32.xlu0 %v3967_v28  ;;  %v16756_v59 = vpop.xlane.xlu0 %3758  ;;  %v21464_v0 = vld [vmem:[#allocation136_spill] sm:$0xff] }
 0x21c   :  { %v5010_v40 = vrot.slane %v16724_v37, %v15047_v39  ;;  %v2723_v43 = vrot.slane %v1701_v62, %v14523_v9  ;;  %v1703_v41 = vcombine.high %v1699_v55, %v1699_v55  ;;  %v16754_v32 = vmul.f32 0.25, %v15847_v22 }
 0x21d   :  { %21452 = vst [vmem:[#allocation169_spill] sm:$0xff] %v16743_v30  ;;  %v3982_v1 = vsel %vm3240_vm0, %v3231_v12, 0.0  ;;  %v3985_v47 = vsel %vm3240_vm0, %v3232_v53, 0.0  ;;  %v16761_v3 = vsel %vm5559_vm7, %v4970_v25, %v5650_v17  ;;  %v4990_v5 = vrot.slane %v16734_v31, %v15047_v39  ;;  %3971 = vadd.xlane.f32.xlu1 %v16671_v57  ;;  %v16774_v12 = vpop.xlane.xlu1 %3761 }
 0x21e   :  { %v16766_v28 = vmul.f32 0.25, %v15943_v35  ;;  %v3988_v22 = vsel %vm3240_vm0, %v3233_v8, 0.0  ;;  %v3236_v55 = vmul.f32 %v2715_v46, %v16704_v61  ;;  %v5654_v62 = vsel %vm5551_vm3, %v4986_v27, %v5653_v44  ;;  %v21453_v27 = vld [vmem:[#allocation122_spill] sm:$0xff] }
 0x21f   :  { %v5014_v53 = vrot.slane %v16743_v30, %v15047_v39  ;;  %v16777_v25 = vsel %vm3240_vm0, %v3234_v51, 0.0  ;;  %v3237_v17 = vmul.f32 %v2719_v63, %v16704_v61  ;;  %v5659_v35 = vsel %vm5547_vm1, %v5010_v40, %v5006_v33  ;;  %3974 = vadd.xlane.f32.xlu0 %v16676_v45  ;;  %v16798_v45 = vpop.xlane.xlu0 %3764 }
 0x220   :  { %v16783_v57 = vsel %vm3240_vm0, %v3235_v6, 0.0  ;;  %v3238_v8 = vmul.f32 %v2723_v43, %v16704_v61  ;;  %v2727_v46 = vrot.slane %v1703_v41, %v14523_v9  ;;  %v4994_v44 = vrot.slane %v16754_v32, %v15047_v39 }
 0x221   :  { %v16790_v30 = vmul.f32 0.25, %v21453_v27  ;;  %v16793_v51 = vmul.f32 0.25, %v16040_v26  ;;  %v16796_v63 = vmul.f32 0.25, %v16055_v16  ;;  %v5655_v6 = vsel %vm5553_vm4, %v4990_v5, %v5654_v62  ;;  %3977 = vadd.xlane.f32.xlu1 %v16690_v24  ;;  %v16817_v5 = vpop.xlane.xlu1 %3767 }
 0x222   :  { %v5018_v33 = vrot.slane %v16766_v28, %v15047_v39  ;;  %v16804_v40 = vmul.f32 0.25, %v15961_v7  ;;  %v16808_v43 = vsel %vm3240_vm0, %v3236_v55, 0.0  ;;  %v5660_v26 = vsel %vm5549_vm2, %v5014_v53, %v5659_v35  ;;  %v21459_v7 = vld [vmem:[#allocation126_spill] sm:$0xff] }
 0x223   :  { %21454 = vst [vmem:[#allocation122_spill] sm:$0xff] %v16790_v30  ;;  %21455 = vst [vmem:[#allocation170_spill] sm:$0xff] %v16793_v51  ;;  %v16812_v16 = vmul.f32 0.25, %v16171_v49  ;;  %v16815_v41 = vmul.f32 0.25, %v16195_v58  ;;  %v16820_v62 = vsel %vm3240_vm0, %v3237_v17, 0.0  ;;  %v16823_v27 = vmul.f32 0.25, %v21459_v7  ;;  %3980 = vadd.xlane.f32.xlu0 %v16693_v56  ;;  %v16839_v35 = vpop.xlane.xlu0 %3770 }
 0x224   :  { %21456 = vst [vmem:[#allocation171_spill] sm:$0xff] %v16804_v40  ;;  %v16826_v24 = vmul.f32 0.25, %v16070_v19  ;;  %v16830_v55 = vsel %vm3240_vm0, %v3238_v8, 0.0  ;;  %v3239_v49 = vmul.f32 %v2727_v46, %v16704_v61  ;;  %v4998_v58 = vrot.slane %v16790_v30, %v15047_v39  ;;  %v21462_v7 = vld [vmem:[#allocation133_spill] sm:$0xff] }
 0x225   :  { %21457 = vst [vmem:[#allocation172_spill] sm:$0xff] %v16812_v16  ;;  %21458 = vst [vmem:[#allocation173_spill] sm:$0xff] %v16815_v41  ;;  %v5038_v53 = vrot.slane %v16793_v51, %v15047_v39  ;;  %v5042_v17 = vrot.slane %v16796_v63, %v15047_v39  ;;  %v5656_v19 = vsel %vm5555_vm5, %v4994_v44, %v5655_v6  ;;  %v16846_v61 = vmul.f32 0.25, %v15980_v14 }
 0x226   :  { %21460 = vst [vmem:[#allocation126_spill] sm:$0xff] %v16826_v24  ;;  %v5661_v56 = vsel %vm5551_vm3, %v5018_v33, %v5660_v26  ;;  %v5022_v8 = vrot.slane %v16804_v40, %v15047_v39  ;;  %v16849_v46 = vmul.f32 0.25, %v16209_v50  ;;  %3983 = vadd.xlane.f32.xlu1 %v3982_v1  ;;  %v16852_v51 = vmul.f32 0.25, %v21462_v7  ;;  %v16861_v33 = vpop.xlane.xlu1 %3773 }
 0x227   :  { %v16855_v30 = vmul.f32 0.25, %v21464_v0  ;;  %v5070_v44 = vrot.slane %v16812_v16, %v15047_v39  ;;  %v5074_v6 = vrot.slane %v16815_v41, %v15047_v39  ;;  %v5046_v50 = vrot.slane %v16826_v24, %v15047_v39  ;;  %3986 = vadd.xlane.f32.xlu0 %v3985_v47  ;;  %v16880_v40 = vpop.xlane.xlu0 %3776 }
 0x228   :  { %21461 = vst [vmem:[#allocation174_spill] sm:$0xff] %v16849_v46  ;;  %21463 = vst [vmem:[#allocation133_spill] sm:$0xff] %v16852_v51  ;;  %v16868_v1 = vmul.f32 0.25, %v16225_v34  ;;  %v16871_v0 = vsel %vm3240_vm0, %v3239_v49, 0.0  ;;  %v5666_v26 = vsel %vm5547_vm1, %v5042_v17, %v5038_v53  ;;  %v16875_v7 = vmul.f32 0.25, %v16315_v21  ;;  %v21469_v53 = vld [vmem:[#allocation134_spill] sm:$0xff] }
 0x229   :  { %v16878_v16 = vmul.f32 0.25, %v16333_v48  ;;  %v16883_v14 = vsel %vm5557_vm6, %v4998_v58, %v5656_v19  ;;  %v5662_v34 = vsel %vm5553_vm4, %v5022_v8, %v5661_v56  ;;  %v5026_v47 = vrot.slane %v16846_v61, %v15047_v39 }
 0x22a   :  { %21465 = vst [vmem:[#allocation136_spill] sm:$0xff] %v16868_v1  ;;  %21466 = vst [vmem:[#allocation175_spill] sm:$0xff] %v16875_v7  ;;  %v16889_v49 = vmul.f32 0.25, %v16097_v52  ;;  %v5078_v21 = vrot.slane %v16849_v46, %v15047_v39  ;;  %3989 = vadd.xlane.f32.xlu1 %v3988_v22  ;;  %v5030_v48 = vrot.slane %v16852_v51, %v15047_v39  ;;  %v16896_v17 = vmul.f32 0.25, %v21469_v53  ;;  %v16901_v56 = vpop.xlane.xlu1 %3779 }
 0x22b   :  { %21467 = vst [vmem:[#allocation176_spill] sm:$0xff] %v16878_v16  ;;  %v5050_v58 = vrot.slane %v16855_v30, %v15047_v39  ;;  %v5673_v19 = vsel %vm5547_vm1, %v5074_v6, %v5070_v44  ;;  %v5667_v52 = vsel %vm5549_vm2, %v5046_v50, %v5666_v26  ;;  %v5082_v8 = vrot.slane %v16868_v1, %v15047_v39  ;;  %v16923_v26 = vpop.xlane.xlu0 %3782 }
 0x22c   :  { %21468 = vst [vmem:[#allocation177_spill] sm:$0xff] %v16889_v49  ;;  %v16907_v22 = vmul.f32 0.25, %v16238_v18  ;;  %v16910_v46 = vmul.f32 0.25, %v16346_v54  ;;  %3992 = vadd.xlane.f32.xlu0 %v16777_v25  ;;  %v5102_v53 = vrot.slane %v16875_v7, %v15047_v39  ;;  %v5106_v44 = vrot.slane %v16878_v16, %v15047_v39  ;;  %v21491_v16 = vld [vmem:[#allocation141_spill] sm:$0xff] }
 0x22d   :  { %v16918_v6 = vmul.f32 0.25, %v16453_v2  ;;  %v16921_v50 = vmul.f32 0.25, %v16474_v10  ;;  %v5054_v18 = vrot.slane %v16889_v49, %v15047_v39  ;;  %v16928_v54 = vmul.f32 0.25, %v16111_v11 }
 0x22e   :  { %21470 = vst [vmem:[#allocation134_spill] sm:$0xff] %v16907_v22  ;;  %21471 = vst [vmem:[#allocation178_spill] sm:$0xff] %v16910_v46  ;;  %v5674_v25 = vsel %vm5549_vm2, %v5078_v21, %v5673_v19  ;;  %3995 = vadd.xlane.f32.xlu1 %v16783_v57  ;;  %v5663_v7 = vsel %vm5555_vm5, %v5026_v47, %v5662_v34  ;;  %v5668_v10 = vsel %vm5551_vm3, %v5050_v58, %v5667_v52  ;;  %v16942_v49 = vpop.xlane.xlu1 %3785  ;;  %v21476_v21 = vld [vmem:[#allocation145_spill] sm:$0xff]  ;;  %v21478_v47 = vld [vmem:[#allocation155_spill] sm:$0xff] }
 0x22f   :  { %21472 = vst [vmem:[#allocation179_spill] sm:$0xff] %v16918_v6  ;;  %21473 = vst [vmem:[#allocation180_spill] sm:$0xff] %v16921_v50  ;;  %v16937_v24 = vmul.f32 0.25, %v16128_v13  ;;  %v16940_v51 = vmul.f32 0.25, %v16366_v38  ;;  %v5086_v11 = vrot.slane %v16907_v22, %v15047_v39  ;;  %v16947_v57 = vmul.f32 0.25, %v21476_v21  ;;  %v16961_v21 = vpop.xlane.xlu0 %3788 }
 0x230   :  { %v5110_v34 = vrot.slane %v16910_v46, %v15047_v39  ;;  %v16952_v19 = vmul.f32 0.25, %v21478_v47  ;;  %3998 = vadd.xlane.f32.xlu0 %v16808_v43  ;;  %v5675_v13 = vsel %vm5551_vm3, %v5082_v8, %v5674_v25  ;;  %v5680_v38 = vsel %vm5547_vm1, %v5106_v44, %v5102_v53  ;;  %v21480_v46 = vld [vmem:[#allocation150_spill] sm:$0xff]  ;;  %v21482_v53 = vld [vmem:[#allocation147_spill] sm:$0xff] }
 0x231   :  { %21474 = vst [vmem:[#allocation181_spill] sm:$0xff] %v16937_v24  ;;  %21475 = vst [vmem:[#allocation182_spill] sm:$0xff] %v16940_v51  ;;  %v5134_v58 = vrot.slane %v16918_v6, %v15047_v39  ;;  %v5138_v52 = vrot.slane %v16921_v50, %v15047_v39  ;;  %v5669_v2 = vsel %vm5553_vm4, %v5054_v18, %v5668_v10  ;;  %v16967_v22 = vmul.f32 0.25, %v21480_v46  ;;  %v21484_v18 = vld [vmem:[#allocation156_spill] sm:$0xff]  ;;  %v21488_v50 = vld [vmem:[#allocation162_spill] sm:$0xff] }
 0x232   :  { %21477 = vst [vmem:[#allocation145_spill] sm:$0xff] %v16947_v57  ;;  %21479 = vst [vmem:[#allocation155_spill] sm:$0xff] %v16952_v19  ;;  %v5058_v47 = vrot.slane %v16928_v54, %v15047_v39  ;;  %4001 = vadd.xlane.f32.xlu1 %v16820_v62  ;;  %v5664_v43 = vsel %vm5557_vm6, %v5030_v48, %v5663_v7  ;;  %v5062_v8 = vrot.slane %v16937_v24, %v15047_v39  ;;  %v16981_v6 = vpop.xlane.xlu1 %3791 }
 0x233   :  { %21481 = vst [vmem:[#allocation150_spill] sm:$0xff] %v16967_v22  ;;  %v16974_v44 = vmul.f32 0.25, %v21482_v53  ;;  %v5114_v25 = vrot.slane %v16940_v51, %v15047_v39  ;;  %v16979_v10 = vmul.f32 0.25, %v21484_v18  ;;  %v5676_v46 = vsel %vm5553_vm4, %v5086_v11, %v5675_v13  ;;  %v21486_v53 = vld [vmem:[#allocation151_spill] sm:$0xff]  ;;  %v17000_v13 = vpop.xlane.xlu0 %3794 }
 0x234   :  { %v5090_v62 = vrot.slane %v16947_v57, %v15047_v39  ;;  %v5681_v7 = vsel %vm5549_vm2, %v5110_v34, %v5680_v38  ;;  %v5142_v48 = vrot.slane %v16952_v19, %v15047_v39  ;;  %4004 = vadd.xlane.f32.xlu0 %v16830_v55  ;;  %v16991_v24 = vmul.f32 0.25, %v21486_v53  ;;  %v21493_v55 = vld [vmem:[#allocation158_spill] sm:$0xff] }
 0x235   :  { %21483 = vst [vmem:[#allocation147_spill] sm:$0xff] %v16974_v44  ;;  %21485 = vst [vmem:[#allocation156_spill] sm:$0xff] %v16979_v10  ;;  %v5687_v18 = vsel %vm5547_vm1, %v5138_v52, %v5134_v58  ;;  %v16995_v51 = vmul.f32 0.25, %v21488_v50  ;;  %v16998_v11 = vmul.f32 0.25, %v16597_v42  ;;  %v17003_v34 = vmul.f32 0.25, %v21491_v16  ;;  %v21495_v42 = vld [vmem:[#allocation148_spill] sm:$0xff] }
 0x236   :  { %21487 = vst [vmem:[#allocation151_spill] sm:$0xff] %v16991_v24  ;;  %v5118_v38 = vrot.slane %v16967_v22, %v15047_v39  ;;  %v17008_v19 = vmul.f32 0.25, %v21493_v55  ;;  %4007 = vadd.xlane.f32.xlu1 %v16871_v0  ;;  %v5670_v58 = vsel %vm5555_vm5, %v5058_v47, %v5669_v2  ;;  %v5094_v50 = vrot.slane %v16974_v44, %v15047_v39  ;;  %v17020_v57 = vpop.xlane.xlu1 %3797  ;;  %v21497_v22 = vld [vmem:[#allocation152_spill] sm:$0xff] }
 0x237   :  { %21489 = vst [vmem:[#allocation162_spill] sm:$0xff] %v16995_v51  ;;  %21490 = vst [vmem:[#allocation183_spill] sm:$0xff] %v16998_v11  ;;  %v17015_v52 = vmul.f32 0.25, %v21495_v42  ;;  %v5682_v53 = vsel %vm5551_vm3, %v5114_v25, %v5681_v7  ;;  %v5146_v16 = vrot.slane %v16979_v10, %v15047_v39  ;;  %v17023_v55 = vmul.f32 0.25, %v21497_v22  ;;  %v21500_v47 = vld [vmem:[#allocation96_spill] sm:$0xff]  ;;  %v21501_v7 = vld [vmem:[#allocation159_spill] sm:$0xff] }
 0x238   :  { %21492 = vst [vmem:[#allocation141_spill] sm:$0xff] %v17003_v34  ;;  %21494 = vst [vmem:[#allocation158_spill] sm:$0xff] %v17008_v19  ;;  %v5688_v0 = vsel %vm5549_vm2, %v5142_v48, %v5687_v18  ;;  %v17027_v2 = vmul.f32 0.25, %v16609_v29  ;;  %5812 = vmax.xlane.f32.xlu0 %v21500_v47  ;;  %v5677_v42 = vsel %vm5555_vm5, %v5090_v62, %v5676_v46  ;;  %v17034_v44 = vmul.f32 0.25, %v21501_v7  ;;  %v17040_v48 = vpop.xlane.xlu0 %3800  ;;  %v21503_v62 = vld [vmem:[#allocation113_spill] sm:$0xff] }
 0x239   :  { %21496 = vst [vmem:[#allocation148_spill] sm:$0xff] %v17015_v52  ;;  %21498 = vst [vmem:[#allocation152_spill] sm:$0xff] %v17023_v55  ;;  %v5122_v25 = vrot.slane %v16991_v24, %v15047_v39  ;;  %v5166_v10 = vrot.slane %v16995_v51, %v15047_v39  ;;  %v5170_v22 = vrot.slane %v16998_v11, %v15047_v39  ;;  %v21504_v51 = vld [vmem:[#allocation153_spill] sm:$0xff]  ;;  %v17056_v1 = vmul.f32 0.25, %v16624_v23 }
 0x23a   :  { %21499 = vst [vmem:[#allocation184_spill] sm:$0xff] %v17027_v2  ;;  %21502 = vst [vmem:[#allocation96_spill] sm:$0xff] %v17034_v44  ;;  %v5066_v29 = vrot.slane %v17003_v34, %v15047_v39  ;;  %v5683_v18 = vsel %vm5553_vm4, %v5118_v38, %v5682_v53  ;;  %v5150_v46 = vrot.slane %v17008_v19, %v15047_v39  ;;  %5815 = vmax.xlane.f32.xlu1 %v21503_v62  ;;  %v17058_v41 = vpop.xlane.xlu1 %3803  ;;  %v21507_v53 = vld [vmem:[#allocation160_spill] sm:$0xff] }
 0x23b   :  { %v5671_v47 = vsel %vm5557_vm6, %v5062_v8, %v5670_v58  ;;  %v5098_v7 = vrot.slane %v17015_v52, %v15047_v39  ;;  %v17052_v24 = vmul.f32 0.25, %v21504_v51  ;;  %v5689_v11 = vsel %vm5551_vm3, %v5146_v16, %v5688_v0  ;;  %21506 = vst [vmem:[#allocation113_spill] sm:$0xff] %v17056_v1  ;;  %v21509_v58 = vld [vmem:[#allocation121_spill] sm:$0xff] }
 0x23c   :  { %v5126_v38 = vrot.slane %v17023_v55, %v15047_v39  ;;  %v17063_v62 = vmul.f32 0.25, %v21507_v53  ;;  %v5174_v8 = vrot.slane %v17027_v2, %v15047_v39  ;;  %5818 = vmax.xlane.f32.xlu0 %v21509_v58  ;;  %v5678_v51 = vsel %vm5557_vm6, %v5094_v50, %v5677_v42  ;;  %v17072_v0 = vpop.xlane.xlu0 %3806  ;;  %v21510_v2 = vld [vmem:[#allocation164_spill] sm:$0xff]  ;;  %v21512_v58 = vld [vmem:[#allocation129_spill] sm:$0xff] }
 0x23d   :  { %21505 = vst [vmem:[#allocation159_spill] sm:$0xff] %v17052_v24  ;;  %v5154_v16 = vrot.slane %v17034_v44, %v15047_v39  ;;  %v5694_v23 = vsel %vm5547_vm1, %v5170_v22, %v5166_v10  ;;  %v17076_v19 = vsel %vm5810_vm8, %v16761_v3, -inf  ;;  %v5684_v53 = vsel %vm5555_vm5, %v5122_v25, %v5683_v18  ;;  %v21518_v44 = vld [vmem:[#allocation166_spill] sm:$0xff] }
 0x23e   :  { %21508 = vst [vmem:[#allocation153_spill] sm:$0xff] %v17063_v62  ;;  %v5690_v55 = vsel %vm5553_vm4, %v5150_v46, %v5689_v11  ;;  %v17081_v52 = vmul.f32 0.25, %v21510_v2  ;;  %5821 = vmax.xlane.f32.xlu1 %v21512_v58  ;;  %v21513_v50 = vrot.slane %v16823_v27, %v15047_v39  ;;  %v21514_v42 = vrot.slane %v16896_v17, %v15047_v39  ;;  %v17097_v2 = vpop.xlane.xlu1 %3809  ;;  %v21515_v46 = vld [vmem:[#allocation161_spill] sm:$0xff] }
 0x23f   :  { %v5130_v25 = vrot.slane %v17052_v24, %v15047_v39  ;;  %v5178_v11 = vrot.slane %v17056_v1, %v15047_v39  ;;  %v5672_v22 = vsel %vm5559_vm7, %v5066_v29, %v5671_v47  ;;  %v5679_v18 = vsel %vm5559_vm7, %v5098_v7, %v5678_v51  ;;  %v21520_v24 = vld [vmem:[#allocation116_spill] sm:$0xff]  ;;  %v21523_v51 = vld [vmem:[#allocation137_spill] sm:$0xff] }
 0x240   :  { %21511 = vst [vmem:[#allocation160_spill] sm:$0xff] %v17081_v52  ;;  %v5658_v10 = vsel %vm5559_vm7, %v21513_v50, %v16883_v14  ;;  %v5665_v3 = vsel %vm5559_vm7, %v21514_v42, %v5664_v43  ;;  %v5158_v14 = vrot.slane %v17063_v62, %v15047_v39  ;;  %v17104_v58 = vmul.f32 0.25, %v21515_v46  ;;  %v21517_v50 = vld [vmem:[#allocation135_spill] sm:$0xff]  ;;  %v17118_v47 = vpop.xlane.xlu0 %3812 }
 0x241   :  { %v5695_v43 = vsel %vm5549_vm2, %v5174_v8, %v5694_v23  ;;  %5824 = vmax.xlane.f32.xlu0 %v21517_v50  ;;  %v5685_v42 = vsel %vm5557_vm6, %v5126_v38, %v5684_v53  ;;  %v17110_v1 = vmul.f32 0.25, %v21518_v44  ;;  %v17113_v34 = vmul.f32 0.25, %v21520_v24  ;;  %v21528_v46 = vld [vmem:[#allocation167_spill] sm:$0xff] }
 0x242   :  { %21516 = vst [vmem:[#allocation121_spill] sm:$0xff] %v17104_v58  ;;  %v17116_v29 = vmul.f32 0.25, %v16715_v36  ;;  %v5691_v7 = vsel %vm5555_vm5, %v5154_v16, %v5690_v55  ;;  %v5182_v8 = vrot.slane %v17081_v52, %v15047_v39  ;;  %5827 = vmax.xlane.f32.xlu1 %v21523_v51  ;;  %v17125_v38 = vsel %vm5810_vm8, %v5658_v10, -inf  ;;  %v17140_v16 = vpop.xlane.xlu1 %3815 }
 0x243   :  { %21519 = vst [vmem:[#allocation164_spill] sm:$0xff] %v17110_v1  ;;  %21521 = vst [vmem:[#allocation129_spill] sm:$0xff] %v17113_v34  ;;  %v17128_v44 = vsel %vm5810_vm8, %v5665_v3, -inf  ;;  %v17131_v24 = vsel %vm5810_vm8, %v5672_v22, -inf  ;;  %v5696_v36 = vsel %vm5551_vm3, %v5178_v11, %v5695_v43  ;;  %v17135_v23 = vmul.f32 0.25, %v16839_v35  ;;  %v21527_v22 = vld [vmem:[#allocation144_spill] sm:$0xff] }
 0x244   :  { %21522 = vst [vmem:[#allocation161_spill] sm:$0xff] %v17116_v29  ;;  %v17138_v55 = vmul.f32 0.25, %v16861_v33  ;;  %v5686_v53 = vsel %vm5559_vm7, %v5130_v25, %v5685_v42  ;;  %v5162_v10 = vrot.slane %v17104_v58, %v15047_v39  ;;  %v17146_v3 = vmul.f32 0.25, %v16728_v4  ;;  %v3819_v50 = vpop.xlane.xlu0 %3818 }
 0x245   :  { %21524 = vst [vmem:[#allocation135_spill] sm:$0xff] %v17135_v23  ;;  %5830 = vmax.xlane.f32.xlu0 %v21527_v22  ;;  %v17150_v11 = vsel %vm5810_vm8, %v5679_v18, -inf  ;;  %v5692_v35 = vsel %vm5557_vm6, %v5158_v14, %v5691_v7  ;;  %v5186_v33 = vrot.slane %v17110_v1, %v15047_v39  ;;  %v17156_v43 = vmul.f32 0.25, %v21528_v46  ;;  %v21532_v7 = vld [vmem:[#allocation146_spill] sm:$0xff] }
 0x246   :  { %21525 = vst [vmem:[#allocation166_spill] sm:$0xff] %v17138_v55  ;;  %21526 = vst [vmem:[#allocation116_spill] sm:$0xff] %v17146_v3  ;;  %v5198_v25 = vrot.slane %v17113_v34, %v15047_v39  ;;  %v5202_v4 = vrot.slane %v17116_v29, %v15047_v39  ;;  %v5697_v42 = vsel %vm5553_vm4, %v5182_v8, %v5696_v36  ;;  %v17164_v18 = vmul.f32 0.25, %v16745_v20  ;;  %v3822_v8 = vpop.xlane.xlu1 %3821 }
 0x247   :  { %21529 = vst [vmem:[#allocation137_spill] sm:$0xff] %v17156_v43  ;;  %v17167_v14 = vmul.f32 0.25, %v16880_v40  ;;  %5833 = vmax.xlane.f32.xlu1 %v21532_v7  ;;  %v17171_v51 = vsel %vm5810_vm8, %v5686_v53, -inf  ;;  %v5230_v22 = vrot.slane %v17135_v23, %v15047_v39  ;;  %v5234_v46 = vrot.slane %v17138_v55, %v15047_v39  ;;  %v21535_v40 = vld [vmem:[#allocation168_spill] sm:$0xff]  ;;  %v21538_v23 = vld [vmem:[#allocation149_spill] sm:$0xff] }
 0x248   :  { %21530 = vst [vmem:[#allocation144_spill] sm:$0xff] %v17164_v18  ;;  %v17178_v34 = vmul.f32 0.25, %v17000_v13  ;;  %v17181_v20 = vmul.f32 0.25, %v17020_v57  ;;  %v17184_v36 = vmul.f32 0.25, %v21535_v40  ;;  %v5206_v53 = vrot.slane %v17146_v3, %v15047_v39  ;;  %v3825_v40 = vpop.xlane.xlu0 %3824 }
 0x249   :  { %21531 = vst [vmem:[#allocation167_spill] sm:$0xff] %v17167_v14  ;;  %v17189_v7 = vmul.f32 0.25, %v16756_v59  ;;  %5836 = vmax.xlane.f32.xlu0 %v21538_v23  ;;  %v17193_v52 = vsel %vm5559_vm7, %v5162_v10, %v5692_v35  ;;  %v5190_v13 = vrot.slane %v17156_v43, %v15047_v39  ;;  %v5701_v57 = vsel %vm5547_vm1, %v5202_v4, %v5198_v25  ;;  %v21543_v35 = vld [vmem:[#allocation154_spill] sm:$0xff] }
 0x24a   :  { %21533 = vst [vmem:[#allocation146_spill] sm:$0xff] %v17178_v34  ;;  %21534 = vst [vmem:[#allocation185_spill] sm:$0xff] %v17181_v20  ;;  %v17199_v62 = vmul.f32 0.25, %v16901_v56  ;;  %v5698_v55 = vsel %vm5555_vm5, %v5186_v33, %v5697_v42  ;;  %v5238_v59 = vrot.slane %v17167_v14, %v15047_v39  ;;  %v17205_v3 = vmul.f32 0.25, %v17040_v48  ;;  %v3828_v42 = vpop.xlane.xlu1 %3827  ;;  %v21545_v14 = vld [vmem:[#allocation157_spill] sm:$0xff] }
 0x24b   :  { %21536 = vst [vmem:[#allocation168_spill] sm:$0xff] %v17184_v36  ;;  %21537 = vst [vmem:[#allocation186_spill] sm:$0xff] %v17189_v7  ;;  %v17207_v23 = vmul.f32 0.25, %v3819_v50  ;;  %v17209_v10 = vmul.f32 0.25, %v3822_v8  ;;  %5839 = vmax.xlane.f32.xlu1 %v21543_v35  ;;  %v5210_v25 = vrot.slane %v17164_v18, %v15047_v39  ;;  %v5708_v56 = vsel %vm5547_vm1, %v5234_v46, %v5230_v22 }
 0x24c   :  { %21539 = vst [vmem:[#allocation149_spill] sm:$0xff] %v17199_v62  ;;  %21540 = vst [vmem:[#allocation187_spill] sm:$0xff] %v17205_v3  ;;  %v5262_v33 = vrot.slane %v17178_v34, %v15047_v39  ;;  %v5266_v4 = vrot.slane %v17181_v20, %v15047_v39  ;;  %v5194_v48 = vrot.slane %v17184_v36, %v15047_v39  ;;  %v17225_v35 = vmul.f32 0.25, %v16923_v26 }
 0x24d   :  { %21541 = vst [vmem:[#allocation188_spill] sm:$0xff] %v17207_v23  ;;  %21542 = vst [vmem:[#allocation189_spill] sm:$0xff] %v17209_v10  ;;  %v5702_v50 = vsel %vm5549_vm2, %v5206_v53, %v5701_v57  ;;  %v5214_v8 = vrot.slane %v17189_v7, %v15047_v39  ;;  %5842 = vmax.xlane.f32.xlu0 %v21545_v14  ;;  %v17229_v22 = vmul.f32 0.25, %v16774_v12  ;;  %v17234_v34 = vmul.f32 0.25, %v17058_v41  ;;  %v3831_v53 = vpop.xlane.xlu0 %3830  ;;  %v21549_v7 = vld [vmem:[#allocation163_spill] sm:$0xff] }
 0x24e   :  { %21544 = vst [vmem:[#allocation154_spill] sm:$0xff] %v17225_v35  ;;  %v5242_v46 = vrot.slane %v17199_v62, %v15047_v39  ;;  %v17236_v43 = vmul.f32 0.25, %v3825_v40  ;;  %v5709_v57 = vsel %vm5549_vm2, %v5238_v59, %v5708_v56  ;;  %v5270_v26 = vrot.slane %v17205_v3, %v15047_v39  ;;  %v3834_v62 = vpop.xlane.xlu1 %3833 }
 0x24f   :  { %21546 = vst [vmem:[#allocation157_spill] sm:$0xff] %v17229_v22  ;;  %21547 = vst [vmem:[#allocation190_spill] sm:$0xff] %v17234_v34  ;;  %v5294_v14 = vrot.slane %v17207_v23, %v15047_v39  ;;  %v5298_v12 = vrot.slane %v17209_v10, %v15047_v39  ;;  %5845 = vmax.xlane.f32.xlu1 %v21549_v7  ;;  %v5703_v20 = vsel %vm5551_vm3, %v5210_v25, %v5702_v50  ;;  %v21554_v25 = vld [vmem:[#allocation165_spill] sm:$0xff] }
 0x250   :  { %21548 = vst [vmem:[#allocation191_spill] sm:$0xff] %v17236_v43  ;;  %v17248_v41 = vmul.f32 0.25, %v16942_v49  ;;  %v5715_v40 = vsel %vm5547_vm1, %v5266_v4, %v5262_v33  ;;  %v5699_v59 = vsel %vm5557_vm6, %v5190_v13, %v5698_v55  ;;  %v17253_v56 = vmul.f32 0.25, %v16798_v45 }
 0x251   :  { %v5246_v23 = vrot.slane %v17225_v35, %v15047_v39  ;;  %v17258_v3 = vmul.f32 0.25, %v17072_v0  ;;  %v17260_v7 = vmul.f32 0.25, %v3828_v42  ;;  %5848 = vmax.xlane.f32.xlu0 %v21554_v25  ;;  %v5218_v49 = vrot.slane %v17229_v22, %v15047_v39  ;;  %v3837_v13 = vpop.xlane.xlu0 %3836 }
 0x252   :  { %21550 = vst [vmem:[#allocation163_spill] sm:$0xff] %v17248_v41  ;;  %21551 = vst [vmem:[#allocation192_spill] sm:$0xff] %v17253_v56  ;;  %v5710_v33 = vsel %vm5551_vm3, %v5242_v46, %v5709_v57  ;;  %v5274_v55 = vrot.slane %v17234_v34, %v15047_v39  ;;  %v5302_v45 = vrot.slane %v17236_v43, %v15047_v39  ;;  %v17272_v0 = vmul.f32 0.25, %v16961_v21  ;;  %v3840_v43 = vpop.xlane.xlu1 %3839 }
 0x253   :  { %21552 = vst [vmem:[#allocation193_spill] sm:$0xff] %v17258_v3  ;;  %21553 = vst [vmem:[#allocation194_spill] sm:$0xff] %v17260_v7  ;;  %v5704_v4 = vsel %vm5553_vm4, %v5214_v8, %v5703_v20  ;;  %v5716_v42 = vsel %vm5549_vm2, %v5270_v26, %v5715_v40  ;;  %v5722_v50 = vsel %vm5547_vm1, %v5298_v12, %v5294_v14  ;;  %5851 = vmax.xlane.f32.xlu1 %v17076_v19 }
 0x254   :  { %21555 = vst [vmem:[#allocation165_spill] sm:$0xff] %v17272_v0  ;;  %v5250_v46 = vrot.slane %v17248_v41, %v15047_v39  ;;  %v17280_v57 = vmul.f32 0.25, %v17097_v2  ;;  %v17282_v25 = vmul.f32 0.25, %v3831_v53  ;;  %v5700_v20 = vsel %vm5559_vm7, %v5194_v48, %v5699_v59  ;;  %v21719_v41 = vld [vmem:[#allocation29_spill] sm:$0xff] }
 0x255   :  { %v5222_v21 = vrot.slane %v17253_v56, %v15047_v39  ;;  %v5711_v8 = vsel %vm5553_vm4, %v5246_v23, %v5710_v33  ;;  %v5278_v26 = vrot.slane %v17258_v3, %v15047_v39  ;;  %v5306_v19 = vrot.slane %v17260_v7, %v15047_v39  ;;  %5854 = vmax.xlane.f32.xlu0 %v17125_v38  ;;  %v3843_v14 = vpop.xlane.xlu0 %3842 }
 0x256   :  { %21556 = vst [vmem:[#allocation195_spill] sm:$0xff] %v17280_v57  ;;  %21557 = vst [vmem:[#allocation196_spill] sm:$0xff] %v17282_v25  ;;  %v17294_v2 = vmul.f32 0.25, %v16817_v5  ;;  %v5717_v53 = vsel %vm5551_vm3, %v5274_v55, %v5716_v42  ;;  %v5723_v48 = vsel %vm5549_vm2, %v5302_v45, %v5722_v50  ;;  %v5705_v12 = vsel %vm5555_vm5, %v5218_v49, %v5704_v4  ;;  %v3846_v55 = vpop.xlane.xlu1 %3845 }
 0x257   :  { %v5254_v23 = vrot.slane %v17272_v0, %v15047_v39  ;;  %v17302_v40 = vmul.f32 0.25, %v16981_v6  ;;  %v17304_v59 = vmul.f32 0.25, %v3834_v62  ;;  %v17306_v33 = vmul.f32 0.25, %v3843_v14  ;;  %5857 = vmax.xlane.f32.xlu1 %v17128_v44 }
 0x258   :  { %21558 = vst [vmem:[#allocation197_spill] sm:$0xff] %v17294_v2  ;;  %v5282_v5 = vrot.slane %v17280_v57, %v15047_v39  ;;  %v17312_v38 = vmul.f32 0.25, %v17118_v47  ;;  %v5310_v49 = vrot.slane %v17282_v25, %v15047_v39  ;;  %v5712_v45 = vsel %vm5555_vm5, %v5250_v46, %v5711_v8 }
 0x259   :  { %21559 = vst [vmem:[#allocation198_spill] sm:$0xff] %v17302_v40  ;;  %21560 = vst [vmem:[#allocation199_spill] sm:$0xff] %v17304_v59  ;;  %v5718_v6 = vsel %vm5553_vm4, %v5278_v26, %v5717_v53  ;;  %v5724_v62 = vsel %vm5551_vm3, %v5306_v19, %v5723_v48  ;;  %v5326_v4 = vrot.slane %v17306_v33, %v15047_v39  ;;  %v17321_v44 = vmul.f32 0.25, %v3846_v55  ;;  %v3849_v46 = vpop.xlane.xlu0 %3848 }
 0x25a   :  { %21561 = vst [vmem:[#allocation200_spill] sm:$0xff] %v17306_v33  ;;  %21562 = vst [vmem:[#allocation201_spill] sm:$0xff] %v17312_v38  ;;  %5860 = vmax.xlane.f32.xlu0 %v17131_v24  ;;  %v5226_v47 = vrot.slane %v17294_v2, %v15047_v39  ;;  %v17327_v42 = vmul.f32 0.25, %v17140_v16  ;;  %v17329_v50 = vmul.f32 0.25, %v3837_v13  ;;  %v5706_v8 = vsel %vm5557_vm6, %v5222_v21, %v5705_v12  ;;  %v3852_v48 = vpop.xlane.xlu1 %3851 }
 0x25b   :  { %21563 = vst [vmem:[#allocation202_spill] sm:$0xff] %v17321_v44  ;;  %v5258_v26 = vrot.slane %v17302_v40, %v15047_v39  ;;  %v5314_v19 = vrot.slane %v17304_v59, %v15047_v39  ;;  %v5330_v24 = vrot.slane %v17321_v44, %v15047_v39  ;;  %v17338_v53 = vmul.f32 0.25, %v3849_v46  ;;  %5863 = vmax.xlane.f32.xlu1 %v17150_v11 }
 0x25c   :  { %21564 = vst [vmem:[#allocation203_spill] sm:$0xff] %v17327_v42  ;;  %21565 = vst [vmem:[#allocation204_spill] sm:$0xff] %v17329_v50  ;;  %v5286_v16 = vrot.slane %v17312_v38, %v15047_v39  ;;  %v5725_v13 = vsel %vm5553_vm4, %v5310_v49, %v5724_v62  ;;  %v5713_v21 = vsel %vm5557_vm6, %v5254_v23, %v5712_v45  ;;  %v17346_v12 = vmul.f32 0.25, %v3840_v43 }
 0x25d   :  { %21566 = vst [vmem:[#allocation205_spill] sm:$0xff] %v17338_v53  ;;  %v5719_v14 = vsel %vm5555_vm5, %v5282_v5, %v5718_v6  ;;  %v5729_v55 = vsel %vm5547_vm1, %v5330_v24, %v5326_v4  ;;  %v5334_v46 = vrot.slane %v17338_v53, %v15047_v39  ;;  %v17351_v33 = vmul.f32 0.25, %v3852_v48  ;;  %v3855_v23 = vpop.xlane.xlu0 %3854 }
 0x25e   :  { %21567 = vst [vmem:[#allocation206_spill] sm:$0xff] %v17346_v12  ;;  %5866 = vmax.xlane.f32.xlu0 %v17171_v51  ;;  %v5290_v11 = vrot.slane %v17327_v42, %v15047_v39  ;;  %v5318_v49 = vrot.slane %v17329_v50, %v15047_v39  ;;  %v5868_v43 = vsel %vm5810_vm8, %v17193_v52, -inf  ;;  %v5707_v5 = vsel %vm5559_vm7, %v5226_v47, %v5706_v8  ;;  %v3858_v4 = vpop.xlane.xlu1 %3857 }
 0x25f   :  { %21568 = vst [vmem:[#allocation207_spill] sm:$0xff] %v17351_v33  ;;  %v5730_v45 = vsel %vm5549_vm2, %v5334_v46, %v5729_v55  ;;  %v5338_v6 = vrot.slane %v17351_v33, %v15047_v39  ;;  %v17364_v62 = vmul.f32 0.25, %v3855_v23  ;;  %5869 = vmax.xlane.f32.xlu1 %v5868_v43  ;;  %v5726_v51 = vsel %vm5555_vm5, %v5314_v19, %v5725_v13 }
 0x260   :  { %v5871_v24 = vsel %vm5810_vm8, %v5700_v20, -inf  ;;  %v5714_v48 = vsel %vm5559_vm7, %v5258_v26, %v5713_v21  ;;  %v5720_v53 = vsel %vm5557_vm6, %v5286_v16, %v5719_v14  ;;  %v5322_v52 = vrot.slane %v17346_v12, %v15047_v39 }
 0x261   :  { %21569 = vst [vmem:[#allocation208_spill] sm:$0xff] %v17364_v62  ;;  %v5731_v47 = vsel %vm5551_vm3, %v5338_v6, %v5730_v45  ;;  %v5342_v8 = vrot.slane %v17364_v62, %v15047_v39  ;;  %v17375_v55 = vmul.f32 0.25, %v3858_v4  ;;  %v3861_v46 = vpop.xlane.xlu0 %3860  ;;  %v5874_v19 = vsel %vm5810_vm8, %v5707_v5, -inf }
 0x262   :  { %5872 = vmax.xlane.f32.xlu0 %v5871_v24  ;;  %v5727_v20 = vsel %vm5557_vm6, %v5318_v49, %v5726_v51  ;;  %v17382_v13 = vmul.f32 0.25, %v3861_v46  ;;  %v5721_v21 = vsel %vm5559_vm7, %v5290_v11, %v5720_v53  ;;  %v3864_v14 = vpop.xlane.xlu1 %3863  ;;  %v5877_v23 = vsel %vm5810_vm8, %v5714_v48, -inf }
 0x263   :  { %21570 = vst [vmem:[#allocation209_spill] sm:$0xff] %v17375_v55  ;;  %v5732_v26 = vsel %vm5553_vm4, %v5342_v8, %v5731_v47  ;;  %v5346_v16 = vrot.slane %v17375_v55, %v15047_v39  ;;  %5875 = vmax.xlane.f32.xlu1 %v5874_v19  ;;  %v17388_v45 = vmul.f32 0.25, %v3864_v14  ;;  %v5728_v49 = vsel %vm5559_vm7, %v5322_v52, %v5727_v20 }
 0x264   :  { %21571 = vst [vmem:[#allocation210_spill] sm:$0xff] %v17382_v13  ;;  %v5350_v43 = vrot.slane %v17382_v13, %v15047_v39  ;;  %v5880_v51 = vsel %vm5810_vm8, %v5721_v21, -inf  ;;  %v5883_v48 = vsel %vm5810_vm8, %v5728_v49, -inf }
 0x265   :  { %21572 = vst [vmem:[#allocation211_spill] sm:$0xff] %v17388_v45  ;;  %v5733_v5 = vsel %vm5555_vm5, %v5346_v16, %v5732_v26  ;;  %v3867_v6 = vpop.xlane.xlu0 %3866  ;;  %v5354_v4 = vrot.slane %v17388_v45, %v15047_v39 }
 0x266   :  { %5878 = vmax.xlane.f32.xlu0 %v5877_v23  ;;  %v17395_v53 = vmul.f32 0.25, %v3867_v6  ;;  %v5734_v11 = vsel %vm5557_vm6, %v5350_v43, %v5733_v5  ;;  %v3870_v24 = vpop.xlane.xlu1 %3869 }
 0x267   :  { %5881 = vmax.xlane.f32.xlu1 %v5880_v51  ;;  %v17401_v52 = vmul.f32 0.25, %v3870_v24  ;;  %v5735_v8 = vsel %vm5559_vm7, %v5354_v4, %v5734_v11 }
 0x268   :  { %21573 = vst [vmem:[#allocation212_spill] sm:$0xff] %v17395_v53  ;;  %v5358_v47 = vrot.slane %v17395_v53, %v15047_v39  ;;  %v5886_v19 = vsel %vm5810_vm8, %v5735_v8, -inf }
 0x269   :  { %21574 = vst [vmem:[#allocation213_spill] sm:$0xff] %v17401_v52  ;;  %v3873_v46 = vpop.xlane.xlu0 %3872  ;;  %v5362_v20 = vrot.slane %v17401_v52, %v15047_v39 }
 0x26a   :  { %5884 = vmax.xlane.f32.xlu0 %v5883_v48  ;;  %v17407_v26 = vmul.f32 0.25, %v3873_v46  ;;  %v3876_v16 = vpop.xlane.xlu1 %3875 }
 0x26b   :  { %5887 = vmax.xlane.f32.xlu1 %v5886_v19  ;;  %v5736_v21 = vsel %vm5547_vm1, %v5362_v20, %v5358_v47  ;;  %v17412_v23 = vmul.f32 0.25, %v3876_v16 }
 0x26c   :  { %21575 = vst [vmem:[#allocation214_spill] sm:$0xff] %v17407_v26  ;;  %v5366_v14 = vrot.slane %v17407_v26, %v15047_v39 }
 0x26d   :  { %21576 = vst [vmem:[#allocation215_spill] sm:$0xff] %v17412_v23  ;;  %v3879_v43 = vpop.xlane.xlu0 %3878  ;;  %v5370_v5 = vrot.slane %v17412_v23, %v15047_v39 }
 0x26e   :  { %v5737_v49 = vsel %vm5549_vm2, %v5366_v14, %v5736_v21  ;;  %v17417_v6 = vmul.f32 0.25, %v3879_v43  ;;  %v3882_v51 = vpop.xlane.xlu1 %3881 }
 0x26f   :  { %v5738_v4 = vsel %vm5551_vm3, %v5370_v5, %v5737_v49  ;;  %v17422_v24 = vmul.f32 0.25, %v3882_v51 }
 0x270   :  { %21577 = vst [vmem:[#allocation216_spill] sm:$0xff] %v17417_v6  ;;  %v5374_v11 = vrot.slane %v17417_v6, %v15047_v39 }
 0x271   :  { %21578 = vst [vmem:[#allocation217_spill] sm:$0xff] %v17422_v24  ;;  %v3885_v48 = vpop.xlane.xlu0 %3884  ;;  %v5378_v8 = vrot.slane %v17422_v24, %v15047_v39  ;;  %v21627_v24 = vld [vmem:[#allocation49_spill] sm:$0xff] }
 0x272   :  { %v5739_v47 = vsel %vm5553_vm4, %v5374_v11, %v5738_v4  ;;  %v17427_v46 = vmul.f32 0.25, %v3885_v48  ;;  %v3888_v19 = vpop.xlane.xlu1 %3887 }
 0x273   :  { %v17431_v16 = vmul.f32 0.25, %v3888_v19  ;;  %v5740_v21 = vsel %vm5555_vm5, %v5378_v8, %v5739_v47 }
 0x274   :  { %21579 = vst [vmem:[#allocation218_spill] sm:$0xff] %v17427_v46  ;;  %v5382_v20 = vrot.slane %v17427_v46, %v15047_v39 }
 0x275   :  { %21580 = vst [vmem:[#allocation219_spill] sm:$0xff] %v17431_v16  ;;  %v3891_v14 = vpop.xlane.xlu0 %3890  ;;  %v5386_v43 = vrot.slane %v17431_v16, %v15047_v39 }
 0x276   :  { %v17436_v49 = vmul.f32 0.25, %v3891_v14  ;;  %v5741_v5 = vsel %vm5557_vm6, %v5382_v20, %v5740_v21  ;;  %v3894_v51 = vpop.xlane.xlu1 %3893 }
 0x277   :  { %v17441_v11 = vmul.f32 0.25, %v3894_v51  ;;  %v5742_v48 = vsel %vm5559_vm7, %v5386_v43, %v5741_v5 }
 0x278   :  { %21581 = vst [vmem:[#allocation220_spill] sm:$0xff] %v17436_v49  ;;  %v5390_v4 = vrot.slane %v17436_v49, %v15047_v39  ;;  %v5889_v46 = vsel %vm5810_vm8, %v5742_v48, -inf }
 0x279   :  { %21582 = vst [vmem:[#allocation221_spill] sm:$0xff] %v17441_v11  ;;  %v3897_v19 = vpop.xlane.xlu0 %3896  ;;  %v5394_v47 = vrot.slane %v17441_v11, %v15047_v39  ;;  %5890 = vmax.xlane.f32.xlu0 %v5889_v46 }
 0x27a   :  { %v17447_v8 = vmul.f32 0.25, %v3897_v19  ;;  %v3900_v14 = vpop.xlane.xlu1 %3899 }
 0x27b   :  { %v5743_v20 = vsel %vm5547_vm1, %v5394_v47, %v5390_v4  ;;  %v17452_v49 = vmul.f32 0.25, %v3900_v14 }
 0x27c   :  { %21583 = vst [vmem:[#allocation222_spill] sm:$0xff] %v17447_v8  ;;  %v5398_v21 = vrot.slane %v17447_v8, %v15047_v39 }
 0x27d   :  { %21584 = vst [vmem:[#allocation223_spill] sm:$0xff] %v17452_v49  ;;  %v3903_v51 = vpop.xlane.xlu0 %3902  ;;  %v5402_v5 = vrot.slane %v17452_v49, %v15047_v39 }
 0x27e   :  { %v5744_v43 = vsel %vm5549_vm2, %v5398_v21, %v5743_v20  ;;  %v17457_v48 = vmul.f32 0.25, %v3903_v51  ;;  %v3906_v6 = vpop.xlane.xlu1 %3905 }
 0x27f   :  { %v5745_v19 = vsel %vm5551_vm3, %v5402_v5, %v5744_v43  ;;  %v17462_v4 = vmul.f32 0.25, %v3906_v6 }
 0x280   :  { %21585 = vst [vmem:[#allocation224_spill] sm:$0xff] %v17457_v48  ;;  %v5406_v46 = vrot.slane %v17457_v48, %v15047_v39 }
 0x281   :  { %21586 = vst [vmem:[#allocation225_spill] sm:$0xff] %v17462_v4  ;;  %v3909_v47 = vpop.xlane.xlu0 %3908  ;;  %v5410_v8 = vrot.slane %v17462_v4, %v15047_v39 }
 0x282   :  { %v5746_v14 = vsel %vm5553_vm4, %v5406_v46, %v5745_v19  ;;  %v17467_v20 = vmul.f32 0.25, %v3909_v47  ;;  %v3912_v21 = vpop.xlane.xlu1 %3911 }
 0x283   :  { %v17471_v26 = vmul.f32 0.25, %v3912_v21  ;;  %v5747_v43 = vsel %vm5555_vm5, %v5410_v8, %v5746_v14 }
 0x284   :  { %21587 = vst [vmem:[#allocation226_spill] sm:$0xff] %v17467_v20  ;;  %v5414_v51 = vrot.slane %v17467_v20, %v15047_v39 }
 0x285   :  { %21588 = vst [vmem:[#allocation227_spill] sm:$0xff] %v17471_v26  ;;  %v3915_v5 = vpop.xlane.xlu0 %3914  ;;  %v5418_v6 = vrot.slane %v17471_v26, %v15047_v39 }
 0x286   :  { %v17476_v48 = vmul.f32 0.25, %v3915_v5  ;;  %v5748_v19 = vsel %vm5557_vm6, %v5414_v51, %v5747_v43  ;;  %v3918_v46 = vpop.xlane.xlu1 %3917 }
 0x287   :  { %v17481_v53 = vmul.f32 0.25, %v3918_v46  ;;  %v5749_v20 = vsel %vm5559_vm7, %v5418_v6, %v5748_v19 }
 0x288   :  { %21589 = vst [vmem:[#allocation228_spill] sm:$0xff] %v17476_v48  ;;  %v5422_v47 = vrot.slane %v17476_v48, %v15047_v39  ;;  %v5892_v13 = vsel %vm5810_vm8, %v5749_v20, -inf }
 0x289   :  { %21590 = vst [vmem:[#allocation229_spill] sm:$0xff] %v17481_v53  ;;  %v3921_v21 = vpop.xlane.xlu0 %3920  ;;  %v5426_v8 = vrot.slane %v17481_v53, %v15047_v39  ;;  %5893 = vmax.xlane.f32.xlu1 %v5892_v13 }
 0x28a   :  { %v17487_v14 = vmul.f32 0.25, %v3921_v21  ;;  %v3924_v5 = vpop.xlane.xlu1 %3923 }
 0x28b   :  { %v5750_v51 = vsel %vm5547_vm1, %v5426_v8, %v5422_v47  ;;  %v17492_v48 = vmul.f32 0.25, %v3924_v5 }
 0x28c   :  { %21591 = vst [vmem:[#allocation230_spill] sm:$0xff] %v17487_v14  ;;  %v5430_v43 = vrot.slane %v17487_v14, %v15047_v39 }
 0x28d   :  { %21592 = vst [vmem:[#allocation231_spill] sm:$0xff] %v17492_v48  ;;  %v3927_v46 = vpop.xlane.xlu0 %3926  ;;  %v5434_v20 = vrot.slane %v17492_v48, %v15047_v39 }
 0x28e   :  { %v5751_v6 = vsel %vm5549_vm2, %v5430_v43, %v5750_v51  ;;  %v17497_v19 = vmul.f32 0.25, %v3927_v46  ;;  %v3930_v62 = vpop.xlane.xlu1 %3929 }
 0x28f   :  { %v5752_v21 = vsel %vm5551_vm3, %v5434_v20, %v5751_v6  ;;  %v17502_v47 = vmul.f32 0.25, %v3930_v62  ;;  %v14474_v20 = vmov 0  }
 0x290   :  { %21593 = vst [vmem:[#allocation232_spill] sm:$0xff] %v17497_v19  ;;  %v5438_v13 = vrot.slane %v17497_v19, %v15047_v39  ;;  %13659 = vset.pattern.permute.xlu0 %v14474_v20  ;;  %13660 = vset.pattern.permute.xlu1 %v14474_v20 }
 0x291   :  { %21594 = vst [vmem:[#allocation233_spill] sm:$0xff] %v17502_v47  ;;  %v3933_v8 = vpop.xlane.xlu0 %3932  ;;  %v5442_v14 = vrot.slane %v17502_v47, %v15047_v39 }
 0x292   :  { %v5753_v5 = vsel %vm5553_vm4, %v5438_v13, %v5752_v21  ;;  %v17507_v51 = vmul.f32 0.25, %v3933_v8  ;;  %v3936_v43 = vpop.xlane.xlu1 %3935 }
 0x293   :  { %v17511_v48 = vmul.f32 0.25, %v3936_v43  ;;  %v5754_v6 = vsel %vm5555_vm5, %v5442_v14, %v5753_v5 }
 0x294   :  { %21595 = vst [vmem:[#allocation234_spill] sm:$0xff] %v17507_v51  ;;  %v5446_v46 = vrot.slane %v17507_v51, %v15047_v39 }
 0x295   :  { %21596 = vst [vmem:[#allocation235_spill] sm:$0xff] %v17511_v48  ;;  %v3939_v62 = vpop.xlane.xlu0 %3938  ;;  %v5450_v21 = vrot.slane %v17511_v48, %v15047_v39 }
 0x296   :  { %v17516_v13 = vmul.f32 0.25, %v3939_v62  ;;  %v5755_v8 = vsel %vm5557_vm6, %v5446_v46, %v5754_v6  ;;  %v3942_v19 = vpop.xlane.xlu1 %3941 }
 0x297   :  { %v17521_v51 = vmul.f32 0.25, %v3942_v19  ;;  %v5756_v43 = vsel %vm5559_vm7, %v5450_v21, %v5755_v8 }
 0x298   :  { %21597 = vst [vmem:[#allocation236_spill] sm:$0xff] %v17516_v13  ;;  %v5454_v47 = vrot.slane %v17516_v13, %v15047_v39  ;;  %v5895_v5 = vsel %vm5810_vm8, %v5756_v43, -inf }
 0x299   :  { %21598 = vst [vmem:[#allocation237_spill] sm:$0xff] %v17521_v51  ;;  %v3945_v14 = vpop.xlane.xlu0 %3944  ;;  %v5458_v20 = vrot.slane %v17521_v51, %v15047_v39  ;;  %5896 = vmax.xlane.f32.xlu0 %v5895_v5 }
 0x29a   :  { %v17527_v53 = vmul.f32 0.25, %v3945_v14  ;;  %v3948_v62 = vpop.xlane.xlu1 %3947 }
 0x29b   :  { %v5757_v46 = vsel %vm5547_vm1, %v5458_v20, %v5454_v47  ;;  %v17532_v13 = vmul.f32 0.25, %v3948_v62 }
 0x29c   :  { %21599 = vst [vmem:[#allocation238_spill] sm:$0xff] %v17527_v53  ;;  %v5462_v6 = vrot.slane %v17527_v53, %v15047_v39 }
 0x29d   :  { %21600 = vst [vmem:[#allocation239_spill] sm:$0xff] %v17532_v13  ;;  %v3951_v19 = vpop.xlane.xlu0 %3950  ;;  %v5466_v8 = vrot.slane %v17532_v13, %v15047_v39 }
 0x29e   :  { %v5758_v21 = vsel %vm5549_vm2, %v5462_v6, %v5757_v46  ;;  %v17537_v43 = vmul.f32 0.25, %v3951_v19  ;;  %v3954_v51 = vpop.xlane.xlu1 %3953 }
 0x29f   :  { %v5759_v14 = vsel %vm5551_vm3, %v5466_v8, %v5758_v21  ;;  %v17542_v47 = vmul.f32 0.25, %v3954_v51 }
 0x2a0   :  { %21601 = vst [vmem:[#allocation240_spill] sm:$0xff] %v17537_v43  ;;  %v5470_v5 = vrot.slane %v17537_v43, %v15047_v39 }
 0x2a1   :  { %21602 = vst [vmem:[#allocation241_spill] sm:$0xff] %v17542_v47  ;;  %v3957_v20 = vpop.xlane.xlu0 %3956  ;;  %v5474_v53 = vrot.slane %v17542_v47, %v15047_v39 }
 0x2a2   :  { %v5760_v62 = vsel %vm5553_vm4, %v5470_v5, %v5759_v14  ;;  %v17547_v46 = vmul.f32 0.25, %v3957_v20  ;;  %v3960_v6 = vpop.xlane.xlu1 %3959 }
 0x2a3   :  { %v17551_v13 = vmul.f32 0.25, %v3960_v6  ;;  %v5761_v21 = vsel %vm5555_vm5, %v5474_v53, %v5760_v62 }
 0x2a4   :  { %21603 = vst [vmem:[#allocation242_spill] sm:$0xff] %v17547_v46  ;;  %v5478_v19 = vrot.slane %v17547_v46, %v15047_v39 }
 0x2a5   :  { %21604 = vst [vmem:[#allocation243_spill] sm:$0xff] %v17551_v13  ;;  %v3963_v8 = vpop.xlane.xlu0 %3962  ;;  %v5482_v51 = vrot.slane %v17551_v13, %v15047_v39 }
 0x2a6   :  { %v17556_v43 = vmul.f32 0.25, %v3963_v8  ;;  %v5762_v14 = vsel %vm5557_vm6, %v5478_v19, %v5761_v21  ;;  %v3966_v5 = vpop.xlane.xlu1 %3965 }
 0x2a7   :  { %v17561_v47 = vmul.f32 0.25, %v3966_v5  ;;  %v5763_v46 = vsel %vm5559_vm7, %v5482_v51, %v5762_v14 }
 0x2a8   :  { %21605 = vst [vmem:[#allocation244_spill] sm:$0xff] %v17556_v43  ;;  %v5486_v20 = vrot.slane %v17556_v43, %v15047_v39  ;;  %v5898_v48 = vsel %vm5810_vm8, %v5763_v46, -inf }
 0x2a9   :  { %21606 = vst [vmem:[#allocation245_spill] sm:$0xff] %v17561_v47  ;;  %v3969_v6 = vpop.xlane.xlu0 %3968  ;;  %v5490_v53 = vrot.slane %v17561_v47, %v15047_v39  ;;  %5899 = vmax.xlane.f32.xlu1 %v5898_v48 }
 0x2aa   :  { %v17567_v62 = vmul.f32 0.25, %v3969_v6  ;;  %v3972_v8 = vpop.xlane.xlu1 %3971 }
 0x2ab   :  { %v5764_v19 = vsel %vm5547_vm1, %v5490_v53, %v5486_v20  ;;  %v17572_v43 = vmul.f32 0.25, %v3972_v8 }
 0x2ac   :  { %21607 = vst [vmem:[#allocation246_spill] sm:$0xff] %v17567_v62  ;;  %v5494_v21 = vrot.slane %v17567_v62, %v15047_v39 }
 0x2ad   :  { %21608 = vst [vmem:[#allocation247_spill] sm:$0xff] %v17572_v43  ;;  %v3975_v5 = vpop.xlane.xlu0 %3974  ;;  %v5498_v46 = vrot.slane %v17572_v43, %v15047_v39 }
 0x2ae   :  { %v5765_v51 = vsel %vm5549_vm2, %v5494_v21, %v5764_v19  ;;  %v17577_v14 = vmul.f32 0.25, %v3975_v5  ;;  %v3978_v47 = vpop.xlane.xlu1 %3977 }
 0x2af   :  { %v5766_v6 = vsel %vm5551_vm3, %v5498_v46, %v5765_v51  ;;  %v17582_v20 = vmul.f32 0.25, %v3978_v47 }
 0x2b0   :  { %21609 = vst [vmem:[#allocation248_spill] sm:$0xff] %v17577_v14  ;;  %v5502_v48 = vrot.slane %v17577_v14, %v15047_v39 }
 0x2b1   :  { %21610 = vst [vmem:[#allocation249_spill] sm:$0xff] %v17582_v20  ;;  %v3981_v53 = vpop.xlane.xlu0 %3980  ;;  %v5506_v62 = vrot.slane %v17582_v20, %v15047_v39 }
 0x2b2   :  { %v5767_v8 = vsel %vm5553_vm4, %v5502_v48, %v5766_v6  ;;  %v17587_v19 = vmul.f32 0.25, %v3981_v53 }
 0x2b3   :  { %v3984_v21 = vpop.xlane.xlu1 %3983  ;;  %v5768_v51 = vsel %vm5555_vm5, %v5506_v62, %v5767_v8 }
 0x2b4   :  { %21611 = vst [vmem:[#allocation250_spill] sm:$0xff] %v17587_v19  ;;  %v5510_v5 = vrot.slane %v17587_v19, %v15047_v39  ;;  %v17591_v43 = vmul.f32 0.25, %v3984_v21 }
 0x2b5   :  { %v3987_v46 = vpop.xlane.xlu0 %3986 }
 0x2b6   :  { %21612 = vst [vmem:[#allocation251_spill] sm:$0xff] %v17591_v43  ;;  %v5514_v47 = vrot.slane %v17591_v43, %v15047_v39  ;;  %v5769_v14 = vsel %vm5557_vm6, %v5510_v5, %v5768_v51  ;;  %v17599_v4 = vmul.f32 0.25, %v3987_v46 }
 0x2b7   :  { %v3990_v6 = vpop.xlane.xlu1 %3989 }
 0x2b8   :  { %v5770_v48 = vsel %vm5559_vm7, %v5514_v47, %v5769_v14  ;;  %21613 = vst [vmem:[#allocation252_spill] sm:$0xff] %v17599_v4  ;;  %v17601_v62 = vmul.f32 0.25, %v3990_v6  ;;  %v5518_v5 = vrot.slane %v17599_v4, %v15047_v39  ;;  %v21617_v47 = vld [vmem:[#allocation37_spill] sm:$0xff] }
 0x2b9   :  { %v3993_v20 = vpop.xlane.xlu0 %3992  ;;  %v5901_v53 = vsel %vm5810_vm8, %v5770_v48, -inf }
 0x2ba   :  { %5902 = vmax.xlane.f32.xlu0 %v5901_v53  ;;  %21614 = vst [vmem:[#allocation253_spill] sm:$0xff] %v17601_v62  ;;  %v17605_v43 = vmul.f32 0.25, %v3993_v20  ;;  %v5522_v51 = vrot.slane %v17601_v62, %v15047_v39  ;;  %v21620_v20 = vld [vmem:[#allocation11_spill] sm:$0xff] }
 0x2bb   :  { %v3996_v13 = vpop.xlane.xlu1 %3995  ;;  %v17621_v49 = vsub.s32 1, %v21620_v20  ;;  %v17625_v4 = vsub.s32 3, %v21620_v20  ;;  %v17649_v23 = vsub.s32 7, %v21620_v20 }
 0x2bc   :  { %21616 = vst [vmem:[#allocation255_spill] sm:$0xff] %v17605_v43  ;;  %v17614_v46 = vmul.f32 0.25, %v3996_v13  ;;  %v5526_v53 = vrot.slane %v17605_v43, %v15047_v39  ;;  %v5771_v11 = vsel %vm5547_vm1, %v5522_v51, %v5518_v5  ;;  %v21625_v5 = vld [vmem:[#allocation44_spill] sm:$0xff] }
 0x2bd   :  { %v3999_v26 = vpop.xlane.xlu0 %3998  ;;  %21621 = vst [vmem:[#allocation257_spill] sm:$0xff] %v17621_v49  ;;  %21622 = vst [vmem:[#allocation258_spill] sm:$0xff] %v17625_v4 }
 0x2be   :  { %21618 = vst [vmem:[#allocation37_spill] sm:$0xff] %v17614_v46  ;;  %v17627_v16 = vmul.f32 0.25, %v3999_v26  ;;  %v5772_v43 = vsel %vm5549_vm2, %v5526_v53, %v5771_v11  ;;  %21628 = vst [vmem:[#allocation49_spill] sm:$0xff] %v17649_v23 }
 0x2bf   :  { %v4002_v19 = vpop.xlane.xlu1 %4001 }
 0x2c0   :  { %21623 = vst [vmem:[#allocation259_spill] sm:$0xff] %v17627_v16  ;;  %v5534_v26 = vrot.slane %v17627_v16, %v15047_v39 }
 0x2c1   :  { %v4005_v21 = vpop.xlane.xlu0 %4004 }
 0x2c3   :  { %v4008_v8 = vpop.xlane.xlu1 %4007 }
 0x2c5   :  { %v17603_v50 = vpop.xlane.xlu0 %5812 }
 0x2c6   :  { %21615 = vst [vmem:[#allocation254_spill] sm:$0xff] %v17603_v50  ;;  %v5942_v14 = vrot.slane %v17603_v50, %v14523_v9 }
 0x2c7   :  { %v17616_v6 = vpop.xlane.xlu1 %5815 }
 0x2c8   :  { %v7219_v48 = vsub.f32 %v21617_v47, %v5942_v14  ;;  %21619 = vst [vmem:[#allocation256_spill] sm:$0xff] %v17616_v6  ;;  %v5978_v13 = vrot.slane %v17616_v6, %v17621_v49  ;;  %v5530_v14 = vrot.slane %v17614_v46, %v15047_v39  ;;  %v5986_v47 = vrot.slane %v17616_v6, %v17625_v4 }
 0x2c9   :  { %v17661_v3 = vpop.xlane.xlu0 %5818 }
 0x2ca   :  { %v7475_v25 = vmul.f32 1.442695, %v7219_v48  ;;  %v17637_v48 = vsub.s32 5, %v21620_v20  ;;  %v7228_v51 = vsub.f32 %v21625_v5, %v5978_v13  ;;  %v5773_v62 = vsel %vm5551_vm3, %v5530_v14, %v5772_v43  ;;  %v21631_v14 = vld [vmem:[#allocation59_spill] sm:$0xff] }
 0x2cb   :  { %v7230_v38 = vsub.f32 %v21627_v24, %v5986_v47  ;;  %v5774_v53 = vsel %vm5553_vm4, %v5534_v26, %v5773_v62  ;;  %v17654_v5 = vmul.f32 0.25, %v4005_v21  ;;  %v17658_v43 = vmul.f32 0.25, %v4008_v8  ;;  %21632 = vst [vmem:[#allocation59_spill] sm:$0xff] %v17661_v3  ;;  %v21634_v26 = vld [vmem:[#allocation63_spill] sm:$0xff] }
 0x2cc   :  { %13693 = vpow2.f32 %v7475_v25  ;;  %21624 = vst [vmem:[#allocation260_spill] sm:$0xff] %v17637_v48  ;;  %v17642_v25 = vmul.f32 0.25, %v4002_v19  ;;  %v5994_v46 = vrot.slane %v17616_v6, %v17637_v48  ;;  %v7493_v11 = vmul.f32 1.442695, %v7228_v51 }
 0x2cd   :  { %21629 = vst [vmem:[#allocation261_spill] sm:$0xff] %v17654_v5  ;;  %v6002_v19 = vrot.slane %v17616_v6, %v17649_v23  ;;  %21630 = vst [vmem:[#allocation262_spill] sm:$0xff] %v17658_v43  ;;  %v7497_v24 = vmul.f32 1.442695, %v7230_v38  ;;  %v17664_v51 = vsub.s32 2, %v21620_v20  ;;  %v5542_v21 = vrot.slane %v17654_v5, %v15047_v39 }
 0x2ce   :  { %21626 = vst [vmem:[#allocation44_spill] sm:$0xff] %v17642_v25  ;;  %v5538_v13 = vrot.slane %v17642_v25, %v15047_v39  ;;  %v7232_v16 = vsub.f32 %v21631_v14, %v5994_v46  ;;  %13695 = vpow2.f32 %v7493_v11  ;;  %v5946_v62 = vrot.slane %v17603_v50, %v17621_v49 }
 0x2cf   :  { %21633 = vst [vmem:[#allocation263_spill] sm:$0xff] %v17664_v51  ;;  %v7234_v8 = vsub.f32 %v21634_v26, %v6002_v19  ;;  %v5546_v38 = vrot.slane %v17658_v43, %v15047_v39  ;;  %13697 = vpow2.f32 %v7497_v24  ;;  %v6010_v11 = vrot.slane %v17661_v3, %v17621_v49 }
 0x2d0   :  { %v5775_v25 = vsel %vm5555_vm5, %v5538_v13, %v5774_v53  ;;  %v7501_v46 = vmul.f32 1.442695, %v7232_v16  ;;  %v5950_v14 = vrot.slane %v17603_v50, %v17664_v51  ;;  %v6018_v53 = vrot.slane %v17661_v3, %v17625_v4  ;;  %v21636_v13 = vld [vmem:[#allocation56_spill] sm:$0xff] }
 0x2d1   :  { %v7505_v52 = vmul.f32 1.442695, %v7234_v8  ;;  %v5776_v45 = vsel %vm5557_vm6, %v5542_v21, %v5775_v25  ;;  %v7236_v19 = vsub.f32 %v21636_v13, %v6010_v11  ;;  %v17686_v43 = vsub.s32 4, %v21620_v20  ;;  %v21638_v8 = vld [vmem:[#allocation40_spill] sm:$0xff]  ;;  %v21639_v11 = vld [vmem:[#allocation61_spill] sm:$0xff] }
 0x2d2   :  { %13699 = vpow2.f32 %v7501_v46  ;;  %v5777_v24 = vsel %vm5559_vm7, %v5546_v38, %v5776_v45  ;;  %v7221_v25 = vsub.f32 %v21638_v8, %v5950_v14  ;;  %v6026_v46 = vrot.slane %v17661_v3, %v17637_v48  ;;  %v21641_v14 = vld [vmem:[#allocation70_spill] sm:$0xff]  ;;  %v17700_v8 = vpop.xlane.xlu1 %5821 }
 0x2d3   :  { %v5904_v16 = vsel %vm5810_vm8, %v5777_v24, -inf  ;;  %21637 = vst [vmem:[#allocation63_spill] sm:$0xff] %v17686_v43  ;;  %13701 = vpow2.f32 %v7505_v52  ;;  %v7238_v45 = vsub.f32 %v21639_v11, %v6018_v53  ;;  %v7509_v38 = vmul.f32 1.442695, %v7236_v19  ;;  %v21640_v24 = vld [vmem:[#allocation42_spill] sm:$0xff] }
 0x2d4   :  { %5905 = vmax.xlane.f32.xlu1 %v5904_v16  ;;  %v5958_v13 = vrot.slane %v17603_v50, %v17686_v43  ;;  %v7479_v55 = vmul.f32 1.442695, %v7221_v25  ;;  %v7240_v52 = vsub.f32 %v21641_v14, %v6026_v46  ;;  %v17703_v19 = vsub.s32 6, %v21620_v20  ;;  %v21646_v20 = vld [vmem:[#allocation48_spill] sm:$0xff] }
 0x2d5   :  { %v5962_v11 = vrot.slane %v17603_v50, %v17637_v48 }
 0x2d6   :  { %v13694_v47 = vpop.eup %13693  ;;  %21643 = vst [vmem:[#allocation56_spill] sm:$0xff] %v17703_v19  ;;  %v7517_v46 = vmul.f32 1.442695, %v7240_v52  ;;  %v5966_v14 = vrot.slane %v17603_v50, %v17703_v19 }
 0x2d7   :  { %8244 = vperm.xlu0 %13659, %v13694_v47   ;;  %v21635_v47 = vld [vmem:[#allocation34_spill] sm:$0xff]  ;;  %v7224_v0 = vsub.f32 %v21646_v20, %v5962_v11  ;;  %v6058_v20 = vrot.slane %v17700_v8, %v17637_v48 }
 0x2d8   :  { %v7220_v5 = vsub.f32 %v21635_v47, %v5946_v62  ;;  %v13696_v26 = vpop.eup %13695  ;;  %v5954_v62 = vrot.slane %v17603_v50, %v17625_v4  ;;  %21642 = vst [vmem:[#allocation34_spill] sm:$0xff] %v17700_v8  ;;  %v21649_v11 = vld [vmem:[#allocation74_spill] sm:$0xff] }
 0x2d9   :  { %v13698_v47 = vpop.eup %13697  ;;  %v7485_v35 = vmul.f32 1.442695, %v7224_v0  ;;  %v6066_v0 = vrot.slane %v17700_v8, %v17649_v23 }
 0x2da   :  { %v7477_v21 = vmul.f32 1.442695, %v7220_v5  ;;  %v7222_v16 = vsub.f32 %v21640_v24, %v5954_v62  ;;  %v6034_v5 = vrot.slane %v17661_v3, %v17649_v23  ;;  %v21644_v62 = vld [vmem:[#allocation46_spill] sm:$0xff] }
 0x2db   :  { %8271 = vperm.xlu0 %13659, %v13696_v26   ;;  %v7513_v26 = vmul.f32 1.442695, %v7238_v45  ;;  %v6042_v45 = vrot.slane %v17700_v8, %v17621_v49 }
 0x2dc   :  { %13703 = vpow2.f32 %v7477_v21  ;;  %v13700_v53 = vpop.eup %13699  ;;  %v7223_v21 = vsub.f32 %v21644_v62, %v5958_v13  ;;  %v7481_v25 = vmul.f32 1.442695, %v7222_v16  ;;  %v6050_v13 = vrot.slane %v17700_v8, %v17625_v4  ;;  %v21647_v16 = vld [vmem:[#allocation68_spill] sm:$0xff]  ;;  %v21648_v62 = vld [vmem:[#allocation51_spill] sm:$0xff] }
 0x2dd   :  { %13705 = vpow2.f32 %v7509_v38  ;;  %v13702_v38 = vpop.eup %13701 }
 0x2de   :  { %13707 = vpow2.f32 %v7479_v55  ;;  %v7483_v33 = vmul.f32 1.442695, %v7223_v21  ;;  %v7246_v21 = vsub.f32 %v21649_v11, %v6050_v13  ;;  %v21654_v11 = vld [vmem:[#allocation87_spill] sm:$0xff] }
 0x2df   :  { %8277 = vperm.xlu0 %13659, %v13698_v47   ;;  %v21645_v47 = vld [vmem:[#allocation75_spill] sm:$0xff]  ;;  %13709 = vpow2.f32 %v7513_v26 }
 0x2e0   :  { %v7242_v24 = vsub.f32 %v21645_v47, %v6034_v5  ;;  %13711 = vpow2.f32 %v7481_v25  ;;  %v7244_v5 = vsub.f32 %v21647_v16, %v6042_v45  ;;  %v7225_v47 = vsub.f32 %v21648_v62, %v5966_v14  ;;  %v21650_v45 = vld [vmem:[#allocation52_spill] sm:$0xff]  ;;  %v21653_v62 = vld [vmem:[#allocation43_spill] sm:$0xff] }
 0x2e1   :  { %13713 = vpow2.f32 %v7517_v46  ;;  %v5974_v14 = vrot.slane %v17616_v6, %v14523_v9 }
 0x2e2   :  { %v7521_v55 = vmul.f32 1.442695, %v7242_v24  ;;  %13715 = vpow2.f32 %v7483_v33  ;;  %v7525_v25 = vmul.f32 1.442695, %v7244_v5  ;;  %v7487_v16 = vmul.f32 1.442695, %v7225_v47  ;;  %v17729_v5 = vpop.xlane.xlu0 %5824 }
 0x2e3   :  { %8283 = vperm.xlu0 %13659, %v13700_v53   ;;  %v5970_v53 = vrot.slane %v17603_v50, %v17649_v23  ;;  %v21651_v33 = vld [vmem:[#allocation79_spill] sm:$0xff]  ;;  %21652 = vst [vmem:[#allocation40_spill] sm:$0xff] %v17729_v5  ;;  %v7227_v47 = vsub.f32 %v21653_v62, %v5974_v14  ;;  %v21657_v62 = vld [vmem:[#allocation53_spill] sm:$0xff] }
 0x2e4   :  { %13717 = vpow2.f32 %v7521_v55  ;;  %v7248_v55 = vsub.f32 %v21651_v33, %v6058_v20  ;;  %v6074_v20 = vrot.slane %v17729_v5, %v17621_v49 }
 0x2e5   :  { %13719 = vpow2.f32 %v7485_v35  ;;  %v5982_v35 = vrot.slane %v17616_v6, %v17664_v51  ;;  %v7491_v33 = vmul.f32 1.442695, %v7227_v47  ;;  %v21658_v47 = vld [vmem:[#allocation89_spill] sm:$0xff] }
 0x2e6   :  { %v13704_v52 = vpop.eup %13703  ;;  %13721 = vpow2.f32 %v7525_v25 }
 0x2e7   :  { %8289 = vperm.xlu0 %13659, %v13702_v38   ;;  %v13706_v26 = vpop.eup %13705  ;;  %8247 = vperm.xlu1 %13660, %v13704_v52   ;;  %v7226_v38 = vsub.f32 %v21650_v45, %v5970_v53  ;;  %v7529_v52 = vmul.f32 1.442695, %v7246_v21  ;;  %13723 = vpow2.f32 %v7487_v16  ;;  %v5990_v45 = vrot.slane %v17616_v6, %v17686_v43 }
 0x2e8   :  { %v13708_v24 = vpop.eup %13707 }
 0x2e9   :  { %v13710_v46 = vpop.eup %13709  ;;  %v7489_v53 = vmul.f32 1.442695, %v7226_v38  ;;  %13725 = vpow2.f32 %v7529_v52  ;;  %v21655_v38 = vld [vmem:[#allocation47_spill] sm:$0xff] }
 0x2ea   :  { %v13712_v13 = vpop.eup %13711  ;;  %v7229_v16 = vsub.f32 %v21655_v38, %v5982_v35  ;;  %v6090_v35 = vrot.slane %v17729_v5, %v17637_v48 }
 0x2eb   :  { %8295 = vperm.xlu0 %13659, %v13706_v26   ;;  %8250 = vperm.xlu1 %13660, %v13708_v24   ;;  %v13714_v26 = vpop.eup %13713  ;;  %v7250_v24 = vsub.f32 %v21654_v11, %v6066_v0  ;;  %13727 = vpow2.f32 %v7489_v53  ;;  %v6082_v0 = vrot.slane %v17729_v5, %v17625_v4  ;;  %v5998_v53 = vrot.slane %v17616_v6, %v17703_v19 }
 0x2ec   :  { %v13716_v21 = vpop.eup %13715  ;;  %v7231_v11 = vsub.f32 %v21657_v62, %v5990_v45  ;;  %v7495_v50 = vmul.f32 1.442695, %v7229_v16  ;;  %v6006_v45 = vrot.slane %v17661_v3, %v14523_v9  ;;  %v6098_v16 = vrot.slane %v17729_v5, %v17649_v23  ;;  %v21662_v62 = vld [vmem:[#allocation55_spill] sm:$0xff] }
 0x2ed   :  { %v7537_v14 = vmul.f32 1.442695, %v7250_v24  ;;  %v7254_v24 = vsub.f32 %v21658_v47, %v6082_v0  ;;  %v21663_v47 = vld [vmem:[#allocation16_spill] sm:$0xff] }
 0x2ee   :  { %v13718_v25 = vpop.eup %13717 }
 0x2ef   :  { %8301 = vperm.xlu0 %13659, %v13710_v46   ;;  %8253 = vperm.xlu1 %13660, %v13712_v13   ;;  %v7533_v46 = vmul.f32 1.442695, %v7248_v55  ;;  %v21656_v55 = vld [vmem:[#allocation82_spill] sm:$0xff]  ;;  %v13720_v13 = vpop.eup %13719 }
 0x2f0   :  { %v7252_v52 = vsub.f32 %v21656_v55, %v6074_v20  ;;  %v7499_v55 = vmul.f32 1.442695, %v7231_v11  ;;  %v7235_v11 = vsub.f32 %v21662_v62, %v6006_v45  ;;  %v21666_v62 = vld [vmem:[#allocation66_spill] sm:$0xff] }
 0x2f1   :  { %13729 = vpow2.f32 %v7533_v46 }
 0x2f2   :  { %13731 = vpow2.f32 %v7491_v33  ;;  %v7541_v46 = vmul.f32 1.442695, %v7252_v52  ;;  %v21660_v33 = vld [vmem:[#allocation14_spill] sm:$0xff]  ;;  %v17755_v52 = vpop.xlane.xlu1 %5827 }
 0x2f3   :  { %8307 = vperm.xlu0 %13659, %v13714_v26   ;;  %8256 = vperm.xlu1 %13660, %v13716_v21   ;;  %v13722_v26 = vpop.eup %13721  ;;  %13733 = vpow2.f32 %v7537_v14  ;;  %v7256_v14 = vsub.f32 %v21660_v33, %v6090_v35  ;;  %21661 = vst [vmem:[#allocation61_spill] sm:$0xff] %v17755_v52  ;;  %v6106_v35 = vrot.slane %v17755_v52, %v17621_v49  ;;  %v7507_v33 = vmul.f32 1.442695, %v7235_v11  ;;  %v21667_v11 = vld [vmem:[#allocation20_spill] sm:$0xff] }
 0x2f4   :  { %v13724_v21 = vpop.eup %13723  ;;  %13735 = vpow2.f32 %v7495_v50  ;;  %v6014_v50 = vrot.slane %v17661_v3, %v17664_v51 }
 0x2f5   :  { %v13726_v20 = vpop.eup %13725  ;;  %13737 = vpow2.f32 %v7541_v46 }
 0x2f6   :  { %v13728_v0 = vpop.eup %13727  ;;  %13739 = vpow2.f32 %v7499_v55 }
 0x2f7   :  { %8313 = vperm.xlu0 %13659, %v13718_v25   ;;  %8259 = vperm.xlu1 %13660, %v13720_v13   ;;  %v21659_v25 = vld [vmem:[#allocation60_spill] sm:$0xff]  ;;  %v7545_v13 = vmul.f32 1.442695, %v7254_v24 }
 0x2f8   :  { %v7233_v38 = vsub.f32 %v21659_v25, %v5998_v53  ;;  %v6022_v25 = vrot.slane %v17661_v3, %v17686_v43 }
 0x2f9   :  { %13741 = vpow2.f32 %v7545_v13 }
 0x2fa   :  { %v7503_v53 = vmul.f32 1.442695, %v7233_v38  ;;  %v21664_v38 = vld [vmem:[#allocation58_spill] sm:$0xff] }
 0x2fb   :  { %8319 = vperm.xlu0 %13659, %v13722_v26   ;;  %8262 = vperm.xlu1 %13660, %v13724_v21   ;;  %v13730_v26 = vpop.eup %13729  ;;  %v7258_v21 = vsub.f32 %v21663_v47, %v6098_v16  ;;  %v7237_v55 = vsub.f32 %v21664_v38, %v6014_v50  ;;  %v6114_v16 = vrot.slane %v17755_v52, %v17625_v4  ;;  %v21669_v38 = vld [vmem:[#allocation73_spill] sm:$0xff] }
 0x2fc   :  { %v13732_v24 = vpop.eup %13731  ;;  %13743 = vpow2.f32 %v7503_v53  ;;  %v6030_v53 = vrot.slane %v17661_v3, %v17703_v19  ;;  %v7239_v47 = vsub.f32 %v21666_v62, %v6022_v25  ;;  %v6122_v50 = vrot.slane %v17755_v52, %v17637_v48 }
 0x2fd   :  { %v13734_v46 = vpop.eup %13733  ;;  %v7553_v45 = vmul.f32 1.442695, %v7258_v21  ;;  %v7511_v6 = vmul.f32 1.442695, %v7237_v55  ;;  %v7262_v21 = vsub.f32 %v21667_v11, %v6114_v16  ;;  %v6038_v25 = vrot.slane %v17700_v8, %v14523_v9 }
 0x2fe   :  { %v7515_v3 = vmul.f32 1.442695, %v7239_v47  ;;  %v6130_v55 = vrot.slane %v17755_v52, %v17649_v23  ;;  %v21672_v47 = vld [vmem:[#allocation24_spill] sm:$0xff] }
 0x2ff   :  { %8325 = vperm.xlu0 %13659, %v13726_v20   ;;  %8265 = vperm.xlu1 %13660, %v13728_v0   ;;  %v7549_v20 = vmul.f32 1.442695, %v7256_v14  ;;  %v21665_v14 = vld [vmem:[#allocation18_spill] sm:$0xff]  ;;  %v13736_v0 = vpop.eup %13735  ;;  %v7561_v16 = vmul.f32 1.442695, %v7262_v21 }
 0x300   :  { %v7260_v13 = vsub.f32 %v21665_v14, %v6106_v35  ;;  %v7241_v14 = vsub.f32 %v21669_v38, %v6030_v53  ;;  %v21671_v53 = vld [vmem:[#allocation67_spill] sm:$0xff]  ;;  %v7266_v11 = vsub.f32 %v21672_v47, %v6130_v55  ;;  %v21674_v38 = vld [vmem:[#allocation72_spill] sm:$0xff] }
 0x301   :  { %13745 = vpow2.f32 %v7549_v20  ;;  %v7243_v62 = vsub.f32 %v21671_v53, %v6038_v25  ;;  %v21677_v47 = vld [vmem:[#allocation76_spill] sm:$0xff] }
 0x302   :  { %13747 = vpow2.f32 %v7507_v33  ;;  %v7557_v20 = vmul.f32 1.442695, %v7260_v13  ;;  %v21670_v33 = vld [vmem:[#allocation22_spill] sm:$0xff]  ;;  %v7569_v55 = vmul.f32 1.442695, %v7266_v11 }
 0x303   :  { %8331 = vperm.xlu0 %13659, %v13730_v26   ;;  %8268 = vperm.xlu1 %13660, %v13732_v24   ;;  %v13738_v26 = vpop.eup %13737  ;;  %13749 = vpow2.f32 %v7553_v45  ;;  %v7264_v45 = vsub.f32 %v21670_v33, %v6122_v50  ;;  %v7523_v25 = vmul.f32 1.442695, %v7243_v62  ;;  %v21678_v11 = vld [vmem:[#allocation26_spill] sm:$0xff] }
 0x304   :  { %v13740_v24 = vpop.eup %13739  ;;  %13751 = vpow2.f32 %v7511_v6  ;;  %v6046_v6 = vrot.slane %v17700_v8, %v17664_v51 }
 0x305   :  { %v13742_v35 = vpop.eup %13741  ;;  %13753 = vpow2.f32 %v7557_v20 }
 0x306   :  { %v13744_v13 = vpop.eup %13743  ;;  %13755 = vpow2.f32 %v7515_v3  ;;  %v6054_v3 = vrot.slane %v17700_v8, %v17686_v43 }
 0x307   :  { %8337 = vperm.xlu0 %13659, %v13734_v46   ;;  %8274 = vperm.xlu1 %13660, %v13736_v0   ;;  %v17775_v46 = vpop.xlane.xlu0 %5830  ;;  %13757 = vpow2.f32 %v7561_v16 }
 0x308   :  { %21668 = vst [vmem:[#allocation42_spill] sm:$0xff] %v17775_v46  ;;  %v6138_v50 = vrot.slane %v17775_v46, %v17621_v49  ;;  %v6146_v33 = vrot.slane %v17775_v46, %v17625_v4  ;;  %v7247_v44 = vsub.f32 %v21677_v47, %v6054_v3  ;;  %v6154_v62 = vrot.slane %v17775_v46, %v17637_v48 }
 0x309   :  { %v6070_v3 = vrot.slane %v17729_v5, %v14523_v9  ;;  %v6078_v47 = vrot.slane %v17729_v5, %v17664_v51  ;;  %v6158_v40 = vrot.slane %v17775_v46, %v17703_v19 }
 0x30a   :  { %v7531_v12 = vmul.f32 1.442695, %v7247_v44 }
 0x30b   :  { %8343 = vperm.xlu0 %13659, %v13738_v26   ;;  %8280 = vperm.xlu1 %13660, %v13740_v24   ;;  %v13746_v0 = vpop.eup %13745  ;;  %v7519_v26 = vmul.f32 1.442695, %v7241_v14  ;;  %v7565_v24 = vmul.f32 1.442695, %v7264_v45  ;;  %v17789_v20 = vpop.xlane.xlu0 %5836  ;;  %v7245_v14 = vsub.f32 %v21674_v38, %v6046_v6  ;;  %v21675_v45 = vld [vmem:[#allocation25_spill] sm:$0xff]  ;;  %v21679_v38 = vld [vmem:[#allocation83_spill] sm:$0xff] }
 0x30c   :  { %21673 = vst [vmem:[#allocation70_spill] sm:$0xff] %v17789_v20  ;;  %v13748_v21 = vpop.eup %13747  ;;  %v7268_v16 = vsub.f32 %v21675_v45, %v6138_v50 }
 0x30d   :  { %13759 = vpow2.f32 %v7519_v26  ;;  %v6062_v26 = vrot.slane %v17700_v8, %v17703_v19  ;;  %v7527_v6 = vmul.f32 1.442695, %v7245_v14  ;;  %v6162_v14 = vrot.slane %v17775_v46, %v17649_v23 }
 0x30e   :  { %13761 = vpow2.f32 %v7565_v24  ;;  %v7270_v24 = vsub.f32 %v21678_v11, %v6146_v33  ;;  %v7573_v50 = vmul.f32 1.442695, %v7268_v16 }
 0x30f   :  { %8349 = vperm.xlu0 %13659, %v13742_v35   ;;  %8286 = vperm.xlu1 %13660, %v13744_v13   ;;  %v13750_v35 = vpop.eup %13749  ;;  %v17797_v53 = vpop.xlane.xlu0 %5842  ;;  %13763 = vpow2.f32 %v7523_v25  ;;  %v7249_v45 = vsub.f32 %v21679_v38, %v6062_v26  ;;  %v21680_v25 = vld [vmem:[#allocation28_spill] sm:$0xff] }
 0x310   :  { %v13752_v13 = vpop.eup %13751  ;;  %21676 = vst [vmem:[#allocation46_spill] sm:$0xff] %v17797_v53  ;;  %13765 = vpow2.f32 %v7569_v55  ;;  %v7272_v55 = vsub.f32 %v21680_v25, %v6154_v62 }
 0x311   :  { %13767 = vpow2.f32 %v7527_v6  ;;  %v7535_v44 = vmul.f32 1.442695, %v7249_v45  ;;  %v21683_v6 = vld [vmem:[#allocation81_spill] sm:$0xff] }
 0x312   :  { %13769 = vpow2.f32 %v7573_v50  ;;  %v7251_v11 = vsub.f32 %v21683_v6, %v6070_v3  ;;  %v7581_v62 = vmul.f32 1.442695, %v7272_v55  ;;  %v21686_v45 = vld [vmem:[#allocation85_spill] sm:$0xff] }
 0x313   :  { %8355 = vperm.xlu0 %13659, %v13746_v0   ;;  %8292 = vperm.xlu1 %13660, %v13748_v21   ;;  %v13754_v0 = vpop.eup %13753  ;;  %v17811_v33 = vpop.xlane.xlu0 %5848  ;;  %13771 = vpow2.f32 %v7531_v12  ;;  %v6086_v12 = vrot.slane %v17729_v5, %v17686_v43  ;;  %v7253_v8 = vsub.f32 %v21686_v45, %v6078_v47 }
 0x314   :  { %v13756_v21 = vpop.eup %13755  ;;  %21681 = vst [vmem:[#allocation75_spill] sm:$0xff] %v17811_v33  ;;  %v7539_v3 = vmul.f32 1.442695, %v7251_v11 }
 0x315   :  { %v7543_v56 = vmul.f32 1.442695, %v7253_v8  ;;  %v6102_v8 = vrot.slane %v17755_v52, %v14523_v9 }
 0x317   :  { %8361 = vperm.xlu0 %13659, %v13750_v35   ;;  %8298 = vperm.xlu1 %13660, %v13752_v13   ;;  %v13758_v35 = vpop.eup %13757  ;;  %v7577_v13 = vmul.f32 1.442695, %v7270_v24  ;;  %v17821_v25 = vpop.xlane.xlu0 %5854 }
 0x318   :  { %v13760_v16 = vpop.eup %13759  ;;  %21685 = vst [vmem:[#allocation68_spill] sm:$0xff] %v17821_v25 }
 0x319   :  { %v13762_v26 = vpop.eup %13761  ;;  %13773 = vpow2.f32 %v7577_v13  ;;  %v21687_v13 = vld [vmem:[#allocation33_spill] sm:$0xff] }
 0x31a   :  { %v13764_v50 = vpop.eup %13763  ;;  %13775 = vpow2.f32 %v7535_v44  ;;  %v6094_v44 = vrot.slane %v17729_v5, %v17703_v19 }
 0x31b   :  { %8367 = vperm.xlu0 %13659, %v13754_v0   ;;  %8304 = vperm.xlu1 %13660, %v13756_v21   ;;  %v17813_v0 = vpop.xlane.xlu1 %5833  ;;  %v21684_v21 = vld [vmem:[#allocation30_spill] sm:$0xff]  ;;  %v13766_v38 = vpop.eup %13765  ;;  %13777 = vpow2.f32 %v7581_v62 }
 0x31c   :  { %21682 = vst [vmem:[#allocation48_spill] sm:$0xff] %v17813_v0  ;;  %v6170_v24 = vrot.slane %v17813_v0, %v17621_v49  ;;  %v6178_v55 = vrot.slane %v17813_v0, %v17625_v4  ;;  %13779 = vpow2.f32 %v7539_v3  ;;  %v6186_v11 = vrot.slane %v17813_v0, %v17637_v48 }
 0x31d   :  { %v6194_v3 = vrot.slane %v17813_v0, %v17649_v23 }
 0x31f   :  { %8373 = vperm.xlu0 %13659, %v13758_v35   ;;  %8310 = vperm.xlu1 %13660, %v13760_v16   ;;  %v7274_v35 = vsub.f32 %v21684_v21, %v6162_v14  ;;  %v7276_v16 = vsub.f32 %v21687_v13, %v6170_v24  ;;  %v21688_v21 = vld [vmem:[#allocation91_spill] sm:$0xff]  ;;  %v17832_v47 = vpop.xlane.xlu1 %5839 }
 0x320   :  { %v7255_v59 = vsub.f32 %v21688_v21, %v6086_v12  ;;  %21689 = vst [vmem:[#allocation51_spill] sm:$0xff] %v17832_v47  ;;  %v21692_v13 = vld [vmem:[#allocation15_spill] sm:$0xff] }
 0x321   :  { %v7585_v14 = vmul.f32 1.442695, %v7274_v35  ;;  %v21690_v35 = vld [vmem:[#allocation38_spill] sm:$0xff]  ;;  %v7589_v24 = vmul.f32 1.442695, %v7276_v16  ;;  %v7257_v5 = vsub.f32 %v21692_v13, %v6094_v44  ;;  %v21696_v44 = vld [vmem:[#allocation17_spill] sm:$0xff] }
 0x322   :  { %v7278_v62 = vsub.f32 %v21690_v35, %v6178_v55  ;;  %v7547_v12 = vmul.f32 1.442695, %v7255_v59  ;;  %v6110_v59 = vrot.slane %v17755_v52, %v17664_v51 }
 0x323   :  { %8379 = vperm.xlu0 %13659, %v13762_v26   ;;  %8316 = vperm.xlu1 %13660, %v13764_v50   ;;  %v13768_v26 = vpop.eup %13767  ;;  %13781 = vpow2.f32 %v7585_v14  ;;  %v17837_v50 = vpop.xlane.xlu0 %5860  ;;  %v21693_v14 = vld [vmem:[#allocation41_spill] sm:$0xff] }
 0x324   :  { %v13770_v6 = vpop.eup %13769  ;;  %21691 = vst [vmem:[#allocation74_spill] sm:$0xff] %v17837_v50  ;;  %13783 = vpow2.f32 %v7543_v56  ;;  %v7593_v55 = vmul.f32 1.442695, %v7278_v62  ;;  %v7551_v56 = vmul.f32 1.442695, %v7257_v5  ;;  %v6202_v62 = vrot.slane %v17789_v20, %v17621_v49 }
 0x325   :  { %13785 = vpow2.f32 %v7589_v24  ;;  %v6118_v5 = vrot.slane %v17755_v52, %v17686_v43 }
 0x326   :  { %13787 = vpow2.f32 %v7547_v12  ;;  %v21698_v12 = vld [vmem:[#allocation19_spill] sm:$0xff] }
 0x327   :  { %8385 = vperm.xlu0 %13659, %v13766_v38   ;;  %8322 = vperm.xlu1 %13660, %v13768_v26   ;;  %v13772_v38 = vpop.eup %13771  ;;  %v7280_v26 = vsub.f32 %v21693_v14, %v6186_v11  ;;  %v17847_v35 = vpop.xlane.xlu0 %5866  ;;  %13789 = vpow2.f32 %v7593_v55  ;;  %v7261_v7 = vsub.f32 %v21698_v12, %v6110_v59  ;;  %v21702_v59 = vld [vmem:[#allocation21_spill] sm:$0xff] }
 0x328   :  { %v13774_v45 = vpop.eup %13773  ;;  %21695 = vst [vmem:[#allocation79_spill] sm:$0xff] %v17847_v35  ;;  %13791 = vpow2.f32 %v7551_v56 }
 0x329   :  { %v13776_v16 = vpop.eup %13775  ;;  %v7597_v11 = vmul.f32 1.442695, %v7280_v26  ;;  %v21700_v26 = vld [vmem:[#allocation124_spill] sm:$0xff] }
 0x32a   :  { %v13778_v21 = vpop.eup %13777  ;;  %v7284_v55 = vsub.f32 %v21700_v26, %v6202_v62 }
 0x32b   :  { %8391 = vperm.xlu0 %13659, %v13770_v6   ;;  %8328 = vperm.xlu1 %13660, %v13772_v38   ;;  %v17845_v6 = vpop.xlane.xlu1 %5845  ;;  %v7259_v38 = vsub.f32 %v21696_v44, %v6102_v8  ;;  %v13780_v24 = vpop.eup %13779  ;;  %13793 = vpow2.f32 %v7597_v11  ;;  %v6126_v44 = vrot.slane %v17755_v52, %v17703_v19  ;;  %v21703_v11 = vld [vmem:[#allocation128_spill] sm:$0xff]  ;;  %v21706_v52 = vld [vmem:[#allocation23_spill] sm:$0xff] }
 0x32c   :  { %21694 = vst [vmem:[#allocation52_spill] sm:$0xff] %v17845_v6  ;;  %v7605_v62 = vmul.f32 1.442695, %v7284_v55 }
 0x32d   :  { %v13782_v14 = vpop.eup %13781  ;;  %v7555_v10 = vmul.f32 1.442695, %v7259_v38  ;;  %v7263_v38 = vsub.f32 %v21702_v59, %v6118_v5  ;;  %v7265_v34 = vsub.f32 %v21706_v52, %v6126_v44  ;;  %v6226_v5 = vrot.slane %v17789_v20, %v17649_v23  ;;  %v21708_v44 = vld [vmem:[#allocation104_spill] sm:$0xff] }
 0x32e   :  { %v6142_v52 = vrot.slane %v17775_v46, %v17664_v51 }
 0x32f   :  { %8397 = vperm.xlu0 %13659, %v13774_v45   ;;  %8334 = vperm.xlu1 %13660, %v13776_v16   ;;  %v21697_v45 = vld [vmem:[#allocation45_spill] sm:$0xff]  ;;  %v17858_v42 = vpop.xlane.xlu1 %5851  ;;  %v17863_v16 = vpop.xlane.xlu0 %5872  ;;  %13795 = vpow2.f32 %v7555_v10  ;;  %v7563_v10 = vmul.f32 1.442695, %v7263_v38  ;;  %v7567_v59 = vmul.f32 1.442695, %v7265_v34 }
 0x330   :  { %v7282_v13 = vsub.f32 %v21697_v45, %v6194_v3  ;;  %21699 = vst [vmem:[#allocation43_spill] sm:$0xff] %v17858_v42  ;;  %v6210_v3 = vrot.slane %v17789_v20, %v17625_v4  ;;  %21701 = vst [vmem:[#allocation87_spill] sm:$0xff] %v17863_v16  ;;  %v7559_v45 = vmul.f32 1.442695, %v7261_v7  ;;  %v6134_v7 = vrot.slane %v17775_v46, %v14523_v9 }
 0x332   :  { %v7601_v8 = vmul.f32 1.442695, %v7282_v13  ;;  %v6218_v13 = vrot.slane %v17789_v20, %v17637_v48  ;;  %v7267_v38 = vsub.f32 %v21708_v44, %v6134_v7  ;;  %v21712_v7 = vld [vmem:[#allocation107_spill] sm:$0xff] }
 0x333   :  { %8403 = vperm.xlu0 %13659, %v13778_v21   ;;  %8340 = vperm.xlu1 %13660, %v13780_v24   ;;  %v13784_v21 = vpop.eup %13783  ;;  %v7286_v24 = vsub.f32 %v21703_v11, %v6210_v3  ;;  %v17871_v12 = vpop.xlane.xlu1 %5857  ;;  %v21710_v11 = vld [vmem:[#allocation57_spill] sm:$0xff] }
 0x334   :  { %v13786_v56 = vpop.eup %13785  ;;  %13797 = vpow2.f32 %v7601_v8  ;;  %21704 = vst [vmem:[#allocation47_spill] sm:$0xff] %v17871_v12  ;;  %v17873_v57 = vpop.xlane.xlu0 %5878  ;;  %v21707_v8 = vld [vmem:[#allocation130_spill] sm:$0xff]  ;;  %v7571_v44 = vmul.f32 1.442695, %v7267_v38 }
 0x335   :  { %21705 = vst [vmem:[#allocation82_spill] sm:$0xff] %v17873_v57  ;;  %13799 = vpow2.f32 %v7559_v45  ;;  %v7288_v3 = vsub.f32 %v21707_v8, %v6218_v13  ;;  %v7609_v55 = vmul.f32 1.442695, %v7286_v24  ;;  %v6234_v13 = vrot.slane %v17832_v47, %v17621_v49 }
 0x336   :  { %13801 = vpow2.f32 %v7605_v62  ;;  %v7269_v8 = vsub.f32 %v21712_v7, %v6142_v52  ;;  %v21716_v52 = vld [vmem:[#allocation27_spill] sm:$0xff]  ;;  %v7273_v57 = vsub.f32 %v21719_v41, %v6158_v40 }
 0x337   :  { %8409 = vperm.xlu0 %13659, %v13782_v14   ;;  %8346 = vperm.xlu1 %13660, %v13784_v21   ;;  %v13788_v14 = vpop.eup %13787  ;;  %13803 = vpow2.f32 %v7563_v10  ;;  %v17884_v45 = vpop.xlane.xlu1 %5863  ;;  %v6150_v10 = vrot.slane %v17775_v46, %v17686_v43 }
 0x338   :  { %v13790_v26 = vpop.eup %13789  ;;  %21709 = vst [vmem:[#allocation53_spill] sm:$0xff] %v17884_v45  ;;  %13805 = vpow2.f32 %v7609_v55  ;;  %v17889_v24 = vpop.xlane.xlu0 %5884  ;;  %v21713_v55 = vld [vmem:[#allocation132_spill] sm:$0xff]  ;;  %v7583_v40 = vmul.f32 1.442695, %v7273_v57 }
 0x339   :  { %v13792_v21 = vpop.eup %13791  ;;  %21711 = vst [vmem:[#allocation89_spill] sm:$0xff] %v17889_v24  ;;  %13807 = vpow2.f32 %v7567_v59  ;;  %v7271_v38 = vsub.f32 %v21716_v52, %v6150_v10  ;;  %v6166_v10 = vrot.slane %v17813_v0, %v14523_v9  ;;  %v6174_v52 = vrot.slane %v17813_v0, %v17664_v51 }
 0x33b   :  { %8415 = vperm.xlu0 %13659, %v13786_v56   ;;  %8352 = vperm.xlu1 %13660, %v13788_v14   ;;  %v13794_v56 = vpop.eup %13793  ;;  %v7290_v14 = vsub.f32 %v21710_v11, %v6226_v5  ;;  %v17899_v24 = vpop.xlane.xlu1 %5869  ;;  %v7579_v46 = vmul.f32 1.442695, %v7271_v38  ;;  %v21723_v38 = vld [vmem:[#allocation31_spill] sm:$0xff] }
 0x33c   :  { %v13796_v62 = vpop.eup %13795  ;;  %21715 = vst [vmem:[#allocation14_spill] sm:$0xff] %v17899_v24  ;;  %v6318_v24 = vrot.slane %v17845_v6, %v17703_v19 }
 0x33d   :  { %v7617_v5 = vmul.f32 1.442695, %v7290_v14  ;;  %v6250_v14 = vrot.slane %v17832_v47, %v17637_v48 }
 0x33e   :  { %v13798_v34 = vpop.eup %13797 }
 0x33f   :  { %8421 = vperm.xlu0 %13659, %v13790_v26   ;;  %8358 = vperm.xlu1 %13660, %v13792_v21   ;;  %v7613_v26 = vmul.f32 1.442695, %v7288_v3  ;;  %v6242_v3 = vrot.slane %v17832_v47, %v17625_v4  ;;  %v7292_v21 = vsub.f32 %v21713_v55, %v6234_v13  ;;  %v13800_v11 = vpop.eup %13799 }
 0x340   :  { %v13802_v59 = vpop.eup %13801 }
 0x341   :  { %13809 = vpow2.f32 %v7613_v26  ;;  %v21717_v26 = vld [vmem:[#allocation64_spill] sm:$0xff]  ;;  %v13804_v55 = vpop.eup %13803 }
 0x342   :  { %13811 = vpow2.f32 %v7571_v44  ;;  %v7294_v13 = vsub.f32 %v21717_v26, %v6242_v3  ;;  %v6258_v44 = vrot.slane %v17832_v47, %v17649_v23 }
 0x343   :  { %8427 = vperm.xlu0 %13659, %v13794_v56   ;;  %8364 = vperm.xlu1 %13660, %v13796_v62   ;;  %v17897_v56 = vpop.xlane.xlu0 %5890  ;;  %v7575_v62 = vmul.f32 1.442695, %v7269_v8  ;;  %13813 = vpow2.f32 %v7617_v5  ;;  %v17912_v8 = vpop.xlane.xlu1 %5875  ;;  %v21721_v5 = vld [vmem:[#allocation138_spill] sm:$0xff] }
 0x344   :  { %21714 = vst [vmem:[#allocation60_spill] sm:$0xff] %v17897_v56  ;;  %v13806_v56 = vpop.eup %13805  ;;  %21720 = vst [vmem:[#allocation16_spill] sm:$0xff] %v17912_v8  ;;  %v7296_v3 = vsub.f32 %v21721_v5, %v6250_v14  ;;  %v6266_v14 = vrot.slane %v17797_v53, %v17621_v49 }
 0x345   :  { %13815 = vpow2.f32 %v7575_v62  ;;  %v7275_v62 = vsub.f32 %v21723_v38, %v6166_v10  ;;  %v21727_v10 = vld [vmem:[#allocation35_spill] sm:$0xff] }
 0x347   :  { %8433 = vperm.xlu0 %13659, %v13798_v34   ;;  %8370 = vperm.xlu1 %13660, %v13800_v11   ;;  %v7621_v34 = vmul.f32 1.442695, %v7292_v21  ;;  %v17907_v7 = vpop.xlane.xlu0 %5896  ;;  %v7625_v21 = vmul.f32 1.442695, %v7294_v13  ;;  %v17927_v5 = vpop.xlane.xlu1 %5881 }
 0x348   :  { %21718 = vst [vmem:[#allocation55_spill] sm:$0xff] %v17907_v7  ;;  %21726 = vst [vmem:[#allocation66_spill] sm:$0xff] %v17927_v5  ;;  %v21729_v7 = vld [vmem:[#allocation39_spill] sm:$0xff] }
 0x349   :  { %13817 = vpow2.f32 %v7621_v34 }
 0x34a   :  { %13819 = vpow2.f32 %v7579_v46  ;;  %v6182_v46 = vrot.slane %v17813_v0, %v17686_v43 }
 0x34b   :  { %8439 = vperm.xlu0 %13659, %v13802_v59   ;;  %8376 = vperm.xlu1 %13660, %v13804_v55   ;;  %v17917_v11 = vpop.xlane.xlu0 %5902  ;;  %v13808_v59 = vpop.eup %13807  ;;  %13821 = vpow2.f32 %v7625_v21  ;;  %v7629_v55 = vmul.f32 1.442695, %v7296_v3  ;;  %v6274_v3 = vrot.slane %v17797_v53, %v17625_v4  ;;  %v21728_v21 = vld [vmem:[#allocation140_spill] sm:$0xff] }
 0x34c   :  { %21722 = vst [vmem:[#allocation58_spill] sm:$0xff] %v17917_v11  ;;  %v13810_v41 = vpop.eup %13809  ;;  %13823 = vpow2.f32 %v7583_v40  ;;  %v7300_v38 = vsub.f32 %v21728_v21, %v6266_v14  ;;  %v6190_v40 = vrot.slane %v17813_v0, %v17703_v19  ;;  %v7279_v5 = vsub.f32 %v21729_v7, %v6182_v46  ;;  %v21732_v0 = vld [vmem:[#allocation125_spill] sm:$0xff] }
 0x34d   :  { %v13812_v34 = vpop.eup %13811  ;;  %13825 = vpow2.f32 %v7629_v55  ;;  %v21731_v55 = vld [vmem:[#allocation143_spill] sm:$0xff]  ;;  %v6198_v46 = vrot.slane %v17789_v20, %v14523_v9 }
 0x34e   :  { %v13814_v57 = vpop.eup %13813  ;;  %v7302_v14 = vsub.f32 %v21731_v55, %v6274_v3  ;;  %v7281_v2 = vsub.f32 %v21732_v0, %v6190_v40  ;;  %v7595_v7 = vmul.f32 1.442695, %v7279_v5  ;;  %v6206_v5 = vrot.slane %v17789_v20, %v17664_v51  ;;  %v21735_v40 = vld [vmem:[#allocation123_spill] sm:$0xff] }
 0x34f   :  { %8445 = vperm.xlu0 %13659, %v13806_v56   ;;  %8382 = vperm.xlu1 %13660, %v13808_v59   ;;  %v21724_v56 = vld [vmem:[#allocation71_spill] sm:$0xff]  ;;  %v7277_v59 = vsub.f32 %v21727_v10, %v6174_v52 }
 0x350   :  { %v7298_v26 = vsub.f32 %v21724_v56, %v6258_v44  ;;  %v13816_v56 = vpop.eup %13815  ;;  %v7641_v3 = vmul.f32 1.442695, %v7302_v14  ;;  %v7599_v0 = vmul.f32 1.442695, %v7281_v2  ;;  %v6298_v14 = vrot.slane %v17845_v6, %v17621_v49 }
 0x351   :  { %v7591_v52 = vmul.f32 1.442695, %v7277_v59  ;;  %v6214_v2 = vrot.slane %v17789_v20, %v17686_v43 }
 0x352   :  { %v7633_v44 = vmul.f32 1.442695, %v7298_v26  ;;  %v6282_v26 = vrot.slane %v17797_v53, %v17637_v48 }
 0x353   :  { %8451 = vperm.xlu0 %13659, %v13810_v41   ;;  %v7587_v41 = vmul.f32 1.442695, %v7275_v62  ;;  %8388 = vperm.xlu1 %13660, %v13812_v34   ;;  %v17940_v62 = vpop.xlane.xlu1 %5887  ;;  %v7637_v34 = vmul.f32 1.442695, %v7300_v38 }
 0x354   :  { %21730 = vst [vmem:[#allocation20_spill] sm:$0xff] %v17940_v62  ;;  %v6222_v62 = vrot.slane %v17789_v20, %v17703_v19  ;;  %v21745_v20 = vld [vmem:[#allocation54_spill] sm:$0xff] }
 0x355   :  { %13827 = vpow2.f32 %v7587_v41  ;;  %v21734_v41 = vld [vmem:[#allocation78_spill] sm:$0xff] }
 0x356   :  { %v17925_v13 = vpop.permute.xlu0 %8244  ;;  %13829 = vpow2.f32 %v7633_v44  ;;  %v7304_v44 = vsub.f32 %v21734_v41, %v6282_v26  ;;  %v7289_v18 = vsub.f32 %v21745_v20, %v6222_v62  ;;  %v6238_v62 = vrot.slane %v17832_v47, %v17664_v51 }
 0x357   :  { %21725 = vst [vmem:[#allocation18_spill] sm:$0xff] %v17925_v13  ;;  %8457 = vperm.xlu0 %13659, %v13814_v57   ;;  %v13818_v13 = vpop.eup %13817  ;;  %8394 = vperm.xlu1 %13660, %v13816_v56   ;;  %13831 = vpow2.f32 %v7591_v52  ;;  %v17950_v59 = vpop.xlane.xlu1 %5893  ;;  %v7283_v52 = vsub.f32 %v21735_v40, %v6198_v46  ;;  %v21739_v46 = vld [vmem:[#allocation127_spill] sm:$0xff] }
 0x358   :  { %v13820_v57 = vpop.eup %13819  ;;  %21733 = vst [vmem:[#allocation73_spill] sm:$0xff] %v17950_v59  ;;  %13833 = vpow2.f32 %v7637_v34  ;;  %v7645_v26 = vmul.f32 1.442695, %v7304_v44  ;;  %v7285_v40 = vsub.f32 %v21739_v46, %v6206_v5  ;;  %v6306_v44 = vrot.slane %v17845_v6, %v17625_v4  ;;  %v21742_v5 = vld [vmem:[#allocation50_spill] sm:$0xff] }
 0x359   :  { %v13822_v10 = vpop.eup %13821  ;;  %13835 = vpow2.f32 %v7595_v7  ;;  %v7615_v20 = vmul.f32 1.442695, %v7289_v18  ;;  %v6246_v18 = vrot.slane %v17832_v47, %v17686_v43 }
 0x35a   :  { %v17935_v11 = vpop.permute.xlu0 %8271  ;;  %v13824_v38 = vpop.eup %13823  ;;  %13837 = vpow2.f32 %v7641_v3  ;;  %v21741_v3 = vld [vmem:[#allocation88_spill] sm:$0xff] }
 0x35b   :  { %8463 = vperm.xlu0 %13659, %v13818_v13   ;;  %8400 = vperm.xlu1 %13660, %v13820_v57   ;;  %v6290_v13 = vrot.slane %v17797_v53, %v17649_v23  ;;  %v13826_v56 = vpop.eup %13825  ;;  %v17960_v57 = vpop.xlane.xlu1 %5899  ;;  %13839 = vpow2.f32 %v7599_v0 }
 0x35c   :  { %21736 = vst [vmem:[#allocation22_spill] sm:$0xff] %v17960_v57  ;;  %v7603_v57 = vmul.f32 1.442695, %v7283_v52  ;;  %13841 = vpow2.f32 %v7645_v26  ;;  %v7287_v52 = vsub.f32 %v21742_v5, %v6214_v2  ;;  %v21744_v26 = vld [vmem:[#allocation92_spill] sm:$0xff]  ;;  %v6230_v2 = vrot.slane %v17832_v47, %v14523_v9 }
 0x35e   :  { %v17945_v21 = vpop.permute.xlu0 %8277  ;;  %13843 = vpow2.f32 %v7603_v57  ;;  %v7611_v57 = vmul.f32 1.442695, %v7287_v52  ;;  %v21749_v52 = vld [vmem:[#allocation131_spill] sm:$0xff] }
 0x35f   :  { %8469 = vperm.xlu0 %13659, %v13822_v10   ;;  %8406 = vperm.xlu1 %13660, %v13824_v38   ;;  %v21737_v10 = vld [vmem:[#allocation84_spill] sm:$0xff]  ;;  %v13828_v34 = vpop.eup %13827 }
 0x360   :  { %v7306_v59 = vsub.f32 %v21737_v10, %v6290_v13  ;;  %v13830_v41 = vpop.eup %13829 }
 0x361   :  { %v17970_v38 = vpop.xlane.xlu1 %5905  ;;  %v13832_v10 = vpop.eup %13831 }
 0x362   :  { %v17955_v55 = vpop.permute.xlu0 %8283  ;;  %21740 = vst [vmem:[#allocation24_spill] sm:$0xff] %v17970_v38  ;;  %v7649_v13 = vmul.f32 1.442695, %v7306_v59  ;;  %v6314_v59 = vrot.slane %v17845_v6, %v17637_v48 }
 0x363   :  { %8475 = vperm.xlu0 %13659, %v13826_v56   ;;  %8412 = vperm.xlu1 %13660, %v13828_v34   ;;  %v7308_v56 = vsub.f32 %v21741_v3, %v6298_v14  ;;  %v7607_v34 = vmul.f32 1.442695, %v7285_v40  ;;  %v7310_v14 = vsub.f32 %v21744_v26, %v6306_v44  ;;  %v6322_v40 = vrot.slane %v17845_v6, %v17649_v23 }
 0x364   :  { %13845 = vpow2.f32 %v7649_v13  ;;  %v21747_v13 = vld [vmem:[#allocation94_spill] sm:$0xff] }
 0x365   :  { %v7653_v46 = vmul.f32 1.442695, %v7308_v56  ;;  %13847 = vpow2.f32 %v7607_v34  ;;  %v7312_v44 = vsub.f32 %v21747_v13, %v6314_v59  ;;  %v7657_v56 = vmul.f32 1.442695, %v7310_v14 }
 0x366   :  { %v17965_v7 = vpop.permute.xlu0 %8289  ;;  %v7291_v34 = vsub.f32 %v21749_v52, %v6230_v2  ;;  %v6330_v14 = vrot.slane %v17811_v33, %v17621_v49  ;;  %v21753_v2 = vld [vmem:[#allocation62_spill] sm:$0xff] }
 0x367   :  { %21738 = vst [vmem:[#allocation67_spill] sm:$0xff] %v17965_v7  ;;  %8481 = vperm.xlu0 %13659, %v13830_v41   ;;  %v13834_v7 = vpop.eup %13833  ;;  %8418 = vperm.xlu1 %13660, %v13832_v10   ;;  %v17980_v41 = vpop.permute.xlu1 %8247  ;;  %13849 = vpow2.f32 %v7653_v46  ;;  %v7661_v59 = vmul.f32 1.442695, %v7312_v44  ;;  %v6338_v44 = vrot.slane %v17811_v33, %v17625_v4 }
 0x368   :  { %21743 = vst [vmem:[#allocation72_spill] sm:$0xff] %v17980_v41  ;;  %v13836_v3 = vpop.eup %13835  ;;  %13851 = vpow2.f32 %v7611_v57  ;;  %v7619_v52 = vmul.f32 1.442695, %v7291_v34  ;;  %v6254_v41 = vrot.slane %v17832_v47, %v17703_v19  ;;  %v21759_v47 = vld [vmem:[#allocation69_spill] sm:$0xff] }
 0x369   :  { %v13838_v38 = vpop.eup %13837  ;;  %13853 = vpow2.f32 %v7657_v56  ;;  %v21755_v56 = vld [vmem:[#allocation99_spill] sm:$0xff] }
 0x36a   :  { %v17975_v0 = vpop.permute.xlu0 %8295  ;;  %v13840_v10 = vpop.eup %13839  ;;  %13855 = vpow2.f32 %v7615_v20  ;;  %v7297_v8 = vsub.f32 %v21759_v47, %v6254_v41  ;;  %v6270_v41 = vrot.slane %v17797_v53, %v17664_v51 }
 0x36b   :  { %8487 = vperm.xlu0 %13659, %v13834_v7   ;;  %8424 = vperm.xlu1 %13660, %v13836_v3   ;;  %v17990_v7 = vpop.permute.xlu1 %8250  ;;  %v13842_v5 = vpop.eup %13841  ;;  %v21751_v3 = vld [vmem:[#allocation97_spill] sm:$0xff]  ;;  %13857 = vpow2.f32 %v7661_v59 }
 0x36c   :  { %21746 = vst [vmem:[#allocation25_spill] sm:$0xff] %v17990_v7  ;;  %v7314_v7 = vsub.f32 %v21751_v3, %v6322_v40  ;;  %v13844_v46 = vpop.eup %13843  ;;  %v7316_v3 = vsub.f32 %v21755_v56, %v6330_v14  ;;  %13859 = vpow2.f32 %v7619_v52  ;;  %v21758_v59 = vld [vmem:[#allocation101_spill] sm:$0xff]  ;;  %v21761_v52 = vld [vmem:[#allocation103_spill] sm:$0xff]  ;;  %v7631_v47 = vmul.f32 1.442695, %v7297_v8 }
 0x36d   :  { %v7318_v14 = vsub.f32 %v21758_v59, %v6338_v44  ;;  %v6278_v8 = vrot.slane %v17797_v53, %v17686_v43 }
 0x36e   :  { %v17985_v22 = vpop.permute.xlu0 %8301  ;;  %v13846_v13 = vpop.eup %13845  ;;  %v7665_v40 = vmul.f32 1.442695, %v7314_v7  ;;  %v6346_v7 = vrot.slane %v17811_v33, %v17637_v48 }
 0x36f   :  { %8493 = vperm.xlu0 %13659, %v13838_v38   ;;  %8430 = vperm.xlu1 %13660, %v13840_v10   ;;  %v18000_v38 = vpop.permute.xlu1 %8253  ;;  %v7293_v10 = vsub.f32 %v21753_v2, %v6238_v62  ;;  %v21756_v62 = vld [vmem:[#allocation65_spill] sm:$0xff]  ;;  %v7669_v2 = vmul.f32 1.442695, %v7316_v3  ;;  %v7673_v44 = vmul.f32 1.442695, %v7318_v14  ;;  %v6362_v14 = vrot.slane %v17858_v42, %v17621_v49 }
 0x370   :  { %21750 = vst [vmem:[#allocation26_spill] sm:$0xff] %v18000_v38  ;;  %v13848_v38 = vpop.eup %13847  ;;  %v7295_v34 = vsub.f32 %v21756_v62, %v6246_v18  ;;  %13861 = vpow2.f32 %v7665_v40  ;;  %v7320_v40 = vsub.f32 %v21761_v52, %v6346_v7 }
 0x372   :  { %v17995_v26 = vpop.permute.xlu0 %8307  ;;  %v7627_v18 = vmul.f32 1.442695, %v7295_v34  ;;  %v21763_v34 = vld [vmem:[#allocation139_spill] sm:$0xff]  ;;  %v7677_v7 = vmul.f32 1.442695, %v7320_v40  ;;  %v6370_v40 = vrot.slane %v17858_v42, %v17625_v4 }
 0x373   :  { %21748 = vst [vmem:[#allocation76_spill] sm:$0xff] %v17995_v26  ;;  %8499 = vperm.xlu0 %13659, %v13842_v5   ;;  %8436 = vperm.xlu1 %13660, %v13844_v46   ;;  %v18010_v5 = vpop.permute.xlu1 %8256  ;;  %v7623_v46 = vmul.f32 1.442695, %v7293_v10  ;;  %v6354_v10 = vrot.slane %v17811_v33, %v17649_v23 }
 0x374   :  { %21754 = vst [vmem:[#allocation28_spill] sm:$0xff] %v18010_v5 }
 0x375   :  { %13863 = vpow2.f32 %v7623_v46 }
 0x376   :  { %v18005_v57 = vpop.permute.xlu0 %8313  ;;  %13865 = vpow2.f32 %v7669_v2 }
 0x377   :  { %21752 = vst [vmem:[#allocation83_spill] sm:$0xff] %v18005_v57  ;;  %8505 = vperm.xlu0 %13659, %v13846_v13   ;;  %v13850_v57 = vpop.eup %13849  ;;  %8442 = vperm.xlu1 %13660, %v13848_v38   ;;  %v18020_v13 = vpop.permute.xlu1 %8259  ;;  %v6262_v38 = vrot.slane %v17797_v53, %v14523_v9  ;;  %13867 = vpow2.f32 %v7627_v18 }
 0x378   :  { %21757 = vst [vmem:[#allocation81_spill] sm:$0xff] %v18020_v13  ;;  %v13852_v56 = vpop.eup %13851  ;;  %13869 = vpow2.f32 %v7673_v44  ;;  %v21768_v44 = vld [vmem:[#allocation109_spill] sm:$0xff]  ;;  %v6286_v13 = vrot.slane %v17797_v53, %v17703_v19  ;;  %v21771_v53 = vld [vmem:[#allocation80_spill] sm:$0xff] }
 0x379   :  { %v13854_v5 = vpop.eup %13853  ;;  %v7299_v46 = vsub.f32 %v21763_v34, %v6262_v38  ;;  %13871 = vpow2.f32 %v7631_v47  ;;  %v21767_v38 = vld [vmem:[#allocation142_spill] sm:$0xff] }
 0x37a   :  { %v18015_v20 = vpop.permute.xlu0 %8319  ;;  %v13856_v3 = vpop.eup %13855  ;;  %13873 = vpow2.f32 %v7677_v7  ;;  %v21770_v7 = vld [vmem:[#allocation111_spill] sm:$0xff]  ;;  %v7305_v16 = vsub.f32 %v21771_v53, %v6286_v13  ;;  %v6302_v13 = vrot.slane %v17845_v6, %v17664_v51 }
 0x37b   :  { %8511 = vperm.xlu0 %13659, %v13850_v57   ;;  %8448 = vperm.xlu1 %13660, %v13852_v56   ;;  %v18030_v57 = vpop.permute.xlu1 %8262  ;;  %v13858_v62 = vpop.eup %13857  ;;  %v21765_v56 = vld [vmem:[#allocation106_spill] sm:$0xff]  ;;  %v7635_v34 = vmul.f32 1.442695, %v7299_v46 }
 0x37c   :  { %21760 = vst [vmem:[#allocation30_spill] sm:$0xff] %v18030_v57  ;;  %v7322_v57 = vsub.f32 %v21765_v56, %v6354_v10  ;;  %v13860_v2 = vpop.eup %13859  ;;  %v7324_v56 = vsub.f32 %v21768_v44, %v6362_v14  ;;  %v7326_v14 = vsub.f32 %v21770_v7, %v6370_v40  ;;  %v7647_v53 = vmul.f32 1.442695, %v7305_v16 }
 0x37d   :  { %v13862_v52 = vpop.eup %13861  ;;  %13875 = vpow2.f32 %v7635_v34  ;;  %v21772_v34 = vld [vmem:[#allocation114_spill] sm:$0xff]  ;;  %v6310_v16 = vrot.slane %v17845_v6, %v17686_v43 }
 0x37e   :  { %v18025_v29 = vpop.permute.xlu0 %8325  ;;  %v7681_v10 = vmul.f32 1.442695, %v7322_v57  ;;  %v6378_v57 = vrot.slane %v17858_v42, %v17637_v48  ;;  %v7689_v40 = vmul.f32 1.442695, %v7326_v14  ;;  %v6394_v14 = vrot.slane %v17821_v25, %v17621_v49 }
 0x37f   :  { %8517 = vperm.xlu0 %13659, %v13854_v5   ;;  %8454 = vperm.xlu1 %13660, %v13856_v3   ;;  %v18040_v5 = vpop.permute.xlu1 %8265  ;;  %v7301_v3 = vsub.f32 %v21767_v38, %v6270_v41  ;;  %v21769_v41 = vld [vmem:[#allocation77_spill] sm:$0xff]  ;;  %v7685_v38 = vmul.f32 1.442695, %v7324_v56 }
 0x380   :  { %21764 = vst [vmem:[#allocation33_spill] sm:$0xff] %v18040_v5  ;;  %v13864_v5 = vpop.eup %13863  ;;  %v7303_v46 = vsub.f32 %v21769_v41, %v6278_v8  ;;  %13877 = vpow2.f32 %v7681_v10  ;;  %v7328_v10 = vsub.f32 %v21772_v34, %v6378_v57 }
 0x382   :  { %v18035_v59 = vpop.permute.xlu0 %8331  ;;  %v7643_v8 = vmul.f32 1.442695, %v7303_v46  ;;  %v21774_v46 = vld [vmem:[#allocation86_spill] sm:$0xff]  ;;  %v7693_v57 = vmul.f32 1.442695, %v7328_v10 }
 0x383   :  { %21762 = vst [vmem:[#allocation85_spill] sm:$0xff] %v18035_v59  ;;  %8523 = vperm.xlu0 %13659, %v13858_v62   ;;  %8460 = vperm.xlu1 %13660, %v13860_v2   ;;  %v18050_v62 = vpop.permute.xlu1 %8268  ;;  %v7639_v2 = vmul.f32 1.442695, %v7301_v3  ;;  %v6386_v3 = vrot.slane %v17858_v42, %v17649_v23  ;;  %v21777_v10 = vld [vmem:[#allocation118_spill] sm:$0xff] }
 0x385   :  { %13879 = vpow2.f32 %v7639_v2 }
 0x386   :  { %v18045_v18 = vpop.permute.xlu0 %8337  ;;  %13881 = vpow2.f32 %v7685_v38 }
 0x387   :  { %21766 = vst [vmem:[#allocation91_spill] sm:$0xff] %v18045_v18  ;;  %8529 = vperm.xlu0 %13659, %v13862_v52   ;;  %v13866_v18 = vpop.eup %13865  ;;  %8466 = vperm.xlu1 %13660, %v13864_v5   ;;  %v18060_v52 = vpop.permute.xlu1 %8274  ;;  %v6294_v5 = vrot.slane %v17845_v6, %v14523_v9  ;;  %13883 = vpow2.f32 %v7643_v8  ;;  %v21779_v6 = vld [vmem:[#allocation95_spill] sm:$0xff] }
 0x388   :  { %v13868_v44 = vpop.eup %13867  ;;  %13885 = vpow2.f32 %v7689_v40  ;;  %v7332_v40 = vsub.f32 %v21777_v10, %v6394_v14 }
 0x389   :  { %v13870_v36 = vpop.eup %13869  ;;  %v7307_v2 = vsub.f32 %v21774_v46, %v6294_v5  ;;  %13887 = vpow2.f32 %v7647_v53  ;;  %v21776_v5 = vld [vmem:[#allocation90_spill] sm:$0xff] }
 0x38a   :  { %v18055_v47 = vpop.permute.xlu0 %8343  ;;  %v13872_v56 = vpop.eup %13871  ;;  %13889 = vpow2.f32 %v7693_v57  ;;  %v7701_v14 = vmul.f32 1.442695, %v7332_v40 }
 0x38b   :  { %8535 = vperm.xlu0 %13659, %v13866_v18   ;;  %8472 = vperm.xlu1 %13660, %v13868_v44   ;;  %v18070_v18 = vpop.permute.xlu1 %8280  ;;  %v13874_v41 = vpop.eup %13873  ;;  %v7330_v44 = vsub.f32 %v16698_v15, %v6386_v3  ;;  %v7651_v46 = vmul.f32 1.442695, %v7307_v2  ;;  %v6402_v3 = vrot.slane %v17821_v25, %v17625_v4 }
 0x38c   :  { %v13876_v38 = vpop.eup %13875 }
 0x38d   :  { %v13878_v34 = vpop.eup %13877  ;;  %v7697_v15 = vmul.f32 1.442695, %v7330_v44  ;;  %13891 = vpow2.f32 %v7651_v46  ;;  %v6410_v44 = vrot.slane %v17821_v25, %v17637_v48  ;;  %v7334_v57 = vsub.f32 %v16713_v60, %v6402_v3 }
 0x38e   :  { %v18065_v1 = vpop.permute.xlu0 %8349 }
 0x38f   :  { %8541 = vperm.xlu0 %13659, %v13870_v36   ;;  %8478 = vperm.xlu1 %13660, %v13872_v56   ;;  %v18080_v36 = vpop.permute.xlu1 %8286  ;;  %v7309_v56 = vsub.f32 %v21776_v5, %v6302_v13  ;;  %v13880_v58 = vpop.eup %13879  ;;  %v21778_v13 = vld [vmem:[#allocation93_spill] sm:$0xff]  ;;  %13893 = vpow2.f32 %v7697_v15  ;;  %v7336_v60 = vsub.f32 %v16754_v32, %v6410_v44  ;;  %v7705_v46 = vmul.f32 1.442695, %v7334_v57 }
 0x390   :  { %v7311_v2 = vsub.f32 %v21778_v13, %v6310_v16  ;;  %v21781_v13 = vld [vmem:[#allocation98_spill] sm:$0xff]  ;;  %v6426_v44 = vrot.slane %v17871_v12, %v17621_v49 }
 0x391   :  { %v7709_v32 = vmul.f32 1.442695, %v7336_v60 }
 0x392   :  { %v18075_v7 = vpop.permute.xlu0 %8355  ;;  %v7659_v16 = vmul.f32 1.442695, %v7311_v2  ;;  %v7340_v60 = vsub.f32 %v16724_v37, %v6426_v44 }
 0x393   :  { %21773 = vst [vmem:[#allocation38_spill] sm:$0xff] %v18075_v7  ;;  %8547 = vperm.xlu0 %13659, %v13874_v41   ;;  %8484 = vperm.xlu1 %13660, %v13876_v38   ;;  %v18090_v41 = vpop.permute.xlu1 %8292  ;;  %v7655_v38 = vmul.f32 1.442695, %v7309_v56  ;;  %v7313_v7 = vsub.f32 %v21779_v6, %v6318_v24  ;;  %v6418_v56 = vrot.slane %v17821_v25, %v17649_v23 }
 0x394   :  { %v6334_v24 = vrot.slane %v17811_v33, %v17664_v51 }
 0x395   :  { %13895 = vpow2.f32 %v7655_v38  ;;  %v7663_v6 = vmul.f32 1.442695, %v7313_v7  ;;  %v6342_v7 = vrot.slane %v17811_v33, %v17686_v43 }
 0x396   :  { %v18085_v8 = vpop.permute.xlu0 %8361  ;;  %13897 = vpow2.f32 %v7701_v14 }
 0x397   :  { %21775 = vst [vmem:[#allocation15_spill] sm:$0xff] %v18085_v8  ;;  %8553 = vperm.xlu0 %13659, %v13878_v34   ;;  %v13882_v8 = vpop.eup %13881  ;;  %8490 = vperm.xlu1 %13660, %v13880_v58   ;;  %v18100_v34 = vpop.permute.xlu1 %8298  ;;  %v6326_v58 = vrot.slane %v17811_v33, %v14523_v9  ;;  %13899 = vpow2.f32 %v7659_v16  ;;  %v21783_v16 = vld [vmem:[#allocation100_spill] sm:$0xff] }
 0x398   :  { %v13884_v5 = vpop.eup %13883  ;;  %13901 = vpow2.f32 %v7705_v46 }
 0x399   :  { %v13886_v10 = vpop.eup %13885  ;;  %v7315_v2 = vsub.f32 %v21781_v13, %v6326_v58  ;;  %13903 = vpow2.f32 %v7663_v6  ;;  %v7317_v58 = vsub.f32 %v21783_v16, %v6334_v24  ;;  %v21785_v24 = vld [vmem:[#allocation102_spill] sm:$0xff] }
 0x39a   :  { %v18095_v53 = vpop.permute.xlu0 %8367  ;;  %v13888_v15 = vpop.eup %13887  ;;  %13905 = vpow2.f32 %v7709_v32  ;;  %v7717_v32 = vmul.f32 1.442695, %v7340_v60 }
 0x39b   :  { %8559 = vperm.xlu0 %13659, %v13882_v8   ;;  %8496 = vperm.xlu1 %13660, %v13884_v5   ;;  %v18110_v8 = vpop.permute.xlu1 %8304  ;;  %v13890_v3 = vpop.eup %13889  ;;  %v7338_v5 = vsub.f32 %v16823_v27, %v6418_v56  ;;  %v6434_v56 = vrot.slane %v17871_v12, %v17625_v4 }
 0x39c   :  { %v13892_v57 = vpop.eup %13891 }
 0x39d   :  { %v13894_v14 = vpop.eup %13893  ;;  %v7713_v27 = vmul.f32 1.442695, %v7338_v5  ;;  %v6442_v5 = vrot.slane %v17871_v12, %v17637_v48  ;;  %v7342_v37 = vsub.f32 %v16766_v28, %v6434_v56 }
 0x39e   :  { %v18105_v59 = vpop.permute.xlu0 %8373 }
 0x39f   :  { %8565 = vperm.xlu0 %13659, %v13886_v10   ;;  %8502 = vperm.xlu1 %13660, %v13888_v15   ;;  %v18120_v38 = vpop.permute.xlu1 %8310  ;;  %v7667_v15 = vmul.f32 1.442695, %v7315_v2  ;;  %v13896_v46 = vpop.eup %13895  ;;  %v7319_v2 = vsub.f32 %v21785_v24, %v6342_v7  ;;  %v7344_v28 = vsub.f32 %v16846_v61, %v6442_v5  ;;  %v7721_v56 = vmul.f32 1.442695, %v7342_v37 }
 0x3a0   :  { %v13898_v13 = vpop.eup %13897  ;;  %v6374_v24 = vrot.slane %v17858_v42, %v17686_v43  ;;  %v6382_v61 = vrot.slane %v17858_v42, %v17703_v19 }
 0x3a1   :  { %13907 = vpow2.f32 %v7667_v15  ;;  %v13900_v44 = vpop.eup %13899  ;;  %v7675_v7 = vmul.f32 1.442695, %v7319_v2  ;;  %v21789_v2 = vld [vmem:[#allocation108_spill] sm:$0xff]  ;;  %v7725_v37 = vmul.f32 1.442695, %v7344_v28  ;;  %v21794_v28 = vld [vmem:[#allocation115_spill] sm:$0xff] }
 0x3a2   :  { %v18115_v40 = vpop.permute.xlu0 %8379  ;;  %13909 = vpow2.f32 %v7713_v27  ;;  %v13902_v16 = vpop.eup %13901  ;;  %v6450_v27 = vrot.slane %v17871_v12, %v17649_v23 }
 0x3a3   :  { %21780 = vst [vmem:[#allocation41_spill] sm:$0xff] %v18115_v40  ;;  %8571 = vperm.xlu0 %13659, %v13890_v3   ;;  %8508 = vperm.xlu1 %13660, %v13892_v57   ;;  %v18130_v3 = vpop.permute.xlu1 %8316  ;;  %v7671_v57 = vmul.f32 1.442695, %v7317_v58  ;;  %v6358_v58 = vrot.slane %v17858_v42, %v14523_v9  ;;  %v13904_v60 = vpop.eup %13903 }
 0x3a4   :  { %v7346_v5 = vsub.f32 %v16896_v17, %v6450_v27  ;;  %v6398_v17 = vrot.slane %v17821_v25, %v17664_v51 }
 0x3a5   :  { %13911 = vpow2.f32 %v7671_v57  ;;  %v7323_v57 = vsub.f32 %v21789_v2, %v6358_v58  ;;  %v6390_v58 = vrot.slane %v17821_v25, %v14523_v9 }
 0x3a6   :  { %v18125_v10 = vpop.permute.xlu0 %8385  ;;  %13913 = vpow2.f32 %v7717_v32 }
 0x3a7   :  { %21782 = vst [vmem:[#allocation17_spill] sm:$0xff] %v18125_v10  ;;  %8577 = vperm.xlu0 %13659, %v13894_v14   ;;  %v6350_v10 = vrot.slane %v17811_v33, %v17703_v19  ;;  %8514 = vperm.xlu1 %13660, %v13896_v46   ;;  %v18140_v14 = vpop.permute.xlu1 %8322  ;;  %v21787_v33 = vld [vmem:[#allocation105_spill] sm:$0xff]  ;;  %v13906_v46 = vpop.eup %13905  ;;  %13915 = vpow2.f32 %v7675_v7  ;;  %v21791_v7 = vld [vmem:[#allocation110_spill] sm:$0xff] }
 0x3a8   :  { %13917 = vpow2.f32 %v7721_v56  ;;  %v7329_v56 = vsub.f32 %v21794_v28, %v6382_v61  ;;  %v21797_v28 = vld [vmem:[#allocation119_spill] sm:$0xff] }
 0x3aa   :  { %v18135_v6 = vpop.permute.xlu0 %8391  ;;  %v7695_v26 = vmul.f32 1.442695, %v7329_v56 }
 0x3ab   :  { %21784 = vst [vmem:[#allocation45_spill] sm:$0xff] %v18135_v6  ;;  %8583 = vperm.xlu0 %13659, %v13898_v13   ;;  %v7321_v6 = vsub.f32 %v21787_v33, %v6350_v10  ;;  %8520 = vperm.xlu1 %13660, %v13900_v44   ;;  %v18150_v15 = vpop.permute.xlu1 %8328  ;;  %v6366_v33 = vrot.slane %v17858_v42, %v17664_v51  ;;  %v13908_v32 = vpop.eup %13907  ;;  %v7683_v42 = vmul.f32 1.442695, %v7323_v57 }
 0x3ad   :  { %v7679_v13 = vmul.f32 1.442695, %v7321_v6  ;;  %v6458_v6 = vrot.slane %v17837_v50, %v17621_v49 }
 0x3ae   :  { %v18145_v40 = vpop.permute.xlu0 %8397 }
 0x3af   :  { %21786 = vst [vmem:[#allocation19_spill] sm:$0xff] %v18145_v40  ;;  %8589 = vperm.xlu0 %13659, %v13902_v16   ;;  %8526 = vperm.xlu1 %13660, %v13904_v60   ;;  %v18162_v44 = vpop.permute.xlu1 %8334  ;;  %v13910_v16 = vpop.eup %13909  ;;  %13919 = vpow2.f32 %v7679_v13  ;;  %v6466_v13 = vrot.slane %v17837_v50, %v17625_v4 }
 0x3b0   :  { %21790 = vst [vmem:[#allocation21_spill] sm:$0xff] %v18162_v44  ;;  %13921 = vpow2.f32 %v7725_v37  ;;  %v13912_v40 = vpop.eup %13911  ;;  %v7333_v37 = vsub.f32 %v21797_v28, %v6398_v17 }
 0x3b1   :  { %v13914_v57 = vpop.eup %13913  ;;  %13923 = vpow2.f32 %v7683_v42  ;;  %v21798_v42 = vld [vmem:[#allocation122_spill] sm:$0xff] }
 0x3b2   :  { %v18157_v10 = vpop.permute.xlu0 %8403 }
 0x3b3   :  { %21788 = vst [vmem:[#allocation124_spill] sm:$0xff] %v18157_v10  ;;  %8595 = vperm.xlu0 %13659, %v13906_v46   ;;  %v7325_v10 = vsub.f32 %v21791_v7, %v6366_v33  ;;  %v21793_v46 = vld [vmem:[#allocation112_spill] sm:$0xff]  ;;  %8532 = vperm.xlu1 %13660, %v13908_v32   ;;  %v18177_v27 = vpop.permute.xlu1 %8340  ;;  %v6406_v33 = vrot.slane %v17821_v25, %v17686_v43  ;;  %v7729_v7 = vmul.f32 1.442695, %v7346_v5 }
 0x3b4   :  { %v7327_v2 = vsub.f32 %v21793_v46, %v6374_v24  ;;  %v7348_v24 = vsub.f32 %v16796_v63, %v6458_v6  ;;  %v6414_v32 = vrot.slane %v17821_v25, %v17703_v19  ;;  %v13916_v6 = vpop.eup %13915 }
 0x3b5   :  { %v7687_v46 = vmul.f32 1.442695, %v7325_v10  ;;  %v7335_v63 = vsub.f32 %v16734_v31, %v6406_v33  ;;  %13925 = vpow2.f32 %v7729_v7  ;;  %v6474_v10 = vrot.slane %v17837_v50, %v17637_v48  ;;  %v13918_v25 = vpop.eup %13917 }
 0x3b6   :  { %v18172_v60 = vpop.permute.xlu0 %8409  ;;  %v7691_v61 = vmul.f32 1.442695, %v7327_v2  ;;  %v7337_v2 = vsub.f32 %v21798_v42, %v6414_v32  ;;  %v6482_v31 = vrot.slane %v17837_v50, %v17649_v23 }
 0x3b7   :  { %21792 = vst [vmem:[#allocation128_spill] sm:$0xff] %v18172_v60  ;;  %8601 = vperm.xlu0 %13659, %v13910_v16   ;;  %v21795_v60 = vld [vmem:[#allocation117_spill] sm:$0xff]  ;;  %8538 = vperm.xlu1 %13660, %v13912_v40   ;;  %v18191_v5 = vpop.permute.xlu1 %8346  ;;  %13927 = vpow2.f32 %v7687_v46  ;;  %v7707_v33 = vmul.f32 1.442695, %v7335_v63  ;;  %v6498_v63 = vrot.slane %v17884_v45, %v17625_v4 }
 0x3b8   :  { %v7331_v16 = vsub.f32 %v21795_v60, %v6390_v58  ;;  %v7350_v58 = vsub.f32 %v16855_v30, %v6466_v13  ;;  %v7733_v60 = vmul.f32 1.442695, %v7348_v24  ;;  %13929 = vpow2.f32 %v7691_v61 }
 0x3b9   :  { %13931 = vpow2.f32 %v7695_v26  ;;  %v7352_v30 = vsub.f32 %v16928_v54, %v6474_v10  ;;  %v13920_v7 = vpop.eup %13919  ;;  %v6422_v13 = vrot.slane %v17871_v12, %v14523_v9  ;;  %v7711_v32 = vmul.f32 1.442695, %v7337_v2  ;;  %v21801_v26 = vld [vmem:[#allocation141_spill] sm:$0xff] }
 0x3ba   :  { %v18188_v44 = vpop.permute.xlu0 %8415  ;;  %v7699_v17 = vmul.f32 1.442695, %v7331_v16  ;;  %13933 = vpow2.f32 %v7733_v60  ;;  %v7737_v24 = vmul.f32 1.442695, %v7350_v58  ;;  %v13922_v46 = vpop.eup %13921  ;;  %v6430_v16 = vrot.slane %v17871_v12, %v17664_v51  ;;  %v21802_v60 = vld [vmem:[#allocation120_spill] sm:$0xff] }
 0x3bb   :  { %21796 = vst [vmem:[#allocation23_spill] sm:$0xff] %v18188_v44  ;;  %8607 = vperm.xlu0 %13659, %v13914_v57   ;;  %v7703_v57 = vmul.f32 1.442695, %v7333_v37  ;;  %8544 = vperm.xlu1 %13660, %v13916_v6   ;;  %v18202_v56 = vpop.permute.xlu1 %8352  ;;  %v6490_v61 = vrot.slane %v17884_v45, %v17621_v49  ;;  %v7354_v54 = vsub.f32 %v21801_v26, %v6482_v31  ;;  %v7741_v37 = vmul.f32 1.442695, %v7352_v30  ;;  %v13924_v6 = vpop.eup %13923  ;;  %v21808_v58 = vld [vmem:[#allocation148_spill] sm:$0xff] }
 0x3bc   :  { %13935 = vpow2.f32 %v7699_v17  ;;  %v6506_v10 = vrot.slane %v17884_v45, %v17637_v48  ;;  %v18223_v42 = vsub.f32 %v21802_v60, %v6422_v13  ;;  %v21803_v17 = vld [vmem:[#allocation169_spill] sm:$0xff]  ;;  %v6514_v31 = vrot.slane %v17884_v45, %v17649_v23  ;;  %v21806_v60 = vld [vmem:[#allocation136_spill] sm:$0xff] }
 0x3bd   :  { %13937 = vpow2.f32 %v7703_v57  ;;  %v18226_v57 = vsub.f32 %v21803_v17, %v6430_v16  ;;  %v9050_v26 = vrot.slane %v17935_v11, %v15047_v39  ;;  %v9046_v13 = vrot.slane %v18050_v62, %v15047_v39  ;;  %v21807_v17 = vld [vmem:[#allocation145_spill] sm:$0xff] }
 0x3be   :  { %v18198_v40 = vpop.permute.xlu0 %8421  ;;  %13939 = vpow2.f32 %v7707_v33  ;;  %v21804_v33 = vld [vmem:[#allocation173_spill] sm:$0xff]  ;;  %v9058_v62 = vrot.slane %v17945_v21, %v15047_v39  ;;  %v9094_v21 = vrot.slane %v18110_v8, %v15047_v39 }
 0x3bf   :  { %21799 = vst [vmem:[#allocation130_spill] sm:$0xff] %v18198_v40  ;;  %8613 = vperm.xlu0 %13659, %v13918_v25   ;;  %8550 = vperm.xlu1 %13660, %v13920_v7   ;;  %v18214_v28 = vpop.permute.xlu1 %8358  ;;  %13941 = vpow2.f32 %v7737_v24  ;;  %v13926_v2 = vpop.eup %13925  ;;  %v7356_v30 = vsub.f32 %v21804_v33, %v6490_v61  ;;  %v9054_v24 = vrot.slane %v18060_v52, %v15047_v39 }
 0x3c0   :  { %13943 = vpow2.f32 %v7711_v32  ;;  %v7358_v61 = vsub.f32 %v21806_v60, %v6498_v63  ;;  %v7360_v33 = vsub.f32 %v21807_v17, %v6506_v10  ;;  %v9082_v52 = vrot.slane %v17975_v0, %v15047_v39 }
 0x3c1   :  { %v13928_v16 = vpop.eup %13927  ;;  %13945 = vpow2.f32 %v7741_v37  ;;  %v18253_v63 = vsub.f32 %v21808_v58, %v6514_v31  ;;  %v7749_v17 = vmul.f32 1.442695, %v7356_v30  ;;  %v9110_v30 = vrot.slane %v18130_v3, %v15047_v39 }
 0x3c2   :  { %v18211_v25 = vpop.permute.xlu0 %8427  ;;  %v13930_v11 = vpop.eup %13929  ;;  %v9126_v3 = vrot.slane %v18150_v15, %v15047_v39  ;;  %v6522_v15 = vrot.slane %v17847_v35, %v17621_v49 }
 0x3c3   :  { %21800 = vst [vmem:[#allocation104_spill] sm:$0xff] %v18211_v25  ;;  %8619 = vperm.xlu0 %13659, %v13922_v46   ;;  %v7745_v46 = vmul.f32 1.442695, %v7354_v54  ;;  %8556 = vperm.xlu1 %13660, %v13924_v6   ;;  %v18239_v32 = vpop.permute.xlu1 %8364  ;;  %v9062_v54 = vrot.slane %v18070_v18, %v15047_v39  ;;  %v10042_v6 = vsel %vm5547_vm1, %v9050_v26, %v9046_v13  ;;  %v13932_v37 = vpop.eup %13931 }
 0x3c4   :  { %v10043_v10 = vsel %vm5549_vm2, %v9054_v24, %v10042_v6  ;;  %v9086_v18 = vrot.slane %v18100_v34, %v15047_v39  ;;  %v13934_v0 = vpop.eup %13933  ;;  %v9090_v26 = vrot.slane %v17985_v22, %v15047_v39  ;;  %v9114_v34 = vrot.slane %v18015_v20, %v15047_v39 }
 0x3c5   :  { %13947 = vpow2.f32 %v7745_v46  ;;  %v9122_v20 = vrot.slane %v18025_v29, %v15047_v39 }
 0x3c6   :  { %v18231_v7 = vpop.permute.xlu0 %8433  ;;  %v18266_v13 = vpop.eup %13935  ;;  %13949 = vpow2.f32 %v7749_v17 }
 0x3c7   :  { %21805 = vst [vmem:[#allocation57_spill] sm:$0xff] %v18231_v7  ;;  %8625 = vperm.xlu0 %13659, %v13926_v2   ;;  %v9078_v2 = vrot.slane %v18090_v41, %v15047_v39  ;;  %v10044_v41 = vsel %vm5551_vm3, %v9058_v62, %v10043_v10  ;;  %8562 = vperm.xlu1 %13660, %v13928_v16   ;;  %v8371_v31 = vpop.permute.xlu1 %8370  ;;  %v18274_v22 = vpop.eup %13937  ;;  %v7753_v62 = vmul.f32 1.442695, %v7358_v61  ;;  %v7757_v61 = vmul.f32 1.442695, %v7360_v33 }
 0x3c8   :  { %v10045_v8 = vsel %vm5553_vm4, %v9062_v54, %v10044_v41  ;;  %v18279_v6 = vpop.eup %13939  ;;  %v9150_v33 = vrot.slane %v18191_v5, %v15047_v39 }
 0x3c9   :  { %v10049_v58 = vsel %vm5547_vm1, %v9082_v52, %v9078_v2  ;;  %v9118_v52 = vrot.slane %v18140_v14, %v15047_v39  ;;  %v10056_v2 = vsel %vm5547_vm1, %v9114_v34, %v9110_v30  ;;  %v13942_v46 = vpop.eup %13941  ;;  %v9178_v34 = vrot.slane %v18095_v53, %v15047_v39 }
 0x3ca   :  { %v18260_v60 = vpop.permute.xlu0 %8439  ;;  %v10050_v24 = vsel %vm5549_vm2, %v9086_v18, %v10049_v58  ;;  %v9146_v18 = vrot.slane %v18055_v47, %v15047_v39  ;;  %v9154_v47 = vrot.slane %v18065_v1, %v15047_v39  ;;  %v9066_v58 = vrot.slane %v17955_v55, %v15047_v39 }
 0x3cb   :  { %8631 = vperm.xlu0 %13659, %v13934_v0   ;;  %v10051_v16 = vsel %vm5551_vm3, %v9090_v26, %v10050_v24  ;;  %v10057_v14 = vsel %vm5549_vm2, %v9118_v52, %v10056_v2  ;;  %v9142_v0 = vrot.slane %v18177_v27, %v15047_v39  ;;  %8568 = vperm.xlu1 %13660, %v13930_v11   ;;  %v8377_v29 = vpop.permute.xlu1 %8376  ;;  %13951 = vpow2.f32 %v7753_v62 }
 0x3cc   :  { %v10052_v54 = vsel %vm5553_vm4, %v9094_v21, %v10051_v16  ;;  %v18294_v21 = vpop.eup %13943  ;;  %v10058_v26 = vsel %vm5551_vm3, %v9122_v20, %v10057_v14  ;;  %v9158_v11 = vrot.slane %v18202_v56, %v15047_v39  ;;  %v9174_v24 = vrot.slane %v18239_v32, %v15047_v39 }
 0x3cd   :  { %v10059_v41 = vsel %vm5553_vm4, %v9126_v3, %v10058_v26  ;;  %v10063_v27 = vsel %vm5547_vm1, %v9146_v18, %v9142_v0  ;;  %v13946_v17 = vpop.eup %13945  ;;  %v9070_v30 = vrot.slane %v18080_v36, %v15047_v39  ;;  %v9102_v56 = vrot.slane %v18120_v38, %v15047_v39  ;;  %v21810_v36 = vld [vmem:[#allocation76_spill] sm:$0xff] }
 0x3ce   :  { %v18287_v10 = vpop.permute.xlu0 %8445  ;;  %v10064_v5 = vsel %vm5549_vm2, %v9150_v33, %v10063_v27  ;;  %v9182_v55 = vrot.slane %v8371_v31, %v15047_v39  ;;  %v9186_v53 = vrot.slane %v18105_v59, %v15047_v39  ;;  %v10070_v20 = vsel %vm5547_vm1, %v9178_v34, %v9174_v24  ;;  %v21811_v59 = vld [vmem:[#allocation38_spill] sm:$0xff] }
 0x3cf   :  { %8637 = vperm.xlu0 %13659, %v13942_v46   ;;  %v10065_v16 = vsel %vm5551_vm3, %v9154_v47, %v10064_v5  ;;  %8574 = vperm.xlu1 %13660, %v13932_v37   ;;  %v18322_v52 = vpop.permute.xlu1 %8382  ;;  %v9190_v2 = vrot.slane %v8377_v29, %v15047_v39  ;;  %v9098_v38 = vrot.slane %v21810_v36, %v15047_v39  ;;  %v7715_v3 = vmul.f32 1.442695, %v18223_v42  ;;  %v13948_v62 = vpop.eup %13947 }
 0x3d0   :  { %21809 = vst [vmem:[#allocation107_spill] sm:$0xff] %v18322_v52  ;;  %v10066_v32 = vsel %vm5553_vm4, %v9158_v11, %v10065_v16  ;;  %v9166_v31 = vrot.slane %v18214_v28, %v15047_v39  ;;  %v10071_v37 = vsel %vm5549_vm2, %v9182_v55, %v10070_v20  ;;  %v9162_v46 = vrot.slane %v21811_v59, %v15047_v39  ;;  %v13950_v5 = vpop.eup %13949  ;;  %v21818_v16 = vld [vmem:[#allocation171_spill] sm:$0xff]  ;;  %v21820_v20 = vld [vmem:[#allocation182_spill] sm:$0xff] }
 0x3d1   :  { %v10072_v18 = vsel %vm5551_vm3, %v9186_v53, %v10071_v37  ;;  %v10046_v0 = vsel %vm5555_vm5, %v9066_v58, %v10045_v8  ;;  %v7761_v29 = vmul.f32 1.442695, %v18253_v63  ;;  %v10053_v33 = vsel %vm5555_vm5, %v9098_v38, %v10052_v54  ;;  %v21813_v8 = vld [vmem:[#allocation21_spill] sm:$0xff] }
 0x3d2   :  { %v18314_v1 = vpop.permute.xlu0 %8451  ;;  %v18343_v26 = vsel %vm5553_vm4, %v9190_v2, %v10072_v18  ;;  %v18349_v42 = vsel %vm5557_vm6, %v9070_v30, %v10046_v0  ;;  %v6530_v47 = vrot.slane %v17847_v35, %v17625_v4  ;;  %v9134_v27 = vrot.slane %v21813_v8, %v15047_v39  ;;  %v21815_v58 = vld [vmem:[#allocation85_spill] sm:$0xff]  ;;  %v21823_v18 = vld [vmem:[#allocation151_spill] sm:$0xff] }
 0x3d3   :  { %8643 = vperm.xlu0 %13659, %v13946_v17   ;;  %21812 = vst [vmem:[#allocation132_spill] sm:$0xff] %v18343_v26  ;;  %8580 = vperm.xlu1 %13660, %v18266_v13   ;;  %v18346_v28 = vpop.permute.xlu1 %8388  ;;  %v18357_v63 = vsel %vm5557_vm6, %v9102_v56, %v10053_v33  ;;  %v10067_v11 = vsel %vm5555_vm5, %v9162_v46, %v10066_v32  ;;  %13953 = vpow2.f32 %v7757_v61  ;;  %v21814_v13 = vld [vmem:[#allocation176_spill] sm:$0xff]  ;;  %v7719_v53 = vmul.f32 1.442695, %v18226_v57  ;;  %v21822_v37 = vld [vmem:[#allocation133_spill] sm:$0xff] }
 0x3d4   :  { %v7364_v17 = vsub.f32 %v21814_v13, %v6522_v15  ;;  %v9130_v34 = vrot.slane %v21815_v58, %v15047_v39  ;;  %v18364_v54 = vsel %vm5557_vm6, %v9166_v31, %v10067_v11  ;;  %v6446_v30 = vrot.slane %v17871_v12, %v17703_v19  ;;  %v21826_v13 = vld [vmem:[#allocation159_spill] sm:$0xff] }
 0x3d5   :  { %v21817_v15 = vrot.slane %v17871_v12, %v17686_v43  ;;  %13955 = vpow2.f32 %v7715_v3  ;;  %v7366_v2 = vsub.f32 %v21820_v20, %v6530_v47  ;;  %v13952_v38 = vpop.eup %13951  ;;  %v6454_v59 = vrot.slane %v17837_v50, %v14523_v9 }
 0x3d6   :  { %v18338_v14 = vpop.permute.xlu0 %8457  ;;  %v10060_v61 = vsel %vm5555_vm5, %v9130_v34, %v10059_v41  ;;  %13957 = vpow2.f32 %v7761_v29  ;;  %v7765_v36 = vmul.f32 1.442695, %v7364_v17  ;;  %v7345_v57 = vsub.f32 %v21822_v37, %v6446_v30  ;;  %v21827_v34 = vld [vmem:[#allocation14_spill] sm:$0xff] }
 0x3d7   :  { %8649 = vperm.xlu0 %13659, %v13948_v62   ;;  %8586 = vperm.xlu1 %13660, %v18274_v22   ;;  %v18371_v56 = vpop.permute.xlu1 %8394  ;;  %v7343_v55 = vsub.f32 %v21818_v16, %v21817_v15  ;;  %v18380_v32 = vsel %vm5557_vm6, %v9134_v27, %v10060_v61  ;;  %v6538_v22 = vrot.slane %v17847_v35, %v17637_v48  ;;  %13959 = vpow2.f32 %v7719_v53  ;;  %v21825_v27 = vld [vmem:[#allocation170_spill] sm:$0xff] }
 0x3d8   :  { %21819 = vst [vmem:[#allocation64_spill] sm:$0xff] %v18380_v32  ;;  %v6546_v46 = vrot.slane %v17847_v35, %v17649_v23  ;;  %13961 = vpow2.f32 %v7765_v36  ;;  %v7769_v62 = vmul.f32 1.442695, %v7366_v2  ;;  %v7727_v47 = vmul.f32 1.442695, %v7345_v57  ;;  %v21831_v36 = vld [vmem:[#allocation180_spill] sm:$0xff] }
 0x3d9   :  { %v7723_v3 = vmul.f32 1.442695, %v7343_v55  ;;  %v7368_v0 = vsub.f32 %v21823_v18, %v6538_v22  ;;  %v6462_v8 = vrot.slane %v17837_v50, %v17664_v51  ;;  %v7347_v11 = vsub.f32 %v21825_v27, %v6454_v59  ;;  %v21830_v55 = vld [vmem:[#allocation126_spill] sm:$0xff]  ;;  %v21833_v18 = vld [vmem:[#allocation177_spill] sm:$0xff] }
 0x3da   :  { %v18366_v24 = vpop.permute.xlu0 %8463  ;;  %v7370_v17 = vsub.f32 %v21826_v13, %v6546_v46  ;;  %v6470_v16 = vrot.slane %v17837_v50, %v17686_v43  ;;  %v6562_v2 = vrot.slane %v21827_v34, %v17625_v4  ;;  %v6478_v46 = vrot.slane %v17837_v50, %v17703_v19 }
 0x3db   :  { %21816 = vst [vmem:[#allocation27_spill] sm:$0xff] %v18366_v24  ;;  %8655 = vperm.xlu0 %13659, %v13950_v5   ;;  %8592 = vperm.xlu1 %13660, %v18279_v6   ;;  %v18388_v31 = vpop.permute.xlu1 %8400  ;;  %13963 = vpow2.f32 %v7723_v3  ;;  %v7773_v58 = vmul.f32 1.442695, %v7368_v0  ;;  %v6554_v5 = vrot.slane %v21827_v34, %v17621_v49  ;;  %v7349_v53 = vsub.f32 %v21830_v55, %v6462_v8 }
 0x3dc   :  { %13965 = vpow2.f32 %v7769_v62  ;;  %v7731_v22 = vmul.f32 1.442695, %v7347_v11  ;;  %v7777_v20 = vmul.f32 1.442695, %v7370_v17  ;;  %v7351_v0 = vsub.f32 %v21833_v18, %v6470_v16  ;;  %v21839_v18 = vld [vmem:[#allocation172_spill] sm:$0xff] }
 0x3dd   :  { %v13954_v6 = vpop.eup %13953  ;;  %13967 = vpow2.f32 %v7727_v47  ;;  %v7735_v62 = vmul.f32 1.442695, %v7349_v53  ;;  %v21834_v47 = vld [vmem:[#allocation156_spill] sm:$0xff]  ;;  %v6486_v16 = vrot.slane %v17884_v45, %v14523_v9  ;;  %v6578_v55 = vrot.slane %v21827_v34, %v17649_v23 }
 0x3de   :  { %v18385_v41 = vpop.permute.xlu0 %8469  ;;  %13969 = vpow2.f32 %v7773_v58  ;;  %v7374_v8 = vsub.f32 %v21834_v47, %v6562_v2  ;;  %v21837_v53 = vld [vmem:[#allocation96_spill] sm:$0xff]  ;;  %v6510_v12 = vrot.slane %v17884_v45, %v17703_v19  ;;  %v6574_v24 = vrot.slane %v21827_v34, %v17703_v19 }
 0x3df   :  { %21821 = vst [vmem:[#allocation29_spill] sm:$0xff] %v18385_v41  ;;  %8661 = vperm.xlu0 %13659, %v13952_v38   ;;  %8598 = vperm.xlu1 %13660, %v18294_v21   ;;  %v18399_v33 = vpop.permute.xlu1 %8406  ;;  %v13956_v30 = vpop.eup %13955  ;;  %v7372_v38 = vsub.f32 %v21831_v36, %v6554_v5  ;;  %13971 = vpow2.f32 %v7731_v22  ;;  %v21836_v5 = vld [vmem:[#allocation181_spill] sm:$0xff] }
 0x3e0   :  { %v13958_v21 = vpop.eup %13957  ;;  %13973 = vpow2.f32 %v7777_v20  ;;  %v7785_v20 = vmul.f32 1.442695, %v7374_v8  ;;  %v21841_v8 = vld [vmem:[#allocation87_spill] sm:$0xff] }
 0x3e1   :  { %v13960_v37 = vpop.eup %13959  ;;  %v7781_v27 = vmul.f32 1.442695, %v7372_v38  ;;  %13975 = vpow2.f32 %v7735_v62  ;;  %v21840_v62 = vld [vmem:[#allocation121_spill] sm:$0xff] }
 0x3e2   :  { %v18396_v29 = vpop.permute.xlu0 %8475  ;;  %v13962_v3 = vpop.eup %13961  ;;  %v7378_v47 = vsub.f32 %v21840_v62, %v6578_v55 }
 0x3e3   :  { %21824 = vst [vmem:[#allocation138_spill] sm:$0xff] %v18396_v29  ;;  %8667 = vperm.xlu0 %13659, %v13954_v6   ;;  %8604 = vperm.xlu1 %13660, %v13956_v30   ;;  %v18409_v15 = vpop.permute.xlu1 %8412  ;;  %v6570_v6 = vrot.slane %v21827_v34, %v17637_v48  ;;  %v7353_v30 = vsub.f32 %v21836_v5, %v6478_v46  ;;  %13977 = vpow2.f32 %v7781_v27 }
 0x3e4   :  { %21829 = vst [vmem:[#allocation71_spill] sm:$0xff] %v18409_v15  ;;  %v6494_v46 = vrot.slane %v17884_v45, %v17664_v51  ;;  %v6586_v27 = vrot.slane %v21841_v8, %v17621_v49  ;;  %v7793_v55 = vmul.f32 1.442695, %v7378_v47  ;;  %v6602_v47 = vrot.slane %v21841_v8, %v17637_v48 }
 0x3e5   :  { %v13964_v11 = vpop.eup %13963  ;;  %v7376_v22 = vsub.f32 %v21837_v53, %v6570_v6 }
 0x3e6   :  { %v18407_v61 = vpop.permute.xlu0 %8481  ;;  %v13966_v17 = vpop.eup %13965 }
 0x3e7   :  { %21828 = vst [vmem:[#allocation31_spill] sm:$0xff] %v18407_v61  ;;  %8673 = vperm.xlu0 %13659, %v13958_v21   ;;  %8610 = vperm.xlu1 %13660, %v13960_v37   ;;  %v18419_v59 = vpop.permute.xlu1 %8418  ;;  %v7739_v21 = vmul.f32 1.442695, %v7351_v0  ;;  %v13968_v2 = vpop.eup %13967  ;;  %v7355_v0 = vsub.f32 %v21839_v18, %v6486_v16  ;;  %v7789_v6 = vmul.f32 1.442695, %v7376_v22  ;;  %v21843_v16 = vld [vmem:[#allocation174_spill] sm:$0xff]  ;;  %v6594_v22 = vrot.slane %v21841_v8, %v17625_v4 }
 0x3e8   :  { %21832 = vst [vmem:[#allocation35_spill] sm:$0xff] %v18419_v59  ;;  %v13970_v38 = vpop.eup %13969  ;;  %v7357_v53 = vsub.f32 %v21843_v16, %v6494_v46  ;;  %v21846_v46 = vld [vmem:[#allocation134_spill] sm:$0xff] }
 0x3e9   :  { %13979 = vpow2.f32 %v7739_v21 }
 0x3ea   :  { %v18417_v57 = vpop.permute.xlu0 %8487  ;;  %13981 = vpow2.f32 %v7785_v20  ;;  %v21844_v20 = vld [vmem:[#allocation183_spill] sm:$0xff] }
 0x3eb   :  { %8679 = vperm.xlu0 %13659, %v13962_v3   ;;  %8616 = vperm.xlu1 %13660, %v13964_v11   ;;  %v18429_v58 = vpop.permute.xlu1 %8424  ;;  %v7743_v3 = vmul.f32 1.442695, %v7353_v30  ;;  %v13972_v11 = vpop.eup %13971  ;;  %v6502_v30 = vrot.slane %v17884_v45, %v17686_v43  ;;  %v21849_v45 = vld [vmem:[#allocation147_spill] sm:$0xff] }
 0x3ec   :  { %21835 = vst [vmem:[#allocation140_spill] sm:$0xff] %v18429_v58  ;;  %v13974_v5 = vpop.eup %13973  ;;  %v7361_v32 = vsub.f32 %v21849_v45, %v6510_v12  ;;  %v6526_v45 = vrot.slane %v17847_v35, %v17664_v51 }
 0x3ed   :  { %13983 = vpow2.f32 %v7743_v3  ;;  %v13976_v18 = vpop.eup %13975 }
 0x3ee   :  { %v18427_v13 = vpop.permute.xlu0 %8493  ;;  %13985 = vpow2.f32 %v7789_v6  ;;  %v7751_v6 = vmul.f32 1.442695, %v7357_v53  ;;  %v6518_v53 = vrot.slane %v17847_v35, %v14523_v9  ;;  %v7759_v12 = vmul.f32 1.442695, %v7361_v32 }
 0x3ef   :  { %8685 = vperm.xlu0 %13659, %v13966_v17   ;;  %8622 = vperm.xlu1 %13660, %v13968_v2   ;;  %v18439_v37 = vpop.permute.xlu1 %8430  ;;  %v7747_v2 = vmul.f32 1.442695, %v7355_v0  ;;  %v7359_v0 = vsub.f32 %v21846_v46, %v6502_v30  ;;  %v6534_v32 = vrot.slane %v17847_v35, %v17686_v43 }
 0x3f0   :  { %21838 = vst [vmem:[#allocation39_spill] sm:$0xff] %v18439_v37  ;;  %v6542_v37 = vrot.slane %v17847_v35, %v17703_v19  ;;  %v21863_v35 = vld [vmem:[#allocation152_spill] sm:$0xff] }
 0x3f1   :  { %13987 = vpow2.f32 %v7747_v2  ;;  %v7755_v30 = vmul.f32 1.442695, %v7359_v0  ;;  %v6610_v2 = vrot.slane %v21841_v8, %v17649_v23  ;;  %v21852_v0 = vld [vmem:[#allocation175_spill] sm:$0xff] }
 0x3f2   :  { %v18437_v36 = vpop.permute.xlu0 %8499  ;;  %13989 = vpow2.f32 %v7793_v55  ;;  %v21850_v55 = vld [vmem:[#allocation164_spill] sm:$0xff]  ;;  %v7369_v41 = vsub.f32 %v21863_v35, %v6542_v37  ;;  %v6558_v37 = vrot.slane %v21827_v34, %v17664_v51 }
 0x3f3   :  { %8691 = vperm.xlu0 %13659, %v13970_v38   ;;  %8628 = vperm.xlu1 %13660, %v13972_v11   ;;  %v18449_v21 = vpop.permute.xlu1 %8436  ;;  %v7380_v38 = vsub.f32 %v21844_v20, %v6586_v27  ;;  %v13978_v11 = vpop.eup %13977  ;;  %v21847_v27 = vld [vmem:[#allocation113_spill] sm:$0xff]  ;;  %13991 = vpow2.f32 %v7751_v6  ;;  %v7363_v6 = vsub.f32 %v21852_v0, %v6518_v53  ;;  %v21857_v53 = vld [vmem:[#allocation178_spill] sm:$0xff] }
 0x3f4   :  { %v13980_v20 = vpop.eup %13979  ;;  %v7775_v35 = vmul.f32 1.442695, %v7369_v41  ;;  %v6566_v41 = vrot.slane %v21827_v34, %v17686_v43 }
 0x3f5   :  { %v7797_v16 = vmul.f32 1.442695, %v7380_v38  ;;  %v7763_v0 = vmul.f32 1.442695, %v7363_v6 }
 0x3f6   :  { %v18447_v17 = vpop.permute.xlu0 %8505 }
 0x3f7   :  { %21842 = vst [vmem:[#allocation143_spill] sm:$0xff] %v18447_v17  ;;  %8697 = vperm.xlu0 %13659, %v13974_v5   ;;  %8634 = vperm.xlu1 %13660, %v13976_v18   ;;  %v18459_v3 = vpop.permute.xlu1 %8442  ;;  %v7382_v5 = vsub.f32 %v21847_v27, %v6594_v22  ;;  %v13982_v18 = vpop.eup %13981  ;;  %v7384_v22 = vsub.f32 %v21850_v55, %v6602_v47  ;;  %13993 = vpow2.f32 %v7797_v16 }
 0x3f8   :  { %13995 = vpow2.f32 %v7755_v30 }
 0x3f9   :  { %v7801_v38 = vmul.f32 1.442695, %v7382_v5  ;;  %v7805_v47 = vmul.f32 1.442695, %v7384_v22  ;;  %v21854_v5 = vld [vmem:[#allocation16_spill] sm:$0xff] }
 0x3fa   :  { %v18457_v62 = vpop.permute.xlu0 %8511  ;;  %v6618_v16 = vrot.slane %v21854_v5, %v17621_v49  ;;  %v6626_v22 = vrot.slane %v21854_v5, %v17625_v4  ;;  %v6638_v40 = vrot.slane %v21854_v5, %v17703_v19 }
 0x3fb   :  { %21845 = vst [vmem:[#allocation125_spill] sm:$0xff] %v18457_v62  ;;  %8703 = vperm.xlu0 %13659, %v13978_v11   ;;  %8640 = vperm.xlu1 %13660, %v13980_v20   ;;  %v18469_v61 = vpop.permute.xlu1 %8448  ;;  %v13984_v11 = vpop.eup %13983  ;;  %13997 = vpow2.f32 %v7801_v38  ;;  %v21858_v38 = vld [vmem:[#allocation161_spill] sm:$0xff] }
 0x3fc   :  { %v13986_v27 = vpop.eup %13985  ;;  %13999 = vpow2.f32 %v7759_v12 }
 0x3fd   :  { %v13988_v55 = vpop.eup %13987  ;;  %14001 = vpow2.f32 %v7805_v47 }
 0x3fe   :  { %v18467_v50 = vpop.permute.xlu0 %8517  ;;  %14003 = vpow2.f32 %v7763_v0  ;;  %v6642_v0 = vrot.slane %v21854_v5, %v17649_v23 }
 0x3ff   :  { %21848 = vst [vmem:[#allocation78_spill] sm:$0xff] %v18467_v50  ;;  %8709 = vperm.xlu0 %13659, %v13982_v18   ;;  %8646 = vperm.xlu1 %13660, %v13984_v11   ;;  %v18479_v20 = vpop.permute.xlu1 %8454  ;;  %v21853_v18 = vld [vmem:[#allocation168_spill] sm:$0xff]  ;;  %v13990_v11 = vpop.eup %13989 }
 0x400   :  { %v7386_v50 = vsub.f32 %v21853_v18, %v6610_v2  ;;  %v7388_v18 = vsub.f32 %v21858_v38, %v6618_v16  ;;  %v21861_v16 = vld [vmem:[#allocation144_spill] sm:$0xff] }
 0x402   :  { %v18477_v46 = vpop.permute.xlu0 %8523  ;;  %v7809_v2 = vmul.f32 1.442695, %v7386_v50  ;;  %v6634_v50 = vrot.slane %v21854_v5, %v17637_v48 }
 0x403   :  { %21851 = vst [vmem:[#allocation123_spill] sm:$0xff] %v18477_v46  ;;  %8715 = vperm.xlu0 %13659, %v13986_v27   ;;  %8652 = vperm.xlu1 %13660, %v13988_v55   ;;  %v18489_v30 = vpop.permute.xlu1 %8460  ;;  %v7365_v27 = vsub.f32 %v21857_v53, %v6526_v45  ;;  %v21860_v45 = vld [vmem:[#allocation150_spill] sm:$0xff]  ;;  %v7813_v53 = vmul.f32 1.442695, %v7388_v18 }
 0x404   :  { %21856 = vst [vmem:[#allocation127_spill] sm:$0xff] %v18489_v30  ;;  %v7367_v6 = vsub.f32 %v21860_v45, %v6534_v32  ;;  %14005 = vpow2.f32 %v7809_v2  ;;  %v21864_v2 = vld [vmem:[#allocation157_spill] sm:$0xff] }
 0x405   :  { %v7767_v47 = vmul.f32 1.442695, %v7365_v27  ;;  %v6550_v27 = vrot.slane %v21827_v34, %v14523_v9  ;;  %v21876_v34 = vld [vmem:[#allocation153_spill] sm:$0xff] }
 0x406   :  { %v18487_v46 = vpop.permute.xlu0 %8529  ;;  %v7771_v32 = vmul.f32 1.442695, %v7367_v6  ;;  %v21866_v6 = vld [vmem:[#allocation179_spill] sm:$0xff]  ;;  %v7377_v59 = vsub.f32 %v21876_v34, %v6574_v24  ;;  %v6590_v34 = vrot.slane %v21841_v8, %v17664_v51 }
 0x407   :  { %21855 = vst [vmem:[#allocation84_spill] sm:$0xff] %v18487_v46  ;;  %8721 = vperm.xlu0 %13659, %v13990_v11   ;;  %v13992_v46 = vpop.eup %13991  ;;  %v18499_v12 = vpop.permute.xlu1 %8466  ;;  %v7390_v11 = vsub.f32 %v21861_v16, %v6626_v22  ;;  %14007 = vpow2.f32 %v7767_v47  ;;  %v7392_v22 = vsub.f32 %v21864_v2, %v6634_v50  ;;  %v7371_v47 = vsub.f32 %v21866_v6, %v6550_v27  ;;  %v21870_v27 = vld [vmem:[#allocation155_spill] sm:$0xff] }
 0x408   :  { %v13994_v55 = vpop.eup %13993  ;;  %8658 = vperm.xlu1 %13660, %v13992_v46   ;;  %21859 = vst [vmem:[#allocation88_spill] sm:$0xff] %v18499_v12  ;;  %14009 = vpow2.f32 %v7813_v53  ;;  %v7791_v24 = vmul.f32 1.442695, %v7377_v59  ;;  %v6598_v59 = vrot.slane %v21841_v8, %v17686_v43 }
 0x409   :  { %v13996_v38 = vpop.eup %13995  ;;  %v7817_v18 = vmul.f32 1.442695, %v7390_v11  ;;  %14011 = vpow2.f32 %v7771_v32  ;;  %v7821_v50 = vmul.f32 1.442695, %v7392_v22  ;;  %v21868_v11 = vld [vmem:[#allocation82_spill] sm:$0xff] }
 0x40a   :  { %v18497_v29 = vpop.permute.xlu0 %8535  ;;  %v13998_v46 = vpop.eup %13997  ;;  %v6650_v53 = vrot.slane %v21868_v11, %v17621_v49  ;;  %v7779_v6 = vmul.f32 1.442695, %v7371_v47  ;;  %v6658_v22 = vrot.slane %v21868_v11, %v17625_v4 }
 0x40b   :  { %8727 = vperm.xlu0 %13659, %v13994_v55   ;;  %v18509_v62 = vpop.permute.xlu1 %8472  ;;  %v14000_v55 = vpop.eup %13999  ;;  %14013 = vpow2.f32 %v7817_v18  ;;  %v21871_v18 = vld [vmem:[#allocation166_spill] sm:$0xff] }
 0x40c   :  { %8664 = vperm.xlu1 %13660, %v13996_v38   ;;  %21862 = vst [vmem:[#allocation50_spill] sm:$0xff] %v18509_v62  ;;  %v14002_v16 = vpop.eup %14001  ;;  %14015 = vpow2.f32 %v7775_v35 }
 0x40d   :  { %v14004_v2 = vpop.eup %14003  ;;  %14017 = vpow2.f32 %v7821_v50 }
 0x40e   :  { %v18507_v26 = vpop.permute.xlu0 %8541  ;;  %14019 = vpow2.f32 %v7779_v6  ;;  %v6674_v6 = vrot.slane %v21868_v11, %v17649_v23 }
 0x40f   :  { %8733 = vperm.xlu0 %13659, %v13998_v46   ;;  %v18519_v38 = vpop.permute.xlu1 %8478  ;;  %v21867_v46 = vld [vmem:[#allocation197_spill] sm:$0xff] }
 0x410   :  { %8670 = vperm.xlu1 %13660, %v14000_v55   ;;  %21865 = vst [vmem:[#allocation92_spill] sm:$0xff] %v18519_v38  ;;  %v7394_v62 = vsub.f32 %v21867_v46, %v6642_v0  ;;  %v14006_v55 = vpop.eup %14005  ;;  %v7396_v46 = vsub.f32 %v21871_v18, %v6650_v53  ;;  %v21874_v53 = vld [vmem:[#allocation149_spill] sm:$0xff] }
 0x411   :  { %v14008_v38 = vpop.eup %14007 }
 0x412   :  { %v18517_v45 = vpop.permute.xlu0 %8547  ;;  %v7825_v0 = vmul.f32 1.442695, %v7394_v62  ;;  %v6666_v62 = vrot.slane %v21868_v11, %v17637_v48 }
 0x413   :  { %8739 = vperm.xlu0 %13659, %v14002_v16   ;;  %v18529_v32 = vpop.permute.xlu1 %8484  ;;  %v7373_v16 = vsub.f32 %v21870_v27, %v6558_v37  ;;  %v21873_v37 = vld [vmem:[#allocation158_spill] sm:$0xff]  ;;  %v7829_v27 = vmul.f32 1.442695, %v7396_v46 }
 0x414   :  { %8676 = vperm.xlu1 %13660, %v14004_v2   ;;  %v14010_v2 = vpop.eup %14009  ;;  %v7375_v47 = vsub.f32 %v21873_v37, %v6566_v41  ;;  %14021 = vpow2.f32 %v7825_v0  ;;  %v21877_v0 = vld [vmem:[#allocation163_spill] sm:$0xff] }
 0x415   :  { %v7783_v50 = vmul.f32 1.442695, %v7373_v16  ;;  %v14012_v18 = vpop.eup %14011  ;;  %v6582_v16 = vrot.slane %v21841_v8, %v14523_v9 }
 0x416   :  { %v18527_v58 = vpop.permute.xlu0 %8553  ;;  %v7787_v41 = vmul.f32 1.442695, %v7375_v47  ;;  %v21879_v47 = vld [vmem:[#allocation162_spill] sm:$0xff] }
 0x417   :  { %21869 = vst [vmem:[#allocation54_spill] sm:$0xff] %v18527_v58  ;;  %8745 = vperm.xlu0 %13659, %v14006_v55   ;;  %v18539_v35 = vpop.permute.xlu1 %8490  ;;  %v7398_v55 = vsub.f32 %v21874_v53, %v6658_v22  ;;  %14023 = vpow2.f32 %v7783_v50  ;;  %v7400_v22 = vsub.f32 %v21877_v0, %v6666_v62  ;;  %v7379_v50 = vsub.f32 %v21879_v47, %v6582_v16  ;;  %v21884_v16 = vld [vmem:[#allocation184_spill] sm:$0xff] }
 0x418   :  { %8682 = vperm.xlu1 %13660, %v14008_v38   ;;  %v14014_v38 = vpop.eup %14013  ;;  %14025 = vpow2.f32 %v7829_v27 }
 0x419   :  { %v7833_v46 = vmul.f32 1.442695, %v7398_v55  ;;  %14027 = vpow2.f32 %v7787_v41  ;;  %v7837_v62 = vmul.f32 1.442695, %v7400_v22  ;;  %v21881_v55 = vld [vmem:[#allocation66_spill] sm:$0xff] }
 0x41a   :  { %v18537_v12 = vpop.permute.xlu0 %8559  ;;  %v6682_v27 = vrot.slane %v21881_v55, %v17621_v49  ;;  %v7795_v47 = vmul.f32 1.442695, %v7379_v50  ;;  %v6690_v22 = vrot.slane %v21881_v55, %v17625_v4 }
 0x41b   :  { %21872 = vst [vmem:[#allocation94_spill] sm:$0xff] %v18537_v12  ;;  %8751 = vperm.xlu0 %13659, %v14010_v2   ;;  %v18549_v30 = vpop.permute.xlu1 %8496  ;;  %v14016_v2 = vpop.eup %14015  ;;  %14029 = vpow2.f32 %v7833_v46  ;;  %v21885_v46 = vld [vmem:[#allocation185_spill] sm:$0xff] }
 0x41c   :  { %8688 = vperm.xlu1 %13660, %v14012_v18   ;;  %v14018_v53 = vpop.eup %14017  ;;  %14031 = vpow2.f32 %v7791_v24 }
 0x41d   :  { %v14020_v0 = vpop.eup %14019  ;;  %14033 = vpow2.f32 %v7837_v62 }
 0x41e   :  { %v18547_v12 = vpop.permute.xlu0 %8565  ;;  %14035 = vpow2.f32 %v7795_v47  ;;  %v6706_v47 = vrot.slane %v21881_v55, %v17649_v23 }
 0x41f   :  { %21875 = vst [vmem:[#allocation131_spill] sm:$0xff] %v18547_v12  ;;  %8757 = vperm.xlu0 %13659, %v14014_v38   ;;  %v18559_v18 = vpop.permute.xlu1 %8502  ;;  %v21880_v38 = vld [vmem:[#allocation198_spill] sm:$0xff] }
 0x420   :  { %8694 = vperm.xlu1 %13660, %v14016_v2   ;;  %v7402_v12 = vsub.f32 %v21880_v38, %v6674_v6  ;;  %v14022_v2 = vpop.eup %14021  ;;  %v7404_v38 = vsub.f32 %v21885_v46, %v6682_v27  ;;  %v21888_v27 = vld [vmem:[#allocation190_spill] sm:$0xff] }
 0x422   :  { %v18557_v37 = vpop.permute.xlu0 %8571  ;;  %v7841_v6 = vmul.f32 1.442695, %v7402_v12  ;;  %v6698_v12 = vrot.slane %v21881_v55, %v17637_v48 }
 0x423   :  { %21878 = vst [vmem:[#allocation97_spill] sm:$0xff] %v18557_v37  ;;  %8763 = vperm.xlu0 %13659, %v14018_v53   ;;  %v18569_v41 = vpop.permute.xlu1 %8508  ;;  %v7381_v53 = vsub.f32 %v21884_v16, %v6590_v34  ;;  %v21887_v34 = vld [vmem:[#allocation160_spill] sm:$0xff]  ;;  %v7845_v16 = vmul.f32 1.442695, %v7404_v38 }
 0x424   :  { %8700 = vperm.xlu1 %13660, %v14020_v0   ;;  %21883 = vst [vmem:[#allocation99_spill] sm:$0xff] %v18569_v41  ;;  %v6606_v41 = vrot.slane %v21841_v8, %v17703_v19  ;;  %v7383_v50 = vsub.f32 %v21887_v34, %v6598_v59  ;;  %14037 = vpow2.f32 %v7841_v6  ;;  %v21891_v8 = vld [vmem:[#allocation137_spill] sm:$0xff]  ;;  %v21892_v6 = vld [vmem:[#allocation195_spill] sm:$0xff] }
 0x425   :  { %v7799_v62 = vmul.f32 1.442695, %v7381_v53  ;;  %v6614_v53 = vrot.slane %v21854_v5, %v14523_v9 }
 0x426   :  { %v18567_v37 = vpop.permute.xlu0 %8577  ;;  %v7385_v52 = vsub.f32 %v21891_v8, %v6606_v41  ;;  %v7803_v59 = vmul.f32 1.442695, %v7383_v50  ;;  %v6622_v41 = vrot.slane %v21854_v5, %v17664_v51  ;;  %v21895_v50 = vld [vmem:[#allocation129_spill] sm:$0xff] }
 0x427   :  { %21882 = vst [vmem:[#allocation62_spill] sm:$0xff] %v18567_v37  ;;  %8769 = vperm.xlu0 %13659, %v14022_v2   ;;  %v14024_v37 = vpop.eup %14023  ;;  %v18579_v24 = vpop.permute.xlu1 %8514  ;;  %v7406_v2 = vsub.f32 %v21888_v27, %v6690_v22  ;;  %14039 = vpow2.f32 %v7799_v62  ;;  %v7408_v22 = vsub.f32 %v21892_v6, %v6698_v12  ;;  %v7387_v62 = vsub.f32 %v21895_v50, %v6614_v53  ;;  %v21899_v53 = vld [vmem:[#allocation116_spill] sm:$0xff] }
 0x428   :  { %v14026_v0 = vpop.eup %14025  ;;  %8706 = vperm.xlu1 %13660, %v14024_v37   ;;  %21886 = vst [vmem:[#allocation65_spill] sm:$0xff] %v18579_v24  ;;  %14041 = vpow2.f32 %v7845_v16  ;;  %v7807_v8 = vmul.f32 1.442695, %v7385_v52  ;;  %v6630_v52 = vrot.slane %v21854_v5, %v17686_v43  ;;  %v21905_v5 = vld [vmem:[#allocation192_spill] sm:$0xff] }
 0x429   :  { %v14028_v46 = vpop.eup %14027  ;;  %v7849_v38 = vmul.f32 1.442695, %v7406_v2  ;;  %14043 = vpow2.f32 %v7803_v59  ;;  %v7853_v12 = vmul.f32 1.442695, %v7408_v22  ;;  %v21897_v2 = vld [vmem:[#allocation89_spill] sm:$0xff] }
 0x42a   :  { %v18577_v15 = vpop.permute.xlu0 %8583  ;;  %v14030_v37 = vpop.eup %14029  ;;  %v6714_v16 = vrot.slane %v21897_v2, %v17621_v49  ;;  %v7811_v50 = vmul.f32 1.442695, %v7387_v62  ;;  %v6722_v22 = vrot.slane %v21897_v2, %v17625_v4 }
 0x42b   :  { %8775 = vperm.xlu0 %13659, %v14026_v0   ;;  %v18589_v24 = vpop.permute.xlu1 %8520  ;;  %v14032_v0 = vpop.eup %14031  ;;  %14045 = vpow2.f32 %v7849_v38  ;;  %v21900_v38 = vld [vmem:[#allocation189_spill] sm:$0xff] }
 0x42c   :  { %8712 = vperm.xlu1 %13660, %v14028_v46   ;;  %21890 = vst [vmem:[#allocation69_spill] sm:$0xff] %v18589_v24  ;;  %v14034_v27 = vpop.eup %14033  ;;  %14047 = vpow2.f32 %v7807_v8 }
 0x42d   :  { %v14036_v6 = vpop.eup %14035  ;;  %14049 = vpow2.f32 %v7853_v12 }
 0x42e   :  { %v18587_v7 = vpop.permute.xlu0 %8589  ;;  %14051 = vpow2.f32 %v7811_v50  ;;  %v6738_v50 = vrot.slane %v21897_v2, %v17649_v23 }
 0x42f   :  { %21889 = vst [vmem:[#allocation101_spill] sm:$0xff] %v18587_v7  ;;  %8781 = vperm.xlu0 %13659, %v14030_v37   ;;  %v18599_v46 = vpop.permute.xlu1 %8526  ;;  %v21896_v37 = vld [vmem:[#allocation203_spill] sm:$0xff] }
 0x430   :  { %8718 = vperm.xlu1 %13660, %v14032_v0   ;;  %21894 = vst [vmem:[#allocation139_spill] sm:$0xff] %v18599_v46  ;;  %v7410_v24 = vsub.f32 %v21896_v37, %v6706_v47  ;;  %v14038_v0 = vpop.eup %14037  ;;  %v7412_v37 = vsub.f32 %v21900_v38, %v6714_v16  ;;  %v21903_v16 = vld [vmem:[#allocation194_spill] sm:$0xff] }
 0x431   :  { %v14040_v46 = vpop.eup %14039 }
 0x432   :  { %v18597_v34 = vpop.permute.xlu0 %8595  ;;  %v7857_v47 = vmul.f32 1.442695, %v7410_v24  ;;  %v6730_v24 = vrot.slane %v21897_v2, %v17637_v48 }
 0x433   :  { %21893 = vst [vmem:[#allocation103_spill] sm:$0xff] %v18597_v34  ;;  %8787 = vperm.xlu0 %13659, %v14034_v27   ;;  %v18609_v59 = vpop.permute.xlu1 %8532  ;;  %v7389_v27 = vsub.f32 %v21899_v53, %v6622_v41  ;;  %v21902_v41 = vld [vmem:[#allocation186_spill] sm:$0xff]  ;;  %v7861_v53 = vmul.f32 1.442695, %v7412_v37  ;;  %v7393_v34 = vsub.f32 %v21905_v5, %v6638_v40  ;;  %v6654_v5 = vrot.slane %v21868_v11, %v17664_v51 }
 0x434   :  { %8724 = vperm.xlu1 %13660, %v14036_v6   ;;  %v14042_v6 = vpop.eup %14041  ;;  %v7391_v62 = vsub.f32 %v21902_v41, %v6630_v52  ;;  %14053 = vpow2.f32 %v7857_v47  ;;  %v21906_v47 = vld [vmem:[#allocation199_spill] sm:$0xff] }
 0x435   :  { %v7815_v12 = vmul.f32 1.442695, %v7389_v27  ;;  %v14044_v38 = vpop.eup %14043  ;;  %v6646_v27 = vrot.slane %v21868_v11, %v14523_v9  ;;  %v7823_v40 = vmul.f32 1.442695, %v7393_v34  ;;  %v6662_v34 = vrot.slane %v21868_v11, %v17686_v43 }
 0x436   :  { %v18607_v25 = vpop.permute.xlu0 %8601  ;;  %v7819_v52 = vmul.f32 1.442695, %v7391_v62  ;;  %v21909_v62 = vld [vmem:[#allocation135_spill] sm:$0xff] }
 0x437   :  { %21898 = vst [vmem:[#allocation106_spill] sm:$0xff] %v18607_v25  ;;  %8793 = vperm.xlu0 %13659, %v14038_v0   ;;  %v18619_v8 = vpop.permute.xlu1 %8538  ;;  %v7414_v0 = vsub.f32 %v21903_v16, %v6722_v22  ;;  %14055 = vpow2.f32 %v7815_v12  ;;  %v7416_v22 = vsub.f32 %v21906_v47, %v6730_v24  ;;  %v7395_v12 = vsub.f32 %v21909_v62, %v6646_v27  ;;  %v21914_v27 = vld [vmem:[#allocation167_spill] sm:$0xff] }
 0x438   :  { %8730 = vperm.xlu1 %13660, %v14040_v46   ;;  %v14046_v46 = vpop.eup %14045  ;;  %14057 = vpow2.f32 %v7861_v53 }
 0x439   :  { %v7865_v37 = vmul.f32 1.442695, %v7414_v0  ;;  %14059 = vpow2.f32 %v7819_v52  ;;  %v7869_v24 = vmul.f32 1.442695, %v7416_v22  ;;  %v21911_v0 = vld [vmem:[#allocation20_spill] sm:$0xff] }
 0x43a   :  { %v18617_v25 = vpop.permute.xlu0 %8607  ;;  %v6746_v53 = vrot.slane %v21911_v0, %v17621_v49  ;;  %v7827_v62 = vmul.f32 1.442695, %v7395_v12  ;;  %v6754_v22 = vrot.slane %v21911_v0, %v17625_v4 }
 0x43b   :  { %21901 = vst [vmem:[#allocation142_spill] sm:$0xff] %v18617_v25  ;;  %8799 = vperm.xlu0 %13659, %v14042_v6   ;;  %v18629_v44 = vpop.permute.xlu1 %8544  ;;  %v14048_v6 = vpop.eup %14047  ;;  %14061 = vpow2.f32 %v7865_v37  ;;  %v21915_v37 = vld [vmem:[#allocation202_spill] sm:$0xff] }
 0x43c   :  { %8736 = vperm.xlu1 %13660, %v14044_v38   ;;  %v14050_v16 = vpop.eup %14049  ;;  %14063 = vpow2.f32 %v7823_v40 }
 0x43d   :  { %v14052_v47 = vpop.eup %14051  ;;  %14065 = vpow2.f32 %v7869_v24 }
 0x43e   :  { %v18627_v25 = vpop.permute.xlu0 %8613  ;;  %14067 = vpow2.f32 %v7827_v62  ;;  %v21923_v62 = vld [vmem:[#allocation209_spill] sm:$0xff] }
 0x43f   :  { %21904 = vst [vmem:[#allocation109_spill] sm:$0xff] %v18627_v25  ;;  %8805 = vperm.xlu0 %13659, %v14046_v46   ;;  %v18639_v38 = vpop.permute.xlu1 %8550  ;;  %v21910_v46 = vld [vmem:[#allocation206_spill] sm:$0xff] }
 0x440   :  { %8742 = vperm.xlu1 %13660, %v14048_v6   ;;  %21908 = vst [vmem:[#allocation111_spill] sm:$0xff] %v18639_v38  ;;  %v7418_v25 = vsub.f32 %v21910_v46, %v6738_v50  ;;  %v14054_v6 = vpop.eup %14053  ;;  %v7420_v46 = vsub.f32 %v21915_v37, %v6746_v53  ;;  %v21919_v53 = vld [vmem:[#allocation207_spill] sm:$0xff] }
 0x442   :  { %v18637_v41 = vpop.permute.xlu0 %8619  ;;  %v7873_v50 = vmul.f32 1.442695, %v7418_v25  ;;  %v6762_v25 = vrot.slane %v21911_v0, %v17637_v48 }
 0x443   :  { %21907 = vst [vmem:[#allocation77_spill] sm:$0xff] %v18637_v41  ;;  %8811 = vperm.xlu0 %13659, %v14050_v16   ;;  %v18649_v52 = vpop.permute.xlu1 %8556  ;;  %v7397_v16 = vsub.f32 %v21914_v27, %v6654_v5  ;;  %v21918_v5 = vld [vmem:[#allocation154_spill] sm:$0xff]  ;;  %v7877_v27 = vmul.f32 1.442695, %v7420_v46 }
 0x444   :  { %8748 = vperm.xlu1 %13660, %v14052_v47   ;;  %21913 = vst [vmem:[#allocation114_spill] sm:$0xff] %v18649_v52  ;;  %v6670_v52 = vrot.slane %v21868_v11, %v17703_v19  ;;  %v7399_v12 = vsub.f32 %v21918_v5, %v6662_v34  ;;  %14069 = vpow2.f32 %v7873_v50  ;;  %v21922_v11 = vld [vmem:[#allocation165_spill] sm:$0xff]  ;;  %v7424_v50 = vsub.f32 %v21923_v62, %v6762_v25 }
 0x445   :  { %v7831_v24 = vmul.f32 1.442695, %v7397_v16  ;;  %v6770_v16 = vrot.slane %v21911_v0, %v17649_v23 }
 0x446   :  { %v18647_v41 = vpop.permute.xlu0 %8625  ;;  %v7401_v7 = vsub.f32 %v21922_v11, %v6670_v52  ;;  %v7835_v34 = vmul.f32 1.442695, %v7399_v12  ;;  %v6686_v52 = vrot.slane %v21881_v55, %v17664_v51  ;;  %v21926_v12 = vld [vmem:[#allocation146_spill] sm:$0xff]  ;;  %v7885_v25 = vmul.f32 1.442695, %v7424_v50 }
 0x447   :  { %21912 = vst [vmem:[#allocation80_spill] sm:$0xff] %v18647_v41  ;;  %8817 = vperm.xlu0 %13659, %v14054_v6   ;;  %v14056_v41 = vpop.eup %14055  ;;  %v18657_v47 = vpop.permute.xlu1 %8562  ;;  %v7422_v6 = vsub.f32 %v21919_v53, %v6754_v22  ;;  %14071 = vpow2.f32 %v7831_v24 }
 0x448   :  { %v14058_v58 = vpop.eup %14057  ;;  %8754 = vperm.xlu1 %13660, %v14056_v41   ;;  %21916 = vst [vmem:[#allocation86_spill] sm:$0xff] %v18657_v47  ;;  %14073 = vpow2.f32 %v7877_v27  ;;  %v7839_v11 = vmul.f32 1.442695, %v7401_v7  ;;  %v6694_v7 = vrot.slane %v21881_v55, %v17686_v43 }
 0x449   :  { %v14060_v41 = vpop.eup %14059  ;;  %v7881_v22 = vmul.f32 1.442695, %v7422_v6  ;;  %14075 = vpow2.f32 %v7835_v34  ;;  %v21928_v6 = vld [vmem:[#allocation60_spill] sm:$0xff] }
 0x44a   :  { %v18659_v40 = vpop.permute.xlu0 %8631  ;;  %v14062_v37 = vpop.eup %14061  ;;  %v6778_v27 = vrot.slane %v21928_v6, %v17621_v49  ;;  %v6786_v50 = vrot.slane %v21928_v6, %v17625_v4 }
 0x44b   :  { %21917 = vst [vmem:[#allocation90_spill] sm:$0xff] %v18659_v40  ;;  %8823 = vperm.xlu0 %13659, %v14058_v58   ;;  %v18667_v47 = vpop.permute.xlu1 %8568  ;;  %v6678_v58 = vrot.slane %v21881_v55, %v14523_v9  ;;  %v14064_v46 = vpop.eup %14063  ;;  %14077 = vpow2.f32 %v7881_v22  ;;  %v21931_v22 = vld [vmem:[#allocation213_spill] sm:$0xff] }
 0x44c   :  { %8760 = vperm.xlu1 %13660, %v14060_v41   ;;  %21920 = vst [vmem:[#allocation118_spill] sm:$0xff] %v18667_v47  ;;  %v14066_v5 = vpop.eup %14065  ;;  %14079 = vpow2.f32 %v7839_v11 }
 0x44d   :  { %v7403_v24 = vsub.f32 %v21926_v12, %v6678_v58  ;;  %v14068_v62 = vpop.eup %14067  ;;  %v21930_v58 = vld [vmem:[#allocation187_spill] sm:$0xff]  ;;  %14081 = vpow2.f32 %v7885_v25 }
 0x44e   :  { %v18669_v40 = vpop.permute.xlu0 %8637 }
 0x44f   :  { %21921 = vst [vmem:[#allocation93_spill] sm:$0xff] %v18669_v40  ;;  %8829 = vperm.xlu0 %13659, %v14062_v37   ;;  %v18677_v53 = vpop.permute.xlu1 %8574  ;;  %v21927_v37 = vld [vmem:[#allocation211_spill] sm:$0xff]  ;;  %v7843_v12 = vmul.f32 1.442695, %v7403_v24 }
 0x450   :  { %8766 = vperm.xlu1 %13660, %v14064_v46   ;;  %21924 = vst [vmem:[#allocation95_spill] sm:$0xff] %v18677_v53  ;;  %v7426_v47 = vsub.f32 %v21927_v37, %v6770_v16  ;;  %v14070_v46 = vpop.eup %14069  ;;  %v7428_v37 = vsub.f32 %v21931_v22, %v6778_v27  ;;  %v21934_v27 = vld [vmem:[#allocation215_spill] sm:$0xff] }
 0x451   :  { %14083 = vpow2.f32 %v7843_v12  ;;  %v21938_v12 = vld [vmem:[#allocation217_spill] sm:$0xff] }
 0x452   :  { %v18679_v41 = vpop.permute.xlu0 %8643  ;;  %v7889_v16 = vmul.f32 1.442695, %v7426_v47  ;;  %v6794_v47 = vrot.slane %v21928_v6, %v17637_v48 }
 0x453   :  { %21925 = vst [vmem:[#allocation98_spill] sm:$0xff] %v18679_v41  ;;  %8835 = vperm.xlu0 %13659, %v14066_v5   ;;  %v18687_v53 = vpop.permute.xlu1 %8580  ;;  %v7405_v5 = vsub.f32 %v21930_v58, %v6686_v52  ;;  %v21933_v52 = vld [vmem:[#allocation193_spill] sm:$0xff]  ;;  %v7893_v58 = vmul.f32 1.442695, %v7428_v37 }
 0x454   :  { %8772 = vperm.xlu1 %13660, %v14068_v62   ;;  %v14072_v62 = vpop.eup %14071  ;;  %v7407_v24 = vsub.f32 %v21933_v52, %v6694_v7  ;;  %14085 = vpow2.f32 %v7889_v16  ;;  %v7432_v16 = vsub.f32 %v21938_v12, %v6794_v47 }
 0x455   :  { %v14074_v41 = vpop.eup %14073  ;;  %v7847_v25 = vmul.f32 1.442695, %v7405_v5  ;;  %v6802_v5 = vrot.slane %v21928_v6, %v17649_v23 }
 0x456   :  { %v18689_v34 = vpop.permute.xlu0 %8649  ;;  %v14076_v22 = vpop.eup %14075  ;;  %v7851_v7 = vmul.f32 1.442695, %v7407_v24  ;;  %v21941_v24 = vld [vmem:[#allocation188_spill] sm:$0xff]  ;;  %v7901_v47 = vmul.f32 1.442695, %v7432_v16 }
 0x457   :  { %21929 = vst [vmem:[#allocation100_spill] sm:$0xff] %v18689_v34  ;;  %8841 = vperm.xlu0 %13659, %v14070_v46   ;;  %v18697_v40 = vpop.permute.xlu1 %8586  ;;  %v6702_v34 = vrot.slane %v21881_v55, %v17703_v19  ;;  %v7430_v46 = vsub.f32 %v21934_v27, %v6786_v50  ;;  %v21937_v55 = vld [vmem:[#allocation201_spill] sm:$0xff]  ;;  %14087 = vpow2.f32 %v7847_v25 }
 0x458   :  { %8778 = vperm.xlu1 %13660, %v14072_v62   ;;  %v14078_v62 = vpop.eup %14077  ;;  %14089 = vpow2.f32 %v7893_v58 }
 0x459   :  { %v7409_v38 = vsub.f32 %v21937_v55, %v6702_v34  ;;  %v7897_v50 = vmul.f32 1.442695, %v7430_v46  ;;  %v14080_v37 = vpop.eup %14079  ;;  %14091 = vpow2.f32 %v7851_v7  ;;  %v6718_v34 = vrot.slane %v21897_v2, %v17664_v51  ;;  %v21943_v46 = vld [vmem:[#allocation73_spill] sm:$0xff] }
 0x45a   :  { %v18699_v11 = vpop.permute.xlu0 %8655  ;;  %v14082_v52 = vpop.eup %14081  ;;  %v6810_v58 = vrot.slane %v21943_v46, %v17621_v49  ;;  %v6818_v16 = vrot.slane %v21943_v46, %v17625_v4 }
 0x45b   :  { %21932 = vst [vmem:[#allocation102_spill] sm:$0xff] %v18699_v11  ;;  %8847 = vperm.xlu0 %13659, %v14074_v41   ;;  %v18707_v17 = vpop.permute.xlu1 %8592  ;;  %v6710_v41 = vrot.slane %v21897_v2, %v14523_v9  ;;  %v7855_v55 = vmul.f32 1.442695, %v7409_v38  ;;  %14093 = vpow2.f32 %v7897_v50  ;;  %v14084_v12 = vpop.eup %14083  ;;  %v6726_v38 = vrot.slane %v21897_v2, %v17686_v43  ;;  %v21947_v50 = vld [vmem:[#allocation221_spill] sm:$0xff] }
 0x45c   :  { %8784 = vperm.xlu1 %13660, %v14076_v22   ;;  %21935 = vst [vmem:[#allocation105_spill] sm:$0xff] %v18707_v17 }
 0x45d   :  { %v7411_v25 = vsub.f32 %v21941_v24, %v6710_v41  ;;  %14095 = vpow2.f32 %v7855_v55  ;;  %v21946_v41 = vld [vmem:[#allocation191_spill] sm:$0xff] }
 0x45e   :  { %v18709_v11 = vpop.permute.xlu0 %8661  ;;  %14097 = vpow2.f32 %v7901_v47 }
 0x45f   :  { %21936 = vst [vmem:[#allocation108_spill] sm:$0xff] %v18709_v11  ;;  %8853 = vperm.xlu0 %13659, %v14078_v62   ;;  %v18717_v27 = vpop.permute.xlu1 %8598  ;;  %v21942_v62 = vld [vmem:[#allocation219_spill] sm:$0xff]  ;;  %v7859_v24 = vmul.f32 1.442695, %v7411_v25 }
 0x460   :  { %8790 = vperm.xlu1 %13660, %v14080_v37   ;;  %21939 = vst [vmem:[#allocation110_spill] sm:$0xff] %v18717_v27  ;;  %v7434_v11 = vsub.f32 %v21942_v62, %v6802_v5  ;;  %v14086_v37 = vpop.eup %14085  ;;  %v7436_v62 = vsub.f32 %v21947_v50, %v6810_v58  ;;  %v21951_v58 = vld [vmem:[#allocation223_spill] sm:$0xff] }
 0x461   :  { %14099 = vpow2.f32 %v7859_v24  ;;  %v21955_v24 = vld [vmem:[#allocation225_spill] sm:$0xff] }
 0x462   :  { %v18719_v22 = vpop.permute.xlu0 %8667  ;;  %v7905_v5 = vmul.f32 1.442695, %v7434_v11  ;;  %v6826_v11 = vrot.slane %v21943_v46, %v17637_v48 }
 0x463   :  { %21940 = vst [vmem:[#allocation112_spill] sm:$0xff] %v18719_v22  ;;  %8859 = vperm.xlu0 %13659, %v14082_v52   ;;  %v18727_v27 = vpop.permute.xlu1 %8604  ;;  %v7413_v52 = vsub.f32 %v21946_v41, %v6718_v34  ;;  %v21950_v34 = vld [vmem:[#allocation196_spill] sm:$0xff]  ;;  %v7909_v41 = vmul.f32 1.442695, %v7436_v62 }
 0x464   :  { %8796 = vperm.xlu1 %13660, %v14084_v12   ;;  %21944 = vst [vmem:[#allocation115_spill] sm:$0xff] %v18727_v27  ;;  %v14088_v12 = vpop.eup %14087  ;;  %v7415_v25 = vsub.f32 %v21950_v34, %v6726_v38  ;;  %14101 = vpow2.f32 %v7905_v5  ;;  %v7440_v5 = vsub.f32 %v21955_v24, %v6826_v11 }
 0x465   :  { %v14090_v22 = vpop.eup %14089  ;;  %v7863_v47 = vmul.f32 1.442695, %v7413_v52  ;;  %v6834_v52 = vrot.slane %v21943_v46, %v17649_v23 }
 0x466   :  { %v18729_v7 = vpop.permute.xlu0 %8673  ;;  %v14092_v50 = vpop.eup %14091  ;;  %v7867_v38 = vmul.f32 1.442695, %v7415_v25  ;;  %v21958_v25 = vld [vmem:[#allocation200_spill] sm:$0xff]  ;;  %v7917_v11 = vmul.f32 1.442695, %v7440_v5 }
 0x467   :  { %21945 = vst [vmem:[#allocation117_spill] sm:$0xff] %v18729_v7  ;;  %8865 = vperm.xlu0 %13659, %v14086_v37   ;;  %v18737_v27 = vpop.permute.xlu1 %8610  ;;  %v6734_v7 = vrot.slane %v21897_v2, %v17703_v19  ;;  %v7438_v37 = vsub.f32 %v21951_v58, %v6818_v16  ;;  %v21954_v2 = vld [vmem:[#allocation204_spill] sm:$0xff]  ;;  %14103 = vpow2.f32 %v7863_v47 }
 0x468   :  { %8802 = vperm.xlu1 %13660, %v14088_v12   ;;  %21948 = vst [vmem:[#allocation119_spill] sm:$0xff] %v18737_v27  ;;  %v14094_v12 = vpop.eup %14093  ;;  %14105 = vpow2.f32 %v7909_v41 }
 0x469   :  { %v7417_v17 = vsub.f32 %v21954_v2, %v6734_v7  ;;  %v7913_v16 = vmul.f32 1.442695, %v7438_v37  ;;  %v14096_v62 = vpop.eup %14095  ;;  %14107 = vpow2.f32 %v7867_v38  ;;  %v6750_v7 = vrot.slane %v21911_v0, %v17664_v51  ;;  %v21960_v37 = vld [vmem:[#allocation55_spill] sm:$0xff] }
 0x46a   :  { %v18739_v55 = vpop.permute.xlu0 %8679  ;;  %v14098_v34 = vpop.eup %14097  ;;  %v6842_v41 = vrot.slane %v21960_v37, %v17621_v49  ;;  %v6850_v5 = vrot.slane %v21960_v37, %v17625_v4 }
 0x46b   :  { %21949 = vst [vmem:[#allocation122_spill] sm:$0xff] %v18739_v55  ;;  %8871 = vperm.xlu0 %13659, %v14090_v22   ;;  %v18747_v27 = vpop.permute.xlu1 %8616  ;;  %v6742_v22 = vrot.slane %v21911_v0, %v14523_v9  ;;  %v7871_v2 = vmul.f32 1.442695, %v7417_v17  ;;  %14109 = vpow2.f32 %v7913_v16  ;;  %v14100_v24 = vpop.eup %14099  ;;  %v6758_v17 = vrot.slane %v21911_v0, %v17686_v43  ;;  %v21964_v16 = vld [vmem:[#allocation229_spill] sm:$0xff] }
 0x46c   :  { %8808 = vperm.xlu1 %13660, %v14092_v50   ;;  %21952 = vst [vmem:[#allocation141_spill] sm:$0xff] %v18747_v27 }
 0x46d   :  { %v7419_v47 = vsub.f32 %v21958_v25, %v6742_v22  ;;  %14111 = vpow2.f32 %v7871_v2  ;;  %v21963_v22 = vld [vmem:[#allocation205_spill] sm:$0xff] }
 0x46e   :  { %v18749_v55 = vpop.permute.xlu0 %8685  ;;  %14113 = vpow2.f32 %v7917_v11 }
 0x46f   :  { %21953 = vst [vmem:[#allocation120_spill] sm:$0xff] %v18749_v55  ;;  %8877 = vperm.xlu0 %13659, %v14094_v12   ;;  %v18757_v58 = vpop.permute.xlu1 %8622  ;;  %v21959_v12 = vld [vmem:[#allocation227_spill] sm:$0xff]  ;;  %v7875_v25 = vmul.f32 1.442695, %v7419_v47 }
 0x470   :  { %8814 = vperm.xlu1 %13660, %v14096_v62   ;;  %21956 = vst [vmem:[#allocation169_spill] sm:$0xff] %v18757_v58  ;;  %v7442_v27 = vsub.f32 %v21959_v12, %v6834_v52  ;;  %v14102_v62 = vpop.eup %14101  ;;  %v7444_v12 = vsub.f32 %v21964_v16, %v6842_v41  ;;  %v21968_v41 = vld [vmem:[#allocation231_spill] sm:$0xff] }
 0x471   :  { %14115 = vpow2.f32 %v7875_v25  ;;  %v21972_v25 = vld [vmem:[#allocation233_spill] sm:$0xff] }
 0x472   :  { %v18759_v50 = vpop.permute.xlu0 %8691  ;;  %v7921_v52 = vmul.f32 1.442695, %v7442_v27  ;;  %v6858_v27 = vrot.slane %v21960_v37, %v17637_v48 }
 0x473   :  { %21957 = vst [vmem:[#allocation173_spill] sm:$0xff] %v18759_v50  ;;  %8883 = vperm.xlu0 %13659, %v14098_v34   ;;  %v18767_v58 = vpop.permute.xlu1 %8628  ;;  %v7421_v34 = vsub.f32 %v21963_v22, %v6750_v7  ;;  %v21967_v7 = vld [vmem:[#allocation208_spill] sm:$0xff]  ;;  %v7925_v22 = vmul.f32 1.442695, %v7444_v12 }
 0x474   :  { %8820 = vperm.xlu1 %13660, %v14100_v24   ;;  %21961 = vst [vmem:[#allocation136_spill] sm:$0xff] %v18767_v58  ;;  %v14104_v24 = vpop.eup %14103  ;;  %v7423_v47 = vsub.f32 %v21967_v7, %v6758_v17  ;;  %14117 = vpow2.f32 %v7921_v52  ;;  %v7448_v52 = vsub.f32 %v21972_v25, %v6858_v27 }
 0x475   :  { %v14106_v50 = vpop.eup %14105  ;;  %v7879_v11 = vmul.f32 1.442695, %v7421_v34  ;;  %v6866_v34 = vrot.slane %v21960_v37, %v17649_v23 }
 0x476   :  { %v18769_v38 = vpop.permute.xlu0 %8697  ;;  %v14108_v16 = vpop.eup %14107  ;;  %v7883_v17 = vmul.f32 1.442695, %v7423_v47  ;;  %v21975_v47 = vld [vmem:[#allocation212_spill] sm:$0xff]  ;;  %v7933_v27 = vmul.f32 1.442695, %v7448_v52 }
 0x477   :  { %21962 = vst [vmem:[#allocation145_spill] sm:$0xff] %v18769_v38  ;;  %8889 = vperm.xlu0 %13659, %v14102_v62   ;;  %v18777_v55 = vpop.permute.xlu1 %8634  ;;  %v6766_v38 = vrot.slane %v21911_v0, %v17703_v19  ;;  %v7446_v62 = vsub.f32 %v21968_v41, %v6850_v5  ;;  %v21971_v0 = vld [vmem:[#allocation210_spill] sm:$0xff]  ;;  %14119 = vpow2.f32 %v7879_v11 }
 0x478   :  { %8826 = vperm.xlu1 %13660, %v14104_v24   ;;  %21965 = vst [vmem:[#allocation148_spill] sm:$0xff] %v18777_v55  ;;  %v14110_v24 = vpop.eup %14109  ;;  %14121 = vpow2.f32 %v7925_v22 }
 0x479   :  { %v7425_v58 = vsub.f32 %v21971_v0, %v6766_v38  ;;  %v7929_v5 = vmul.f32 1.442695, %v7446_v62  ;;  %v14112_v12 = vpop.eup %14111  ;;  %14123 = vpow2.f32 %v7883_v17  ;;  %v6782_v38 = vrot.slane %v21928_v6, %v17664_v51  ;;  %v21977_v62 = vld [vmem:[#allocation22_spill] sm:$0xff] }
 0x47a   :  { %v18779_v2 = vpop.permute.xlu0 %8703  ;;  %v14114_v7 = vpop.eup %14113  ;;  %v6874_v22 = vrot.slane %v21977_v62, %v17621_v49  ;;  %v6882_v52 = vrot.slane %v21977_v62, %v17625_v4 }
 0x47b   :  { %21966 = vst [vmem:[#allocation76_spill] sm:$0xff] %v18779_v2  ;;  %8895 = vperm.xlu0 %13659, %v14106_v50   ;;  %v18787_v55 = vpop.permute.xlu1 %8640  ;;  %v6774_v50 = vrot.slane %v21928_v6, %v14523_v9  ;;  %v7887_v0 = vmul.f32 1.442695, %v7425_v58  ;;  %14125 = vpow2.f32 %v7929_v5  ;;  %v14116_v25 = vpop.eup %14115  ;;  %v6790_v58 = vrot.slane %v21928_v6, %v17686_v43  ;;  %v21981_v5 = vld [vmem:[#allocation237_spill] sm:$0xff] }
 0x47c   :  { %8832 = vperm.xlu1 %13660, %v14108_v16   ;;  %21969 = vst [vmem:[#allocation38_spill] sm:$0xff] %v18787_v55 }
 0x47d   :  { %v7427_v11 = vsub.f32 %v21975_v47, %v6774_v50  ;;  %14127 = vpow2.f32 %v7887_v0  ;;  %v21980_v50 = vld [vmem:[#allocation214_spill] sm:$0xff] }
 0x47e   :  { %v18789_v2 = vpop.permute.xlu0 %8709  ;;  %14129 = vpow2.f32 %v7933_v27 }
 0x47f   :  { %21970 = vst [vmem:[#allocation21_spill] sm:$0xff] %v18789_v2  ;;  %8901 = vperm.xlu0 %13659, %v14110_v24   ;;  %v18797_v41 = vpop.permute.xlu1 %8646  ;;  %v21976_v24 = vld [vmem:[#allocation235_spill] sm:$0xff]  ;;  %v7891_v47 = vmul.f32 1.442695, %v7427_v11 }
 0x480   :  { %8838 = vperm.xlu1 %13660, %v14112_v12   ;;  %21973 = vst [vmem:[#allocation176_spill] sm:$0xff] %v18797_v41  ;;  %v7450_v2 = vsub.f32 %v21976_v24, %v6866_v34  ;;  %v14118_v12 = vpop.eup %14117  ;;  %v7452_v24 = vsub.f32 %v21981_v5, %v6874_v22  ;;  %v21985_v22 = vld [vmem:[#allocation239_spill] sm:$0xff] }
 0x481   :  { %14131 = vpow2.f32 %v7891_v47  ;;  %v21989_v47 = vld [vmem:[#allocation241_spill] sm:$0xff] }
 0x482   :  { %v18799_v16 = vpop.permute.xlu0 %8715  ;;  %v7937_v34 = vmul.f32 1.442695, %v7450_v2  ;;  %v6890_v2 = vrot.slane %v21977_v62, %v17637_v48 }
 0x483   :  { %21974 = vst [vmem:[#allocation85_spill] sm:$0xff] %v18799_v16  ;;  %8907 = vperm.xlu0 %13659, %v14114_v7   ;;  %v18807_v41 = vpop.permute.xlu1 %8652  ;;  %v7429_v7 = vsub.f32 %v21980_v50, %v6782_v38  ;;  %v21984_v38 = vld [vmem:[#allocation216_spill] sm:$0xff]  ;;  %v7941_v50 = vmul.f32 1.442695, %v7452_v24 }
 0x484   :  { %8844 = vperm.xlu1 %13660, %v14116_v25   ;;  %21978 = vst [vmem:[#allocation171_spill] sm:$0xff] %v18807_v41  ;;  %v14120_v25 = vpop.eup %14119  ;;  %v7431_v11 = vsub.f32 %v21984_v38, %v6790_v58  ;;  %14133 = vpow2.f32 %v7937_v34  ;;  %v7456_v34 = vsub.f32 %v21989_v47, %v6890_v2 }
 0x485   :  { %v14122_v16 = vpop.eup %14121  ;;  %v7895_v27 = vmul.f32 1.442695, %v7429_v7  ;;  %v6898_v7 = vrot.slane %v21977_v62, %v17649_v23 }
 0x486   :  { %v18809_v17 = vpop.permute.xlu0 %8721  ;;  %v14124_v5 = vpop.eup %14123  ;;  %v7899_v58 = vmul.f32 1.442695, %v7431_v11  ;;  %v21992_v11 = vld [vmem:[#allocation220_spill] sm:$0xff]  ;;  %v7949_v2 = vmul.f32 1.442695, %v7456_v34 }
 0x487   :  { %21979 = vst [vmem:[#allocation182_spill] sm:$0xff] %v18809_v17  ;;  %8913 = vperm.xlu0 %13659, %v14118_v12   ;;  %v18817_v41 = vpop.permute.xlu1 %8658  ;;  %v6798_v17 = vrot.slane %v21928_v6, %v17703_v19  ;;  %v7454_v12 = vsub.f32 %v21985_v22, %v6882_v52  ;;  %v21988_v6 = vld [vmem:[#allocation218_spill] sm:$0xff]  ;;  %14135 = vpow2.f32 %v7895_v27 }
 0x488   :  { %8850 = vperm.xlu1 %13660, %v14120_v25   ;;  %21982 = vst [vmem:[#allocation133_spill] sm:$0xff] %v18817_v41  ;;  %v14126_v25 = vpop.eup %14125  ;;  %14137 = vpow2.f32 %v7941_v50 }
 0x489   :  { %v7433_v55 = vsub.f32 %v21988_v6, %v6798_v17  ;;  %v7945_v52 = vmul.f32 1.442695, %v7454_v12  ;;  %v14128_v24 = vpop.eup %14127  ;;  %14139 = vpow2.f32 %v7899_v58  ;;  %v6814_v17 = vrot.slane %v21943_v46, %v17664_v51  ;;  %v21994_v12 = vld [vmem:[#allocation58_spill] sm:$0xff] }
 0x48a   :  { %v18819_v0 = vpop.permute.xlu0 %8727  ;;  %v14130_v38 = vpop.eup %14129  ;;  %v6906_v50 = vrot.slane %v21994_v12, %v17621_v49  ;;  %v6914_v34 = vrot.slane %v21994_v12, %v17625_v4 }
 0x48b   :  { %21983 = vst [vmem:[#allocation151_spill] sm:$0xff] %v18819_v0  ;;  %8919 = vperm.xlu0 %13659, %v14122_v16   ;;  %v18827_v41 = vpop.permute.xlu1 %8664  ;;  %v6806_v16 = vrot.slane %v21943_v46, %v14523_v9  ;;  %v7903_v6 = vmul.f32 1.442695, %v7433_v55  ;;  %14141 = vpow2.f32 %v7945_v52  ;;  %v14132_v47 = vpop.eup %14131  ;;  %v6822_v55 = vrot.slane %v21943_v46, %v17686_v43  ;;  %v21998_v52 = vld [vmem:[#allocation245_spill] sm:$0xff] }
 0x48c   :  { %8856 = vperm.xlu1 %13660, %v14124_v5   ;;  %21986 = vst [vmem:[#allocation170_spill] sm:$0xff] %v18827_v41 }
 0x48d   :  { %v7435_v27 = vsub.f32 %v21992_v11, %v6806_v16  ;;  %14143 = vpow2.f32 %v7903_v6  ;;  %v21997_v16 = vld [vmem:[#allocation222_spill] sm:$0xff] }
 0x48e   :  { %v18829_v0 = vpop.permute.xlu0 %8733  ;;  %14145 = vpow2.f32 %v7949_v2 }
 0x48f   :  { %21987 = vst [vmem:[#allocation159_spill] sm:$0xff] %v18829_v0  ;;  %8925 = vperm.xlu0 %13659, %v14126_v25   ;;  %v18837_v22 = vpop.permute.xlu1 %8670  ;;  %v21993_v25 = vld [vmem:[#allocation243_spill] sm:$0xff]  ;;  %v7907_v11 = vmul.f32 1.442695, %v7435_v27 }
 0x490   :  { %8862 = vperm.xlu1 %13660, %v14128_v24   ;;  %21990 = vst [vmem:[#allocation126_spill] sm:$0xff] %v18837_v22  ;;  %v7458_v41 = vsub.f32 %v21993_v25, %v6898_v7  ;;  %v14134_v24 = vpop.eup %14133  ;;  %v7460_v25 = vsub.f32 %v21998_v52, %v6906_v50  ;;  %v22002_v50 = vld [vmem:[#allocation247_spill] sm:$0xff] }
 0x491   :  { %14147 = vpow2.f32 %v7907_v11  ;;  %v22005_v11 = vld [vmem:[#allocation249_spill] sm:$0xff] }
 0x492   :  { %v18839_v5 = vpop.permute.xlu0 %8739  ;;  %v7953_v7 = vmul.f32 1.442695, %v7458_v41  ;;  %v6922_v41 = vrot.slane %v21994_v12, %v17637_v48 }
 0x493   :  { %21991 = vst [vmem:[#allocation180_spill] sm:$0xff] %v18839_v5  ;;  %8931 = vperm.xlu0 %13659, %v14130_v38   ;;  %v18847_v22 = vpop.permute.xlu1 %8676  ;;  %v7437_v38 = vsub.f32 %v21997_v16, %v6814_v17  ;;  %v22001_v17 = vld [vmem:[#allocation224_spill] sm:$0xff]  ;;  %v7957_v16 = vmul.f32 1.442695, %v7460_v25 }
 0x494   :  { %8868 = vperm.xlu1 %13660, %v14132_v47   ;;  %21995 = vst [vmem:[#allocation177_spill] sm:$0xff] %v18847_v22  ;;  %v14136_v47 = vpop.eup %14135  ;;  %v7439_v27 = vsub.f32 %v22001_v17, %v6822_v55  ;;  %14149 = vpow2.f32 %v7953_v7  ;;  %v7464_v7 = vsub.f32 %v22005_v11, %v6922_v41 }
 0x495   :  { %v14138_v5 = vpop.eup %14137  ;;  %v7911_v2 = vmul.f32 1.442695, %v7437_v38  ;;  %v6930_v38 = vrot.slane %v21994_v12, %v17649_v23 }
 0x496   :  { %v18849_v58 = vpop.permute.xlu0 %8745  ;;  %v14140_v52 = vpop.eup %14139  ;;  %v7915_v55 = vmul.f32 1.442695, %v7439_v27  ;;  %v22008_v27 = vld [vmem:[#allocation228_spill] sm:$0xff]  ;;  %v7965_v41 = vmul.f32 1.442695, %v7464_v7 }
 0x497   :  { %21996 = vst [vmem:[#allocation156_spill] sm:$0xff] %v18849_v58  ;;  %8937 = vperm.xlu0 %13659, %v14134_v24   ;;  %v18857_v0 = vpop.permute.xlu1 %8682  ;;  %v6830_v58 = vrot.slane %v21943_v46, %v17703_v19  ;;  %v7462_v24 = vsub.f32 %v22002_v50, %v6914_v34  ;;  %v22004_v46 = vld [vmem:[#allocation226_spill] sm:$0xff]  ;;  %14151 = vpow2.f32 %v7911_v2 }
 0x498   :  { %8874 = vperm.xlu1 %13660, %v14136_v47   ;;  %21999 = vst [vmem:[#allocation181_spill] sm:$0xff] %v18857_v0  ;;  %v14142_v47 = vpop.eup %14141  ;;  %14153 = vpow2.f32 %v7957_v16 }
 0x499   :  { %v7441_v22 = vsub.f32 %v22004_v46, %v6830_v58  ;;  %v7961_v34 = vmul.f32 1.442695, %v7462_v24  ;;  %v14144_v25 = vpop.eup %14143  ;;  %14155 = vpow2.f32 %v7915_v55  ;;  %v6846_v58 = vrot.slane %v21960_v37, %v17664_v51  ;;  %v22010_v24 = vld [vmem:[#allocation24_spill] sm:$0xff] }
 0x49a   :  { %v18859_v6 = vpop.permute.xlu0 %8751  ;;  %v14146_v17 = vpop.eup %14145  ;;  %v6938_v16 = vrot.slane %v22010_v24, %v17621_v49  ;;  %v6946_v7 = vrot.slane %v22010_v24, %v17625_v4 }
 0x49b   :  { %22000 = vst [vmem:[#allocation96_spill] sm:$0xff] %v18859_v6  ;;  %8943 = vperm.xlu0 %13659, %v14138_v5   ;;  %v18867_v0 = vpop.permute.xlu1 %8688  ;;  %v6838_v5 = vrot.slane %v21960_v37, %v14523_v9  ;;  %v7919_v46 = vmul.f32 1.442695, %v7441_v22  ;;  %14157 = vpow2.f32 %v7961_v34  ;;  %v14148_v11 = vpop.eup %14147  ;;  %v6854_v22 = vrot.slane %v21960_v37, %v17686_v43  ;;  %v22014_v34 = vld [vmem:[#allocation253_spill] sm:$0xff] }
 0x49c   :  { %8880 = vperm.xlu1 %13660, %v14140_v52  }
 0x49d   :  { %v7443_v2 = vsub.f32 %v22008_v27, %v6838_v5  ;;  %14159 = vpow2.f32 %v7919_v46  ;;  %v22013_v5 = vld [vmem:[#allocation230_spill] sm:$0xff] }
 0x49e   :  { %v18869_v6 = vpop.permute.xlu0 %8757  ;;  %14161 = vpow2.f32 %v7965_v41 }
 0x49f   :  { %22003 = vst [vmem:[#allocation172_spill] sm:$0xff] %v18869_v6  ;;  %8949 = vperm.xlu0 %13659, %v14142_v47   ;;  %v18877_v50 = vpop.permute.xlu1 %8694  ;;  %v22009_v47 = vld [vmem:[#allocation251_spill] sm:$0xff]  ;;  %v7923_v27 = vmul.f32 1.442695, %v7443_v2 }
 0x4a0   :  { %8886 = vperm.xlu1 %13660, %v14144_v25   ;;  %22006 = vst [vmem:[#allocation121_spill] sm:$0xff] %v18877_v50  ;;  %v7466_v6 = vsub.f32 %v22009_v47, %v6930_v38  ;;  %v14150_v25 = vpop.eup %14149  ;;  %v7468_v47 = vsub.f32 %v22014_v34, %v6938_v16  ;;  %v22017_v16 = vld [vmem:[#allocation37_spill] sm:$0xff] }
 0x4a1   :  { %14163 = vpow2.f32 %v7923_v27  ;;  %v22020_v27 = vld [vmem:[#allocation44_spill] sm:$0xff] }
 0x4a2   :  { %v18879_v52 = vpop.permute.xlu0 %8763  ;;  %v7969_v38 = vmul.f32 1.442695, %v7466_v6  ;;  %v6954_v6 = vrot.slane %v22010_v24, %v17637_v48 }
 0x4a3   :  { %22007 = vst [vmem:[#allocation174_spill] sm:$0xff] %v18879_v52  ;;  %8955 = vperm.xlu0 %13659, %v14146_v17   ;;  %v18887_v50 = vpop.permute.xlu1 %8700  ;;  %v7445_v17 = vsub.f32 %v22013_v5, %v6846_v58  ;;  %v22016_v58 = vld [vmem:[#allocation232_spill] sm:$0xff]  ;;  %v7973_v5 = vmul.f32 1.442695, %v7468_v47 }
 0x4a4   :  { %8892 = vperm.xlu1 %13660, %v14148_v11   ;;  %22011 = vst [vmem:[#allocation183_spill] sm:$0xff] %v18887_v50  ;;  %v14152_v11 = vpop.eup %14151  ;;  %v7447_v2 = vsub.f32 %v22016_v58, %v6854_v22  ;;  %14165 = vpow2.f32 %v7969_v38  ;;  %v7472_v38 = vsub.f32 %v22020_v27, %v6954_v6 }
 0x4a5   :  { %v14154_v49 = vpop.eup %14153  ;;  %v7927_v41 = vmul.f32 1.442695, %v7445_v17  ;;  %v6962_v17 = vrot.slane %v22010_v24, %v17649_v23 }
 0x4a6   :  { %v18889_v55 = vpop.permute.xlu0 %8769  ;;  %v14156_v34 = vpop.eup %14155  ;;  %v7931_v22 = vmul.f32 1.442695, %v7447_v2  ;;  %v22022_v2 = vld [vmem:[#allocation236_spill] sm:$0xff]  ;;  %v7981_v6 = vmul.f32 1.442695, %v7472_v38 }
 0x4a7   :  { %22012 = vst [vmem:[#allocation134_spill] sm:$0xff] %v18889_v55  ;;  %8961 = vperm.xlu0 %13659, %v14150_v25   ;;  %v18897_v52 = vpop.permute.xlu1 %8706  ;;  %v6862_v55 = vrot.slane %v21960_v37, %v17703_v19  ;;  %v7470_v25 = vsub.f32 %v22017_v16, %v6946_v7  ;;  %v22019_v37 = vld [vmem:[#allocation234_spill] sm:$0xff]  ;;  %14167 = vpow2.f32 %v7927_v41 }
 0x4a8   :  { %8898 = vperm.xlu1 %13660, %v14152_v11   ;;  %22015 = vst [vmem:[#allocation113_spill] sm:$0xff] %v18897_v52  ;;  %v14158_v11 = vpop.eup %14157  ;;  %14169 = vpow2.f32 %v7973_v5 }
 0x4a9   :  { %v7449_v50 = vsub.f32 %v22019_v37, %v6862_v55  ;;  %v7977_v7 = vmul.f32 1.442695, %v7470_v25  ;;  %v14160_v47 = vpop.eup %14159  ;;  %14171 = vpow2.f32 %v7931_v22  ;;  %v6878_v55 = vrot.slane %v21977_v62, %v17664_v51  ;;  %v22025_v22 = vld [vmem:[#allocation238_spill] sm:$0xff] }
 0x4aa   :  { %v18899_v46 = vpop.permute.xlu0 %8775  ;;  %v14162_v58 = vpop.eup %14161 }
 0x4ab   :  { %8967 = vperm.xlu0 %13659, %v14154_v49   ;;  %v18907_v4 = vpop.permute.xlu1 %8712  ;;  %v6870_v49 = vrot.slane %v21977_v62, %v14523_v9  ;;  %v7935_v37 = vmul.f32 1.442695, %v7449_v50  ;;  %14173 = vpow2.f32 %v7977_v7  ;;  %v14164_v25 = vpop.eup %14163  ;;  %v6886_v50 = vrot.slane %v21977_v62, %v17686_v43 }
 0x4ac   :  { %8904 = vperm.xlu1 %13660, %v14156_v34   ;;  %22018 = vst [vmem:[#allocation147_spill] sm:$0xff] %v18907_v4  ;;  %v7453_v48 = vsub.f32 %v22025_v22, %v6878_v55 }
 0x4ad   :  { %v7451_v41 = vsub.f32 %v22022_v2, %v6870_v49  ;;  %14175 = vpow2.f32 %v7935_v37  ;;  %v6894_v2 = vrot.slane %v21977_v62, %v17703_v19  ;;  %v22027_v37 = vld [vmem:[#allocation240_spill] sm:$0xff]  ;;  %v6902_v62 = vrot.slane %v21994_v12, %v14523_v9 }
 0x4ae   :  { %v18909_v52 = vpop.permute.xlu0 %8781  ;;  %v14166_v5 = vpop.eup %14165  ;;  %14177 = vpow2.f32 %v7981_v6 }
 0x4af   :  { %8973 = vperm.xlu0 %13659, %v14158_v11   ;;  %v18917_v16 = vpop.permute.xlu1 %8718  ;;  %v22023_v11 = vld [vmem:[#allocation262_spill] sm:$0xff] }
 0x4b0   :  { %8910 = vperm.xlu1 %13660, %v14160_v47   ;;  %22021 = vst [vmem:[#allocation164_spill] sm:$0xff] %v18917_v16  ;;  %v7474_v23 = vsub.f32 %v22023_v11, %v6962_v17  ;;  %v7939_v16 = vmul.f32 1.442695, %v7451_v41  ;;  %v7455_v11 = vsub.f32 %v22027_v37, %v6886_v50  ;;  %v6910_v37 = vrot.slane %v21994_v12, %v17664_v51 }
 0x4b1   :  { %v14168_v17 = vpop.eup %14167 }
 0x4b2   :  { %v18919_v34 = vpop.permute.xlu0 %8787  ;;  %v7985_v49 = vmul.f32 1.442695, %v7474_v23  ;;  %v14170_v7 = vpop.eup %14169  ;;  %14179 = vpow2.f32 %v7939_v16 }
 0x4b3   :  { %8979 = vperm.xlu0 %13659, %v14162_v58   ;;  %v18925_v27 = vpop.permute.xlu1 %8724  ;;  %v14172_v55 = vpop.eup %14171 }
 0x4b4   :  { %8916 = vperm.xlu1 %13660, %v14164_v25   ;;  %v7943_v25 = vmul.f32 1.442695, %v7453_v48  ;;  %14181 = vpow2.f32 %v7985_v49 }
 0x4b5   :  { %v14174_v41 = vpop.eup %14173 }
 0x4b6   :  { %v18927_v47 = vpop.permute.xlu0 %8793  ;;  %14183 = vpow2.f32 %v7943_v25 }
 0x4b7   :  { %22024 = vst [vmem:[#allocation175_spill] sm:$0xff] %v18927_v47  ;;  %8985 = vperm.xlu0 %13659, %v14166_v5   ;;  %v18932_v38 = vpop.permute.xlu1 %8730  ;;  %v22029_v5 = vld [vmem:[#allocation242_spill] sm:$0xff]  ;;  %v14176_v50 = vpop.eup %14175 }
 0x4b8   :  { %8922 = vperm.xlu1 %13660, %v14168_v17   ;;  %v7457_v22 = vsub.f32 %v22029_v5, %v6894_v2  ;;  %v7947_v17 = vmul.f32 1.442695, %v7455_v11  ;;  %v14178_v16 = vpop.eup %14177 }
 0x4ba   :  { %v18934_v58 = vpop.permute.xlu0 %8799  ;;  %14185 = vpow2.f32 %v7947_v17 }
 0x4bb   :  { %22026 = vst [vmem:[#allocation168_spill] sm:$0xff] %v18934_v58  ;;  %8991 = vperm.xlu0 %13659, %v14170_v7   ;;  %v18939_v23 = vpop.permute.xlu1 %8736  ;;  %v7951_v7 = vmul.f32 1.442695, %v7457_v22 }
 0x4bc   :  { %8928 = vperm.xlu1 %13660, %v14172_v55   ;;  %v22031_v55 = vld [vmem:[#allocation244_spill] sm:$0xff]  ;;  %v14180_v11 = vpop.eup %14179 }
 0x4bd   :  { %v7459_v2 = vsub.f32 %v22031_v55, %v6902_v62  ;;  %14187 = vpow2.f32 %v7951_v7  ;;  %v22036_v55 = vld [vmem:[#allocation248_spill] sm:$0xff] }
 0x4be   :  { %v18941_v6 = vpop.permute.xlu0 %8805  ;;  %v14182_v25 = vpop.eup %14181 }
 0x4bf   :  { %22028 = vst [vmem:[#allocation178_spill] sm:$0xff] %v18941_v6  ;;  %8997 = vperm.xlu0 %13659, %v14174_v41   ;;  %v18946_v48 = vpop.permute.xlu1 %8742  ;;  %v7955_v22 = vmul.f32 1.442695, %v7459_v2 }
 0x4c0   :  { %8934 = vperm.xlu1 %13660, %v14176_v50   ;;  %v6918_v50 = vrot.slane %v21994_v12, %v17686_v43  ;;  %v14184_v6 = vpop.eup %14183 }
 0x4c1   :  { %14189 = vpow2.f32 %v7955_v22  ;;  %v22041_v22 = vld [vmem:[#allocation252_spill] sm:$0xff] }
 0x4c2   :  { %v18948_v49 = vpop.permute.xlu0 %8811 }
 0x4c3   :  { %22030 = vst [vmem:[#allocation161_spill] sm:$0xff] %v18948_v49  ;;  %9003 = vperm.xlu0 %13659, %v14178_v16   ;;  %v18953_v5 = vpop.permute.xlu1 %8748  ;;  %v22034_v49 = vld [vmem:[#allocation246_spill] sm:$0xff]  ;;  %v6926_v16 = vrot.slane %v21994_v12, %v17703_v19  ;;  %v6942_v12 = vrot.slane %v22010_v24, %v17664_v51 }
 0x4c4   :  { %8940 = vperm.xlu1 %13660, %v14180_v11   ;;  %22032 = vst [vmem:[#allocation150_spill] sm:$0xff] %v18953_v5  ;;  %v7461_v17 = vsub.f32 %v22034_v49, %v6910_v37  ;;  %v7463_v11 = vsub.f32 %v22036_v55, %v6918_v50  ;;  %v22038_v37 = vld [vmem:[#allocation250_spill] sm:$0xff]  ;;  %v22046_v5 = vld [vmem:[#allocation72_spill] sm:$0xff] }
 0x4c5   :  { %v7465_v2 = vsub.f32 %v22038_v37, %v6926_v16  ;;  %v6950_v16 = vrot.slane %v22010_v24, %v17686_v43  ;;  %v9018_v43 = vrot.slane %v22046_v5, %v15047_v39  ;;  %v9214_v5 = vrot.slane %v18371_v56, %v15047_v39 }
 0x4c6   :  { %v18955_v41 = vpop.permute.xlu0 %8817  ;;  %v7959_v7 = vmul.f32 1.442695, %v7461_v17  ;;  %v9270_v56 = vrot.slane %v18449_v21, %v15047_v39 }
 0x4c7   :  { %22033 = vst [vmem:[#allocation144_spill] sm:$0xff] %v18955_v41  ;;  %9009 = vperm.xlu0 %13659, %v14182_v25   ;;  %v18960_v58 = vpop.permute.xlu1 %8754  ;;  %v14186_v41 = vpop.eup %14185  ;;  %v6934_v25 = vrot.slane %v22010_v24, %v14523_v9 }
 0x4c8   :  { %8946 = vperm.xlu1 %13660, %v14184_v6   ;;  %22035 = vst [vmem:[#allocation152_spill] sm:$0xff] %v18960_v58  ;;  %14191 = vpow2.f32 %v7959_v7  ;;  %v7963_v6 = vmul.f32 1.442695, %v7463_v11  ;;  %v14188_v58 = vpop.eup %14187  ;;  %v6958_v11 = vrot.slane %v22010_v24, %v17703_v19  ;;  %v22042_v7 = vld [vmem:[#allocation255_spill] sm:$0xff]  ;;  %v22047_v24 = vld [vmem:[#allocation25_spill] sm:$0xff] }
 0x4c9   :  { %v7467_v55 = vsub.f32 %v22041_v22, %v6934_v25  ;;  %v7469_v37 = vsub.f32 %v22042_v7, %v6942_v12  ;;  %v22045_v25 = vld [vmem:[#allocation261_spill] sm:$0xff]  ;;  %v9022_v19 = vrot.slane %v22047_v24, %v15047_v39  ;;  %v22051_v24 = vld [vmem:[#allocation28_spill] sm:$0xff] }
 0x4ca   :  { %v18962_v62 = vpop.permute.xlu0 %8823  ;;  %14193 = vpow2.f32 %v7963_v6  ;;  %v7473_v22 = vsub.f32 %v22045_v25, %v6958_v11  ;;  %v22050_v11 = vld [vmem:[#allocation26_spill] sm:$0xff] }
 0x4cb   :  { %v18967_v4 = vpop.permute.xlu1 %8760  ;;  %v7971_v9 = vmul.f32 1.442695, %v7467_v55  ;;  %v22049_v55 = vld [vmem:[#allocation18_spill] sm:$0xff]  ;;  %v9026_v7 = vrot.slane %v22050_v11, %v15047_v39 }
 0x4cc   :  { %8952 = vperm.xlu1 %13660, %v14186_v41   ;;  %22037 = vst [vmem:[#allocation157_spill] sm:$0xff] %v18967_v4  ;;  %v7967_v41 = vmul.f32 1.442695, %v7465_v2  ;;  %v14190_v4 = vpop.eup %14189  ;;  %v22044_v2 = vld [vmem:[#allocation259_spill] sm:$0xff] }
 0x4ce   :  { %v18969_v49 = vpop.permute.xlu0 %8829  ;;  %14195 = vpow2.f32 %v7967_v41 }
 0x4cf   :  { %v18976_v50 = vpop.permute.xlu1 %8766  ;;  %14197 = vpow2.f32 %v7971_v9 }
 0x4d0   :  { %8958 = vperm.xlu1 %13660, %v14188_v58   ;;  %22039 = vst [vmem:[#allocation179_spill] sm:$0xff] %v18976_v50  ;;  %v7471_v50 = vsub.f32 %v22044_v2, %v6950_v16  ;;  %v9014_v16 = vrot.slane %v22049_v55, %v15047_v39  ;;  %v22053_v55 = vld [vmem:[#allocation81_spill] sm:$0xff] }
 0x4d1   :  { %v9034_v9 = vrot.slane %v22053_v55, %v15047_v39  ;;  %v22058_v55 = vld [vmem:[#allocation15_spill] sm:$0xff] }
 0x4d2   :  { %v18978_v17 = vpop.permute.xlu0 %8835  ;;  %v14192_v6 = vpop.eup %14191  ;;  %v7979_v25 = vmul.f32 1.442695, %v7471_v50 }
 0x4d3   :  { %22040 = vst [vmem:[#allocation197_spill] sm:$0xff] %v18978_v17  ;;  %v18986_v51 = vpop.permute.xlu1 %8772  ;;  %v7975_v17 = vmul.f32 1.442695, %v7469_v37  ;;  %v9030_v37 = vrot.slane %v22051_v24, %v15047_v39 }
 0x4d4   :  { %8964 = vperm.xlu1 %13660, %v14190_v4   ;;  %v9206_v4 = vrot.slane %v18346_v28, %v15047_v39  ;;  %v22052_v28 = vld [vmem:[#allocation45_spill] sm:$0xff]  ;;  %v14194_v2 = vpop.eup %14193 }
 0x4d5   :  { %14199 = vpow2.f32 %v7975_v17  ;;  %v22054_v17 = vld [vmem:[#allocation67_spill] sm:$0xff] }
 0x4d6   :  { %v18988_v58 = vpop.permute.xlu0 %8841  ;;  %14201 = vpow2.f32 %v7979_v25 }
 0x4d7   :  { %22043 = vst [vmem:[#allocation155_spill] sm:$0xff] %v18988_v58  ;;  %v18998_v12 = vpop.permute.xlu1 %8778  ;;  %v7983_v58 = vmul.f32 1.442695, %v7473_v22  ;;  %v9222_v22 = vrot.slane %v18388_v31, %v15047_v39  ;;  %v22056_v31 = vld [vmem:[#allocation30_spill] sm:$0xff] }
 0x4d8   :  { %8970 = vperm.xlu1 %13660, %v14192_v6   ;;  %v9210_v6 = vrot.slane %v22052_v28, %v15047_v39 }
 0x4d9   :  { %14203 = vpow2.f32 %v7983_v58  ;;  %v9398_v58 = vrot.slane %v18609_v59, %v15047_v39  ;;  %v9402_v59 = vrot.slane %v18497_v29, %v15047_v39 }
 0x4da   :  { %v19000_v41 = vpop.permute.xlu0 %8847  ;;  %v10077_v47 = vsel %vm5547_vm1, %v9210_v6, %v9206_v4  ;;  %v9074_v4 = vrot.slane %v22054_v17, %v15047_v39  ;;  %v9274_v6 = vrot.slane %v18260_v60, %v15047_v39 }
 0x4db   :  { %22048 = vst [vmem:[#allocation166_spill] sm:$0xff] %v19000_v41  ;;  %v10035_v41 = vsel %vm5547_vm1, %v9018_v43, %v9014_v16  ;;  %v19019_v24 = vpop.permute.xlu1 %8784  ;;  %v10078_v43 = vsel %vm5549_vm2, %v9214_v5, %v10077_v47  ;;  %v9038_v5 = vrot.slane %v22056_v31, %v15047_v39 }
 0x4dc   :  { %v10036_v11 = vsel %vm5549_vm2, %v9022_v19, %v10035_v41  ;;  %8976 = vperm.xlu1 %13660, %v14194_v2   ;;  %v9278_v19 = vrot.slane %v18459_v3, %v15047_v39  ;;  %v22055_v41 = vld [vmem:[#allocation19_spill] sm:$0xff] }
 0x4dd   :  { %v10037_v50 = vsel %vm5551_vm3, %v9026_v7, %v10036_v11  ;;  %v9218_v16 = vrot.slane %v22055_v41, %v15047_v39  ;;  %v14196_v7 = vpop.eup %14195  ;;  %v22057_v3 = vld [vmem:[#allocation83_spill] sm:$0xff]  ;;  %v9286_v41 = vrot.slane %v18469_v61, %v15047_v39  ;;  %v9338_v61 = vrot.slane %v18417_v57, %v15047_v39 }
 0x4de   :  { %v19021_v28 = vpop.permute.xlu0 %8853  ;;  %v10038_v21 = vsel %vm5553_vm4, %v9030_v37, %v10037_v50  ;;  %v9106_v2 = vrot.slane %v22057_v3, %v15047_v39  ;;  %v9170_v37 = vrot.slane %v22058_v55, %v15047_v39  ;;  %v10091_v50 = vsel %vm5547_vm1, %v9274_v6, %v9270_v56  ;;  %v22059_v56 = vld [vmem:[#allocation124_spill] sm:$0xff] }
 0x4df   :  { %v19037_v47 = vsel %vm5555_vm5, %v9034_v9, %v10038_v21  ;;  %v10079_v11 = vsel %vm5551_vm3, %v9218_v16, %v10078_v43  ;;  %v19047_v60 = vpop.permute.xlu1 %8790  ;;  %v10048_v9 = vsel %vm5559_vm7, %v9074_v4, %v18349_v42  ;;  %v10092_v21 = vsel %vm5549_vm2, %v9278_v19, %v10091_v50 }
 0x4e0   :  { %8982 = vperm.xlu1 %13660, %v14196_v7   ;;  %v10080_v17 = vsel %vm5553_vm4, %v9222_v22, %v10079_v11  ;;  %v9334_v43 = vrot.slane %v18529_v32, %v15047_v39  ;;  %v9226_v16 = vrot.slane %v22059_v56, %v15047_v39  ;;  %v9282_v6 = vrot.slane %v18287_v10, %v15047_v39  ;;  %v14198_v22 = vpop.eup %14197 }
 0x4e1   :  { %v9230_v7 = vrot.slane %v18399_v33, %v15047_v39  ;;  %v9342_v42 = vrot.slane %v18539_v35, %v15047_v39  ;;  %v9290_v19 = vrot.slane %v18314_v1, %v15047_v39  ;;  %v10294_v32 = vsel %vm5810_vm8, %v10048_v9, 0.0  ;;  %v22060_v9 = vld [vmem:[#allocation128_spill] sm:$0xff] }
 0x4e2   :  { %v19049_v25 = vpop.permute.xlu0 %8859  ;;  %v10055_v4 = vsel %vm5559_vm7, %v9106_v2, %v18357_v63  ;;  %v10093_v10 = vsel %vm5551_vm3, %v9282_v6, %v10092_v21  ;;  %v10069_v1 = vsel %vm5559_vm7, %v9170_v37, %v18364_v54  ;;  %v10081_v35 = vsel %vm5555_vm5, %v9226_v16, %v10080_v17  ;;  %v14200_v2 = vpop.eup %14199 }
 0x4e3   :  { %v19075_v33 = vpop.permute.xlu1 %8796  ;;  %v10094_v57 = vsel %vm5553_vm4, %v9286_v41, %v10093_v10  ;;  %v9294_v55 = vrot.slane %v18479_v20, %v15047_v39  ;;  %v10105_v63 = vsel %vm5547_vm1, %v9338_v61, %v9334_v43  ;;  %v9350_v50 = vrot.slane %v18549_v30, %v15047_v39  ;;  %v22061_v41 = vld [vmem:[#allocation33_spill] sm:$0xff]  ;;  %v14202_v6 = vpop.eup %14201 }
 0x4e4   :  { %8988 = vperm.xlu1 %13660, %v14198_v22   ;;  %v10106_v11 = vsel %vm5549_vm2, %v9342_v42, %v10105_v63  ;;  %v9406_v54 = vrot.slane %v18619_v8, %v15047_v39  ;;  %v10082_v37 = vsel %vm5557_vm6, %v9230_v7, %v10081_v35  ;;  %v9234_v17 = vrot.slane %v22060_v9, %v15047_v39 }
 0x4e5   :  { %v9346_v20 = vrot.slane %v18427_v13, %v15047_v39  ;;  %v10297_v21 = vsel %vm5810_vm8, %v10055_v4, 0.0  ;;  %v9042_v43 = vrot.slane %v22061_v41, %v15047_v39  ;;  %v9298_v30 = vrot.slane %v18338_v14, %v15047_v39 }
 0x4e6   :  { %v19077_v3 = vpop.permute.xlu0 %8865  ;;  %10295 = vadd.xlane.f32.xlu0 %v10294_v32  ;;  %v10303_v16 = vsel %vm5810_vm8, %v10069_v1, 0.0  ;;  %v10095_v13 = vsel %vm5555_vm5, %v9290_v19, %v10094_v57  ;;  %v10119_v7 = vsel %vm5547_vm1, %v9402_v59, %v9398_v58  ;;  %v10083_v42 = vsel %vm5559_vm7, %v9234_v17, %v10082_v37  ;;  %v22062_v57 = vld [vmem:[#allocation91_spill] sm:$0xff]  ;;  %v22065_v17 = vld [vmem:[#allocation136_spill] sm:$0xff] }
 0x4e7   :  { %v19105_v8 = vpop.permute.xlu1 %8802  ;;  %v10107_v29 = vsel %vm5551_vm3, %v9346_v20, %v10106_v11  ;;  %v10096_v22 = vsel %vm5557_vm6, %v9294_v55, %v10095_v13  ;;  %v10120_v61 = vsel %vm5549_vm2, %v9406_v54, %v10119_v7  ;;  %v9414_v32 = vrot.slane %v18629_v44, %v15047_v39  ;;  %v22063_v44 = vld [vmem:[#allocation41_spill] sm:$0xff]  ;;  %v22064_v54 = vld [vmem:[#allocation111_spill] sm:$0xff] }
 0x4e8   :  { %8994 = vperm.xlu1 %13660, %v14200_v2   ;;  %v10108_v14 = vsel %vm5553_vm4, %v9350_v50, %v10107_v29  ;;  %v9462_v4 = vrot.slane %v18687_v53, %v15047_v39  ;;  %v9354_v19 = vrot.slane %v18437_v36, %v15047_v39  ;;  %v9410_v10 = vrot.slane %v18507_v26, %v15047_v39  ;;  %v14204_v50 = vpop.eup %14203  ;;  %v22069_v7 = vld [vmem:[#allocation101_spill] sm:$0xff] }
 0x4e9   :  { %v9358_v1 = vrot.slane %v18559_v18, %v15047_v39  ;;  %v9470_v35 = vrot.slane %v18697_v40, %v15047_v39  ;;  %v9194_v63 = vrot.slane %v22063_v44, %v15047_v39  ;;  %v9466_v53 = vrot.slane %v18577_v15, %v15047_v39 }
 0x4ea   :  { %v19107_v56 = vpop.permute.xlu0 %8871  ;;  %10298 = vadd.xlane.f32.xlu0 %v10297_v21  ;;  %v10309_v26 = vsel %vm5810_vm8, %v10083_v42, 0.0  ;;  %v9418_v18 = vrot.slane %v18517_v45, %v15047_v39  ;;  %v10121_v40 = vsel %vm5551_vm3, %v9410_v10, %v10120_v61  ;;  %v10097_v2 = vsel %vm5559_vm7, %v9298_v30, %v10096_v22  ;;  %v22066_v45 = vld [vmem:[#allocation105_spill] sm:$0xff]  ;;  %v22067_v30 = vld [vmem:[#allocation148_spill] sm:$0xff]  ;;  %v22070_v22 = vld [vmem:[#allocation90_spill] sm:$0xff] }
 0x4eb   :  { %v19135_v36 = vpop.permute.xlu1 %8808  ;;  %v10109_v11 = vsel %vm5555_vm5, %v9354_v19, %v10108_v14  ;;  %v10122_v15 = vsel %vm5553_vm4, %v9414_v32, %v10121_v40  ;;  %v9422_v37 = vrot.slane %v22064_v54, %v15047_v39  ;;  %v10133_v9 = vsel %vm5547_vm1, %v9466_v53, %v9462_v4  ;;  %v22071_v32 = vld [vmem:[#allocation17_spill] sm:$0xff]  ;;  %v22072_v19 = vld [vmem:[#allocation54_spill] sm:$0xff] }
 0x4ec   :  { %9000 = vperm.xlu1 %13660, %v14202_v6   ;;  %v9526_v20 = vrot.slane %v22065_v17, %v15047_v39  ;;  %v10134_v59 = vsel %vm5549_vm2, %v9470_v35, %v10133_v9  ;;  %v9478_v21 = vrot.slane %v22066_v45, %v15047_v39  ;;  %v10110_v13 = vsel %vm5557_vm6, %v9358_v1, %v10109_v11  ;;  %v22068_v6 = vld [vmem:[#allocation143_spill] sm:$0xff]  ;;  %v22073_v17 = vld [vmem:[#allocation38_spill] sm:$0xff] }
 0x4ed   :  { %v9362_v29 = vrot.slane %v22068_v6, %v15047_v39  ;;  %v9474_v42 = vrot.slane %v22069_v7, %v15047_v39  ;;  %v9530_v14 = vrot.slane %v22070_v22, %v15047_v39  ;;  %v9426_v10 = vrot.slane %v22072_v19, %v15047_v39 }
 0x4ee   :  { %v19137_v58 = vpop.permute.xlu0 %8877  ;;  %10304 = vadd.xlane.f32.xlu0 %v10303_v16  ;;  %v9534_v16 = vrot.slane %v22067_v30, %v15047_v39  ;;  %v10315_v35 = vsel %vm5810_vm8, %v10097_v2, 0.0  ;;  %v10123_v53 = vsel %vm5555_vm5, %v9418_v18, %v10122_v15  ;;  %v9542_v45 = vrot.slane %v22073_v17, %v15047_v39  ;;  %v22074_v30 = vld [vmem:[#allocation177_spill] sm:$0xff]  ;;  %v22075_v18 = vld [vmem:[#allocation103_spill] sm:$0xff] }
 0x4ef   :  { %v19163_v61 = vpop.permute.xlu1 %8814  ;;  %v10135_v40 = vsel %vm5551_vm3, %v9474_v42, %v10134_v59  ;;  %v10147_v11 = vsel %vm5547_vm1, %v9530_v14, %v9526_v20  ;;  %v9590_v2 = vrot.slane %v22074_v30, %v15047_v39  ;;  %v9482_v15 = vrot.slane %v22075_v18, %v15047_v39  ;;  %v22076_v59 = vld [vmem:[#allocation93_spill] sm:$0xff]  ;;  %v22080_v42 = vld [vmem:[#allocation130_spill] sm:$0xff] }
 0x4f0   :  { %9006 = vperm.xlu1 %13660, %v14204_v50   ;;  %v10111_v50 = vsel %vm5559_vm7, %v9362_v29, %v10110_v13  ;;  %v10136_v54 = vsel %vm5553_vm4, %v9478_v21, %v10135_v40  ;;  %v10148_v9 = vsel %vm5549_vm2, %v9534_v16, %v10147_v11  ;;  %v9538_v20 = vrot.slane %v22076_v59, %v15047_v39  ;;  %v22077_v13 = vld [vmem:[#allocation110_spill] sm:$0xff]  ;;  %v22079_v16 = vld [vmem:[#allocation23_spill] sm:$0xff]  ;;  %v22083_v59 = vld [vmem:[#allocation176_spill] sm:$0xff] }
 0x4f1   :  { %v9486_v6 = vrot.slane %v22077_v13, %v15047_v39  ;;  %v9242_v7 = vrot.slane %v22079_v16, %v15047_v39  ;;  %v9250_v22 = vrot.slane %v22080_v42, %v15047_v39  ;;  %v22081_v14 = vld [vmem:[#allocation122_spill] sm:$0xff]  ;;  %v9550_v13 = vrot.slane %v22083_v59, %v15047_v39  ;;  %v22089_v59 = vld [vmem:[#allocation100_spill] sm:$0xff] }
 0x4f2   :  { %10310 = vadd.xlane.f32.xlu0 %v10309_v26  ;;  %v19169_v1 = vpop.permute.xlu0 %8883  ;;  %v10124_v26 = vsel %vm5557_vm6, %v9422_v37, %v10123_v53  ;;  %v22078_v37 = vld [vmem:[#allocation181_spill] sm:$0xff]  ;;  %v9594_v19 = vrot.slane %v22081_v14, %v15047_v39  ;;  %v10321_v53 = vsel %vm5810_vm8, %v10111_v50, 0.0  ;;  %v22082_v40 = vld [vmem:[#allocation98_spill] sm:$0xff]  ;;  %v10149_v17 = vsel %vm5551_vm3, %v9538_v20, %v10148_v9  ;;  %v22086_v20 = vld [vmem:[#allocation120_spill] sm:$0xff] }
 0x4f3   :  { %v9598_v21 = vrot.slane %v22078_v37, %v15047_v39  ;;  %v19191_v29 = vpop.permute.xlu1 %8820  ;;  %v9546_v11 = vrot.slane %v22082_v40, %v15047_v39  ;;  %v10125_v30 = vsel %vm5559_vm7, %v9426_v10, %v10124_v26  ;;  %v10150_v18 = vsel %vm5553_vm4, %v9542_v45, %v10149_v17  ;;  %v22084_v45 = vld [vmem:[#allocation104_spill] sm:$0xff]  ;;  %v22088_v17 = vld [vmem:[#allocation107_spill] sm:$0xff] }
 0x4f4   :  { %v10161_v37 = vsel %vm5547_vm1, %v9594_v19, %v9590_v2  ;;  %v9654_v14 = vrot.slane %v18925_v27, %v15047_v39  ;;  %v9606_v9 = vrot.slane %v18867_v0, %v15047_v39  ;;  %v9662_v10 = vrot.slane %v18932_v38, %v15047_v39  ;;  %v22085_v27 = vld [vmem:[#allocation106_spill] sm:$0xff]  ;;  %v22087_v19 = vld [vmem:[#allocation151_spill] sm:$0xff] }
 0x4f5   :  { %v10162_v40 = vsel %vm5549_vm2, %v9598_v21, %v10161_v37  ;;  %v9602_v21 = vrot.slane %v22086_v20, %v15047_v39  ;;  %v9658_v0 = vrot.slane %v22087_v19, %v15047_v39  ;;  %v9198_v38 = vrot.slane %v22088_v17, %v15047_v39 }
 0x4f6   :  { %10316 = vadd.xlane.f32.xlu0 %v10315_v35  ;;  %v10137_v35 = vsel %vm5555_vm5, %v9482_v15, %v10136_v54  ;;  %v19211_v50 = vpop.permute.xlu0 %8889  ;;  %v9490_v15 = vrot.slane %v22085_v27, %v15047_v39  ;;  %v9670_v55 = vrot.slane %v18939_v23, %v15047_v39  ;;  %v22093_v23 = vld [vmem:[#allocation57_spill] sm:$0xff]  ;;  %v9782_v31 = vrot.slane %v19191_v29, %v15047_v39 }
 0x4f7   :  { %v19218_v26 = vpop.permute.xlu1 %8826  ;;  %v10138_v54 = vsel %vm5557_vm6, %v9486_v6, %v10137_v35  ;;  %v10327_v6 = vsel %vm5810_vm8, %v10125_v30, 0.0  ;;  %v10151_v35 = vsel %vm5555_vm5, %v9546_v11, %v10150_v18  ;;  %v10163_v37 = vsel %vm5551_vm3, %v9602_v21, %v10162_v40  ;;  %v22090_v11 = vld [vmem:[#allocation173_spill] sm:$0xff] }
 0x4f8   :  { %v10175_v27 = vsel %vm5547_vm1, %v9658_v0, %v9654_v14  ;;  %v10139_v4 = vsel %vm5559_vm7, %v9490_v15, %v10138_v54  ;;  %v10152_v20 = vsel %vm5557_vm6, %v9550_v13, %v10151_v35  ;;  %v10164_v19 = vsel %vm5553_vm4, %v9606_v9, %v10163_v37  ;;  %v22091_v14 = vld [vmem:[#allocation159_spill] sm:$0xff]  ;;  %v22092_v13 = vld [vmem:[#allocation121_spill] sm:$0xff] }
 0x4f9   :  { %v10176_v2 = vsel %vm5549_vm2, %v9662_v10, %v10175_v27  ;;  %v9718_v30 = vrot.slane %v18986_v51, %v15047_v39  ;;  %v9610_v18 = vrot.slane %v22090_v11, %v15047_v39  ;;  %v9666_v40 = vrot.slane %v22091_v14, %v15047_v39 }
 0x4fa   :  { %10322 = vadd.xlane.f32.xlu0 %v10321_v53  ;;  %v9554_v53 = vrot.slane %v22089_v59, %v15047_v39  ;;  %v9614_v54 = vrot.slane %v22092_v13, %v15047_v39  ;;  %v9726_v9 = vrot.slane %v18998_v12, %v15047_v39  ;;  %v19253_v10 = vpop.permute.xlu0 %8895  ;;  %v9266_v15 = vrot.slane %v22093_v23, %v15047_v39 }
 0x4fb   :  { %v8833_v59 = vpop.permute.xlu1 %8832  ;;  %v9722_v51 = vrot.slane %v18899_v46, %v15047_v39  ;;  %v10333_v21 = vsel %vm5810_vm8, %v10139_v4, 0.0  ;;  %v10040_v0 = vsel %vm5557_vm6, %v9038_v5, %v19037_v47  ;;  %v10177_v12 = vsel %vm5551_vm3, %v9666_v40, %v10176_v2 }
 0x4fc   :  { %v10153_v37 = vsel %vm5559_vm7, %v9554_v53, %v10152_v20  ;;  %v10165_v27 = vsel %vm5555_vm5, %v9610_v18, %v10164_v19  ;;  %v10178_v11 = vsel %vm5553_vm4, %v9670_v55, %v10177_v12  ;;  %v9678_v46 = vrot.slane %v18946_v48, %v15047_v39  ;;  %v22095_v48 = vld [vmem:[#allocation145_spill] sm:$0xff] }
 0x4fd   :  { %v10189_v4 = vsel %vm5547_vm1, %v9722_v51, %v9718_v30  ;;  %v9734_v2 = vrot.slane %v19019_v24, %v15047_v39  ;;  %v9790_v53 = vrot.slane %v19218_v26, %v15047_v39  ;;  %v10166_v55 = vsel %vm5557_vm6, %v9614_v54, %v10165_v27  ;;  %v22096_v24 = vld [vmem:[#allocation71_spill] sm:$0xff] }
 0x4fe   :  { %10328 = vadd.xlane.f32.xlu0 %v10327_v6  ;;  %v22094_v6 = vld [vmem:[#allocation180_spill] sm:$0xff]  ;;  %v10190_v5 = vsel %vm5549_vm2, %v9726_v9, %v10189_v4  ;;  %v9618_v20 = vrot.slane %v22095_v48, %v15047_v39  ;;  %v9730_v19 = vrot.slane %v18909_v52, %v15047_v39  ;;  %v9786_v29 = vrot.slane %v18962_v62, %v15047_v39  ;;  %v22097_v26 = vld [vmem:[#allocation35_spill] sm:$0xff]  ;;  %v19298_v40 = vpop.permute.xlu0 %8901 }
 0x4ff   :  { %v9674_v35 = vrot.slane %v22094_v6, %v15047_v39  ;;  %v19276_v47 = vpop.permute.xlu1 %8838  ;;  %v10041_v30 = vsel %vm5559_vm7, %v9042_v43, %v10040_v0  ;;  %v9238_v18 = vrot.slane %v22096_v24, %v15047_v39  ;;  %v9246_v14 = vrot.slane %v22097_v26, %v15047_v39  ;;  %v22100_v4 = vld [vmem:[#allocation27_spill] sm:$0xff] }
 0x500   :  { %v10339_v13 = vsel %vm5810_vm8, %v10153_v37, 0.0  ;;  %v10191_v54 = vsel %vm5551_vm3, %v9730_v19, %v10190_v5  ;;  %v10203_v62 = vsel %vm5547_vm1, %v9786_v29, %v9782_v31  ;;  %v10167_v41 = vsel %vm5559_vm7, %v9618_v20, %v10166_v55  ;;  %v22099_v37 = vld [vmem:[#allocation156_spill] sm:$0xff]  ;;  %v22103_v26 = vld [vmem:[#allocation175_spill] sm:$0xff] }
 0x501   :  { %v10179_v52 = vsel %vm5555_vm5, %v9674_v35, %v10178_v11  ;;  %v10192_v51 = vsel %vm5553_vm4, %v9734_v2, %v10191_v54  ;;  %v10204_v0 = vsel %vm5549_vm2, %v9790_v53, %v10203_v62  ;;  %v9798_v6 = vrot.slane %v8833_v59, %v15047_v39  ;;  %v22098_v35 = vld [vmem:[#allocation127_spill] sm:$0xff]  ;;  %v22105_v62 = vld [vmem:[#allocation50_spill] sm:$0xff] }
 0x502   :  { %10334 = vadd.xlane.f32.xlu0 %v10333_v21  ;;  %v10180_v43 = vsel %vm5557_vm6, %v9678_v46, %v10179_v52  ;;  %v9742_v21 = vrot.slane %v19047_v60, %v15047_v39  ;;  %v9302_v12 = vrot.slane %v22098_v35, %v15047_v39  ;;  %v9682_v27 = vrot.slane %v22099_v37, %v15047_v39  ;;  %v22101_v60 = vld [vmem:[#allocation88_spill] sm:$0xff]  ;;  %v22104_v52 = vld [vmem:[#allocation197_spill] sm:$0xff] }
 0x503   :  { %v19304_v9 = vpop.permute.xlu1 %8844  ;;  %v9738_v11 = vrot.slane %v18919_v34, %v15047_v39  ;;  %v9794_v46 = vrot.slane %v18969_v49, %v15047_v39  ;;  %v9306_v31 = vrot.slane %v22100_v4, %v15047_v39  ;;  %v9310_v5 = vrot.slane %v22101_v60, %v15047_v39 }
 0x504   :  { %v10291_v59 = vsel %vm5810_vm8, %v10041_v30, 0.0  ;;  %v10345_v2 = vsel %vm5810_vm8, %v10167_v41, 0.0  ;;  %v10084_v53 = vsel %vm5547_vm1, %v9242_v7, %v9238_v18  ;;  %v10181_v49 = vsel %vm5559_vm7, %v9682_v27, %v10180_v43  ;;  %v19340_v30 = vpop.permute.xlu0 %8907  ;;  %v22102_v7 = vld [vmem:[#allocation140_spill] sm:$0xff]  ;;  %v22106_v41 = vld [vmem:[#allocation99_spill] sm:$0xff] }
 0x505   :  { %v10205_v34 = vsel %vm5551_vm3, %v9794_v46, %v10204_v0  ;;  %v10193_v48 = vsel %vm5555_vm5, %v9738_v11, %v10192_v51  ;;  %v10085_v20 = vsel %vm5549_vm2, %v9246_v14, %v10084_v53  ;;  %v9806_v29 = vrot.slane %v19276_v47, %v15047_v39  ;;  %v22109_v46 = vld [vmem:[#allocation125_spill] sm:$0xff]  ;;  %v22111_v53 = vld [vmem:[#allocation39_spill] sm:$0xff] }
 0x506   :  { %10340 = vadd.xlane.f32.xlu0 %v10339_v13  ;;  %v10206_v19 = vsel %vm5553_vm4, %v9798_v6, %v10205_v34  ;;  %v10194_v16 = vsel %vm5557_vm6, %v9742_v21, %v10193_v48  ;;  %v9254_v24 = vrot.slane %v22102_v7, %v15047_v39  ;;  %v10098_v18 = vsel %vm5547_vm1, %v9306_v31, %v9302_v12  ;;  %v22107_v21 = vld [vmem:[#allocation29_spill] sm:$0xff]  ;;  %v22110_v31 = vld [vmem:[#allocation132_spill] sm:$0xff] }
 0x507   :  { %v19332_v55 = vpop.permute.xlu1 %8850  ;;  %v9746_v13 = vrot.slane %v22103_v26, %v15047_v39  ;;  %v9802_v14 = vrot.slane %v22104_v52, %v15047_v39  ;;  %v10099_v54 = vsel %vm5549_vm2, %v9310_v5, %v10098_v18  ;;  %v9318_v47 = vrot.slane %v22105_v62, %v15047_v39  ;;  %v22108_v6 = vld [vmem:[#allocation65_spill] sm:$0xff]  ;;  %v22115_v52 = vld [vmem:[#allocation138_spill] sm:$0xff] }
 0x508   :  { %v9366_v43 = vrot.slane %v22106_v41, %v15047_v39  ;;  %v10351_v51 = vsel %vm5810_vm8, %v10181_v49, 0.0  ;;  %v9314_v0 = vrot.slane %v22107_v21, %v15047_v39  ;;  %v9374_v35 = vrot.slane %v22108_v6, %v15047_v39 }
 0x509   :  { %v10195_v37 = vsel %vm5559_vm7, %v9746_v13, %v10194_v16  ;;  %v10207_v27 = vsel %vm5555_vm5, %v9802_v14, %v10206_v19  ;;  %v10086_v11 = vsel %vm5551_vm3, %v9250_v22, %v10085_v20  ;;  %v9370_v4 = vrot.slane %v22109_v46, %v15047_v39  ;;  %v22112_v22 = vld [vmem:[#allocation155_spill] sm:$0xff]  ;;  %v19384_v19 = vpop.permute.xlu0 %8913 }
 0x50a   :  { %10346 = vadd.xlane.f32.xlu0 %v10345_v2  ;;  %v10074_v60 = vsel %vm5555_vm5, %v9194_v63, %v22110_v31  ;;  %v10208_v5 = vsel %vm5557_vm6, %v9806_v29, %v10207_v27  ;;  %v10087_v2 = vsel %vm5553_vm4, %v9254_v24, %v10086_v11  ;;  %v9262_v34 = vrot.slane %v22111_v53, %v15047_v39  ;;  %v22113_v29 = vld [vmem:[#allocation92_spill] sm:$0xff]  ;;  %v22114_v24 = vld [vmem:[#allocation69_spill] sm:$0xff]  ;;  %v22123_v11 = vld [vmem:[#allocation86_spill] sm:$0xff] }
 0x50b   :  { %v19360_v12 = vpop.permute.xlu1 %8856  ;;  %v10100_v42 = vsel %vm5551_vm3, %v9314_v0, %v10099_v54  ;;  %v9810_v49 = vrot.slane %v22112_v22, %v15047_v39  ;;  %v10112_v20 = vsel %vm5547_vm1, %v9370_v4, %v9366_v43  ;;  %v10075_v44 = vsel %vm5557_vm6, %v9198_v38, %v10074_v60  ;;  %v22116_v38 = vld [vmem:[#allocation78_spill] sm:$0xff]  ;;  %v22117_v54 = vld [vmem:[#allocation64_spill] sm:$0xff]  ;;  %v22124_v60 = vld [vmem:[#allocation139_spill] sm:$0xff] }
 0x50c   :  { %v10101_v48 = vsel %vm5553_vm4, %v9318_v47, %v10100_v42  ;;  %v10357_v63 = vsel %vm5810_vm8, %v10195_v37, 0.0  ;;  %v9326_v16 = vrot.slane %v22113_v29, %v15047_v39  ;;  %v10113_v7 = vsel %vm5549_vm2, %v9374_v35, %v10112_v20  ;;  %v22121_v0 = vld [vmem:[#allocation114_spill] sm:$0xff]  ;;  %v22125_v53 = vld [vmem:[#allocation31_spill] sm:$0xff] }
 0x50d   :  { %v9382_v18 = vrot.slane %v22114_v24, %v15047_v39  ;;  %v10209_v13 = vsel %vm5559_vm7, %v9810_v49, %v10208_v5  ;;  %v9322_v17 = vrot.slane %v22115_v52, %v15047_v39  ;;  %v9378_v14 = vrot.slane %v22116_v38, %v15047_v39  ;;  %v22126_v42 = vld [vmem:[#allocation123_spill] sm:$0xff]  ;;  %v19434_v49 = vpop.permute.xlu0 %8919 }
 0x50e   :  { %10352 = vadd.xlane.f32.xlu0 %v10351_v51  ;;  %v22118_v62 = vrot.slane %v22062_v57, %v15047_v39  ;;  %v22119_v41 = vrot.slane %v22084_v45, %v15047_v39  ;;  %v22120_v51 = vld [vmem:[#allocation94_spill] sm:$0xff]  ;;  %v9430_v6 = vrot.slane %v22121_v0, %v15047_v39  ;;  %v22122_v35 = vrot.slane %v22071_v32, %v15047_v39 }
 0x50f   :  { %v19396_v26 = vpop.permute.xlu1 %8862  ;;  %v9434_v21 = vrot.slane %v22120_v51, %v15047_v39  ;;  %v10114_v27 = vsel %vm5551_vm3, %v9378_v14, %v10113_v7  ;;  %v9438_v45 = vrot.slane %v22123_v11, %v15047_v39  ;;  %v10363_v46 = vsel %vm5810_vm8, %v10209_v13, 0.0  ;;  %v22128_v13 = vld [vmem:[#allocation131_spill] sm:$0xff] }
 0x510   :  { %v10062_v47 = vsel %vm5559_vm7, %v22118_v62, %v22117_v54  ;;  %v10088_v43 = vsel %vm5555_vm5, %v22119_v41, %v10087_v2  ;;  %v10076_v37 = vsel %vm5559_vm7, %v22122_v35, %v10075_v44  ;;  %v10102_v4 = vsel %vm5555_vm5, %v9322_v17, %v10101_v48  ;;  %v22129_v17 = vld [vmem:[#allocation115_spill] sm:$0xff]  ;;  %v22130_v54 = vld [vmem:[#allocation84_spill] sm:$0xff] }
 0x511   :  { %v10089_v57 = vsel %vm5557_vm6, %v9262_v34, %v10088_v43  ;;  %v10115_v31 = vsel %vm5553_vm4, %v9382_v18, %v10114_v27  ;;  %v9390_v5 = vrot.slane %v22124_v60, %v15047_v39  ;;  %v10103_v2 = vsel %vm5557_vm6, %v9326_v16, %v10102_v4  ;;  %v22127_v16 = vld [vmem:[#allocation118_spill] sm:$0xff]  ;;  %v22134_v4 = vld [vmem:[#allocation95_spill] sm:$0xff] }
 0x512   :  { %10358 = vadd.xlane.f32.xlu0 %v10357_v63  ;;  %v9330_v34 = vrot.slane %v22125_v53, %v15047_v39  ;;  %v9386_v22 = vrot.slane %v22126_v42, %v15047_v39  ;;  %v10300_v48 = vsel %vm5810_vm8, %v10062_v47, 0.0  ;;  %v10126_v20 = vsel %vm5547_vm1, %v9434_v21, %v9430_v6  ;;  %v22131_v47 = vld [vmem:[#allocation119_spill] sm:$0xff]  ;;  %v22132_v21 = vld [vmem:[#allocation142_spill] sm:$0xff]  ;;  %v22136_v42 = vld [vmem:[#allocation141_spill] sm:$0xff] }
 0x513   :  { %v8869_v32 = vpop.permute.xlu1 %8868  ;;  %v10090_v63 = vsel %vm5559_vm7, %v9266_v15, %v10089_v57  ;;  %v10127_v29 = vsel %vm5549_vm2, %v9438_v45, %v10126_v20  ;;  %v9446_v7 = vrot.slane %v22127_v16, %v15047_v39  ;;  %v9442_v52 = vrot.slane %v22128_v13, %v15047_v39  ;;  %v19471_v45 = vpop.permute.xlu0 %8925  ;;  %v22139_v16 = vld [vmem:[#allocation109_spill] sm:$0xff] }
 0x514   :  { %10292 = vadd.xlane.f32.xlu1 %v10291_v59  ;;  %v9846_v44 = vrot.slane %v8869_v32, %v15047_v39  ;;  %v10306_v59 = vsel %vm5810_vm8, %v10076_v37, 0.0  ;;  %v10104_v24 = vsel %vm5559_vm7, %v9330_v34, %v10103_v2  ;;  %v10116_v18 = vsel %vm5555_vm5, %v9386_v22, %v10115_v31  ;;  %v22133_v37 = vld [vmem:[#allocation97_spill] sm:$0xff] }
 0x515   :  { %v9494_v38 = vrot.slane %v22129_v17, %v15047_v39  ;;  %v9850_v23 = vrot.slane %v19107_v56, %v15047_v39  ;;  %v10117_v14 = vsel %vm5557_vm6, %v9390_v5, %v10116_v18  ;;  %v9394_v62 = vrot.slane %v22130_v54, %v15047_v39  ;;  %v22135_v5 = vld [vmem:[#allocation171_spill] sm:$0xff]  ;;  %v22141_v18 = vld [vmem:[#allocation77_spill] sm:$0xff] }
 0x516   :  { %10364 = vadd.xlane.f32.xlu0 %v10363_v46  ;;  %v9502_v41 = vrot.slane %v22131_v47, %v15047_v39  ;;  %v10312_v51 = vsel %vm5810_vm8, %v10090_v63, 0.0  ;;  %v9498_v0 = vrot.slane %v22132_v21, %v15047_v39  ;;  %v10128_v6 = vsel %vm5551_vm3, %v9442_v52, %v10127_v29  ;;  %v22138_v63 = vld [vmem:[#allocation62_spill] sm:$0xff] }
 0x517   :  { %v8875_v15 = vpop.permute.xlu1 %8874  ;;  %v10217_v56 = vsel %vm5547_vm1, %v9850_v23, %v9846_v44  ;;  %v10318_v35 = vsel %vm5810_vm8, %v10104_v24, 0.0  ;;  %v9450_v57 = vrot.slane %v22133_v37, %v15047_v39  ;;  %v10129_v27 = vsel %vm5553_vm4, %v9446_v7, %v10128_v6 }
 0x518   :  { %10301 = vadd.xlane.f32.xlu1 %v10300_v48  ;;  %v9854_v43 = vrot.slane %v8875_v15, %v15047_v39  ;;  %v10118_v46 = vsel %vm5559_vm7, %v9394_v62, %v10117_v14  ;;  %v9454_v31 = vrot.slane %v22134_v4, %v15047_v39  ;;  %v10140_v60 = vsel %vm5547_vm1, %v9498_v0, %v9494_v38  ;;  %v22137_v48 = vld [vmem:[#allocation133_spill] sm:$0xff]  ;;  %v19508_v0 = vpop.permute.xlu0 %8931  ;;  %v22146_v4 = vld [vmem:[#allocation108_spill] sm:$0xff] }
 0x519   :  { %v9558_v32 = vrot.slane %v22135_v5, %v15047_v39  ;;  %v9858_v2 = vrot.slane %v19137_v58, %v15047_v39  ;;  %v10141_v34 = vsel %vm5549_vm2, %v9502_v41, %v10140_v60  ;;  %v9510_v22 = vrot.slane %v22136_v42, %v15047_v39  ;;  %v22140_v58 = vld [vmem:[#allocation102_spill] sm:$0xff]  ;;  %v22142_v41 = vld [vmem:[#allocation169_spill] sm:$0xff] }
 0x51a   :  { %v10218_v11 = vsel %vm5549_vm2, %v9854_v43, %v10217_v56  ;;  %v9566_v20 = vrot.slane %v22137_v48, %v15047_v39  ;;  %v9458_v29 = vrot.slane %v22138_v63, %v15047_v39  ;;  %v9506_v7 = vrot.slane %v22139_v16, %v15047_v39  ;;  %v22143_v56 = vld [vmem:[#allocation170_spill] sm:$0xff]  ;;  %v22147_v60 = vld [vmem:[#allocation113_spill] sm:$0xff] }
 0x51b   :  { %v8881_v53 = vpop.permute.xlu1 %8880  ;;  %v10219_v24 = vsel %vm5551_vm3, %v9858_v2, %v10218_v11  ;;  %v9514_v13 = vrot.slane %v22141_v18, %v15047_v39  ;;  %v10324_v17 = vsel %vm5810_vm8, %v10118_v46, 0.0  ;;  %v10130_v38 = vsel %vm5555_vm5, %v9450_v57, %v10129_v27  ;;  %v22145_v11 = vld [vmem:[#allocation80_spill] sm:$0xff] }
 0x51c   :  { %10307 = vadd.xlane.f32.xlu1 %v10306_v59  ;;  %v9862_v44 = vrot.slane %v8881_v53, %v15047_v39  ;;  %v9562_v59 = vrot.slane %v22140_v58, %v15047_v39  ;;  %v10142_v23 = vsel %vm5551_vm3, %v9506_v7, %v10141_v34  ;;  %v9866_v14 = vrot.slane %v19169_v1, %v15047_v39  ;;  %v22144_v1 = vld [vmem:[#allocation183_spill] sm:$0xff]  ;;  %v22148_v2 = vld [vmem:[#allocation112_spill] sm:$0xff] }
 0x51d   :  { %v10131_v62 = vsel %vm5557_vm6, %v9454_v31, %v10130_v38  ;;  %v10143_v47 = vsel %vm5553_vm4, %v9510_v22, %v10142_v23  ;;  %v9518_v43 = vrot.slane %v22142_v41, %v15047_v39  ;;  %v9574_v37 = vrot.slane %v22143_v56, %v15047_v39  ;;  %v22149_v34 = vld [vmem:[#allocation76_spill] sm:$0xff] }
 0x51e   :  { %v10220_v52 = vsel %vm5553_vm4, %v9862_v44, %v10219_v24  ;;  %v10154_v15 = vsel %vm5547_vm1, %v9562_v59, %v9558_v32  ;;  %v9874_v57 = vrot.slane %v19211_v50, %v15047_v39  ;;  %v9522_v46 = vrot.slane %v22145_v11, %v15047_v39  ;;  %v22150_v44 = vld [vmem:[#allocation150_spill] sm:$0xff]  ;;  %v22153_v38 = vld [vmem:[#allocation96_spill] sm:$0xff] }
 0x51f   :  { %v8887_v54 = vpop.permute.xlu1 %8886  ;;  %v10155_v21 = vsel %vm5549_vm2, %v9566_v20, %v10154_v15  ;;  %v10221_v27 = vsel %vm5555_vm5, %v9866_v14, %v10220_v52  ;;  %v9570_v31 = vrot.slane %v22146_v4, %v15047_v39  ;;  %v9630_v5 = vrot.slane %v22147_v60, %v15047_v39  ;;  %v22158_v60 = vld [vmem:[#allocation117_spill] sm:$0xff] }
 0x520   :  { %10313 = vadd.xlane.f32.xlu1 %v10312_v51  ;;  %v9870_v6 = vrot.slane %v8887_v54, %v15047_v39  ;;  %v9622_v51 = vrot.slane %v22144_v1, %v15047_v39  ;;  %v9578_v53 = vrot.slane %v22148_v2, %v15047_v39  ;;  %v9626_v42 = vrot.slane %v22149_v34, %v15047_v39  ;;  %v19550_v54 = vpop.permute.xlu0 %8937 }
 0x521   :  { %v10132_v48 = vsel %vm5559_vm7, %v9458_v29, %v10131_v62  ;;  %v10156_v20 = vsel %vm5551_vm3, %v9570_v31, %v10155_v21  ;;  %v9686_v63 = vrot.slane %v22150_v44, %v15047_v39  ;;  %v10144_v7 = vsel %vm5555_vm5, %v9514_v13, %v10143_v47  ;;  %v22152_v29 = vld [vmem:[#allocation126_spill] sm:$0xff]  ;;  %v22154_v13 = vld [vmem:[#allocation147_spill] sm:$0xff]  ;;  %v22155_v62 = vld [vmem:[#allocation21_spill] sm:$0xff] }
 0x522   :  { %v10222_v32 = vsel %vm5557_vm6, %v9870_v6, %v10221_v27  ;;  %v10157_v58 = vsel %vm5553_vm4, %v9574_v37, %v10156_v20  ;;  %v10168_v59 = vsel %vm5547_vm1, %v9626_v42, %v9622_v51  ;;  %v10145_v18 = vsel %vm5557_vm6, %v9518_v43, %v10144_v7  ;;  %v22156_v51 = vld [vmem:[#allocation157_spill] sm:$0xff]  ;;  %v22157_v27 = vld [vmem:[#allocation172_spill] sm:$0xff] }
 0x523   :  { %v19529_v50 = vpop.permute.xlu1 %8892  ;;  %v10223_v22 = vsel %vm5559_vm7, %v9874_v57, %v10222_v32  ;;  %v9582_v52 = vrot.slane %v22152_v29, %v15047_v39  ;;  %v9690_v23 = vrot.slane %v22153_v38, %v15047_v39  ;;  %v10169_v15 = vsel %vm5549_vm2, %v9630_v5, %v10168_v59  ;;  %v22159_v32 = vld [vmem:[#allocation85_spill] sm:$0xff]  ;;  %v22163_v29 = vld [vmem:[#allocation174_spill] sm:$0xff] }
 0x524   :  { %10319 = vadd.xlane.f32.xlu1 %v10318_v35  ;;  %v10369_v16 = vsel %vm5810_vm8, %v10223_v22, 0.0  ;;  %v22151_v35 = vld [vmem:[#allocation152_spill] sm:$0xff]  ;;  %v9638_v14 = vrot.slane %v22154_v13, %v15047_v39  ;;  %v9634_v47 = vrot.slane %v22155_v62, %v15047_v39  ;;  %v10330_v21 = vsel %vm5810_vm8, %v10132_v48, 0.0  ;;  %v22164_v38 = vld [vmem:[#allocation178_spill] sm:$0xff] }
 0x525   :  { %v9694_v24 = vrot.slane %v22151_v35, %v15047_v39  ;;  %10370 = vadd.xlane.f32.xlu0 %v10369_v16  ;;  %v10182_v43 = vsel %vm5547_vm1, %v9690_v23, %v9686_v63  ;;  %v10146_v6 = vsel %vm5559_vm7, %v9522_v46, %v10145_v18  ;;  %v10158_v56 = vsel %vm5555_vm5, %v9578_v53, %v10157_v58  ;;  %v22160_v53 = vld [vmem:[#allocation164_spill] sm:$0xff]  ;;  %v22162_v58 = vld [vmem:[#allocation179_spill] sm:$0xff]  ;;  %v22165_v62 = vld [vmem:[#allocation182_spill] sm:$0xff] }
 0x526   :  { %v10170_v37 = vsel %vm5551_vm3, %v9634_v47, %v10169_v15  ;;  %v9702_v57 = vrot.slane %v22156_v51, %v15047_v39  ;;  %v9698_v11 = vrot.slane %v22157_v27, %v15047_v39  ;;  %v9758_v46 = vrot.slane %v19105_v8, %v15047_v39  ;;  %v19583_v8 = vpop.permute.xlu0 %8943  ;;  %v22166_v47 = vld [vmem:[#allocation166_spill] sm:$0xff] }
 0x527   :  { %v19554_v41 = vpop.permute.xlu1 %8898  ;;  %v10183_v1 = vsel %vm5549_vm2, %v9694_v24, %v10182_v43  ;;  %v10171_v4 = vsel %vm5553_vm4, %v9638_v14, %v10170_v37  ;;  %v10159_v31 = vsel %vm5557_vm6, %v9582_v52, %v10158_v56  ;;  %v9586_v5 = vrot.slane %v22158_v60, %v15047_v39  ;;  %v22168_v60 = vld [vmem:[#allocation161_spill] sm:$0xff] }
 0x528   :  { %10325 = vadd.xlane.f32.xlu1 %v10324_v17  ;;  %v9750_v17 = vrot.slane %v19075_v33, %v15047_v39  ;;  %v9642_v2 = vrot.slane %v22159_v32, %v15047_v39  ;;  %v9646_v34 = vrot.slane %v22160_v53, %v15047_v39  ;;  %v22161_v33 = vld [vmem:[#allocation168_spill] sm:$0xff]  ;;  %v10184_v48 = vsel %vm5551_vm3, %v9698_v11, %v10183_v1 }
 0x529   :  { %v9754_v42 = vrot.slane %v22161_v33, %v15047_v39  ;;  %v10336_v20 = vsel %vm5810_vm8, %v10146_v6, 0.0  ;;  %v10185_v44 = vsel %vm5553_vm4, %v9702_v57, %v10184_v48  ;;  %v10160_v16 = vsel %vm5559_vm7, %v9586_v5, %v10159_v31 }
 0x52a   :  { %v10172_v7 = vsel %vm5555_vm5, %v9642_v2, %v10171_v4  ;;  %v9710_v59 = vrot.slane %v22162_v58, %v15047_v39  ;;  %v9766_v24 = vrot.slane %v19135_v36, %v15047_v39  ;;  %v9814_v18 = vrot.slane %v19304_v9, %v15047_v39  ;;  %v19615_v37 = vpop.permute.xlu0 %8949 }
 0x52b   :  { %v19580_v22 = vpop.permute.xlu1 %8904  ;;  %v10196_v63 = vsel %vm5547_vm1, %v9754_v42, %v9750_v17  ;;  %v9706_v52 = vrot.slane %v22163_v29, %v15047_v39  ;;  %v9762_v23 = vrot.slane %v22164_v38, %v15047_v39  ;;  %v9822_v15 = vrot.slane %v19332_v55, %v15047_v39 }
 0x52c   :  { %10331 = vadd.xlane.f32.xlu1 %v10330_v21  ;;  %v10197_v35 = vsel %vm5549_vm2, %v9758_v46, %v10196_v63  ;;  %v10173_v14 = vsel %vm5557_vm6, %v9646_v34, %v10172_v7  ;;  %v9650_v36 = vrot.slane %v22165_v62, %v15047_v39  ;;  %v9818_v9 = vrot.slane %v22166_v47, %v15047_v39  ;;  %v22167_v46 = vld [vmem:[#allocation134_spill] sm:$0xff] }
 0x52d   :  { %v10198_v43 = vsel %vm5551_vm3, %v9762_v23, %v10197_v35  ;;  %v10342_v21 = vsel %vm5810_vm8, %v10160_v16, 0.0  ;;  %v10186_v6 = vsel %vm5555_vm5, %v9706_v52, %v10185_v44  ;;  %v9774_v57 = vrot.slane %v19163_v61, %v15047_v39 }
 0x52e   :  { %v10199_v56 = vsel %vm5553_vm4, %v9766_v24, %v10198_v43  ;;  %v10210_v55 = vsel %vm5547_vm1, %v9818_v9, %v9814_v18  ;;  %v10174_v1 = vsel %vm5559_vm7, %v9650_v36, %v10173_v14  ;;  %v10187_v51 = vsel %vm5557_vm6, %v9710_v59, %v10186_v6  ;;  %v19651_v16 = vpop.permute.xlu0 %8955 }
 0x52f   :  { %v19603_v13 = vpop.permute.xlu1 %8910  ;;  %v10211_v17 = vsel %vm5549_vm2, %v9822_v15, %v10210_v55  ;;  %v9830_v27 = vrot.slane %v19360_v12, %v15047_v39  ;;  %v9878_v11 = vrot.slane %v19529_v50, %v15047_v39  ;;  %v9714_v31 = vrot.slane %v22167_v46, %v15047_v39 }
 0x530   :  { %10337 = vadd.xlane.f32.xlu1 %v10336_v20  ;;  %v9770_v5 = vrot.slane %v22168_v60, %v15047_v39  ;;  %v9826_v32 = vrot.slane %v19021_v28, %v15047_v39  ;;  %v9886_v61 = vrot.slane %v19554_v41, %v15047_v39  ;;  %v9882_v12 = vrot.slane %v19253_v10, %v15047_v39 }
 0x531   :  { %v10348_v53 = vsel %vm5810_vm8, %v10174_v1, 0.0  ;;  %v10188_v34 = vsel %vm5559_vm7, %v9714_v31, %v10187_v51  ;;  %v9914_v28 = vrot.slane %v19434_v49, %v15047_v39  ;;  %v9838_v20 = vrot.slane %v19396_v26, %v15047_v39  ;;  %v22169_v49 = vld [vmem:[#allocation144_spill] sm:$0xff] }
 0x532   :  { %v10212_v50 = vsel %vm5551_vm3, %v9826_v32, %v10211_v17  ;;  %v10200_v33 = vsel %vm5555_vm5, %v9770_v5, %v10199_v56  ;;  %v10224_v41 = vsel %vm5547_vm1, %v9882_v12, %v9878_v11  ;;  %v9894_v63 = vrot.slane %v19580_v22, %v15047_v39  ;;  %v8962_v47 = vpop.permute.xlu0 %8961 }
 0x533   :  { %v8917_v4 = vpop.permute.xlu1 %8916  ;;  %v10213_v42 = vsel %vm5553_vm4, %v9830_v27, %v10212_v50  ;;  %v10201_v10 = vsel %vm5557_vm6, %v9774_v57, %v10200_v33  ;;  %v10225_v44 = vsel %vm5549_vm2, %v9886_v61, %v10224_v41  ;;  %v9778_v58 = vrot.slane %v22169_v49, %v15047_v39 }
 0x534   :  { %10343 = vadd.xlane.f32.xlu1 %v10342_v21  ;;  %v9910_v2 = vrot.slane %v8917_v4, %v15047_v39  ;;  %v9834_v59 = vrot.slane %v19049_v25, %v15047_v39  ;;  %v9890_v35 = vrot.slane %v19298_v40, %v15047_v39  ;;  %v10354_v18 = vsel %vm5810_vm8, %v10188_v34, 0.0 }
 0x535   :  { %v9922_v22 = vrot.slane %v19471_v45, %v15047_v39  ;;  %v10202_v38 = vsel %vm5559_vm7, %v9778_v58, %v10201_v10  ;;  %v9902_v40 = vrot.slane %v19603_v13, %v15047_v39  ;;  %v9842_v45 = vrot.slane %v19077_v3, %v15047_v39 }
 0x536   :  { %v10231_v26 = vsel %vm5547_vm1, %v9914_v28, %v9910_v2  ;;  %v10226_v29 = vsel %vm5551_vm3, %v9890_v35, %v10225_v44  ;;  %v10214_v25 = vsel %vm5555_vm5, %v9834_v59, %v10213_v42  ;;  %v9898_v62 = vrot.slane %v19340_v30, %v15047_v39  ;;  %v8968_v4 = vpop.permute.xlu0 %8967 }
 0x537   :  { %v8923_v48 = vpop.permute.xlu1 %8922  ;;  %v10227_v23 = vsel %vm5553_vm4, %v9894_v63, %v10226_v29  ;;  %v10215_v14 = vsel %vm5557_vm6, %v9838_v20, %v10214_v25  ;;  %v10360_v43 = vsel %vm5810_vm8, %v10202_v38, 0.0  ;;  %v9930_v13 = vrot.slane %v19508_v0, %v15047_v39 }
 0x538   :  { %10349 = vadd.xlane.f32.xlu1 %v10348_v53  ;;  %v9918_v7 = vrot.slane %v8923_v48, %v15047_v39  ;;  %v10216_v6 = vsel %vm5559_vm7, %v9842_v45, %v10215_v14  ;;  %v10228_v56 = vsel %vm5555_vm5, %v9898_v62, %v10227_v23  ;;  %v9906_v55 = vrot.slane %v19384_v19, %v15047_v39 }
 0x539   :  { %v10229_v30 = vsel %vm5557_vm6, %v9902_v40, %v10228_v56  ;;  %v9938_v1 = vrot.slane %v19550_v54, %v15047_v39  ;;  %v10366_v0 = vsel %vm5810_vm8, %v10216_v6, 0.0  ;;  %v9946_v31 = vrot.slane %v19583_v8, %v15047_v39 }
 0x53a   :  { %v10232_v24 = vsel %vm5549_vm2, %v9918_v7, %v10231_v26  ;;  %v10230_v11 = vsel %vm5559_vm7, %v9906_v55, %v10229_v30  ;;  %v8974_v61 = vpop.permute.xlu0 %8973  ;;  %v9954_v2 = vrot.slane %v19615_v37, %v15047_v39  ;;  %v9962_v8 = vrot.slane %v19651_v16, %v15047_v39  ;;  %v14336_v30 = vld [vmem:[#allocation5 + $0x10] sm:$0xff] }
 0x53b   :  { %v8929_v52 = vpop.permute.xlu1 %8928  ;;  %v10233_v36 = vsel %vm5551_vm3, %v9922_v22, %v10232_v24  ;;  %v10372_v54 = vsel %vm5810_vm8, %v10230_v11, 0.0  ;;  %v9970_v48 = vrot.slane %v8962_v47, %v15047_v39  ;;  %v9978_v16 = vrot.slane %v8968_v4, %v15047_v39  ;;  %v14334_v47 = vld [vmem:[#allocation5] sm:$0xff] }
 0x53c   :  { %10355 = vadd.xlane.f32.xlu1 %v10354_v18  ;;  %v9926_v15 = vrot.slane %v8929_v52, %v15047_v39  ;;  %v9986_v24 = vrot.slane %v8974_v61, %v15047_v39  ;;  %v14337_v4 = vld [vmem:[#allocation2 + $0x20] sm:$0xff] }
 0x53e   :  { %v10234_v9 = vsel %vm5553_vm4, %v9926_v15, %v10233_v36  ;;  %v8980_v28 = vpop.permute.xlu0 %8979  ;;  %v14333_v36 = vld [vmem:[#allocation2] sm:$0xff] }
 0x53f   :  { %v8935_v21 = vpop.permute.xlu1 %8934  ;;  %v10235_v51 = vsel %vm5555_vm5, %v9930_v13, %v10234_v9  ;;  %v9994_v25 = vrot.slane %v8980_v28, %v15047_v39  ;;  %v10387_v9 = vmul.f32 %v14334_v47, %v14333_v36  ;;  %v14353_v47 = vld [vmem:[#allocation2 + $0xa8] sm:$0xff] }
 0x540   :  { %10361 = vadd.xlane.f32.xlu1 %v10360_v43  ;;  %v9934_v3 = vrot.slane %v8935_v21, %v15047_v39 }
 0x541   :  { %v10419_v56 = vsel %vm3240_vm0, %v10387_v9, 0.0  ;;  %v14354_v9 = vld [vmem:[#allocation5 + $0xa8] sm:$0xff] }
 0x542   :  { %v10236_v57 = vsel %vm5557_vm6, %v9934_v3, %v10235_v51  ;;  %v8986_v49 = vpop.permute.xlu0 %8985  ;;  %v14335_v3 = vld [vmem:[#allocation2 + $0x10] sm:$0xff] }
 0x543   :  { %v8941_v17 = vpop.permute.xlu1 %8940  ;;  %v10237_v27 = vsel %vm5559_vm7, %v9938_v1, %v10236_v57  ;;  %v10002_v15 = vrot.slane %v8986_v49, %v15047_v39  ;;  %v10389_v55 = vmul.f32 %v14336_v30, %v14335_v3  ;;  %v14357_v30 = vld [vmem:[#allocation2 + $0xb8] sm:$0xff] }
 0x544   :  { %10367 = vadd.xlane.f32.xlu1 %v10366_v0  ;;  %v10375_v46 = vsel %vm5810_vm8, %v10237_v27, 0.0  ;;  %v9942_v19 = vrot.slane %v8941_v17, %v15047_v39 }
 0x545   :  { %10376 = vadd.xlane.f32.xlu0 %v10375_v46  ;;  %v10425_v11 = vsel %vm3240_vm0, %v10389_v55, 0.0  ;;  %v14338_v46 = vld [vmem:[#allocation5 + $0x20] sm:$0xff]  ;;  %v14358_v55 = vld [vmem:[#allocation5 + $0xb8] sm:$0xff] }
 0x546   :  { %v10238_v32 = vsel %vm5547_vm1, %v9946_v31, %v9942_v19  ;;  %v8992_v22 = vpop.permute.xlu0 %8991  ;;  %v10391_v19 = vmul.f32 %v14338_v46, %v14337_v4  ;;  %v14362_v4 = vld [vmem:[#allocation5 + $0x48] sm:$0xff] }
 0x547   :  { %v8947_v60 = vpop.permute.xlu1 %8946  ;;  %v10010_v1 = vrot.slane %v8992_v22, %v15047_v39  ;;  %v14348_v22 = vld [vmem:[#allocation5 + $0x18] sm:$0xff] }
 0x548   :  { %10373 = vadd.xlane.f32.xlu1 %v10372_v54  ;;  %v9950_v5 = vrot.slane %v8947_v60, %v15047_v39 }
 0x54a   :  { %v10239_v12 = vsel %vm5549_vm2, %v9950_v5, %v10238_v32  ;;  %v8998_v45 = vpop.permute.xlu0 %8997 }
 0x54b   :  { %v8953_v50 = vpop.permute.xlu1 %8952  ;;  %v10240_v34 = vsel %vm5551_vm3, %v9954_v2, %v10239_v12  ;;  %v10018_v54 = vrot.slane %v8998_v45, %v15047_v39  ;;  %v10431_v12 = vsel %vm3240_vm0, %v10391_v19, 0.0  ;;  %v14339_v2 = vld [vmem:[#allocation2 + $0x30] sm:$0xff] }
 0x54c   :  { %v9958_v53 = vrot.slane %v8953_v50, %v15047_v39  ;;  %v14340_v50 = vld [vmem:[#allocation5 + $0x30] sm:$0xff] }
 0x54d   :  { %v14363_v19 = vld [vmem:[#allocation2 + $0x90] sm:$0xff] }
 0x54e   :  { %v10241_v33 = vsel %vm5553_vm4, %v9958_v53, %v10240_v34  ;;  %v9004_v0 = vpop.permute.xlu0 %9003  ;;  %v10393_v53 = vmul.f32 %v14340_v50, %v14339_v2  ;;  %v14367_v2 = vld [vmem:[#allocation2 + $0xa0] sm:$0xff] }
 0x54f   :  { %v8959_v42 = vpop.permute.xlu1 %8958  ;;  %v10242_v10 = vsel %vm5555_vm5, %v9962_v8, %v10241_v33  ;;  %v10026_v34 = vrot.slane %v9004_v0, %v15047_v39  ;;  %v14360_v0 = vld [vmem:[#allocation5 + $0x80] sm:$0xff] }
 0x550   :  { %v9966_v41 = vrot.slane %v8959_v42, %v15047_v39  ;;  %v14368_v50 = vld [vmem:[#allocation5 + $0xa0] sm:$0xff] }
 0x552   :  { %v10243_v37 = vsel %vm5557_vm6, %v9966_v41, %v10242_v10  ;;  %v9010_v32 = vpop.permute.xlu0 %9009  ;;  %v10437_v41 = vsel %vm3240_vm0, %v10393_v53, 0.0  ;;  %v14341_v10 = vld [vmem:[#allocation2 + $0x40] sm:$0xff]  ;;  %v10407_v53 = vmul.f32 %v14368_v50, %v14367_v2  ;;  %v14396_v2 = vld [vmem:[#allocation5 + $0xf8] sm:$0xff] }
 0x553   :  { %v8965_v20 = vpop.permute.xlu1 %8964  ;;  %v10244_v44 = vsel %vm5559_vm7, %v9970_v48, %v10243_v37  ;;  %v10034_v42 = vrot.slane %v9010_v32, %v15047_v39  ;;  %v14342_v37 = vld [vmem:[#allocation5 + $0x40] sm:$0xff]  ;;  %v14365_v32 = vld [vmem:[#allocation2 + $0x50] sm:$0xff] }
 0x554   :  { %v10378_v63 = vsel %vm5810_vm8, %v10244_v44, 0.0  ;;  %v9974_v7 = vrot.slane %v8965_v20, %v15047_v39  ;;  %v10395_v20 = vmul.f32 %v14342_v37, %v14341_v10  ;;  %v14343_v44 = vld [vmem:[#allocation2 + $0x8] sm:$0xff] }
 0x555   :  { %10379 = vadd.xlane.f32.xlu1 %v10378_v63  ;;  %v14344_v63 = vld [vmem:[#allocation5 + $0x8] sm:$0xff] }
 0x556   :  { %v10245_v35 = vsel %vm5547_vm1, %v9978_v16, %v9974_v7  ;;  %v10388_v7 = vmul.f32 %v14344_v63, %v14343_v44  ;;  %v14373_v44 = vld [vmem:[#allocation2 + $0x60] sm:$0xff] }
 0x557   :  { %v8971_v58 = vpop.permute.xlu1 %8970  ;;  %v14374_v63 = vld [vmem:[#allocation5 + $0x60] sm:$0xff] }
 0x558   :  { %v9982_v59 = vrot.slane %v8971_v58, %v15047_v39  ;;  %v10443_v58 = vsel %vm3240_vm0, %v10395_v20, 0.0 }
 0x55a   :  { %v10246_v26 = vsel %vm5549_vm2, %v9982_v59, %v10245_v35  ;;  %v10422_v59 = vsel %vm3240_vm0, %v10388_v7, 0.0  ;;  %v14345_v35 = vld [vmem:[#allocation2 + $0x88] sm:$0xff]  ;;  %v10399_v7 = vmul.f32 %v14374_v63, %v14373_v44 }
 0x55b   :  { %v8977_v18 = vpop.permute.xlu1 %8976  ;;  %v10247_v52 = vsel %vm5551_vm3, %v9986_v24, %v10246_v26  ;;  %v14346_v26 = vld [vmem:[#allocation5 + $0x88] sm:$0xff] }
 0x55c   :  { %v9990_v29 = vrot.slane %v8977_v18, %v15047_v39  ;;  %v10404_v24 = vmul.f32 %v14346_v26, %v14345_v35  ;;  %v14347_v18 = vld [vmem:[#allocation2 + $0x18] sm:$0xff]  ;;  %v14377_v26 = vld [vmem:[#allocation2 + $0x68] sm:$0xff] }
 0x55e   :  { %v10248_v38 = vsel %vm5553_vm4, %v9990_v29, %v10247_v52  ;;  %v10390_v29 = vmul.f32 %v14348_v22, %v14347_v18  ;;  %v10470_v52 = vsel %vm3240_vm0, %v10404_v24, 0.0  ;;  %v14378_v24 = vld [vmem:[#allocation5 + $0x68] sm:$0xff] }
 0x55f   :  { %v8983_v23 = vpop.permute.xlu1 %8982  ;;  %v10249_v14 = vsel %vm5555_vm5, %v9994_v25, %v10248_v38  ;;  %v14349_v25 = vld [vmem:[#allocation2 + $0x98] sm:$0xff]  ;;  %v10400_v18 = vmul.f32 %v14378_v24, %v14377_v26  ;;  %v14379_v22 = vld [vmem:[#allocation2 + $0xc8] sm:$0xff] }
 0x560   :  { %v9998_v40 = vrot.slane %v8983_v23, %v15047_v39  ;;  %v10428_v38 = vsel %vm3240_vm0, %v10390_v29, 0.0  ;;  %v14350_v23 = vld [vmem:[#allocation5 + $0x98] sm:$0xff]  ;;  %v14380_v29 = vld [vmem:[#allocation5 + $0xc8] sm:$0xff] }
 0x562   :  { %v10250_v62 = vsel %vm5557_vm6, %v9998_v40, %v10249_v14  ;;  %v10406_v40 = vmul.f32 %v14350_v23, %v14349_v25  ;;  %v14352_v14 = vld [vmem:[#allocation5 + $0x28] sm:$0xff]  ;;  %v14381_v23 = vld [vmem:[#allocation2 + $0x70] sm:$0xff] }
 0x563   :  { %v8989_v43 = vpop.permute.xlu1 %8988  ;;  %v10251_v13 = vsel %vm5559_vm7, %v10002_v15, %v10250_v62  ;;  %v14351_v15 = vld [vmem:[#allocation2 + $0x28] sm:$0xff] }
 0x564   :  { %v10381_v21 = vsel %vm5810_vm8, %v10251_v13, 0.0  ;;  %v10006_v6 = vrot.slane %v8989_v43, %v15047_v39  ;;  %v10392_v45 = vmul.f32 %v14352_v14, %v14351_v15  ;;  %v10476_v62 = vsel %vm3240_vm0, %v10406_v40, 0.0  ;;  %v14355_v13 = vld [vmem:[#allocation2 + $0x38] sm:$0xff]  ;;  %v14382_v40 = vld [vmem:[#allocation5 + $0x70] sm:$0xff] }
 0x565   :  { %10382 = vadd.xlane.f32.xlu0 %v10381_v21  ;;  %v10408_v43 = vmul.f32 %v14354_v9, %v14353_v47  ;;  %v14356_v21 = vld [vmem:[#allocation5 + $0x38] sm:$0xff]  ;;  %v10401_v15 = vmul.f32 %v14382_v40, %v14381_v23  ;;  %v14383_v14 = vld [vmem:[#allocation2 + $0xd0] sm:$0xff] }
 0x566   :  { %v10252_v17 = vsel %vm5547_vm1, %v10010_v1, %v10006_v6  ;;  %v10434_v36 = vsel %vm3240_vm0, %v10392_v45, 0.0  ;;  %v10394_v6 = vmul.f32 %v14356_v21, %v14355_v13  ;;  %v10410_v1 = vmul.f32 %v14358_v55, %v14357_v30  ;;  %v14384_v45 = vld [vmem:[#allocation5 + $0xd0] sm:$0xff]  ;;  %v14386_v13 = vld [vmem:[#allocation5 + $0x78] sm:$0xff] }
 0x567   :  { %v8995_v51 = vpop.permute.xlu1 %8994  ;;  %v10461_v47 = vsel %vm3240_vm0, %v10401_v15, 0.0  ;;  %vm13492_vm1 = vcmask 654912  }
 0x568   :  { %v10014_v57 = vrot.slane %v8995_v51, %v15047_v39  ;;  %v10440_v3 = vsel %vm3240_vm0, %v10394_v6, 0.0  ;;  %v14359_v51 = vld [vmem:[#allocation2 + $0x80] sm:$0xff]  ;;  %v14387_v6 = vld [vmem:[#allocation2 + $0xd8] sm:$0xff] }
 0x569   :  { %10420 = vadd.xlane.f32.xlu0 %v10419_v56  ;;  %v10482_v56 = vsel %vm3240_vm0, %v10408_v43, 0.0  ;;  %v14385_v43 = vld [vmem:[#allocation2 + $0x78] sm:$0xff] }
 0x56a   :  { %v10253_v27 = vsel %vm5549_vm2, %v10014_v57, %v10252_v17  ;;  %v10403_v57 = vmul.f32 %v14360_v0, %v14359_v51  ;;  %v10488_v17 = vsel %vm3240_vm0, %v10410_v1, 0.0  ;;  %v10402_v21 = vmul.f32 %v14386_v13, %v14385_v43  ;;  %v14389_v51 = vld [vmem:[#allocation2 + $0xe0] sm:$0xff] }
 0x56b   :  { %v9001_v31 = vpop.permute.xlu1 %9000  ;;  %v10254_v5 = vsel %vm5551_vm3, %v10018_v54, %v10253_v27  ;;  %v14364_v54 = vld [vmem:[#allocation5 + $0x90] sm:$0xff]  ;;  %v14390_v0 = vld [vmem:[#allocation5 + $0xe0] sm:$0xff]  ;;  %vm13499_vm2 = vcmask 720512   ;;  %vm13506_vm3 = vcmask 786112  }
 0x56c   :  { %v10022_v60 = vrot.slane %v9001_v31, %v15047_v39  ;;  %v10467_v27 = vsel %vm3240_vm0, %v10403_v57, 0.0  ;;  %v10405_v31 = vmul.f32 %v14364_v54, %v14363_v19  ;;  %v10464_v55 = vsel %vm3240_vm0, %v10402_v21, 0.0  ;;  %v14393_v54 = vld [vmem:[#allocation2 + $0xf0] sm:$0xff]  ;;  %v22170_v13 = vld [vmem:[#allocation254_spill] sm:$0xff] }
 0x56d   :  { %10426 = vadd.xlane.f32.xlu0 %v10425_v11  ;;  %v14361_v11 = vld [vmem:[#allocation2 + $0x48] sm:$0xff]  ;;  %v10415_v57 = vmul.f32 %v14390_v0, %v14389_v51 }
 0x56e   :  { %v10255_v61 = vsel %vm5553_vm4, %v10022_v60, %v10254_v5  ;;  %v10396_v46 = vmul.f32 %v14362_v4, %v14361_v11  ;;  %v10473_v5 = vsel %vm3240_vm0, %v10405_v31, 0.0  ;;  %v14392_v11 = vld [vmem:[#allocation5 + $0xe8] sm:$0xff]  ;;  %v14394_v31 = vld [vmem:[#allocation5 + $0xf0] sm:$0xff]  ;;  %vm13513_vm4 = vcmask 851712  }
 0x56f   :  { %v9007_v33 = vpop.permute.xlu1 %9006  ;;  %v10256_v28 = vsel %vm5555_vm5, %v10026_v34, %v10255_v61  ;;  %v14366_v61 = vld [vmem:[#allocation5 + $0x50] sm:$0xff]  ;;  %vm13520_vm5 = vcmask 917312  }
 0x570   :  { %v10030_v8 = vrot.slane %v9007_v33, %v15047_v39  ;;  %v10446_v60 = vsel %vm3240_vm0, %v10396_v46, 0.0  ;;  %v10479_v33 = vsel %vm3240_vm0, %v10407_v53, 0.0 }
 0x571   :  { %10432 = vadd.xlane.f32.xlu0 %v10431_v12  ;;  %v10397_v12 = vmul.f32 %v14366_v61, %v14365_v32 }
 0x572   :  { %v10257_v48 = vsel %vm5557_vm6, %v10030_v8, %v10256_v28  ;;  %v14369_v8 = vld [vmem:[#allocation2 + $0x58] sm:$0xff]  ;;  %vm13527_vm6 = vcmask 982912  }
 0x573   :  { %v10258_v49 = vsel %vm5559_vm7, %v10034_v42, %v10257_v48  ;;  %v10449_v34 = vsel %vm3240_vm0, %v10397_v12, 0.0  ;;  %v14370_v42 = vld [vmem:[#allocation5 + $0x58] sm:$0xff]  ;;  %v14372_v48 = vld [vmem:[#allocation5 + $0xb0] sm:$0xff]  ;;  %vm13534_vm7 = vcmask 1048512  }
 0x574   :  { %v10384_v16 = vsel %vm5810_vm8, %v10258_v49, 0.0  ;;  %v10398_v28 = vmul.f32 %v14370_v42, %v14369_v8  ;;  %v14375_v49 = vld [vmem:[#allocation2 + $0xc0] sm:$0xff]  ;;  %v14395_v12 = vld [vmem:[#allocation2 + $0xf8] sm:$0xff] }
 0x575   :  { %10438 = vadd.xlane.f32.xlu0 %v10437_v41  ;;  %10385 = vadd.xlane.f32.xlu1 %v10384_v16  ;;  %v14371_v41 = vld [vmem:[#allocation2 + $0xb0] sm:$0xff]  ;;  %v14376_v16 = vld [vmem:[#allocation5 + $0xc0] sm:$0xff]  ;;  %v10418_v50 = vmul.f32 %v14396_v2, %v14395_v12 }
 0x576   :  { %v10409_v10 = vmul.f32 %v14372_v48, %v14371_v41  ;;  %v10452_v37 = vsel %vm3240_vm0, %v10398_v28, 0.0 }
 0x578   :  { %v10485_v20 = vsel %vm3240_vm0, %v10409_v10, 0.0 }
 0x579   :  { %10444 = vadd.xlane.f32.xlu0 %v10443_v58  ;;  %10423 = vadd.xlane.f32.xlu1 %v10422_v59  ;;  %v10411_v58 = vmul.f32 %v14376_v16, %v14375_v49  ;;  %v10455_v59 = vsel %vm3240_vm0, %v10399_v7, 0.0 }
 0x57b   :  { %v10491_v35 = vsel %vm3240_vm0, %v10411_v58, 0.0 }
 0x57d   :  { %10471 = vadd.xlane.f32.xlu0 %v10470_v52  ;;  %10429 = vadd.xlane.f32.xlu1 %v10428_v38  ;;  %v10412_v52 = vmul.f32 %v14380_v29, %v14379_v22  ;;  %v10458_v38 = vsel %vm3240_vm0, %v10400_v18, 0.0 }
 0x57f   :  { %v10494_v25 = vsel %vm3240_vm0, %v10412_v52, 0.0 }
 0x581   :  { %10477 = vadd.xlane.f32.xlu0 %v10476_v62  ;;  %10435 = vadd.xlane.f32.xlu1 %v10434_v36  ;;  %v10413_v62 = vmul.f32 %v14384_v45, %v14383_v14  ;;  %v10296_v36 = vpop.xlane.xlu0 %10295 }
 0x582   :  { %14205 = vrcp.f32 %v10296_v36 }
 0x583   :  { %v10497_v9 = vsel %vm3240_vm0, %v10413_v62, 0.0 }
 0x585   :  { %10483 = vadd.xlane.f32.xlu0 %v10482_v56  ;;  %10441 = vadd.xlane.f32.xlu1 %v10440_v3  ;;  %v14388_v56 = vld [vmem:[#allocation5 + $0xd8] sm:$0xff]  ;;  %v10299_v30 = vpop.xlane.xlu0 %10298 }
 0x586   :  { %v10414_v3 = vmul.f32 %v14388_v56, %v14387_v6  ;;  %14207 = vrcp.f32 %v10299_v30 }
 0x588   :  { %v10500_v1 = vsel %vm3240_vm0, %v10414_v3, 0.0 }
 0x589   :  { %10489 = vadd.xlane.f32.xlu0 %v10488_v17  ;;  %10468 = vadd.xlane.f32.xlu1 %v10467_v27  ;;  %v10503_v17 = vsel %vm3240_vm0, %v10415_v57, 0.0  ;;  %v14391_v27 = vld [vmem:[#allocation2 + $0xe8] sm:$0xff]  ;;  %v10305_v46 = vpop.xlane.xlu0 %10304 }
 0x58a   :  { %v10416_v4 = vmul.f32 %v14392_v11, %v14391_v27  ;;  %14209 = vrcp.f32 %v10305_v46  ;;  %v22171_v57 = vld [vmem:[#allocation59_spill] sm:$0xff] }
 0x58c   :  { %v10506_v19 = vsel %vm3240_vm0, %v10416_v4, 0.0  ;;  %v19780_v29 = vpop.eup %14205 }
 0x58d   :  { %10447 = vadd.xlane.f32.xlu0 %v10446_v60  ;;  %10474 = vadd.xlane.f32.xlu1 %v10473_v5  ;;  %v10417_v60 = vmul.f32 %v14394_v31, %v14393_v54  ;;  %v10311_v32 = vpop.xlane.xlu0 %10310 }
 0x58e   :  { %14211 = vrcp.f32 %v10311_v32 }
 0x58f   :  { %v10509_v61 = vsel %vm3240_vm0, %v10417_v60, 0.0 }
 0x590   :  { %v19782_v52 = vpop.eup %14207 }
 0x591   :  { %10450 = vadd.xlane.f32.xlu0 %v10449_v34  ;;  %10480 = vadd.xlane.f32.xlu1 %v10479_v33  ;;  %v10512_v34 = vsel %vm3240_vm0, %v10418_v50, 0.0  ;;  %v10317_v33 = vpop.xlane.xlu0 %10316  ;;  %vm13485_vm0 = vcmask 589312  }
 0x592   :  { %14213 = vrcp.f32 %v10317_v33 }
 0x595   :  { %10453 = vadd.xlane.f32.xlu0 %v10452_v37  ;;  %10486 = vadd.xlane.f32.xlu1 %v10485_v20  ;;  %v10323_v42 = vpop.xlane.xlu0 %10322 }
 0x596   :  { %14215 = vrcp.f32 %v10323_v42  ;;  %v22173_v42 = vld [vmem:[#allocation42_spill] sm:$0xff] }
 0x599   :  { %10456 = vadd.xlane.f32.xlu0 %v10455_v59  ;;  %10492 = vadd.xlane.f32.xlu1 %v10491_v35  ;;  %v10329_v41 = vpop.xlane.xlu0 %10328 }
 0x59a   :  { %14217 = vrcp.f32 %v10329_v41 }
 0x59d   :  { %10459 = vadd.xlane.f32.xlu0 %v10458_v38  ;;  %10495 = vadd.xlane.f32.xlu1 %v10494_v25  ;;  %v10335_v10 = vpop.xlane.xlu0 %10334  ;;  %v19784_v38 = vpop.eup %14209 }
 0x59e   :  { %14219 = vrcp.f32 %v10335_v10  ;;  %v19786_v23 = vpop.eup %14211 }
 0x59f   :  { %v19788_v40 = vpop.eup %14213 }
 0x5a0   :  { %v19790_v14 = vpop.eup %14215 }
 0x5a1   :  { %10462 = vadd.xlane.f32.xlu0 %v10461_v47  ;;  %10498 = vadd.xlane.f32.xlu1 %v10497_v9  ;;  %v10293_v5 = vpop.xlane.xlu1 %10292  ;;  %v10341_v20 = vpop.xlane.xlu0 %10340 }
 0x5a2   :  { %14221 = vrcp.f32 %v10341_v20 }
 0x5a4   :  { %v19792_v45 = vpop.eup %14217 }
 0x5a5   :  { %10465 = vadd.xlane.f32.xlu0 %v10464_v55  ;;  %10501 = vadd.xlane.f32.xlu1 %v10500_v1  ;;  %v10302_v53 = vpop.xlane.xlu1 %10301  ;;  %v10347_v63 = vpop.xlane.xlu0 %10346 }
 0x5a6   :  { %14223 = vrcp.f32 %v10347_v63 }
 0x5a8   :  { %v19794_v36 = vpop.eup %14219 }
 0x5a9   :  { %10504 = vadd.xlane.f32.xlu1 %v10503_v17  ;;  %v10308_v8 = vpop.xlane.xlu1 %10307  ;;  %v10353_v49 = vpop.xlane.xlu0 %10352 }
 0x5aa   :  { %14225 = vrcp.f32 %v10353_v49 }
 0x5ac   :  { %v19796_v9 = vpop.eup %14221 }
 0x5ad   :  { %10507 = vadd.xlane.f32.xlu1 %v10506_v19  ;;  %v10314_v28 = vpop.xlane.xlu1 %10313  ;;  %v10359_v58 = vpop.xlane.xlu0 %10358 }
 0x5ae   :  { %14227 = vrcp.f32 %v10359_v58  ;;  %v22174_v58 = vld [vmem:[#allocation70_spill] sm:$0xff] }
 0x5af   :  { %14229 = vrcp.f32 %v10293_v5  ;;  %v22172_v5 = vld [vmem:[#allocation40_spill] sm:$0xff] }
 0x5b0   :  { %v19798_v43 = vpop.eup %14223 }
 0x5b1   :  { %10510 = vadd.xlane.f32.xlu1 %v10509_v61  ;;  %v10320_v48 = vpop.xlane.xlu1 %10319  ;;  %v10365_v35 = vpop.xlane.xlu0 %10364 }
 0x5b2   :  { %14231 = vrcp.f32 %v10365_v35  ;;  %v22175_v35 = vld [vmem:[#allocation256_spill] sm:$0xff] }
 0x5b3   :  { %14233 = vrcp.f32 %v10302_v53 }
 0x5b4   :  { %14235 = vrcp.f32 %v10308_v8  ;;  %v19801_v6 = vpop.eup %14225 }
 0x5b5   :  { %10513 = vadd.xlane.f32.xlu1 %v10512_v34  ;;  %v10326_v37 = vpop.xlane.xlu1 %10325  ;;  %v10371_v24 = vpop.xlane.xlu0 %10370  ;;  %14237 = vrcp.f32 %v10314_v28 }
 0x5b6   :  { %14239 = vrcp.f32 %v10320_v48 }
 0x5b7   :  { %14241 = vrcp.f32 %v10371_v24 }
 0x5b8   :  { %14243 = vrcp.f32 %v10326_v37  ;;  %v19803_v30 = vpop.eup %14227 }
 0x5b9   :  { %v10332_v44 = vpop.xlane.xlu1 %10331  ;;  %v14230_v51 = vpop.eup %14229 }
 0x5ba   :  { %14245 = vrcp.f32 %v10332_v44 }
 0x5bc   :  { %v19805_v0 = vpop.eup %14231 }
 0x5bd   :  { %v10338_v7 = vpop.xlane.xlu1 %10337  ;;  %v19808_v27 = vpop.eup %14233 }
 0x5be   :  { %14247 = vrcp.f32 %v10338_v7  ;;  %v19810_v46 = vpop.eup %14235 }
 0x5bf   :  { %v19812_v31 = vpop.eup %14237 }
 0x5c0   :  { %v19814_v60 = vpop.eup %14239 }
 0x5c1   :  { %v10344_v16 = vpop.xlane.xlu1 %10343  ;;  %v19817_v61 = vpop.eup %14241 }
 0x5c2   :  { %14249 = vrcp.f32 %v10344_v16  ;;  %v19819_v50 = vpop.eup %14243 }
 0x5c4   :  { %v19821_v33 = vpop.eup %14245 }
 0x5c5   :  { %v10350_v59 = vpop.xlane.xlu1 %10349 }
 0x5c8   :  { %v19823_v8 = vpop.eup %14247 }
 0x5c9   :  { %v10356_v26 = vpop.xlane.xlu1 %10355 }
 0x5cc   :  { %v19826_v41 = vpop.eup %14249 }
 0x5cd   :  { %v10362_v18 = vpop.xlane.xlu1 %10361 }
 0x5d1   :  { %v10368_v15 = vpop.xlane.xlu1 %10367 }
 0x5d2   :  { %v10377_v22 = vpop.xlane.xlu0 %10376 }
 0x5d5   :  { %v10374_v56 = vpop.xlane.xlu1 %10373 }
 0x5e2   :  { %v10380_v11 = vpop.xlane.xlu1 %10379 }
 0x5f2   :  { %v10383_v25 = vpop.xlane.xlu0 %10382 }
 0x5f6   :  { %v10421_v62 = vpop.xlane.xlu0 %10420 }
 0x5f7   :  { %v10515_v47 = vmul.f32 0.25, %v10421_v62  ;;  %v22177_v62 = vld [vmem:[#allocation257_spill] sm:$0xff] }
 0x5f9   :  { %v10547_v21 = vsub.f32 %v10515_v47, %v22170_v13  ;;  %v22178_v13 = vld [vmem:[#allocation263_spill] sm:$0xff] }
 0x5fa   :  { %v10427_v3 = vpop.xlane.xlu0 %10426 }
 0x5fb   :  { %v10579_v55 = vmul.f32 1.442695, %v10547_v21  ;;  %v10517_v1 = vmul.f32 0.25, %v10427_v3 }
 0x5fd   :  { %14251 = vpow2.f32 %v10579_v55  ;;  %v10549_v17 = vsub.f32 %v10517_v1, %v22171_v57 }
 0x5fe   :  { %14253 = vrcp.f32 %v10350_v59  ;;  %v10433_v4 = vpop.xlane.xlu0 %10432 }
 0x5ff   :  { %14255 = vrcp.f32 %v10356_v26  ;;  %v10583_v19 = vmul.f32 1.442695, %v10549_v17  ;;  %v10519_v54 = vmul.f32 0.25, %v10433_v4 }
 0x600   :  { %14257 = vrcp.f32 %v10362_v18 }
 0x601   :  { %14259 = vpow2.f32 %v10583_v19  ;;  %v10551_v32 = vsub.f32 %v10519_v54, %v22172_v5  ;;  %v22180_v19 = vld [vmem:[#allocation63_spill] sm:$0xff]  ;;  %v22181_v5 = vld [vmem:[#allocation260_spill] sm:$0xff] }
 0x602   :  { %14261 = vrcp.f32 %v10368_v15  ;;  %v10439_v12 = vpop.xlane.xlu0 %10438  ;;  %v10386_v2 = vpop.xlane.xlu1 %10385  ;;  %v22176_v15 = vld [vmem:[#allocation13_spill] sm:$0xff] }
 0x603   :  { %14263 = vrcp.f32 %v10377_v22  ;;  %v10587_v53 = vmul.f32 1.442695, %v10551_v32  ;;  %v10521_v34 = vmul.f32 0.25, %v10439_v12  ;;  %v22182_v12 = vld [vmem:[#allocation56_spill] sm:$0xff] }
 0x604   :  { %14265 = vrcp.f32 %v10374_v56  ;;  %v22179_v56 = vld [vmem:[#allocation258_spill] sm:$0xff] }
 0x605   :  { %14267 = vpow2.f32 %v10587_v53  ;;  %v10553_v28 = vsub.f32 %v10521_v34, %v22173_v42  ;;  %v22184_v34 = vld [vmem:[#allocation53_spill] sm:$0xff] }
 0x606   :  { %14269 = vrcp.f32 %v10380_v11  ;;  %v10445_v48 = vpop.xlane.xlu0 %10444  ;;  %v10424_v10 = vpop.xlane.xlu1 %10423 }
 0x607   :  { %v14252_v37 = vpop.eup %14251  ;;  %14271 = vrcp.f32 %v10383_v25  ;;  %v10591_v20 = vmul.f32 1.442695, %v10553_v28  ;;  %v10523_v44 = vmul.f32 0.25, %v10445_v48  ;;  %v10516_v63 = vmul.f32 0.25, %v10424_v10  ;;  %v22185_v28 = vld [vmem:[#allocation34_spill] sm:$0xff]  ;;  %v22186_v10 = vld [vmem:[#allocation49_spill] sm:$0xff] }
 0x608   :  { %v19828_v7 = vpop.eup %14253  ;;  %v10644_v49 = vmul.f32 %v14252_v37, %v14230_v51  ;;  %14273 = vrcp.f32 %v10386_v2 }
 0x609   :  { %v19830_v16 = vpop.eup %14255  ;;  %14275 = vpow2.f32 %v10591_v20  ;;  %v10555_v59 = vsub.f32 %v10523_v44, %v22174_v58  ;;  %v10548_v26 = vsub.f32 %v10516_v63, %v22175_v35 }
 0x60a   :  { %v19834_v24 = vpop.eup %14257  ;;  %v10472_v18 = vpop.xlane.xlu0 %10471  ;;  %v10742_v25 = vrot.slane %v10644_v49, %v22176_v15  ;;  %v10746_v47 = vrot.slane %v10644_v49, %v22177_v62  ;;  %v10750_v21 = vrot.slane %v10644_v49, %v22178_v13  ;;  %v10754_v3 = vrot.slane %v10644_v49, %v22179_v56 }
 0x60b   :  { %v10430_v22 = vpop.xlane.xlu1 %10429  ;;  %v14260_v55 = vpop.eup %14259  ;;  %v10595_v1 = vmul.f32 1.442695, %v10555_v59  ;;  %v10581_v51 = vmul.f32 1.442695, %v10548_v26  ;;  %v10532_v57 = vmul.f32 0.25, %v10472_v18  ;;  %v10758_v54 = vrot.slane %v10644_v49, %v22180_v19 }
 0x60c   :  { %v10518_v17 = vmul.f32 0.25, %v10430_v22  ;;  %v19840_v11 = vpop.eup %14261  ;;  %v19843_v4 = vmul.f32 %v14260_v55, %v19782_v52  ;;  %v10762_v32 = vrot.slane %v10644_v49, %v22181_v5  ;;  %v10766_v2 = vrot.slane %v10644_v49, %v22182_v12 }
 0x60d   :  { %v19848_v53 = vpop.eup %14263  ;;  %14277 = vpow2.f32 %v10595_v1  ;;  %v10564_v42 = vsub.f32 %v10532_v57, %v22184_v34  ;;  %v10770_v37 = vrot.slane %v10644_v49, %v22186_v10  ;;  %v11763_v63 = vcombine.low %v10742_v25, %v10746_v47  ;;  %v22188_v49 = vld [vmem:[#allocation12_spill] sm:$0xff]  ;;  %v22190_v25 = vld [vmem:[#allocation14_spill] sm:$0xff] }
 0x60e   :  { %22183 = vst [vmem:[#allocation158_spill] sm:$0xff] %v19848_v53  ;;  %v10550_v48 = vsub.f32 %v10518_v17, %v22185_v28  ;;  %v19853_v20 = vpop.eup %14265  ;;  %14279 = vpow2.f32 %v10581_v51  ;;  %v10478_v52 = vpop.xlane.xlu0 %10477  ;;  %v11764_v58 = vcombine.low %v10750_v21, %v10754_v3  ;;  %v11765_v59 = vcombine.low %v10758_v54, %v10762_v32  ;;  %v22191_v21 = vld [vmem:[#allocation61_spill] sm:$0xff] }
 0x60f   :  { %v10436_v44 = vpop.xlane.xlu1 %10435  ;;  %v14268_v35 = vpop.eup %14267  ;;  %v10613_v26 = vmul.f32 1.442695, %v10564_v42  ;;  %v10534_v22 = vmul.f32 0.25, %v10478_v52  ;;  %v11766_v17 = vcombine.low %v10766_v2, %v10770_v37  ;;  %v11773_v34 = vrot.slane %v11763_v63, %v22188_v49 }
 0x610   :  { %v10585_v18 = vmul.f32 1.442695, %v10550_v48  ;;  %v10520_v55 = vmul.f32 0.25, %v10436_v44  ;;  %v19855_v1 = vpop.eup %14269  ;;  %v19858_v57 = vmul.f32 %v14268_v35, %v19784_v38  ;;  %v11780_v51 = vrot.slane %v11764_v58, %v22188_v49 }
 0x611   :  { %22187 = vst [vmem:[#allocation149_spill] sm:$0xff] %v19855_v1  ;;  %v19862_v28 = vpop.eup %14271  ;;  %14281 = vpow2.f32 %v10613_v26  ;;  %v10566_v47 = vsub.f32 %v10534_v22, %v22190_v25  ;;  %v11787_v54 = vrot.slane %v11765_v59, %v22188_v49  ;;  %v11794_v2 = vrot.slane %v11766_v17, %v22188_v49 }
 0x612   :  { %22189 = vst [vmem:[#allocation153_spill] sm:$0xff] %v19862_v28  ;;  %v10552_v3 = vsub.f32 %v10520_v55, %v22191_v21  ;;  %v19867_v32 = vpop.eup %14273  ;;  %14283 = vpow2.f32 %v10585_v18  ;;  %v10484_v42 = vpop.xlane.xlu0 %10483  ;;  %v11795_v48 = vcombine.low %v11773_v34, %v11780_v51  ;;  %v10806_v37 = vrot.slane %v19843_v4, %v22176_v15  ;;  %v22193_v55 = vld [vmem:[#allocation16_spill] sm:$0xff]  ;;  %v22202_v28 = vld [vmem:[#allocation87_spill] sm:$0xff] }
 0x613   :  { %22192 = vst [vmem:[#allocation163_spill] sm:$0xff] %v19867_v32  ;;  %v10442_v38 = vpop.xlane.xlu1 %10441  ;;  %v14276_v52 = vpop.eup %14275  ;;  %v10617_v44 = vmul.f32 1.442695, %v10566_v47  ;;  %v10536_v58 = vmul.f32 0.25, %v10484_v42  ;;  %v11796_v59 = vcombine.low %v11787_v54, %v11794_v2  ;;  %v10810_v18 = vrot.slane %v19843_v4, %v22177_v62  ;;  %v22194_v34 = vld [vmem:[#allocation48_spill] sm:$0xff] }
 0x614   :  { %v10589_v63 = vmul.f32 1.442695, %v10552_v3  ;;  %v10522_v35 = vmul.f32 0.25, %v10442_v38  ;;  %v19873_v26 = vmul.f32 %v14276_v52, %v19786_v23  ;;  %v11803_v22 = vrot.slane %v11795_v48, %v22188_v49 }
 0x615   :  { %14285 = vpow2.f32 %v10617_v44  ;;  %v10568_v17 = vsub.f32 %v10536_v58, %v22193_v55  ;;  %v10814_v25 = vrot.slane %v19843_v4, %v22178_v13  ;;  %v11810_v21 = vrot.slane %v11796_v59, %v22188_v49 }
 0x616   :  { %v10554_v51 = vsub.f32 %v10522_v35, %v22194_v34  ;;  %14287 = vpow2.f32 %v10589_v63  ;;  %v10490_v47 = vpop.xlane.xlu0 %10489  ;;  %v10818_v3 = vrot.slane %v19843_v4, %v22179_v56  ;;  %v22195_v34 = vld [vmem:[#allocation66_spill] sm:$0xff] }
 0x617   :  { %v10469_v23 = vpop.xlane.xlu1 %10468  ;;  %v14278_v42 = vpop.eup %14277  ;;  %v10621_v38 = vmul.f32 1.442695, %v10568_v17  ;;  %v10538_v48 = vmul.f32 0.25, %v10490_v47  ;;  %v11811_v63 = vcombine.low %v11803_v22, %v11810_v21  ;;  %v22196_v17 = vld [vmem:[#allocation74_spill] sm:$0xff]  ;;  %v19899_v22 = vcombine.low %v10806_v37, %v10810_v18  ;;  %v22198_v18 = vld [vmem:[#allocation51_spill] sm:$0xff] }
 0x618   :  { %v10593_v2 = vmul.f32 1.442695, %v10554_v51  ;;  %v10531_v52 = vmul.f32 0.25, %v10469_v23  ;;  %v14280_v44 = vpop.eup %14279  ;;  %v19888_v58 = vmul.f32 %v14278_v42, %v19788_v40  ;;  %v19901_v21 = vcombine.low %v10814_v25, %v10818_v3  ;;  %v22199_v3 = vld [vmem:[#allocation79_spill] sm:$0xff] }
 0x619   :  { %v10646_v55 = vmul.f32 %v14280_v44, %v19780_v29  ;;  %14289 = vpow2.f32 %v10621_v38  ;;  %v10570_v54 = vsub.f32 %v10538_v48, %v22195_v34  ;;  %13332 = vperm.xlu0 %13659, %v11811_v63  }
 0x61a   :  { %v10563_v51 = vsub.f32 %v10531_v52, %v22196_v17  ;;  %14291 = vpow2.f32 %v10593_v2  ;;  %v10448_v47 = vpop.xlane.xlu0 %10447 }
 0x61b   :  { %v10475_v23 = vpop.xlane.xlu1 %10474  ;;  %v14282_v42 = vpop.eup %14281  ;;  %v10625_v59 = vmul.f32 1.442695, %v10570_v54  ;;  %v10524_v29 = vmul.f32 0.25, %v10448_v47  ;;  %v10774_v2 = vrot.slane %v10646_v55, %v22176_v15  ;;  %v10778_v52 = vrot.slane %v10646_v55, %v22177_v62 }
 0x61c   :  { %v10611_v35 = vmul.f32 1.442695, %v10563_v51  ;;  %v10533_v38 = vmul.f32 0.25, %v10475_v23  ;;  %v14284_v44 = vpop.eup %14283  ;;  %v19904_v48 = vmul.f32 %v14282_v42, %v19826_v41  ;;  %v10782_v63 = vrot.slane %v10646_v55, %v22178_v13 }
 0x61d   :  { %v19910_v37 = vmul.f32 %v14284_v44, %v19808_v27  ;;  %14293 = vpow2.f32 %v10625_v59  ;;  %v10556_v25 = vsub.f32 %v10524_v29, %v22198_v18  ;;  %v10786_v41 = vrot.slane %v10646_v55, %v22179_v56 }
 0x61e   :  { %22197 = vst [vmem:[#allocation162_spill] sm:$0xff] %v19904_v48  ;;  %v10565_v54 = vsub.f32 %v10533_v38, %v22199_v3  ;;  %14295 = vpow2.f32 %v10611_v35  ;;  %v10451_v34 = vpop.xlane.xlu0 %10450  ;;  %v10790_v51 = vrot.slane %v10646_v55, %v22180_v19  ;;  %v10794_v47 = vrot.slane %v10646_v55, %v22181_v5  ;;  %v22201_v3 = vld [vmem:[#allocation46_spill] sm:$0xff] }
 0x61f   :  { %v10481_v17 = vpop.xlane.xlu1 %10480  ;;  %v14286_v23 = vpop.eup %14285  ;;  %v10597_v42 = vmul.f32 1.442695, %v10556_v25  ;;  %v10525_v39 = vmul.f32 0.25, %v10451_v34  ;;  %v10798_v29 = vrot.slane %v10646_v55, %v22182_v12  ;;  %v10802_v35 = vrot.slane %v10646_v55, %v22186_v10 }
 0x620   :  { %v10615_v40 = vmul.f32 1.442695, %v10565_v54  ;;  %v10535_v27 = vmul.f32 0.25, %v10481_v17  ;;  %v14288_v44 = vpop.eup %14287  ;;  %v19918_v59 = vmul.f32 %v14286_v23, %v19828_v7  ;;  %v11812_v38 = vcombine.low %v10774_v2, %v10778_v52 }
 0x621   :  { %v19923_v18 = vmul.f32 %v14288_v44, %v19810_v46  ;;  %14297 = vpow2.f32 %v10597_v42  ;;  %v10557_v32 = vsub.f32 %v10525_v39, %v22201_v3  ;;  %v11813_v17 = vcombine.low %v10782_v63, %v10786_v41  ;;  %v22203_v63 = vld [vmem:[#allocation52_spill] sm:$0xff] }
 0x622   :  { %22200 = vst [vmem:[#allocation198_spill] sm:$0xff] %v19918_v59  ;;  %v10567_v25 = vsub.f32 %v10535_v27, %v22202_v28  ;;  %14299 = vpow2.f32 %v10615_v40  ;;  %v10454_v54 = vpop.xlane.xlu0 %10453  ;;  %v11814_v1 = vcombine.low %v10790_v51, %v10794_v47  ;;  %v11815_v7 = vcombine.low %v10798_v29, %v10802_v35 }
 0x623   :  { %v10487_v34 = vpop.xlane.xlu1 %10486  ;;  %v14290_v23 = vpop.eup %14289  ;;  %v10599_v59 = vmul.f32 1.442695, %v10557_v32  ;;  %v10526_v48 = vmul.f32 0.25, %v10454_v54  ;;  %v11822_v52 = vrot.slane %v11812_v38, %v22188_v49  ;;  %v11829_v39 = vrot.slane %v11813_v17, %v22188_v49  ;;  %v22204_v32 = vld [vmem:[#allocation82_spill] sm:$0xff] }
 0x624   :  { %v10619_v53 = vmul.f32 1.442695, %v10567_v25  ;;  %v10537_v55 = vmul.f32 0.25, %v10487_v34  ;;  %v14292_v2 = vpop.eup %14291  ;;  %v19928_v46 = vmul.f32 %v14290_v23, %v19830_v16  ;;  %v11836_v28 = vrot.slane %v11814_v1, %v22188_v49 }
 0x625   :  { %v19934_v40 = vmul.f32 %v14292_v2, %v19812_v31  ;;  %14301 = vpow2.f32 %v10599_v59  ;;  %v10558_v41 = vsub.f32 %v10526_v48, %v22203_v63  ;;  %v11843_v42 = vrot.slane %v11815_v7, %v22188_v49 }
 0x626   :  { %v10569_v51 = vsub.f32 %v10537_v55, %v22204_v32  ;;  %14303 = vpow2.f32 %v10619_v53  ;;  %v10457_v47 = vpop.xlane.xlu0 %10456  ;;  %v11844_v16 = vcombine.low %v11822_v52, %v11829_v39  ;;  %v22205_v44 = vrot.slane %v19843_v4, %v22181_v5  ;;  %v22209_v55 = vld [vmem:[#allocation75_spill] sm:$0xff]  ;;  %v22210_v52 = vld [vmem:[#allocation89_spill] sm:$0xff] }
 0x627   :  { %v10493_v27 = vpop.xlane.xlu1 %10492  ;;  %v22206_v1 = vrot.slane %v19843_v4, %v22180_v19  ;;  %v14294_v31 = vpop.eup %14293  ;;  %v10601_v35 = vmul.f32 1.442695, %v10558_v41  ;;  %v10527_v38 = vmul.f32 0.25, %v10457_v47  ;;  %v11845_v25 = vcombine.low %v11836_v28, %v11843_v42 }
 0x628   :  { %v10623_v59 = vmul.f32 1.442695, %v10569_v51  ;;  %v10539_v48 = vmul.f32 0.25, %v10493_v27  ;;  %v14296_v3 = vpop.eup %14295  ;;  %v19946_v53 = vmul.f32 %v14294_v31, %v19834_v24  ;;  %v11852_v54 = vrot.slane %v11844_v16, %v22188_v49 }
 0x629   :  { %v11863_v29 = vcombine.low %v22206_v1, %v22205_v44  ;;  %v22207_v34 = vrot.slane %v19843_v4, %v22186_v10  ;;  %v22208_v17 = vrot.slane %v19843_v4, %v22182_v12  ;;  %v19956_v23 = vmul.f32 %v14296_v3, %v19796_v9 }
 0x62a   :  { %14305 = vpow2.f32 %v10601_v35  ;;  %v10559_v2 = vsub.f32 %v10527_v38, %v22209_v55  ;;  %v10571_v39 = vsub.f32 %v10539_v48, %v22210_v52  ;;  %v11859_v24 = vrot.slane %v11845_v25, %v22188_v49  ;;  %v10460_v28 = vpop.xlane.xlu0 %10459 }
 0x62b   :  { %v11864_v7 = vcombine.low %v22208_v17, %v22207_v34  ;;  %14307 = vpow2.f32 %v10623_v59  ;;  %v11871_v63 = vrot.slane %v19899_v22, %v22188_v49  ;;  %v11878_v41 = vrot.slane %v19901_v21, %v22188_v49  ;;  %v14298_v4 = vpop.eup %14297  ;;  %v22211_v22 = vld [vmem:[#allocation43_spill] sm:$0xff] }
 0x62c   :  { %v10603_v32 = vmul.f32 1.442695, %v10559_v2  ;;  %v10627_v51 = vmul.f32 1.442695, %v10571_v39  ;;  %v10528_v9 = vmul.f32 0.25, %v10460_v28  ;;  %v11885_v47 = vrot.slane %v11863_v29, %v22188_v49  ;;  %v14300_v42 = vpop.eup %14299 }
 0x62d   :  { %v19967_v16 = vmul.f32 %v14298_v4, %v19814_v60  ;;  %v11860_v27 = vcombine.low %v11852_v54, %v11859_v24  ;;  %v11892_v44 = vrot.slane %v11864_v7, %v22188_v49  ;;  %v11893_v1 = vcombine.low %v11871_v63, %v11878_v41  ;;  %v10496_v54 = vpop.xlane.xlu1 %10495 }
 0x62e   :  { %v19971_v31 = vmul.f32 %v14300_v42, %v19798_v43  ;;  %14309 = vpow2.f32 %v10603_v32  ;;  %v10560_v21 = vsub.f32 %v10528_v9, %v22211_v22  ;;  %v10838_v35 = vrot.slane %v19910_v37, %v22176_v15  ;;  %v10463_v52 = vpop.xlane.xlu0 %10462 }
 0x62f   :  { %13335 = vperm.xlu1 %13660, %v11860_v27   ;;  %14311 = vpow2.f32 %v10627_v51  ;;  %v11894_v29 = vcombine.low %v11885_v47, %v11892_v44  ;;  %v11901_v59 = vrot.slane %v11893_v1, %v22188_v49  ;;  %v10842_v60 = vrot.slane %v19910_v37, %v22177_v62  ;;  %v14302_v38 = vpop.eup %14301  ;;  %v22212_v1 = vld [vmem:[#allocation20_spill] sm:$0xff] }
 0x630   :  { %v10605_v48 = vmul.f32 1.442695, %v10560_v21  ;;  %v10846_v43 = vrot.slane %v19910_v37, %v22178_v13  ;;  %v10850_v3 = vrot.slane %v19910_v37, %v22179_v56  ;;  %v10854_v25 = vrot.slane %v19910_v37, %v22180_v19  ;;  %v14304_v34 = vpop.eup %14303 }
 0x631   :  { %v19986_v17 = vmul.f32 %v14302_v38, %v19790_v14  ;;  %v11908_v7 = vrot.slane %v11894_v29, %v22188_v49  ;;  %v10858_v55 = vrot.slane %v19910_v37, %v22181_v5  ;;  %v10862_v2 = vrot.slane %v19910_v37, %v22182_v12  ;;  %v22213_v29 = vld [vmem:[#allocation68_spill] sm:$0xff] }
 0x632   :  { %v19994_v39 = vmul.f32 %v14304_v34, %v19801_v6  ;;  %14313 = vpow2.f32 %v10605_v48  ;;  %v10866_v24 = vrot.slane %v19910_v37, %v22186_v10  ;;  %v11910_v28 = vcombine.low %v10838_v35, %v10842_v60 }
 0x633   :  { %v11909_v63 = vcombine.low %v11901_v59, %v11908_v7  ;;  %v11911_v14 = vcombine.low %v10846_v43, %v10850_v3  ;;  %v11912_v41 = vcombine.low %v10854_v25, %v10858_v55  ;;  %v10540_v4 = vmul.f32 0.25, %v10496_v54 }
 0x634   :  { %v14306_v32 = vpop.eup %14305  ;;  %v11913_v51 = vcombine.low %v10862_v2, %v10866_v24  ;;  %v11920_v9 = vrot.slane %v11910_v28, %v22188_v49  ;;  %v10529_v47 = vmul.f32 0.25, %v10463_v52  ;;  %v10870_v42 = vrot.slane %v19858_v57, %v22176_v15 }
 0x635   :  { %v14308_v27 = vpop.eup %14307  ;;  %v20002_v6 = vmul.f32 %v14306_v32, %v19819_v50  ;;  %13338 = vperm.xlu1 %13660, %v11909_v63   ;;  %v11927_v37 = vrot.slane %v11911_v14, %v22188_v49  ;;  %v11934_v44 = vrot.slane %v11912_v41, %v22188_v49  ;;  %v10572_v22 = vsub.f32 %v10540_v4, %v22212_v1 }
 0x636   :  { %v20008_v21 = vmul.f32 %v14308_v27, %v19803_v30  ;;  %v11941_v35 = vrot.slane %v11913_v51, %v22188_v49  ;;  %v10561_v59 = vsub.f32 %v10529_v47, %v22213_v29  ;;  %v10874_v60 = vrot.slane %v19858_v57, %v22177_v62  ;;  %v10466_v29 = vpop.xlane.xlu0 %10465 }
 0x637   :  { %v11942_v38 = vcombine.low %v11920_v9, %v11927_v37  ;;  %v10629_v50 = vmul.f32 1.442695, %v10572_v22  ;;  %v10878_v48 = vrot.slane %v19858_v57, %v22178_v13  ;;  %v10882_v43 = vrot.slane %v19858_v57, %v22179_v56 }
 0x638   :  { %v14310_v3 = vpop.eup %14309  ;;  %v11943_v25 = vcombine.low %v11934_v44, %v11941_v35  ;;  %v10607_v54 = vmul.f32 1.442695, %v10561_v59  ;;  %v10886_v30 = vrot.slane %v19858_v57, %v22180_v19  ;;  %v10890_v34 = vrot.slane %v19858_v57, %v22181_v5  ;;  %v10499_v44 = vpop.xlane.xlu1 %10498 }
 0x639   :  { %v14312_v7 = vpop.eup %14311  ;;  %v20023_v55 = vmul.f32 %v14310_v3, %v19792_v45  ;;  %v11950_v2 = vrot.slane %v11942_v38, %v22188_v49  ;;  %14315 = vpow2.f32 %v10629_v50  ;;  %v10894_v52 = vrot.slane %v19858_v57, %v22182_v12 }
 0x63a   :  { %v20029_v24 = vmul.f32 %v14312_v7, %v19805_v0  ;;  %v11957_v28 = vrot.slane %v11943_v25, %v22188_v49  ;;  %14317 = vpow2.f32 %v10607_v54  ;;  %v10898_v63 = vrot.slane %v19858_v57, %v22186_v10 }
 0x63b   :  { %v11959_v14 = vcombine.low %v10870_v42, %v10874_v60  ;;  %v11960_v41 = vcombine.low %v10878_v48, %v10882_v43  ;;  %v11961_v4 = vcombine.low %v10886_v30, %v10890_v34  ;;  %v10902_v45 = vrot.slane %v19923_v18, %v22176_v15 }
 0x63c   :  { %v14314_v32 = vpop.eup %14313  ;;  %v11958_v51 = vcombine.low %v11950_v2, %v11957_v28  ;;  %v11962_v9 = vcombine.low %v10894_v52, %v10898_v63  ;;  %v10906_v47 = vrot.slane %v19923_v18, %v22177_v62  ;;  %v10910_v0 = vrot.slane %v19923_v18, %v22178_v13  ;;  %v22214_v63 = vld [vmem:[#allocation60_spill] sm:$0xff] }
 0x63d   :  { %v20041_v27 = vmul.f32 %v14314_v32, %v19821_v33  ;;  %v11969_v57 = vrot.slane %v11959_v14, %v22188_v49  ;;  %v11976_v42 = vrot.slane %v11960_v41, %v22188_v49  ;;  %v11983_v37 = vrot.slane %v11961_v4, %v22188_v49  ;;  %v22215_v4 = vld [vmem:[#allocation47_spill] sm:$0xff] }
 0x63e   :  { %13341 = vperm.xlu0 %13659, %v11958_v51   ;;  %v11990_v1 = vrot.slane %v11962_v9, %v22188_v49  ;;  %v10914_v22 = vrot.slane %v19923_v18, %v22179_v56  ;;  %v10918_v35 = vrot.slane %v19923_v18, %v22180_v19  ;;  %v10922_v33 = vrot.slane %v19923_v18, %v22181_v5 }
 0x63f   :  { %v11991_v59 = vcombine.low %v11969_v57, %v11976_v42  ;;  %v10926_v60 = vrot.slane %v19923_v18, %v22182_v12  ;;  %v10930_v38 = vrot.slane %v19923_v18, %v22186_v10  ;;  %v12008_v50 = vcombine.low %v10902_v45, %v10906_v47 }
 0x640   :  { %v11992_v48 = vcombine.low %v11983_v37, %v11990_v1  ;;  %v12009_v43 = vcombine.low %v10910_v0, %v10914_v22  ;;  %v12010_v3 = vcombine.low %v10918_v35, %v10922_v33  ;;  %v10541_v25 = vmul.f32 0.25, %v10499_v44 }
 0x641   :  { %v11999_v54 = vrot.slane %v11991_v59, %v22188_v49  ;;  %v12011_v30 = vcombine.low %v10926_v60, %v10930_v38  ;;  %v12018_v34 = vrot.slane %v12008_v50, %v22188_v49  ;;  %v10530_v7 = vmul.f32 0.25, %v10466_v29 }
 0x642   :  { %v12006_v2 = vrot.slane %v11992_v48, %v22188_v49  ;;  %v12025_v52 = vrot.slane %v12009_v43, %v22188_v49  ;;  %v12032_v28 = vrot.slane %v12010_v3, %v22188_v49  ;;  %v10573_v14 = vsub.f32 %v10541_v25, %v22214_v63 }
 0x643   :  { %v14316_v18 = vpop.eup %14315  ;;  %v12039_v41 = vrot.slane %v12011_v30, %v22188_v49  ;;  %v10562_v45 = vsub.f32 %v10530_v7, %v22215_v4  ;;  %v10934_v32 = vrot.slane %v19873_v26, %v22176_v15  ;;  %v10938_v51 = vrot.slane %v19873_v26, %v22177_v62 }
 0x644   :  { %v14318_v9 = vpop.eup %14317  ;;  %v20070_v47 = vmul.f32 %v14316_v18, %v19840_v11  ;;  %v12007_v0 = vcombine.low %v11999_v54, %v12006_v2  ;;  %v12040_v57 = vcombine.low %v12018_v34, %v12025_v52  ;;  %v10631_v42 = vmul.f32 1.442695, %v10573_v14  ;;  %v10502_v2 = vpop.xlane.xlu1 %10501 }
 0x645   :  { %v20073_v37 = vmul.f32 %v14318_v9, %v19794_v36  ;;  %v12041_v44 = vcombine.low %v12032_v28, %v12039_v41  ;;  %v10609_v1 = vmul.f32 1.442695, %v10562_v45  ;;  %v10942_v22 = vrot.slane %v19873_v26, %v22178_v13 }
 0x646   :  { %13344 = vperm.xlu1 %13660, %v12007_v0   ;;  %v12048_v35 = vrot.slane %v12040_v57, %v22188_v49  ;;  %14319 = vpow2.f32 %v10631_v42  ;;  %v10946_v33 = vrot.slane %v19873_v26, %v22179_v56  ;;  %v10950_v11 = vrot.slane %v19873_v26, %v22180_v19 }
 0x647   :  { %v12055_v29 = vrot.slane %v12041_v44, %v22188_v49  ;;  %14321 = vpow2.f32 %v10609_v1  ;;  %v10954_v36 = vrot.slane %v19873_v26, %v22181_v5  ;;  %v10958_v59 = vrot.slane %v19873_v26, %v22182_v12 }
 0x648   :  { %v10962_v60 = vrot.slane %v19873_v26, %v22186_v10  ;;  %v12057_v38 = vcombine.low %v10934_v32, %v10938_v51  ;;  %v12058_v50 = vcombine.low %v10942_v22, %v10946_v33  ;;  %v10966_v48 = vrot.slane %v19934_v40, %v22176_v15  ;;  %v22216_v33 = vld [vmem:[#allocation73_spill] sm:$0xff] }
 0x649   :  { %v12056_v43 = vcombine.low %v12048_v35, %v12055_v29  ;;  %v12059_v3 = vcombine.low %v10950_v11, %v10954_v36  ;;  %v10970_v25 = vrot.slane %v19934_v40, %v22177_v62  ;;  %v10974_v54 = vrot.slane %v19934_v40, %v22178_v13 }
 0x64a   :  { %v12060_v30 = vcombine.low %v10958_v59, %v10962_v60  ;;  %v12067_v34 = vrot.slane %v12057_v38, %v22188_v49  ;;  %v12074_v7 = vrot.slane %v12058_v50, %v22188_v49  ;;  %v10978_v26 = vrot.slane %v19934_v40, %v22179_v56 }
 0x64b   :  { %13347 = vperm.xlu0 %13659, %v12056_v43   ;;  %v12081_v52 = vrot.slane %v12059_v3, %v22188_v49  ;;  %v10982_v28 = vrot.slane %v19934_v40, %v22180_v19  ;;  %v10986_v63 = vrot.slane %v19934_v40, %v22181_v5  ;;  %v10990_v14 = vrot.slane %v19934_v40, %v22182_v12 }
 0x64c   :  { %v12088_v18 = vrot.slane %v12060_v30, %v22188_v49  ;;  %v12089_v41 = vcombine.low %v12067_v34, %v12074_v7  ;;  %v10994_v4 = vrot.slane %v19934_v40, %v22186_v10  ;;  %v12106_v45 = vcombine.low %v10966_v48, %v10970_v25 }
 0x64d   :  { %v12107_v32 = vcombine.low %v10974_v54, %v10978_v26  ;;  %v12108_v51 = vcombine.low %v10982_v28, %v10986_v63  ;;  %v10542_v9 = vmul.f32 0.25, %v10502_v2  ;;  %v10998_v0 = vrot.slane %v19888_v58, %v22176_v15  ;;  %v10505_v26 = vpop.xlane.xlu1 %10504 }
 0x64e   :  { %v12090_v57 = vcombine.low %v12081_v52, %v12088_v18  ;;  %v12097_v42 = vrot.slane %v12089_v41, %v22188_v49  ;;  %v12109_v44 = vcombine.low %v10990_v14, %v10994_v4  ;;  %v12116_v1 = vrot.slane %v12106_v45, %v22188_v49 }
 0x64f   :  { %v12123_v22 = vrot.slane %v12107_v32, %v22188_v49  ;;  %v12130_v35 = vrot.slane %v12108_v51, %v22188_v49  ;;  %v10574_v11 = vsub.f32 %v10542_v9, %v22216_v33  ;;  %v11002_v40 = vrot.slane %v19888_v58, %v22177_v62 }
 0x650   :  { %v14320_v29 = vpop.eup %14319  ;;  %v12104_v36 = vrot.slane %v12090_v57, %v22188_v49  ;;  %v12137_v59 = vrot.slane %v12109_v44, %v22188_v49  ;;  %v11006_v60 = vrot.slane %v19888_v58, %v22178_v13  ;;  %v11010_v38 = vrot.slane %v19888_v58, %v22179_v56 }
 0x651   :  { %v14322_v50 = vpop.eup %14321  ;;  %v20125_v48 = vmul.f32 %v14320_v29, %v19817_v61  ;;  %v12138_v43 = vcombine.low %v12116_v1, %v12123_v22  ;;  %v10633_v3 = vmul.f32 1.442695, %v10574_v11  ;;  %v11014_v25 = vrot.slane %v19888_v58, %v22180_v19 }
 0x652   :  { %v20130_v54 = vmul.f32 %v14322_v50, %v19823_v8  ;;  %v12105_v30 = vcombine.low %v12097_v42, %v12104_v36  ;;  %v12139_v34 = vcombine.low %v12130_v35, %v12137_v59  ;;  %v11018_v7 = vrot.slane %v19888_v58, %v22181_v5 }
 0x653   :  { %v12146_v2 = vrot.slane %v12138_v43, %v22188_v49  ;;  %14323 = vpow2.f32 %v10633_v3  ;;  %v11022_v61 = vrot.slane %v19888_v58, %v22182_v12  ;;  %v11026_v52 = vrot.slane %v19888_v58, %v22186_v10 }
 0x654   :  { %13350 = vperm.xlu1 %13660, %v12105_v30   ;;  %v12153_v28 = vrot.slane %v12139_v34, %v22188_v49  ;;  %v12155_v8 = vcombine.low %v10998_v0, %v11002_v40  ;;  %v12156_v63 = vcombine.low %v11006_v60, %v11010_v38  ;;  %v12157_v14 = vcombine.low %v11014_v25, %v11018_v7  ;;  %v22217_v0 = vld [vmem:[#allocation55_spill] sm:$0xff] }
 0x655   :  { %v12158_v18 = vcombine.low %v11022_v61, %v11026_v52  ;;  %v10543_v41 = vmul.f32 0.25, %v10505_v26  ;;  %v11030_v4 = vrot.slane %v19967_v16, %v22176_v15  ;;  %v11034_v45 = vrot.slane %v19967_v16, %v22177_v62 }
 0x656   :  { %v12154_v32 = vcombine.low %v12146_v2, %v12153_v28  ;;  %v12165_v51 = vrot.slane %v12155_v8, %v22188_v49  ;;  %v12172_v9 = vrot.slane %v12156_v63, %v22188_v49  ;;  %v12179_v58 = vrot.slane %v12157_v14, %v22188_v49  ;;  %v10508_v63 = vpop.xlane.xlu1 %10507 }
 0x657   :  { %v12186_v57 = vrot.slane %v12158_v18, %v22188_v49  ;;  %v10575_v42 = vsub.f32 %v10543_v41, %v22217_v0  ;;  %v11038_v44 = vrot.slane %v19967_v16, %v22178_v13  ;;  %v11042_v1 = vrot.slane %v19967_v16, %v22179_v56 }
 0x658   :  { %13353 = vperm.xlu0 %13659, %v12154_v32   ;;  %v12187_v22 = vcombine.low %v12165_v51, %v12172_v9  ;;  %v11046_v35 = vrot.slane %v19967_v16, %v22180_v19  ;;  %v11050_v33 = vrot.slane %v19967_v16, %v22181_v5  ;;  %v11054_v11 = vrot.slane %v19967_v16, %v22182_v12 }
 0x659   :  { %v12188_v40 = vcombine.low %v12179_v58, %v12186_v57  ;;  %v10635_v29 = vmul.f32 1.442695, %v10575_v42  ;;  %v11058_v36 = vrot.slane %v19967_v16, %v22186_v10  ;;  %v12204_v59 = vcombine.low %v11030_v4, %v11034_v45 }
 0x65a   :  { %v12195_v60 = vrot.slane %v12187_v22, %v22188_v49  ;;  %v12205_v38 = vcombine.low %v11038_v44, %v11042_v1  ;;  %v12206_v50 = vcombine.low %v11046_v35, %v11050_v33  ;;  %v11254_v43 = vrot.slane %v19956_v23, %v22176_v15 }
 0x65b   :  { %v12202_v3 = vrot.slane %v12188_v40, %v22188_v49  ;;  %14325 = vpow2.f32 %v10635_v29  ;;  %v12207_v25 = vcombine.low %v11054_v11, %v11058_v36  ;;  %v12214_v30 = vrot.slane %v12204_v59, %v22188_v49  ;;  %v22219_v11 = vld [vmem:[#allocation22_spill] sm:$0xff] }
 0x65c   :  { %v12221_v34 = vrot.slane %v12205_v38, %v22188_v49  ;;  %v12228_v7 = vrot.slane %v12206_v50, %v22188_v49  ;;  %v11258_v16 = vrot.slane %v19956_v23, %v22177_v62  ;;  %v11262_v26 = vrot.slane %v19956_v23, %v22178_v13 }
 0x65d   :  { %v14324_v2 = vpop.eup %14323  ;;  %v12203_v61 = vcombine.low %v12195_v60, %v12202_v3  ;;  %v12235_v52 = vrot.slane %v12207_v25, %v22188_v49  ;;  %v11266_v28 = vrot.slane %v19956_v23, %v22179_v56  ;;  %v11270_v8 = vrot.slane %v19956_v23, %v22180_v19 }
 0x65e   :  { %v20178_v14 = vmul.f32 %v14324_v2, %v19853_v20  ;;  %v12236_v18 = vcombine.low %v12214_v30, %v12221_v34  ;;  %v11274_v41 = vrot.slane %v19956_v23, %v22181_v5  ;;  %v11278_v4 = vrot.slane %v19956_v23, %v22182_v12  ;;  %v22218_v20 = vld [vmem:[#allocation162_spill] sm:$0xff] }
 0x65f   :  { %13356 = vperm.xlu1 %13660, %v12203_v61   ;;  %v12237_v45 = vcombine.low %v12228_v7, %v12235_v52  ;;  %v11282_v32 = vrot.slane %v19956_v23, %v22186_v10  ;;  %v12547_v51 = vcombine.low %v11254_v43, %v11258_v16  ;;  %v12548_v9 = vcombine.low %v11262_v26, %v11266_v28  ;;  %v22220_v2 = vld [vmem:[#allocation158_spill] sm:$0xff] }
 0x660   :  { %v12244_v58 = vrot.slane %v12236_v18, %v22188_v49  ;;  %v12549_v57 = vcombine.low %v11270_v8, %v11274_v41  ;;  %v10544_v0 = vmul.f32 0.25, %v10508_v63  ;;  %v11286_v42 = vrot.slane %v22218_v20, %v22176_v15 }
 0x661   :  { %v12251_v44 = vrot.slane %v12237_v45, %v22188_v49  ;;  %v12550_v1 = vcombine.low %v11278_v4, %v11282_v32  ;;  %v12557_v22 = vrot.slane %v12547_v51, %v22188_v49  ;;  %v12564_v35 = vrot.slane %v12548_v9, %v22188_v49  ;;  %v10511_v9 = vpop.xlane.xlu1 %10510 }
 0x662   :  { %v12571_v33 = vrot.slane %v12549_v57, %v22188_v49  ;;  %v10576_v23 = vsub.f32 %v10544_v0, %v22219_v11  ;;  %v11290_v40 = vrot.slane %v22218_v20, %v22177_v62  ;;  %v11294_v29 = vrot.slane %v22218_v20, %v22178_v13 }
 0x663   :  { %v12252_v36 = vcombine.low %v12244_v58, %v12251_v44  ;;  %v12578_v59 = vrot.slane %v12550_v1, %v22188_v49  ;;  %v12579_v60 = vcombine.low %v12557_v22, %v12564_v35  ;;  %v11298_v38 = vrot.slane %v22218_v20, %v22179_v56 }
 0x664   :  { %v10637_v50 = vmul.f32 1.442695, %v10576_v23  ;;  %v11302_v43 = vrot.slane %v22218_v20, %v22180_v19  ;;  %v11306_v3 = vrot.slane %v22218_v20, %v22181_v5  ;;  %v11310_v25 = vrot.slane %v22218_v20, %v22182_v12 }
 0x665   :  { %v14326_v30 = vpop.eup %14325  ;;  %13359 = vperm.xlu0 %13659, %v12252_v36   ;;  %v12580_v34 = vcombine.low %v12571_v33, %v12578_v59  ;;  %v12587_v7 = vrot.slane %v12579_v60, %v22188_v49  ;;  %v11314_v16 = vrot.slane %v22218_v20, %v22186_v10  ;;  %v12596_v26 = vcombine.low %v11286_v42, %v11290_v40  ;;  %v22221_v59 = vld [vmem:[#allocation198_spill] sm:$0xff] }
 0x666   :  { %v20211_v61 = vmul.f32 %v14326_v30, %v22220_v2  ;;  %14327 = vpow2.f32 %v10637_v50  ;;  %v12597_v52 = vcombine.low %v11294_v29, %v11298_v38  ;;  %v12598_v28 = vcombine.low %v11302_v43, %v11306_v3  ;;  %v22222_v3 = vld [vmem:[#allocation58_spill] sm:$0xff] }
 0x667   :  { %v12594_v8 = vrot.slane %v12580_v34, %v22188_v49  ;;  %v12599_v63 = vcombine.low %v11310_v25, %v11314_v16  ;;  %v12606_v18 = vrot.slane %v12596_v26, %v22188_v49  ;;  %v11318_v41 = vrot.slane %v19971_v31, %v22176_v15 }
 0x668   :  { %v12613_v4 = vrot.slane %v12597_v52, %v22188_v49  ;;  %v12620_v45 = vrot.slane %v12598_v28, %v22188_v49  ;;  %v11322_v32 = vrot.slane %v19971_v31, %v22177_v62  ;;  %v11326_v51 = vrot.slane %v19971_v31, %v22178_v13 }
 0x669   :  { %v12595_v58 = vcombine.low %v12587_v7, %v12594_v8  ;;  %v12627_v57 = vrot.slane %v12599_v63, %v22188_v49  ;;  %v11330_v0 = vrot.slane %v19971_v31, %v22179_v56  ;;  %v11334_v20 = vrot.slane %v19971_v31, %v22180_v19 }
 0x66a   :  { %v12628_v42 = vcombine.low %v12606_v18, %v12613_v4  ;;  %v11338_v44 = vrot.slane %v19971_v31, %v22181_v5  ;;  %v11342_v1 = vrot.slane %v19971_v31, %v22182_v12  ;;  %v11346_v22 = vrot.slane %v19971_v31, %v22186_v10  ;;  %v22223_v4 = vld [vmem:[#allocation149_spill] sm:$0xff] }
 0x66b   :  { %13380 = vperm.xlu1 %13660, %v12595_v58   ;;  %v12629_v35 = vcombine.low %v12620_v45, %v12627_v57  ;;  %v12645_v33 = vcombine.low %v11318_v41, %v11322_v32  ;;  %v12646_v11 = vcombine.low %v11326_v51, %v11330_v0  ;;  %v10545_v23 = vmul.f32 0.25, %v10511_v9 }
 0x66c   :  { %v12636_v40 = vrot.slane %v12628_v42, %v22188_v49  ;;  %v12647_v29 = vcombine.low %v11334_v20, %v11338_v44  ;;  %v12648_v36 = vcombine.low %v11342_v1, %v11346_v22  ;;  %v11350_v60 = vrot.slane %v22221_v59, %v22176_v15 }
 0x66d   :  { %v12643_v38 = vrot.slane %v12629_v35, %v22188_v49  ;;  %v12655_v50 = vrot.slane %v12645_v33, %v22188_v49  ;;  %v12662_v43 = vrot.slane %v12646_v11, %v22188_v49  ;;  %v10577_v31 = vsub.f32 %v10545_v23, %v22222_v3  ;;  %v10514_v23 = vpop.xlane.xlu1 %10513 }
 0x66e   :  { %v12669_v25 = vrot.slane %v12647_v29, %v22188_v49  ;;  %v12676_v30 = vrot.slane %v12648_v36, %v22188_v49  ;;  %v11354_v34 = vrot.slane %v22221_v59, %v22177_v62  ;;  %v11358_v7 = vrot.slane %v22221_v59, %v22178_v13 }
 0x66f   :  { %v12644_v16 = vcombine.low %v12636_v40, %v12643_v38  ;;  %v12677_v26 = vcombine.low %v12655_v50, %v12662_v43  ;;  %v10639_v2 = vmul.f32 1.442695, %v10577_v31  ;;  %v11362_v52 = vrot.slane %v22221_v59, %v22179_v56 }
 0x670   :  { %v14328_v28 = vpop.eup %14327  ;;  %v12678_v8 = vcombine.low %v12669_v25, %v12676_v30  ;;  %v11366_v63 = vrot.slane %v22221_v59, %v22180_v19  ;;  %v11370_v18 = vrot.slane %v22221_v59, %v22181_v5  ;;  %v11374_v41 = vrot.slane %v22221_v59, %v22182_v12 }
 0x671   :  { %v20256_v45 = vmul.f32 %v14328_v28, %v22223_v4  ;;  %13383 = vperm.xlu0 %13659, %v12644_v16   ;;  %v12685_v32 = vrot.slane %v12677_v26, %v22188_v49  ;;  %14329 = vpow2.f32 %v10639_v2  ;;  %v11378_v51 = vrot.slane %v22221_v59, %v22186_v10 }
 0x672   :  { %v12692_v9 = vrot.slane %v12678_v8, %v22188_v49  ;;  %v12694_v58 = vcombine.low %v11350_v60, %v11354_v34  ;;  %v12695_v57 = vcombine.low %v11358_v7, %v11362_v52  ;;  %v12696_v0 = vcombine.low %v11366_v63, %v11370_v18 }
 0x673   :  { %v12697_v20 = vcombine.low %v11374_v41, %v11378_v51  ;;  %v11382_v42 = vrot.slane %v19994_v39, %v22176_v15  ;;  %v11386_v44 = vrot.slane %v19994_v39, %v22177_v62  ;;  %v11390_v1 = vrot.slane %v19994_v39, %v22178_v13 }
 0x674   :  { %v12693_v22 = vcombine.low %v12685_v32, %v12692_v9  ;;  %v12704_v35 = vrot.slane %v12694_v58, %v22188_v49  ;;  %v12711_v33 = vrot.slane %v12695_v57, %v22188_v49  ;;  %v12718_v11 = vrot.slane %v12696_v0, %v22188_v49  ;;  %v22225_v0 = vld [vmem:[#allocation153_spill] sm:$0xff] }
 0x675   :  { %v12725_v40 = vrot.slane %v12697_v20, %v22188_v49  ;;  %v11394_v29 = vrot.slane %v19994_v39, %v22179_v56  ;;  %v11398_v36 = vrot.slane %v19994_v39, %v22180_v19  ;;  %v11402_v59 = vrot.slane %v19994_v39, %v22181_v5 }
 0x676   :  { %13386 = vperm.xlu1 %13660, %v12693_v22   ;;  %v12726_v60 = vcombine.low %v12704_v35, %v12711_v33  ;;  %v11406_v38 = vrot.slane %v19994_v39, %v22182_v12  ;;  %v11410_v50 = vrot.slane %v19994_v39, %v22186_v10  ;;  %v12743_v43 = vcombine.low %v11382_v42, %v11386_v44  ;;  %v22224_v39 = vld [vmem:[#allocation24_spill] sm:$0xff] }
 0x677   :  { %v12727_v3 = vcombine.low %v12718_v11, %v12725_v40  ;;  %v12744_v31 = vcombine.low %v11390_v1, %v11394_v29  ;;  %v12745_v25 = vcombine.low %v11398_v36, %v11402_v59  ;;  %v10546_v30 = vmul.f32 0.25, %v10514_v23 }
 0x678   :  { %v12734_v34 = vrot.slane %v12726_v60, %v22188_v49  ;;  %v12746_v7 = vcombine.low %v11406_v38, %v11410_v50  ;;  %v12753_v16 = vrot.slane %v12743_v43, %v22188_v49  ;;  %v11414_v26 = vrot.slane %v19928_v46, %v22176_v15 }
 0x679   :  { %v12741_v2 = vrot.slane %v12727_v3, %v22188_v49  ;;  %v12760_v52 = vrot.slane %v12744_v31, %v22188_v49  ;;  %v12767_v28 = vrot.slane %v12745_v25, %v22188_v49  ;;  %v10578_v8 = vsub.f32 %v10546_v30, %v22224_v39 }
 0x67a   :  { %v12774_v63 = vrot.slane %v12746_v7, %v22188_v49  ;;  %v11418_v18 = vrot.slane %v19928_v46, %v22177_v62  ;;  %v11422_v41 = vrot.slane %v19928_v46, %v22178_v13  ;;  %v11426_v4 = vrot.slane %v19928_v46, %v22179_v56 }
 0x67b   :  { %v14330_v32 = vpop.eup %14329  ;;  %v12742_v51 = vcombine.low %v12734_v34, %v12741_v2  ;;  %v12775_v9 = vcombine.low %v12753_v16, %v12760_v52  ;;  %v10641_v58 = vmul.f32 1.442695, %v10578_v8  ;;  %v11430_v57 = vrot.slane %v19928_v46, %v22180_v19 }
 0x67c   :  { %v20300_v20 = vmul.f32 %v14330_v32, %v22225_v0  ;;  %v12776_v42 = vcombine.low %v12767_v28, %v12774_v63  ;;  %v11434_v44 = vrot.slane %v19928_v46, %v22181_v5  ;;  %v11438_v1 = vrot.slane %v19928_v46, %v22182_v12 }
 0x67d   :  { %13389 = vperm.xlu0 %13659, %v12742_v51   ;;  %v12783_v22 = vrot.slane %v12775_v9, %v22188_v49  ;;  %14331 = vpow2.f32 %v10641_v58  ;;  %v11442_v35 = vrot.slane %v19928_v46, %v22186_v10  ;;  %v12792_v33 = vcombine.low %v11414_v26, %v11418_v18 }
 0x67e   :  { %v12790_v11 = vrot.slane %v12776_v42, %v22188_v49  ;;  %v12793_v23 = vcombine.low %v11422_v41, %v11426_v4  ;;  %v12794_v40 = vcombine.low %v11430_v57, %v11434_v44  ;;  %v11446_v29 = vrot.slane %v20008_v21, %v22176_v15 }
 0x67f   :  { %v12795_v36 = vcombine.low %v11438_v1, %v11442_v35  ;;  %v12802_v59 = vrot.slane %v12792_v33, %v22188_v49  ;;  %v11450_v60 = vrot.slane %v20008_v21, %v22177_v62  ;;  %v11454_v38 = vrot.slane %v20008_v21, %v22178_v13 }
 0x680   :  { %v12791_v50 = vcombine.low %v12783_v22, %v12790_v11  ;;  %v12809_v46 = vrot.slane %v12793_v23, %v22188_v49  ;;  %v12816_v43 = vrot.slane %v12794_v40, %v22188_v49  ;;  %v11458_v3 = vrot.slane %v20008_v21, %v22179_v56  ;;  %v22226_v11 = vld [vmem:[#allocation163_spill] sm:$0xff] }
 0x681   :  { %v12823_v31 = vrot.slane %v12795_v36, %v22188_v49  ;;  %v11462_v25 = vrot.slane %v20008_v21, %v22180_v19  ;;  %v11466_v30 = vrot.slane %v20008_v21, %v22181_v5  ;;  %v11470_v34 = vrot.slane %v20008_v21, %v22182_v12 }
 0x682   :  { %13392 = vperm.xlu1 %13660, %v12791_v50   ;;  %v12824_v7 = vcombine.low %v12802_v59, %v12809_v46  ;;  %v11474_v16 = vrot.slane %v20008_v21, %v22186_v10  ;;  %v12841_v26 = vcombine.low %v11446_v29, %v11450_v60  ;;  %v12842_v2 = vcombine.low %v11454_v38, %v11458_v3 }
 0x683   :  { %v12825_v52 = vcombine.low %v12816_v43, %v12823_v31  ;;  %v12843_v28 = vcombine.low %v11462_v25, %v11466_v30  ;;  %v11478_v39 = vrot.slane %v19946_v53, %v22176_v15  ;;  %v11482_v8 = vrot.slane %v19946_v53, %v22177_v62 }
 0x684   :  { %v12832_v63 = vrot.slane %v12824_v7, %v22188_v49  ;;  %v12844_v18 = vcombine.low %v11470_v34, %v11474_v16  ;;  %v12851_v41 = vrot.slane %v12841_v26, %v22188_v49  ;;  %v12858_v4 = vrot.slane %v12842_v2, %v22188_v49 }
 0x685   :  { %v12839_v32 = vrot.slane %v12825_v52, %v22188_v49  ;;  %v12865_v21 = vrot.slane %v12843_v28, %v22188_v49  ;;  %v11486_v51 = vrot.slane %v19946_v53, %v22178_v13  ;;  %v11490_v9 = vrot.slane %v19946_v53, %v22179_v56 }
 0x686   :  { %v12872_v58 = vrot.slane %v12844_v18, %v22188_v49  ;;  %v12873_v57 = vcombine.low %v12851_v41, %v12858_v4  ;;  %v11494_v0 = vrot.slane %v19946_v53, %v22180_v19  ;;  %v11498_v42 = vrot.slane %v19946_v53, %v22181_v5 }
 0x687   :  { %v14332_v44 = vpop.eup %14331  ;;  %v12840_v1 = vcombine.low %v12832_v63, %v12839_v32  ;;  %v11502_v22 = vrot.slane %v19946_v53, %v22182_v12  ;;  %v11506_v35 = vrot.slane %v19946_v53, %v22186_v10  ;;  %v12890_v33 = vcombine.low %v11478_v39, %v11482_v8 }
 0x688   :  { %v20353_v23 = vmul.f32 %v14332_v44, %v22226_v11  ;;  %v12874_v40 = vcombine.low %v12865_v21, %v12872_v58  ;;  %v12881_v29 = vrot.slane %v12873_v57, %v22188_v49  ;;  %v12891_v36 = vcombine.low %v11486_v51, %v11490_v9 }
 0x689   :  { %13395 = vperm.xlu0 %13659, %v12840_v1   ;;  %v12892_v59 = vcombine.low %v11494_v0, %v11498_v42  ;;  %v12893_v60 = vcombine.low %v11502_v22, %v11506_v35  ;;  %v12900_v38 = vrot.slane %v12890_v33, %v22188_v49  ;;  %v11510_v50 = vrot.slane %v20029_v24, %v22176_v15 }
 0x68a   :  { %v12888_v46 = vrot.slane %v12874_v40, %v22188_v49  ;;  %v12907_v53 = vrot.slane %v12891_v36, %v22188_v49  ;;  %v11514_v43 = vrot.slane %v20029_v24, %v22177_v62  ;;  %v11518_v3 = vrot.slane %v20029_v24, %v22178_v13 }
 0x68b   :  { %v12914_v31 = vrot.slane %v12892_v59, %v22188_v49  ;;  %v12921_v25 = vrot.slane %v12893_v60, %v22188_v49  ;;  %v11522_v30 = vrot.slane %v20029_v24, %v22179_v56  ;;  %v11526_v34 = vrot.slane %v20029_v24, %v22180_v19 }
 0x68c   :  { %v12889_v7 = vcombine.low %v12881_v29, %v12888_v46  ;;  %v12922_v16 = vcombine.low %v12900_v38, %v12907_v53  ;;  %v11530_v26 = vrot.slane %v20029_v24, %v22181_v5  ;;  %v11534_v2 = vrot.slane %v20029_v24, %v22182_v12 }
 0x68d   :  { %v12923_v52 = vcombine.low %v12914_v31, %v12921_v25  ;;  %v11538_v28 = vrot.slane %v20029_v24, %v22186_v10  ;;  %v12939_v39 = vcombine.low %v11510_v50, %v11514_v43  ;;  %v12940_v8 = vcombine.low %v11518_v3, %v11522_v30 }
 0x68e   :  { %13398 = vperm.xlu1 %13660, %v12889_v7   ;;  %v12930_v63 = vrot.slane %v12922_v16, %v22188_v49  ;;  %v12941_v18 = vcombine.low %v11526_v34, %v11530_v26  ;;  %v11062_v41 = vrot.slane %v19986_v17, %v22176_v15  ;;  %v11066_v4 = vrot.slane %v19986_v17, %v22177_v62 }
 0x68f   :  { %v12937_v32 = vrot.slane %v12923_v52, %v22188_v49  ;;  %v12942_v21 = vcombine.low %v11534_v2, %v11538_v28  ;;  %v12949_v51 = vrot.slane %v12939_v39, %v22188_v49  ;;  %v12956_v9 = vrot.slane %v12940_v8, %v22188_v49 }
 0x690   :  { %v12963_v24 = vrot.slane %v12941_v18, %v22188_v49  ;;  %v11070_v58 = vrot.slane %v19986_v17, %v22178_v13  ;;  %v11074_v57 = vrot.slane %v19986_v17, %v22179_v56  ;;  %v11078_v0 = vrot.slane %v19986_v17, %v22180_v19 }
 0x691   :  { %v12938_v42 = vcombine.low %v12930_v63, %v12937_v32  ;;  %v12970_v44 = vrot.slane %v12942_v21, %v22188_v49  ;;  %v12971_v1 = vcombine.low %v12949_v51, %v12956_v9  ;;  %v11082_v22 = vrot.slane %v19986_v17, %v22181_v5 }
 0x692   :  { %v11086_v35 = vrot.slane %v19986_v17, %v22182_v12  ;;  %v11090_v33 = vrot.slane %v19986_v17, %v22186_v10  ;;  %v12253_v11 = vcombine.low %v11062_v41, %v11066_v4  ;;  %v12254_v40 = vcombine.low %v11070_v58, %v11074_v57 }
 0x693   :  { %13401 = vperm.xlu0 %13659, %v12938_v42   ;;  %v12972_v29 = vcombine.low %v12963_v24, %v12970_v44  ;;  %v12979_v36 = vrot.slane %v12971_v1, %v22188_v49  ;;  %v12255_v59 = vcombine.low %v11078_v0, %v11082_v22  ;;  %v11542_v60 = vrot.slane %v20070_v47, %v22176_v15 }
 0x694   :  { %v12256_v38 = vcombine.low %v11086_v35, %v11090_v33  ;;  %v12263_v50 = vrot.slane %v12253_v11, %v22188_v49  ;;  %v12270_v46 = vrot.slane %v12254_v40, %v22188_v49  ;;  %v11546_v53 = vrot.slane %v20070_v47, %v22177_v62 }
 0x695   :  { %v12986_v17 = vrot.slane %v12972_v29, %v22188_v49  ;;  %v12277_v43 = vrot.slane %v12255_v59, %v22188_v49  ;;  %v11550_v3 = vrot.slane %v20070_v47, %v22178_v13  ;;  %v11554_v31 = vrot.slane %v20070_v47, %v22179_v56 }
 0x696   :  { %v12284_v25 = vrot.slane %v12256_v38, %v22188_v49  ;;  %v12285_v30 = vcombine.low %v12263_v50, %v12270_v46  ;;  %v11558_v34 = vrot.slane %v20070_v47, %v22180_v19  ;;  %v11562_v7 = vrot.slane %v20070_v47, %v22181_v5 }
 0x697   :  { %v12987_v16 = vcombine.low %v12979_v36, %v12986_v17  ;;  %v11566_v26 = vrot.slane %v20070_v47, %v22182_v12  ;;  %v11570_v2 = vrot.slane %v20070_v47, %v22186_v10  ;;  %v12988_v52 = vcombine.low %v11542_v60, %v11546_v53 }
 0x698   :  { %v12286_v28 = vcombine.low %v12277_v43, %v12284_v25  ;;  %v12293_v39 = vrot.slane %v12285_v30, %v22188_v49  ;;  %v12989_v8 = vcombine.low %v11550_v3, %v11554_v31  ;;  %v12990_v63 = vcombine.low %v11558_v34, %v11562_v7 }
 0x699   :  { %13404 = vperm.xlu1 %13660, %v12987_v16   ;;  %v12991_v18 = vcombine.low %v11566_v26, %v11570_v2  ;;  %v12998_v41 = vrot.slane %v12988_v52, %v22188_v49  ;;  %v11094_v4 = vrot.slane %v20002_v6, %v22176_v15  ;;  %v11098_v32 = vrot.slane %v20002_v6, %v22177_v62 }
 0x69a   :  { %v12300_v21 = vrot.slane %v12286_v28, %v22188_v49  ;;  %v13005_v47 = vrot.slane %v12989_v8, %v22188_v49  ;;  %v13012_v51 = vrot.slane %v12990_v63, %v22188_v49  ;;  %v11102_v9 = vrot.slane %v20002_v6, %v22178_v13 }
 0x69b   :  { %v13019_v24 = vrot.slane %v12991_v18, %v22188_v49  ;;  %v11106_v58 = vrot.slane %v20002_v6, %v22179_v56  ;;  %v11110_v57 = vrot.slane %v20002_v6, %v22180_v19  ;;  %v11114_v0 = vrot.slane %v20002_v6, %v22181_v5 }
 0x69c   :  { %v12301_v42 = vcombine.low %v12293_v39, %v12300_v21  ;;  %v13020_v44 = vcombine.low %v12998_v41, %v13005_v47  ;;  %v11118_v1 = vrot.slane %v20002_v6, %v22182_v12  ;;  %v11122_v22 = vrot.slane %v20002_v6, %v22186_v10 }
 0x69d   :  { %v13021_v35 = vcombine.low %v13012_v51, %v13019_v24  ;;  %v12302_v33 = vcombine.low %v11094_v4, %v11098_v32  ;;  %v12303_v11 = vcombine.low %v11102_v9, %v11106_v58  ;;  %v12304_v40 = vcombine.low %v11110_v57, %v11114_v0 }
 0x69e   :  { %13362 = vperm.xlu1 %13660, %v12301_v42   ;;  %v13028_v29 = vrot.slane %v13020_v44, %v22188_v49  ;;  %v12305_v36 = vcombine.low %v11118_v1, %v11122_v22  ;;  %v11574_v59 = vrot.slane %v20125_v48, %v22176_v15  ;;  %v11578_v60 = vrot.slane %v20125_v48, %v22177_v62 }
 0x69f   :  { %v13035_v38 = vrot.slane %v13021_v35, %v22188_v49  ;;  %v12312_v50 = vrot.slane %v12302_v33, %v22188_v49  ;;  %v12319_v6 = vrot.slane %v12303_v11, %v22188_v49  ;;  %v12326_v46 = vrot.slane %v12304_v40, %v22188_v49 }
 0x6a0   :  { %v12333_v53 = vrot.slane %v12305_v36, %v22188_v49  ;;  %v11582_v17 = vrot.slane %v20125_v48, %v22178_v13  ;;  %v11586_v43 = vrot.slane %v20125_v48, %v22179_v56  ;;  %v11590_v3 = vrot.slane %v20125_v48, %v22180_v19 }
 0x6a1   :  { %v13036_v31 = vcombine.low %v13028_v29, %v13035_v38  ;;  %v12334_v25 = vcombine.low %v12312_v50, %v12319_v6  ;;  %v11594_v30 = vrot.slane %v20125_v48, %v22181_v5  ;;  %v11598_v34 = vrot.slane %v20125_v48, %v22182_v12 }
 0x6a2   :  { %v12335_v7 = vcombine.low %v12326_v46, %v12333_v53  ;;  %v11602_v16 = vrot.slane %v20125_v48, %v22186_v10  ;;  %v13037_v26 = vcombine.low %v11574_v59, %v11578_v60  ;;  %v13038_v2 = vcombine.low %v11582_v17, %v11586_v43 }
 0x6a3   :  { %13407 = vperm.xlu0 %13659, %v13036_v31   ;;  %v12342_v52 = vrot.slane %v12334_v25, %v22188_v49  ;;  %v13039_v28 = vcombine.low %v11590_v3, %v11594_v30  ;;  %v11126_v39 = vrot.slane %v20023_v55, %v22176_v15  ;;  %v11130_v8 = vrot.slane %v20023_v55, %v22177_v62 }
 0x6a4   :  { %v12349_v63 = vrot.slane %v12335_v7, %v22188_v49  ;;  %v13040_v18 = vcombine.low %v11598_v34, %v11602_v16  ;;  %v13047_v41 = vrot.slane %v13037_v26, %v22188_v49  ;;  %v13054_v4 = vrot.slane %v13038_v2, %v22188_v49 }
 0x6a5   :  { %v13061_v48 = vrot.slane %v13039_v28, %v22188_v49  ;;  %v11134_v32 = vrot.slane %v20023_v55, %v22178_v13  ;;  %v11138_v21 = vrot.slane %v20023_v55, %v22179_v56  ;;  %v11142_v47 = vrot.slane %v20023_v55, %v22180_v19 }
 0x6a6   :  { %v12350_v51 = vcombine.low %v12342_v52, %v12349_v63  ;;  %v13068_v9 = vrot.slane %v13040_v18, %v22188_v49  ;;  %v13069_v24 = vcombine.low %v13047_v41, %v13054_v4  ;;  %v11146_v58 = vrot.slane %v20023_v55, %v22181_v5 }
 0x6a7   :  { %v11150_v57 = vrot.slane %v20023_v55, %v22182_v12  ;;  %v11154_v0 = vrot.slane %v20023_v55, %v22186_v10  ;;  %v12351_v42 = vcombine.low %v11126_v39, %v11130_v8  ;;  %v12352_v44 = vcombine.low %v11134_v32, %v11138_v21 }
 0x6a8   :  { %13365 = vperm.xlu1 %13660, %v12350_v51   ;;  %v13070_v1 = vcombine.low %v13061_v48, %v13068_v9  ;;  %v13077_v22 = vrot.slane %v13069_v24, %v22188_v49  ;;  %v12353_v35 = vcombine.low %v11142_v47, %v11146_v58  ;;  %v11606_v33 = vrot.slane %v20178_v14, %v22176_v15 }
 0x6a9   :  { %v12354_v11 = vcombine.low %v11150_v57, %v11154_v0  ;;  %v12361_v40 = vrot.slane %v12351_v42, %v22188_v49  ;;  %v12368_v29 = vrot.slane %v12352_v44, %v22188_v49  ;;  %v11610_v36 = vrot.slane %v20178_v14, %v22177_v62 }
 0x6aa   :  { %v13084_v55 = vrot.slane %v13070_v1, %v22188_v49  ;;  %v12375_v59 = vrot.slane %v12353_v35, %v22188_v49  ;;  %v11614_v60 = vrot.slane %v20178_v14, %v22178_v13  ;;  %v11618_v38 = vrot.slane %v20178_v14, %v22179_v56 }
 0x6ab   :  { %v12382_v50 = vrot.slane %v12354_v11, %v22188_v49  ;;  %v12383_v6 = vcombine.low %v12361_v40, %v12368_v29  ;;  %v11622_v46 = vrot.slane %v20178_v14, %v22180_v19  ;;  %v11626_v53 = vrot.slane %v20178_v14, %v22181_v5 }
 0x6ac   :  { %v13085_v17 = vcombine.low %v13077_v22, %v13084_v55  ;;  %v11630_v43 = vrot.slane %v20178_v14, %v22182_v12  ;;  %v11634_v3 = vrot.slane %v20178_v14, %v22186_v10  ;;  %v13086_v31 = vcombine.low %v11606_v33, %v11610_v36 }
 0x6ad   :  { %v12384_v25 = vcombine.low %v12375_v59, %v12382_v50  ;;  %v12391_v30 = vrot.slane %v12383_v6, %v22188_v49  ;;  %v13087_v34 = vcombine.low %v11614_v60, %v11618_v38  ;;  %v13088_v7 = vcombine.low %v11622_v46, %v11626_v53 }
 0x6ae   :  { %13410 = vperm.xlu0 %13659, %v13085_v17   ;;  %v13089_v16 = vcombine.low %v11630_v43, %v11634_v3  ;;  %v13096_v26 = vrot.slane %v13086_v31, %v22188_v49  ;;  %v11158_v2 = vrot.slane %v20041_v27, %v22176_v15  ;;  %v11162_v52 = vrot.slane %v20041_v27, %v22177_v62 }
 0x6af   :  { %v12398_v28 = vrot.slane %v12384_v25, %v22188_v49  ;;  %v13103_v14 = vrot.slane %v13087_v34, %v22188_v49  ;;  %v13110_v39 = vrot.slane %v13088_v7, %v22188_v49  ;;  %v11166_v8 = vrot.slane %v20041_v27, %v22178_v13 }
 0x6b0   :  { %v13117_v63 = vrot.slane %v13089_v16, %v22188_v49  ;;  %v11170_v18 = vrot.slane %v20041_v27, %v22179_v56  ;;  %v11174_v41 = vrot.slane %v20041_v27, %v22180_v19  ;;  %v11178_v4 = vrot.slane %v20041_v27, %v22181_v5 }
 0x6b1   :  { %v12399_v48 = vcombine.low %v12391_v30, %v12398_v28  ;;  %v13118_v32 = vcombine.low %v13096_v26, %v13103_v14  ;;  %v11182_v21 = vrot.slane %v20041_v27, %v22182_v12  ;;  %v11186_v47 = vrot.slane %v20041_v27, %v22186_v10 }
 0x6b2   :  { %v13119_v51 = vcombine.low %v13110_v39, %v13117_v63  ;;  %v12400_v9 = vcombine.low %v11158_v2, %v11162_v52  ;;  %v12401_v24 = vcombine.low %v11166_v8, %v11170_v18  ;;  %v12402_v58 = vcombine.low %v11174_v41, %v11178_v4 }
 0x6b3   :  { %13368 = vperm.xlu1 %13660, %v12399_v48   ;;  %v13126_v57 = vrot.slane %v13118_v32, %v22188_v49  ;;  %v12403_v0 = vcombine.low %v11182_v21, %v11186_v47  ;;  %v11638_v42 = vrot.slane %v20211_v61, %v22176_v15  ;;  %v11642_v44 = vrot.slane %v20211_v61, %v22177_v62 }
 0x6b4   :  { %v13133_v1 = vrot.slane %v13119_v51, %v22188_v49  ;;  %v12410_v22 = vrot.slane %v12400_v9, %v22188_v49  ;;  %v12417_v27 = vrot.slane %v12401_v24, %v22188_v49  ;;  %v12424_v35 = vrot.slane %v12402_v58, %v22188_v49 }
 0x6b5   :  { %v12431_v33 = vrot.slane %v12403_v0, %v22188_v49  ;;  %v11646_v11 = vrot.slane %v20211_v61, %v22178_v13  ;;  %v11650_v40 = vrot.slane %v20211_v61, %v22179_v56  ;;  %v11654_v29 = vrot.slane %v20211_v61, %v22180_v19 }
 0x6b6   :  { %v13134_v36 = vcombine.low %v13126_v57, %v13133_v1  ;;  %v12432_v55 = vcombine.low %v12410_v22, %v12417_v27  ;;  %v11658_v59 = vrot.slane %v20211_v61, %v22181_v5  ;;  %v11662_v60 = vrot.slane %v20211_v61, %v22182_v12 }
 0x6b7   :  { %v12433_v38 = vcombine.low %v12424_v35, %v12431_v33  ;;  %v11666_v50 = vrot.slane %v20211_v61, %v22186_v10  ;;  %v13135_v6 = vcombine.low %v11638_v42, %v11642_v44  ;;  %v13136_v46 = vcombine.low %v11646_v11, %v11650_v40 }
 0x6b8   :  { %13413 = vperm.xlu0 %13659, %v13134_v36   ;;  %v12440_v53 = vrot.slane %v12432_v55, %v22188_v49  ;;  %v13137_v17 = vcombine.low %v11654_v29, %v11658_v59  ;;  %v11190_v43 = vrot.slane %v20073_v37, %v22176_v15  ;;  %v11194_v3 = vrot.slane %v20073_v37, %v22177_v62 }
 0x6b9   :  { %v12447_v31 = vrot.slane %v12433_v38, %v22188_v49  ;;  %v13138_v25 = vcombine.low %v11662_v60, %v11666_v50  ;;  %v13145_v30 = vrot.slane %v13135_v6, %v22188_v49  ;;  %v13152_v34 = vrot.slane %v13136_v46, %v22188_v49 }
 0x6ba   :  { %v13159_v61 = vrot.slane %v13137_v17, %v22188_v49  ;;  %v11198_v7 = vrot.slane %v20073_v37, %v22178_v13  ;;  %v11202_v16 = vrot.slane %v20073_v37, %v22179_v56  ;;  %v11206_v26 = vrot.slane %v20073_v37, %v22180_v19 }
 0x6bb   :  { %v12448_v2 = vcombine.low %v12440_v53, %v12447_v31  ;;  %v13166_v52 = vrot.slane %v13138_v25, %v22188_v49  ;;  %v13167_v28 = vcombine.low %v13145_v30, %v13152_v34  ;;  %v11210_v14 = vrot.slane %v20073_v37, %v22181_v5 }
 0x6bc   :  { %v11214_v39 = vrot.slane %v20073_v37, %v22182_v12  ;;  %v11218_v8 = vrot.slane %v20073_v37, %v22186_v10  ;;  %v12449_v63 = vcombine.low %v11190_v43, %v11194_v3  ;;  %v12450_v18 = vcombine.low %v11198_v7, %v11202_v16 }
 0x6bd   :  { %13371 = vperm.xlu1 %13660, %v12448_v2   ;;  %v13168_v41 = vcombine.low %v13159_v61, %v13166_v52  ;;  %v13175_v4 = vrot.slane %v13167_v28, %v22188_v49  ;;  %v12451_v48 = vcombine.low %v11206_v26, %v11210_v14  ;;  %v11670_v32 = vrot.slane %v20256_v45, %v22176_v15 }
 0x6be   :  { %v12452_v21 = vcombine.low %v11214_v39, %v11218_v8  ;;  %v12459_v47 = vrot.slane %v12449_v63, %v22188_v49  ;;  %v12466_v51 = vrot.slane %v12450_v18, %v22188_v49  ;;  %v11674_v9 = vrot.slane %v20256_v45, %v22177_v62 }
 0x6bf   :  { %v13182_v37 = vrot.slane %v13168_v41, %v22188_v49  ;;  %v12473_v24 = vrot.slane %v12451_v48, %v22188_v49  ;;  %v11678_v58 = vrot.slane %v20256_v45, %v22178_v13  ;;  %v11682_v57 = vrot.slane %v20256_v45, %v22179_v56 }
 0x6c0   :  { %v12480_v0 = vrot.slane %v12452_v21, %v22188_v49  ;;  %v12481_v42 = vcombine.low %v12459_v47, %v12466_v51  ;;  %v11686_v44 = vrot.slane %v20256_v45, %v22180_v19  ;;  %v11690_v1 = vrot.slane %v20256_v45, %v22181_v5 }
 0x6c1   :  { %v13183_v22 = vcombine.low %v13175_v4, %v13182_v37  ;;  %v11694_v27 = vrot.slane %v20256_v45, %v22182_v12  ;;  %v11698_v35 = vrot.slane %v20256_v45, %v22186_v10  ;;  %v13184_v33 = vcombine.low %v11670_v32, %v11674_v9 }
 0x6c2   :  { %v12482_v11 = vcombine.low %v12473_v24, %v12480_v0  ;;  %v12489_v40 = vrot.slane %v12481_v42, %v22188_v49  ;;  %v13185_v29 = vcombine.low %v11678_v58, %v11682_v57  ;;  %v13186_v36 = vcombine.low %v11686_v44, %v11690_v1 }
 0x6c3   :  { %13416 = vperm.xlu0 %13659, %v13183_v22   ;;  %v13187_v55 = vcombine.low %v11694_v27, %v11698_v35  ;;  %v13194_v59 = vrot.slane %v13184_v33, %v22188_v49  ;;  %v11222_v60 = vrot.slane %v20130_v54, %v22176_v15  ;;  %v11226_v38 = vrot.slane %v20130_v54, %v22177_v62 }
 0x6c4   :  { %v12496_v50 = vrot.slane %v12482_v11, %v22188_v49  ;;  %v13201_v45 = vrot.slane %v13185_v29, %v22188_v49  ;;  %v13208_v6 = vrot.slane %v13186_v36, %v22188_v49  ;;  %v11230_v46 = vrot.slane %v20130_v54, %v22178_v13 }
 0x6c5   :  { %v13215_v53 = vrot.slane %v13187_v55, %v22188_v49  ;;  %v11234_v17 = vrot.slane %v20130_v54, %v22179_v56  ;;  %v11238_v43 = vrot.slane %v20130_v54, %v22180_v19  ;;  %v11242_v3 = vrot.slane %v20130_v54, %v22181_v5 }
 0x6c6   :  { %v12497_v31 = vcombine.low %v12489_v40, %v12496_v50  ;;  %v13216_v25 = vcombine.low %v13194_v59, %v13201_v45  ;;  %v11246_v30 = vrot.slane %v20130_v54, %v22182_v12  ;;  %v11250_v34 = vrot.slane %v20130_v54, %v22186_v10 }
 0x6c7   :  { %v13217_v61 = vcombine.low %v13208_v6, %v13215_v53  ;;  %v12498_v7 = vcombine.low %v11222_v60, %v11226_v38  ;;  %v12499_v16 = vcombine.low %v11230_v46, %v11234_v17  ;;  %v12500_v26 = vcombine.low %v11238_v43, %v11242_v3 }
 0x6c8   :  { %13374 = vperm.xlu1 %13660, %v12497_v31   ;;  %v13224_v2 = vrot.slane %v13216_v25, %v22188_v49  ;;  %v12501_v52 = vcombine.low %v11246_v30, %v11250_v34  ;;  %v11702_v28 = vrot.slane %v20300_v20, %v22176_v15  ;;  %v11706_v14 = vrot.slane %v20300_v20, %v22177_v62  ;;  %v13336_v31 = vpop.permute.xlu1 %13335  ;;  %v13333_v30 = vpop.permute.xlu0 %13332 }
 0x6c9   :  { %v13231_v39 = vrot.slane %v13217_v61, %v22188_v49  ;;  %v12508_v8 = vrot.slane %v12498_v7, %v22188_v49  ;;  %v12515_v54 = vrot.slane %v12499_v16, %v22188_v49  ;;  %v12522_v63 = vrot.slane %v12500_v26, %v22188_v49 }
 0x6ca   :  { %v12529_v18 = vrot.slane %v12501_v52, %v22188_v49  ;;  %v11710_v41 = vrot.slane %v20300_v20, %v22178_v13  ;;  %v11714_v4 = vrot.slane %v20300_v20, %v22179_v56  ;;  %v11718_v48 = vrot.slane %v20300_v20, %v22180_v19 }
 0x6cb   :  { %v13232_v32 = vcombine.low %v13224_v2, %v13231_v39  ;;  %v12530_v21 = vcombine.low %v12508_v8, %v12515_v54  ;;  %v11722_v47 = vrot.slane %v20300_v20, %v22181_v5  ;;  %v11726_v51 = vrot.slane %v20300_v20, %v22182_v12 }
 0x6cc   :  { %v12531_v9 = vcombine.low %v12522_v63, %v12529_v18  ;;  %v11730_v37 = vrot.slane %v20300_v20, %v22186_v10  ;;  %v13233_v24 = vcombine.low %v11702_v28, %v11706_v14  ;;  %v13234_v58 = vcombine.low %v11710_v41, %v11714_v4  ;;  %v13339_v25 = vpop.permute.xlu1 %13338  ;;  %v13342_v61 = vpop.permute.xlu0 %13341 }
 0x6cd   :  { %13419 = vperm.xlu0 %13659, %v13232_v32   ;;  %v12538_v57 = vrot.slane %v12530_v21, %v22188_v49  ;;  %v13235_v0 = vcombine.low %v11718_v48, %v11722_v47  ;;  %v11734_v42 = vrot.slane %v20353_v23, %v22176_v15  ;;  %v11738_v44 = vrot.slane %v20353_v23, %v22177_v62  ;;  %v22227_v21 = vld [vmem:[#allocation32_spill] sm:$0xff] }
 0x6ce   :  { %v12545_v1 = vrot.slane %v12531_v9, %v22188_v49  ;;  %v13236_v22 = vcombine.low %v11726_v51, %v11730_v37  ;;  %v13243_v27 = vrot.slane %v13233_v24, %v22188_v49  ;;  %v13250_v35 = vrot.slane %v13234_v58, %v22188_v49  ;;  %v22228_v37 = vld [vmem:[#allocation11_spill] sm:$0xff] }
 0x6cf   :  { %v13257_v20 = vrot.slane %v13235_v0, %v22188_v49  ;;  %v11742_v33 = vrot.slane %v20353_v23, %v22178_v13  ;;  %v11746_v11 = vrot.slane %v20353_v23, %v22179_v56  ;;  %v11750_v15 = vrot.slane %v20353_v23, %v22180_v19 }
 0x6d0   :  { %v12546_v40 = vcombine.low %v12538_v57, %v12545_v1  ;;  %v13264_v62 = vrot.slane %v13236_v22, %v22188_v49  ;;  %v13265_v29 = vcombine.low %v13243_v27, %v13250_v35  ;;  %v11754_v36 = vrot.slane %v20353_v23, %v22181_v5  ;;  %v20671_v34 = vpop.permute.xlu1 %13344  ;;  %v20675_v16 = vpop.permute.xlu0 %13347 }
 0x6d1   :  { %v11758_v55 = vrot.slane %v20353_v23, %v22182_v12  ;;  %v11762_v59 = vrot.slane %v20353_v23, %v22186_v10  ;;  %v13282_v13 = vcombine.low %v11734_v42, %v11738_v44  ;;  %v13283_v60 = vcombine.low %v11742_v33, %v11746_v11  ;;  %v22229_v11 = vld [vmem:[#allocation36_spill] sm:$0xff] }
 0x6d2   :  { %13377 = vperm.xlu1 %13660, %v12546_v40   ;;  %v13266_v56 = vcombine.low %v13257_v20, %v13264_v62  ;;  %v13273_v38 = vrot.slane %v13265_v29, %v22188_v49  ;;  %v13284_v19 = vcombine.low %v11750_v15, %v11754_v36  ;;  %v13431_v47 = vadd.s32 4294967288, %v22227_v21 }
 0x6d3   :  { %v13285_v50 = vcombine.low %v11758_v55, %v11762_v59  ;;  %v13292_v45 = vrot.slane %v13282_v13, %v22188_v49  ;;  %v13299_v6 = vrot.slane %v13283_v60, %v22188_v49  ;;  %v13438_v51 = vadd.s32 4294967280, %v22227_v21 }
 0x6d4   :  { %v13280_v5 = vrot.slane %v13266_v56, %v22188_v49  ;;  %v13306_v46 = vrot.slane %v13284_v19, %v22188_v49  ;;  %v20673_v7 = vpop.permute.xlu1 %13350  ;;  %v13434_v24 = vsub.s32 %v13431_v47, %v22228_v37  ;;  %v13445_v58 = vadd.s32 4294967272, %v22227_v21 }
 0x6d5   :  { %v13313_v12 = vrot.slane %v13285_v50, %v22188_v49  ;;  %v13314_v53 = vcombine.low %v13292_v45, %v13299_v6  ;;  %v13441_v0 = vsub.s32 %v13438_v51, %v22228_v37  ;;  %v13452_v42 = vadd.s32 4294967264, %v22227_v21 }
 0x6d6   :  { %v13281_v10 = vcombine.low %v13273_v38, %v13280_v5  ;;  %v13459_v44 = vadd.s32 4294967256, %v22227_v21  ;;  %v13435_v1 = vrot.slane %v13336_v31, %v13434_v24  ;;  %v13448_v22 = vsub.s32 %v13445_v58, %v22228_v37 }
 0x6d7   :  { %v13315_v23 = vcombine.low %v13306_v46, %v13313_v12  ;;  %v13322_v17 = vrot.slane %v13314_v53, %v22188_v49  ;;  %v20679_v2 = vpop.permute.xlu0 %13353  ;;  %v13442_v27 = vrot.slane %v13339_v25, %v13441_v0  ;;  %v13455_v35 = vsub.s32 %v13452_v42, %v22228_v37 }
 0x6d8   :  { %13422 = vperm.xlu0 %13659, %v13281_v10   ;;  %v13430_v15 = vrot.slane %v13333_v30, %v22229_v11  ;;  %v13473_v40 = vadd.s32 4294967240, %v22227_v21  ;;  %v13462_v29 = vsub.s32 %v13459_v44, %v22228_v37  ;;  %v13466_v36 = vadd.s32 4294967248, %v22227_v21 }
 0x6d9   :  { %v13329_v43 = vrot.slane %v13315_v23, %v22188_v49  ;;  %v13449_v13 = vrot.slane %v13342_v61, %v13448_v22  ;;  %v13456_v38 = vrot.slane %v20671_v34, %v13455_v35  ;;  %v13480_v46 = vadd.s32 4294967232, %v22227_v21 }
 0x6da   :  { %v13437_v59 = vsel %vm13436_vm9, %v13435_v1, %v13430_v15  ;;  %v13476_v45 = vsub.s32 %v13473_v40, %v22228_v37  ;;  %v13463_v6 = vrot.slane %v20675_v16, %v13462_v29  ;;  %v13469_v5 = vsub.s32 %v13466_v36, %v22228_v37 }
 0x6db   :  { %v13330_v3 = vcombine.low %v13322_v17, %v13329_v43  ;;  %v13444_v56 = vsel %vm13443_vm10, %v13442_v27, %v13437_v59  ;;  %v13494_v34 = vadd.s32 4294967216, %v22227_v21  ;;  %v13483_v16 = vsub.s32 %v13480_v46, %v22228_v37 }
 0x6dc   :  { %v13451_v53 = vsel %vm13450_vm11, %v13449_v13, %v13444_v56  ;;  %v13477_v30 = vrot.slane %v20679_v2, %v13476_v45  ;;  %v13470_v61 = vrot.slane %v20673_v7, %v13469_v5  ;;  %v13515_v7 = vadd.s32 4294967192, %v22227_v21 }
 0x6dd   :  { %13425 = vperm.xlu0 %13659, %v13330_v3   ;;  %v13458_v43 = vsel %vm13457_vm12, %v13456_v38, %v13451_v53  ;;  %v13487_v3 = vadd.s32 4294967224, %v22227_v21  ;;  %v13522_v58 = vadd.s32 4294967184, %v22227_v21  ;;  %v13529_v1 = vadd.s32 4294967176, %v22227_v21 }
 0x6de   :  { %v20677_v26 = vpop.permute.xlu1 %13356  ;;  %v13518_v15 = vsub.s32 %v13515_v7, %v22228_v37 }
 0x6df   :  { %v13490_v2 = vsub.s32 %v13487_v3, %v22228_v37  ;;  %v13484_v42 = vrot.slane %v20677_v26, %v13483_v16 }
 0x6e4   :  { %v20681_v52 = vpop.permute.xlu0 %13359 }
 0x6ea   :  { %v13381_v28 = vpop.permute.xlu1 %13380 }
 0x6eb   :  { %v13539_v55 = vrot.slane %v13381_v28, %v22229_v11  ;;  %v13501_v28 = vadd.s32 4294967208, %v22227_v21 }
 0x6ed   :  { %v13504_v44 = vsub.s32 %v13501_v28, %v22228_v37 }
 0x6f0   :  { %v13384_v14 = vpop.permute.xlu0 %13383 }
 0x6f1   :  { %v13543_v20 = vrot.slane %v13384_v14, %v13434_v24  ;;  %v13465_v14 = vsel %vm13464_vm13, %v13463_v6, %v13458_v43  ;;  %v13497_v24 = vsub.s32 %v13494_v34, %v22228_v37  ;;  %v22230_v34 = vlaneseq }
 0x6f3   :  { %v13544_v19 = vsel %vm13436_vm9, %v13543_v20, %v13539_v55  ;;  %v13532_v55 = vsub.s32 %v13529_v1, %v22228_v37  ;;  %vm13633_vm8 = vcmp.lt.s32.totalorder %v22230_v34, 256 }
 0x6f5   :  { %v13387_v39 = vpop.permute.xlu1 %13386 }
 0x6f6   :  { %v13548_v60 = vrot.slane %v13387_v39, %v13441_v0 }
 0x6f8   :  { %v13549_v10 = vsel %vm13443_vm10, %v13548_v60, %v13544_v19 }
 0x6fc   :  { %v13390_v8 = vpop.permute.xlu0 %13389 }
 0x6fd   :  { %v13553_v50 = vrot.slane %v13390_v8, %v13448_v22 }
 0x6ff   :  { %v13554_v31 = vsel %vm13450_vm11, %v13553_v50, %v13549_v10 }
 0x701   :  { %v20683_v54 = vpop.permute.xlu1 %13392 }
 0x702   :  { %v13558_v23 = vrot.slane %v20683_v54, %v13455_v35  ;;  %v13508_v54 = vadd.s32 4294967200, %v22227_v21  ;;  %v13491_v35 = vrot.slane %v20681_v52, %v13490_v2 }
 0x704   :  { %v13559_v39 = vsel %vm13457_vm12, %v13558_v23, %v13554_v31  ;;  %v13511_v27 = vsub.s32 %v13508_v54, %v22228_v37 }
 0x708   :  { %v20685_v63 = vpop.permute.xlu0 %13395 }
 0x709   :  { %v13563_v25 = vrot.slane %v20685_v63, %v13462_v29  ;;  %v13525_v29 = vsub.s32 %v13522_v58, %v22228_v37 }
 0x70b   :  { %v13564_v63 = vsel %vm13464_vm13, %v13563_v25, %v13559_v39 }
 0x70d   :  { %v20687_v18 = vpop.permute.xlu1 %13398 }
 0x70e   :  { %v13568_v8 = vrot.slane %v20687_v18, %v13469_v5  ;;  %v13472_v18 = vsel %vm13471_vm14, %v13470_v61, %v13465_v14 }
 0x70f   :  { %v13479_v26 = vsel %vm13478_vm15, %v13477_v30, %v13472_v18 }
 0x712   :  { %v20689_v41 = vpop.permute.xlu0 %13401 }
 0x713   :  { %v13573_v47 = vrot.slane %v20689_v41, %v13476_v45  ;;  %v13569_v41 = vsel %vm13471_vm14, %v13568_v8, %v13564_v63 }
 0x715   :  { %v13574_v20 = vsel %vm13478_vm15, %v13573_v47, %v13569_v41 }
 0x718   :  { %v20691_v4 = vpop.permute.xlu1 %13404 }
 0x719   :  { %v13578_v22 = vrot.slane %v20691_v4, %v13483_v16 }
 0x71b   :  { %v13579_v59 = vsel %vm13485_vm0, %v13578_v22, %v13574_v20 }
 0x71d   :  { %v20695_v32 = vpop.permute.xlu1 %13362 }
 0x71e   :  { %v13498_v40 = vrot.slane %v20695_v32, %v13497_v24 }
 0x722   :  { %v20693_v48 = vpop.permute.xlu0 %13407 }
 0x723   :  { %v13583_v11 = vrot.slane %v20693_v48, %v13490_v2  ;;  %v13486_v48 = vsel %vm13485_vm0, %v13484_v42, %v13479_v26 }
 0x725   :  { %v13584_v56 = vsel %vm13492_vm1, %v13583_v11, %v13579_v59 }
 0x727   :  { %v20703_v57 = vpop.permute.xlu1 %13365 }
 0x728   :  { %v13505_v4 = vrot.slane %v20703_v57, %v13504_v44 }
 0x72d   :  { %v20699_v9 = vpop.permute.xlu0 %13410 }
 0x72e   :  { %v13588_v21 = vrot.slane %v20699_v9, %v13497_v24  ;;  %v13493_v9 = vsel %vm13492_vm1, %v13491_v35, %v13486_v48 }
 0x72f   :  { %v13500_v38 = vsel %vm13499_vm2, %v13498_v40, %v13493_v9 }
 0x730   :  { %v13589_v37 = vsel %vm13499_vm2, %v13588_v21, %v13584_v56  ;;  %v13507_v45 = vsel %vm13506_vm3, %v13505_v4, %v13500_v38 }
 0x732   :  { %v20714_v62 = vpop.permute.xlu1 %13368 }
 0x733   :  { %v13512_v13 = vrot.slane %v20714_v62, %v13511_v27 }
 0x735   :  { %v13514_v5 = vsel %vm13513_vm4, %v13512_v13, %v13507_v45 }
 0x737   :  { %v20710_v33 = vpop.permute.xlu0 %13413 }
 0x738   :  { %v13593_v36 = vrot.slane %v20710_v33, %v13504_v44 }
 0x73a   :  { %v13594_v62 = vsel %vm13506_vm3, %v13593_v36, %v13589_v37 }
 0x73c   :  { %v20732_v17 = vpop.permute.xlu1 %13371 }
 0x73d   :  { %v13519_v57 = vrot.slane %v20732_v17, %v13518_v15 }
 0x73f   :  { %v13521_v53 = vsel %vm13520_vm5, %v13519_v57, %v13514_v5 }
 0x742   :  { %v20727_v12 = vpop.permute.xlu0 %13416 }
 0x743   :  { %v13598_v32 = vrot.slane %v20727_v12, %v13511_v27 }
 0x745   :  { %v13599_v46 = vsel %vm13513_vm4, %v13598_v32, %v13594_v62 }
 0x747   :  { %v13375_v0 = vpop.permute.xlu1 %13374 }
 0x748   :  { %v13526_v19 = vrot.slane %v13375_v0, %v13525_v29 }
 0x74a   :  { %v13528_v17 = vsel %vm13527_vm6, %v13526_v19, %v13521_v53 }
 0x74c   :  { %v13420_v51 = vpop.permute.xlu0 %13419 }
 0x74d   :  { %v13603_v33 = vrot.slane %v13420_v51, %v13518_v15 }
 0x74f   :  { %v13604_v10 = vsel %vm13520_vm5, %v13603_v33, %v13599_v46 }
 0x751   :  { %v13378_v60 = vpop.permute.xlu1 %13377 }
 0x752   :  { %v13533_v6 = vrot.slane %v13378_v60, %v13532_v55 }
 0x754   :  { %v13535_v3 = vsel %vm13534_vm7, %v13533_v6, %v13528_v17 }
 0x757   :  { %v13423_v52 = vpop.permute.xlu0 %13422 }
 0x758   :  { %v13608_v50 = vrot.slane %v13423_v52, %v13525_v29 }
 0x75a   :  { %v13609_v43 = vsel %vm13527_vm6, %v13608_v50, %v13604_v10 }
 0x75c   :  { %v13426_v12 = vpop.permute.xlu0 %13425 }
 0x75d   :  { %v13613_v23 = vrot.slane %v13426_v12, %v13532_v55 }
 0x75f   :  { %v13614_v31 = vsel %vm13534_vm7, %v13613_v23, %v13609_v43 }
 0x760   :  { %v13615_v25 = vcombine.low %v13535_v3, %v13614_v31 }
 0x762   :  { %v13622_v30 = vrot.slane %v13615_v25, %v22188_v49 }
 0x764   :  { %v13629_v61 = vrot.slane %v13622_v30, %v22188_v49 }
 0x766   :  { %13635 = vst.msk [vmem:[#allocation7] sm:$0x3] %vm13633_vm8, %v13629_v61 }
 0x767   :  { %14452 = shalt.err (!%p14449_p6)
}
 0x768   :  { %s14453_s10 = scalar_lea.hbm %s20803_s2, 32 }
 0x769   :  { %p14454_p7 = scmp.ne.s32.totalorder %s20803_s2, %s14453_s10  ;;  %p14457_p8 = scmp.lt.u32.totalorder %s14453_s10, %s20803_s2 }
 0x76b   :  { %p14459_p9 = pnand %p14457_p8, %p14454_p7 }
 0x76d   :  { %14462 = shalt.err (!%p14459_p9)
}
 0x76e   :  { %13645 = dma.vmem_to_hbm [thread:$0]  %s13643_s6, 32, %s20803_s2, [#allocation4]  }
 0x76f   :  { %14467 = dma.done.wait [#allocation4], 32  }
 0x770   :  { %14468 = vsyncadd [#allocation4], 4294967264 }
 0x771   :  { %13649 = vsyncpa [#allocation3], 1 }
 0x772   :  { %13650 = vsyncpa [#allocation6], 1 }
 0x773   :  { %13651 = vsyncpa [#allocation4], 1 }

</bundles_post_ra>
